<compile_context>
chip_gen: v7x
topology: tpu7x:2x2x1
jax: 0.10.0
libtpu: 0.0.40
codegen_flags: <defaults>
</compile_context>

<pallas_src>
import functools
import math

import jax
import jax.numpy as jnp
from jax.experimental import pallas as pl
from jax.experimental.pallas import tpu as pltpu


# ----------------------------- helpers -----------------------------

def _round_up(x, m):
    return (x + m - 1) // m * m


def _tile(dim, target):
    """Largest 128-multiple tile <= target that divides round_up(dim, 128)."""
    padded = _round_up(dim, 128)
    t = min(_round_up(target, 128), padded)
    t = max(128, (t // 128) * 128)
    while padded % t != 0:
        t -= 128
    return t


def _pad2(a, rows, cols):
    r, c = a.shape
    if r == rows and c == cols:
        return a
    return jnp.pad(a, ((0, rows - r), (0, cols - c)))


@functools.lru_cache(maxsize=None)
def _vmem_limit_bytes():
    # generation-aware: ~48 MiB on v7x (64 MiB phys), ~96 MiB on v5e/v6e (128 MiB)
    try:
        cap = int(pltpu.get_tpu_info().vmem_capacity_bytes)
    except Exception:
        cap = 64 * 1024 * 1024  # conservative fallback
    return max(32 * 1024 * 1024, min(cap * 3 // 4, 96 * 1024 * 1024))


def _gelu(x):
    # tanh-approximate GELU; TODO(synk): swap to exact erf GELU for bit-parity
    # with UER/HuggingFace BertForMaskedLM if Mosaic erf lowering is available.
    return 0.5 * x * (1.0 + jnp.tanh(0.7978845608028654 * (x + 0.044715 * x * x * x)))


def _layernorm(y, g, b, eps):
    mu = jnp.mean(y, axis=-1, keepdims=True)
    var = jnp.mean(jnp.square(y - mu), axis=-1, keepdims=True)
    inv = jax.lax.rsqrt(var + eps)
    return (y - mu) * inv * g + b


# ----------------------------- Pallas kernels -----------------------------

def _attn_block_kernel(emb_ref, eg_ref, eb_ref, wqkv_ref, bqkv_ref, bias_ref,
                       wo_ref, bo_ref, ag_ref, ab_ref, o_ref, *, nh, eps):
    """Per-batch fused attention block.

    emb-LN prologue -> QKV matmul -> per-head attention (softmax in f32)
    -> out-projection + residual + LN epilogue.  bf16 on the MXU, f32 stats.
    """
    S, H = emb_ref.shape
    Dh = H // nh
    scale = 1.0 / math.sqrt(Dh)

    x = _layernorm(emb_ref[...], eg_ref[...], eb_ref[...], eps)          # f32 (S, H)
    xb = x.astype(jnp.bfloat16)

    qkv = (jnp.dot(xb, wqkv_ref[...], preferred_element_type=jnp.float32)
           + bqkv_ref[...])                                              # f32 (S, 3H)
    bias = bias_ref[0]                                                   # (1, S) f32

    ctx_heads = []
    for h in range(nh):
        q = qkv[:, h * Dh:(h + 1) * Dh].astype(jnp.bfloat16)
        k = qkv[:, H + h * Dh:H + (h + 1) * Dh].astype(jnp.bfloat16)
        v = qkv[:, 2 * H + h * Dh:2 * H + (h + 1) * Dh].astype(jnp.bfloat16)
        s = jax.lax.dot_general(q, k, (((1,), (1,)), ((), ())),
                                preferred_element_type=jnp.float32) * scale + bias
        s = s - jnp.max(s, axis=-1, keepdims=True)
        p = jnp.exp(s)
        p = p * pl.reciprocal(jnp.sum(p, axis=-1, keepdims=True), approx=True)
        ctx_heads.append(jnp.dot(p.astype(jnp.bfloat16), v,
                                 preferred_element_type=jnp.float32))
    ctx = (ctx_heads[0] if nh == 1
           else jnp.concatenate(ctx_heads, axis=-1)).astype(jnp.bfloat16)

    y = (jnp.dot(ctx, wo_ref[...], preferred_element_type=jnp.float32)
         + bo_ref[...] + x)
    o_ref[...] = _layernorm(y, ag_ref[...], ab_ref[...], eps).astype(o_ref.dtype)


def _ffn_head_kernel(x_ref, w1_ref, b1_ref, w2_ref, b2_ref, fg_ref, fb_ref,
                     wt_ref, bt_ref, hg_ref, hb_ref, o_ref, *, eps):
    """Fused FFN (GELU) + residual + LN, then MLM transform (GELU) + LN."""
    x = x_ref[...]                                   # bf16 (tm, H)
    xf = x.astype(jnp.float32)

    h = _gelu(jnp.dot(x, w1_ref[...], preferred_element_type=jnp.float32)
              + b1_ref[...])
    y = (jnp.dot(h.astype(jnp.bfloat16), w2_ref[...],
                 preferred_element_type=jnp.float32) + b2_ref[...] + xf)
    x2 = _layernorm(y, fg_ref[...], fb_ref[...], eps)

    t = _gelu(jnp.dot(x2.astype(jnp.bfloat16), wt_ref[...],
                      preferred_element_type=jnp.float32) + bt_ref[...])
    t = _layernorm(t, hg_ref[...], hb_ref[...], eps)
    o_ref[...] = t.astype(o_ref.dtype)


def _matmul_kernel(x_ref, w_ref, b_ref, o_ref, acc_ref):
    """Tiled matmul + bias: grid=(M/tm, N/tn, K/tk); bf16 operands, f32 acc."""
    k = pl.program_id(2)

    @pl.when(k == 0)
    def _():
        acc_ref[...] = jnp.zeros_like(acc_ref)

    acc_ref[...] += jnp.dot(x_ref[...].astype(jnp.bfloat16), w_ref[...],
                            preferred_element_type=jnp.float32)

    @pl.when(k == pl.num_programs(2) - 1)
    def _():
        o_ref[...] = (acc_ref[...] + b_ref[...]).astype(o_ref.dtype)


# ----------------------------- Pallas wrappers -----------------------------

def pallas_attention_block(emb, attn_bias, p, *, B, S, nh, eps=1e-12):
    M, H = emb.shape
    H3 = p['wqkv'].shape[1]
    f32 = jnp.float32
    args = [emb,
            p['emb_ln_g'].reshape(1, H).astype(f32),
            p['emb_ln_b'].reshape(1, H).astype(f32),
            p['wqkv'],
            p['bqkv'].reshape(1, H3).astype(f32),
            attn_bias,
            p['wo'],
            p['bo'].reshape(1, H).astype(f32),
            p['attn_ln_g'].reshape(1, H).astype(f32),
            p['attn_ln_b'].reshape(1, H).astype(f32)]
    vec = lambda n: pl.BlockSpec((1, n), lambda b: (0, 0))
    in_specs = [
        pl.BlockSpec((S, H), lambda b: (b, 0)),      # per-batch token rows
        vec(H), vec(H),                               # emb LN params
        pl.BlockSpec((H, H3), lambda b: (0, 0)),      # fused QKV weight
        vec(H3),
        pl.BlockSpec((1, 1, S), lambda b: (b, 0, 0)),  # additive key mask
        pl.BlockSpec((H, H), lambda b: (0, 0)),       # out-proj weight
        vec(H), vec(H), vec(H),                       # out bias + attn LN params
    ]
    return pl.pallas_call(
        functools.partial(_attn_block_kernel, nh=nh, eps=eps),
        out_shape=jax.ShapeDtypeStruct((M, H), jnp.bfloat16),
        grid=(B,),
        in_specs=in_specs,
        out_specs=pl.BlockSpec((S, H), lambda b: (b, 0)),
        compiler_params=pltpu.CompilerParams(
            dimension_semantics=("parallel",),
            vmem_limit_bytes=_vmem_limit_bytes()),
    )(*args)


def pallas_ffn_mlm_head(x, p, *, eps=1e-12, tm=256):
    M, H = x.shape
    I = p['w1'].shape[1]
    tm_e = _tile(M, tm)
    Mp = _round_up(M, tm_e)
    xp = _pad2(x, Mp, H)
    f32 = jnp.float32
    args = [xp,
            p['w1'], p['b1'].reshape(1, I).astype(f32),
            p['w2'], p['b2'].reshape(1, H).astype(f32),
            p['ffn_ln_g'].reshape(1, H).astype(f32),
            p['ffn_ln_b'].reshape(1, H).astype(f32),
            p['wt'], p['bt'].reshape(1, H).astype(f32),
            p['head_ln_g'].reshape(1, H).astype(f32),
            p['head_ln_b'].reshape(1, H).astype(f32)]
    vec = lambda n: pl.BlockSpec((1, n), lambda i: (0, 0))
    in_specs = [
        pl.BlockSpec((tm_e, H), lambda i: (i, 0)),
        pl.BlockSpec((H, I), lambda i: (0, 0)), vec(I),
        pl.BlockSpec((I, H), lambda i: (0, 0)), vec(H),
        vec(H), vec(H),
        pl.BlockSpec((H, H), lambda i: (0, 0)), vec(H),
        vec(H), vec(H),
    ]
    out = pl.pallas_call(
        functools.partial(_ffn_head_kernel, eps=eps),
        out_shape=jax.ShapeDtypeStruct((Mp, H), jnp.bfloat16),
        grid=(Mp // tm_e,),
        in_specs=in_specs,
        out_specs=pl.BlockSpec((tm_e, H), lambda i: (i, 0)),
        compiler_params=pltpu.CompilerParams(
            dimension_semantics=("parallel",),
            vmem_limit_bytes=_vmem_limit_bytes()),
    )(*args)
    return out[:M]


def pallas_matmul_bias(x, w, b, *, out_dtype=jnp.float32, tm=256, tn=256, tk=512):
    """logits = x @ w + b   (w stored in (K, N) layout, bf16)."""
    M, K = x.shape
    Kw, N = w.shape
    assert K == Kw
    tm_e, tn_e, tk_e = _tile(M, tm), _tile(N, tn), _tile(K, tk)
    Mp, Np, Kp = _round_up(M, tm_e), _round_up(N, tn_e), _round_up(K, tk_e)
    xp = _pad2(x, Mp, Kp)
    wp = _pad2(w, Kp, Np)
    bp = _pad2(b.reshape(1, N).astype(jnp.float32), 1, Np)
    out = pl.pallas_call(
        _matmul_kernel,
        out_shape=jax.ShapeDtypeStruct((Mp, Np), out_dtype),
        grid=(Mp // tm_e, Np // tn_e, Kp // tk_e),
        in_specs=[pl.BlockSpec((tm_e, tk_e), lambda i, j, k: (i, k)),
                  pl.BlockSpec((tk_e, tn_e), lambda i, j, k: (k, j)),
                  pl.BlockSpec((1, tn_e), lambda i, j, k: (0, j))],
        out_specs=pl.BlockSpec((tm_e, tn_e), lambda i, j, k: (i, j)),
        scratch_shapes=[pltpu.VMEM((tm_e, tn_e), jnp.float32)],
        compiler_params=pltpu.CompilerParams(
            dimension_semantics=("parallel", "parallel", "arbitrary"),
            vmem_limit_bytes=_vmem_limit_bytes()),
    )(xp, wp, bp)
    return out[:M, :N]


# ----------------------------- Model definition -----------------------------

def init_params(key, V, H, nh, I, P):
    ks = jax.random.split(key, 12)

    def n(k, shape):
        return jax.random.normal(k, shape, jnp.float32) * 0.02

    ones = lambda d: jnp.ones((d,), jnp.float32)
    zeros = lambda d: jnp.zeros((d,), jnp.float32)

    word = n(ks[0], (V, H))
    wq, wk, wv = n(ks[3], (H, H)), n(ks[4], (H, H)), n(ks[5], (H, H))
    return dict(
        # matmul weights stored bf16; biases / LN params / embeddings stay f32.
        word_emb=word,                                    # (V, H) for gather
        dec_w=word.T.astype(jnp.bfloat16),                # tied decoder, (H, V) layout
        pos_emb=n(ks[1], (P, H)),
        type_emb=n(ks[2], (2, H)),
        emb_ln_g=ones(H), emb_ln_b=zeros(H),
        wqkv=jnp.concatenate([wq, wk, wv], axis=1).astype(jnp.bfloat16),
        bqkv=zeros(3 * H),
        wo=n(ks[6], (H, H)).astype(jnp.bfloat16), bo=zeros(H),
        attn_ln_g=ones(H), attn_ln_b=zeros(H),
        w1=n(ks[7], (H, I)).astype(jnp.bfloat16), b1=zeros(I),
        w2=n(ks[8], (I, H)).astype(jnp.bfloat16), b2=zeros(H),
        ffn_ln_g=ones(H), ffn_ln_b=zeros(H),
        wt=n(ks[9], (H, H)).astype(jnp.bfloat16), bt=zeros(H),
        head_ln_g=ones(H), head_ln_b=zeros(H),
        dec_bias=zeros(V),
    )


def generator_forward(params, inputs, tgt_mlm, attention_mask, *, nh):
    B, S = inputs.shape
    V, H = params['word_emb'].shape
    M = B * S

    # ---------------- BertForMaskedLM (tiny synthetic config) ----------------
    # Embedding gather + pos + type in XLA; embedding LayerNorm is fused as a
    # prologue of the attention-block kernel (no standalone LN pallas_call).
    emb = (jnp.take(params['word_emb'], inputs, axis=0)
           + params['pos_emb'][None, :S, :]
           + params['type_emb'][0][None, None, :]).reshape(M, H).astype(jnp.float32)

    attn_bias = ((1.0 - attention_mask.astype(jnp.float32)) * -10000.0).reshape(B, 1, S)

    # Fused: emb-LN -> QKV -> all-heads attention -> out-proj + residual + LN
    x = pallas_attention_block(emb, attn_bias, params, B=B, S=S, nh=nh)

    # Fused: FFN (GELU) + residual + LN, then MLM transform (GELU) + LN -> t
    t = pallas_ffn_mlm_head(x, params)

    # ---------------- GeneratorModel masking / gather ----------------
    # TODO(synk): torch boolean indexing (output_mlm[tgt>0]) has a data-dependent
    # output size; JAX needs static shapes, so selected rows are stably compacted
    # to the front of a (B*S, V) buffer and `denominator` carries the true count.
    # The compaction is applied to the (M, H) hidden rows BEFORE the tied-decoder
    # matmul so the gather moves H-wide rows instead of V-wide logits.
    tgt_flat = tgt_mlm.reshape(-1)
    sel = tgt_flat > 0
    order = jnp.argsort(jnp.logical_not(sel), stable=True)  # selected rows first
    t_sel = jnp.take(t, order, axis=0)

    # Tied decoder (weight pre-stored in (H, V) layout -> plain (k, n) matmul)
    output_mlm = pallas_matmul_bias(t_sel, params['dec_w'], params['dec_bias'])

    tgt_out = jnp.where(sel[order], tgt_flat[order], 0)
    denominator = jnp.sum(sel).astype(jnp.float32) + 1e-6
    return output_mlm, tgt_out, denominator


# ----------------------------- Example run -----------------------------

if __name__ == "__main__":
    # small, lane-aligned demo config (head_dim = 128 for full lane utilization)
    B, S, H, NH, I, V, P = 2, 64, 256, 2, 512, 512, 128

    key = jax.random.PRNGKey(0)
    k_param, k_inp, k_tv, k_tp = jax.random.split(key, 4)

    params = init_params(k_param, V, H, NH, I, P)
    inputs = jax.random.randint(k_inp, (B, S), 0, V, dtype=jnp.int32)
    tgt_vals = jax.random.randint(k_tv, (B, S), 1, V, dtype=jnp.int32)
    mlm_positions = jax.random.uniform(k_tp, (B, S)) < 0.3
    tgt_mlm = jnp.where(mlm_positions, tgt_vals, 0).astype(jnp.int32)
    attention_mask = jnp.ones((B, S), jnp.float32)

    fwd = jax.jit(functools.partial(generator_forward, nh=NH))
    output_mlm, tgt_out, denom = fwd(params, inputs, tgt_mlm, attention_mask)
    jax.block_until_ready((output_mlm, tgt_out, denom))

    assert output_mlm.shape == (B * S, V)
    assert tgt_out.shape == (B * S,)
    assert bool(jnp.all(jnp.isfinite(output_mlm)))
    print("KERNEL_OK")
</pallas_src>

<mosaic_0001>
module attributes {stable_mosaic.version = 11 : i64} {
  func.func @_attn_block_kernel(%arg0: i32, %arg1: memref<64x256xf32, #tpu.memory_space<vmem>>, %arg2: memref<1x256xf32, #tpu.memory_space<vmem>>, %arg3: memref<1x256xf32, #tpu.memory_space<vmem>>, %arg4: memref<256x768xbf16, #tpu.memory_space<vmem>>, %arg5: memref<1x768xf32, #tpu.memory_space<vmem>>, %arg6: memref<1x1x64xf32, #tpu.memory_space<vmem>>, %arg7: memref<256x256xbf16, #tpu.memory_space<vmem>>, %arg8: memref<1x256xf32, #tpu.memory_space<vmem>>, %arg9: memref<1x256xf32, #tpu.memory_space<vmem>>, %arg10: memref<1x256xf32, #tpu.memory_space<vmem>>, %arg11: memref<64x256xbf16, #tpu.memory_space<vmem>>) attributes {dimension_semantics = [#tpu.dimension_semantics<parallel>], iteration_bounds = array<i64: 2>, scalar_prefetch = 0 : i64, scratch_operands = 0 : i64, tpu.core_type = #tpu.core_type<tc>, window_params = [{transform_indices = @transform_0, window_bounds = array<i64: 64, 256>}, {pipeline_mode = #tpu.pipeline_mode<synchronous>, transform_indices = @transform_1, window_bounds = array<i64: 1, 256>}, {pipeline_mode = #tpu.pipeline_mode<synchronous>, transform_indices = @transform_2, window_bounds = array<i64: 1, 256>}, {pipeline_mode = #tpu.pipeline_mode<synchronous>, transform_indices = @transform_3, window_bounds = array<i64: 256, 768>}, {pipeline_mode = #tpu.pipeline_mode<synchronous>, transform_indices = @transform_4, window_bounds = array<i64: 1, 768>}, {transform_indices = @transform_5, window_bounds = array<i64: 1, 1, 64>}, {pipeline_mode = #tpu.pipeline_mode<synchronous>, transform_indices = @transform_6, window_bounds = array<i64: 256, 256>}, {pipeline_mode = #tpu.pipeline_mode<synchronous>, transform_indices = @transform_7, window_bounds = array<i64: 1, 256>}, {pipeline_mode = #tpu.pipeline_mode<synchronous>, transform_indices = @transform_8, window_bounds = array<i64: 1, 256>}, {pipeline_mode = #tpu.pipeline_mode<synchronous>, transform_indices = @transform_9, window_bounds = array<i64: 1, 256>}, {transform_indices = @transform_10, window_bounds = array<i64: 64, 256>}]} {
    %c0 = arith.constant 0 : index
    %c0_0 = arith.constant 0 : index
    %0 = vector.load %arg1[%c0, %c0_0] : memref<64x256xf32, #tpu.memory_space<vmem>>, vector<64x256xf32>
    %c0_1 = arith.constant 0 : index
    %c0_2 = arith.constant 0 : index
    %1 = vector.load %arg2[%c0_1, %c0_2] : memref<1x256xf32, #tpu.memory_space<vmem>>, vector<1x256xf32>
    %c0_3 = arith.constant 0 : index
    %c0_4 = arith.constant 0 : index
    %2 = vector.load %arg3[%c0_3, %c0_4] : memref<1x256xf32, #tpu.memory_space<vmem>>, vector<1x256xf32>
    %cst = arith.constant dense<0.000000e+00> : vector<64xf32>
    %3 = vector.multi_reduction <add>, %0, %cst [1] : vector<64x256xf32> to vector<64xf32>
    %4 = vector.shape_cast %3 : vector<64xf32> to vector<64x1xf32>
    %cst_5 = arith.constant 2.560000e+02 : f32
    %5 = vector.broadcast %cst_5 : f32 to vector<64x1xf32>
    %6 = arith.divf %4, %5 : vector<64x1xf32>
    %7 = vector.broadcast %6 : vector<64x1xf32> to vector<64x256xf32>
    %8 = arith.subf %0, %7 : vector<64x256xf32>
    %9 = arith.mulf %8, %8 : vector<64x256xf32>
    %cst_6 = arith.constant dense<0.000000e+00> : vector<64xf32>
    %10 = vector.multi_reduction <add>, %9, %cst_6 [1] : vector<64x256xf32> to vector<64xf32>
    %11 = vector.shape_cast %10 : vector<64xf32> to vector<64x1xf32>
    %cst_7 = arith.constant 2.560000e+02 : f32
    %12 = vector.broadcast %cst_7 : f32 to vector<64x1xf32>
    %13 = arith.divf %11, %12 : vector<64x1xf32>
    %cst_8 = arith.constant 9.99999996E-13 : f32
    %14 = vector.broadcast %cst_8 : f32 to vector<64x1xf32>
    %15 = arith.addf %13, %14 : vector<64x1xf32>
    %16 = math.rsqrt %15 : vector<64x1xf32>
    %17 = vector.broadcast %6 : vector<64x1xf32> to vector<64x256xf32>
    %18 = arith.subf %0, %17 : vector<64x256xf32>
    %19 = vector.broadcast %16 : vector<64x1xf32> to vector<64x256xf32>
    %20 = arith.mulf %18, %19 : vector<64x256xf32>
    %21 = vector.broadcast %1 : vector<1x256xf32> to vector<64x256xf32>
    %22 = arith.mulf %20, %21 : vector<64x256xf32>
    %23 = vector.broadcast %2 : vector<1x256xf32> to vector<64x256xf32>
    %24 = arith.addf %22, %23 : vector<64x256xf32>
    %25 = arith.truncf %24 : vector<64x256xf32> to vector<64x256xbf16>
    %c0_9 = arith.constant 0 : index
    %c0_10 = arith.constant 0 : index
    %26 = vector.load %arg4[%c0_9, %c0_10] : memref<256x768xbf16, #tpu.memory_space<vmem>>, vector<256x768xbf16>
    %cst_11 = arith.constant dense<0.000000e+00> : vector<64x768xf32>
    %27 = tpu.matmul %25, %26, %cst_11 {dimension_numbers = #tpu.dot_dimension_numbers<[1], [0], [0], [1], [0, 0, 1, 1], [], []>} : vector<64x256xbf16>, vector<256x768xbf16>, vector<64x768xf32> -> vector<64x768xf32>
    %c0_12 = arith.constant 0 : index
    %c0_13 = arith.constant 0 : index
    %28 = vector.load %arg5[%c0_12, %c0_13] : memref<1x768xf32, #tpu.memory_space<vmem>>, vector<1x768xf32>
    %29 = vector.broadcast %28 : vector<1x768xf32> to vector<64x768xf32>
    %30 = arith.addf %27, %29 : vector<64x768xf32>
    %c0_14 = arith.constant 0 : index
    %c0_15 = arith.constant 0 : index
    %c0_16 = arith.constant 0 : index
    %31 = vector.load %arg6[%c0_14, %c0_15, %c0_16] : memref<1x1x64xf32, #tpu.memory_space<vmem>>, vector<1x1x64xf32>
    %32 = vector.shape_cast %31 : vector<1x1x64xf32> to vector<1x64xf32>
    %33 = vector.extract_strided_slice %30 {offsets = [0, 0], sizes = [64, 128], strides = [1, 1]} : vector<64x768xf32> to vector<64x128xf32>
    %34 = arith.truncf %33 : vector<64x128xf32> to vector<64x128xbf16>
    %35 = vector.extract_strided_slice %30 {offsets = [0, 256], sizes = [64, 128], strides = [1, 1]} : vector<64x768xf32> to vector<64x128xf32>
    %36 = arith.truncf %35 : vector<64x128xf32> to vector<64x128xbf16>
    %37 = vector.extract_strided_slice %30 {offsets = [0, 512], sizes = [64, 128], strides = [1, 1]} : vector<64x768xf32> to vector<64x128xf32>
    %38 = arith.truncf %37 : vector<64x128xf32> to vector<64x128xbf16>
    %cst_17 = arith.constant dense<0.000000e+00> : vector<64x64xf32>
    %39 = tpu.matmul %34, %36, %cst_17 {dimension_numbers = #tpu.dot_dimension_numbers<[1], [1], [0], [0], [0, 0, 1, 0], [], []>} : vector<64x128xbf16>, vector<64x128xbf16>, vector<64x64xf32> -> vector<64x64xf32>
    %cst_18 = arith.constant 0.0883883461 : f32
    %40 = vector.broadcast %cst_18 : f32 to vector<64x64xf32>
    %41 = arith.mulf %39, %40 : vector<64x64xf32>
    %42 = vector.broadcast %32 : vector<1x64xf32> to vector<64x64xf32>
    %43 = arith.addf %41, %42 : vector<64x64xf32>
    %cst_19 = arith.constant dense<0xFF800000> : vector<64xf32>
    %44 = vector.multi_reduction <maximumf>, %43, %cst_19 [1] : vector<64x64xf32> to vector<64xf32>
    %45 = vector.shape_cast %44 : vector<64xf32> to vector<64x1xf32>
    %46 = vector.broadcast %45 : vector<64x1xf32> to vector<64x64xf32>
    %47 = arith.subf %43, %46 : vector<64x64xf32>
    %48 = math.exp %47 : vector<64x64xf32>
    %cst_20 = arith.constant dense<0.000000e+00> : vector<64xf32>
    %49 = vector.multi_reduction <add>, %48, %cst_20 [1] : vector<64x64xf32> to vector<64xf32>
    %50 = vector.shape_cast %49 : vector<64xf32> to vector<64x1xf32>
    %51 = tpu.reciprocal %50 {approx = true} : vector<64x1xf32> -> vector<64x1xf32>
    %52 = vector.broadcast %51 : vector<64x1xf32> to vector<64x64xf32>
    %53 = arith.mulf %48, %52 : vector<64x64xf32>
    %54 = arith.truncf %53 : vector<64x64xf32> to vector<64x64xbf16>
    %cst_21 = arith.constant dense<0.000000e+00> : vector<64x128xf32>
    %55 = tpu.matmul %54, %38, %cst_21 {dimension_numbers = #tpu.dot_dimension_numbers<[1], [0], [0], [1], [0, 0, 1, 1], [], []>} : vector<64x64xbf16>, vector<64x128xbf16>, vector<64x128xf32> -> vector<64x128xf32>
    %56 = vector.extract_strided_slice %30 {offsets = [0, 128], sizes = [64, 128], strides = [1, 1]} : vector<64x768xf32> to vector<64x128xf32>
    %57 = arith.truncf %56 : vector<64x128xf32> to vector<64x128xbf16>
    %58 = vector.extract_strided_slice %30 {offsets = [0, 384], sizes = [64, 128], strides = [1, 1]} : vector<64x768xf32> to vector<64x128xf32>
    %59 = arith.truncf %58 : vector<64x128xf32> to vector<64x128xbf16>
    %60 = vector.extract_strided_slice %30 {offsets = [0, 640], sizes = [64, 128], strides = [1, 1]} : vector<64x768xf32> to vector<64x128xf32>
    %61 = arith.truncf %60 : vector<64x128xf32> to vector<64x128xbf16>
    %cst_22 = arith.constant dense<0.000000e+00> : vector<64x64xf32>
    %62 = tpu.matmul %57, %59, %cst_22 {dimension_numbers = #tpu.dot_dimension_numbers<[1], [1], [0], [0], [0, 0, 1, 0], [], []>} : vector<64x128xbf16>, vector<64x128xbf16>, vector<64x64xf32> -> vector<64x64xf32>
    %cst_23 = arith.constant 0.0883883461 : f32
    %63 = vector.broadcast %cst_23 : f32 to vector<64x64xf32>
    %64 = arith.mulf %62, %63 : vector<64x64xf32>
    %65 = vector.broadcast %32 : vector<1x64xf32> to vector<64x64xf32>
    %66 = arith.addf %64, %65 : vector<64x64xf32>
    %cst_24 = arith.constant dense<0xFF800000> : vector<64xf32>
    %67 = vector.multi_reduction <maximumf>, %66, %cst_24 [1] : vector<64x64xf32> to vector<64xf32>
    %68 = vector.shape_cast %67 : vector<64xf32> to vector<64x1xf32>
    %69 = vector.broadcast %68 : vector<64x1xf32> to vector<64x64xf32>
    %70 = arith.subf %66, %69 : vector<64x64xf32>
    %71 = math.exp %70 : vector<64x64xf32>
    %cst_25 = arith.constant dense<0.000000e+00> : vector<64xf32>
    %72 = vector.multi_reduction <add>, %71, %cst_25 [1] : vector<64x64xf32> to vector<64xf32>
    %73 = vector.shape_cast %72 : vector<64xf32> to vector<64x1xf32>
    %74 = tpu.reciprocal %73 {approx = true} : vector<64x1xf32> -> vector<64x1xf32>
    %75 = vector.broadcast %74 : vector<64x1xf32> to vector<64x64xf32>
    %76 = arith.mulf %71, %75 : vector<64x64xf32>
    %77 = arith.truncf %76 : vector<64x64xf32> to vector<64x64xbf16>
    %cst_26 = arith.constant dense<0.000000e+00> : vector<64x128xf32>
    %78 = tpu.matmul %77, %61, %cst_26 {dimension_numbers = #tpu.dot_dimension_numbers<[1], [0], [0], [1], [0, 0, 1, 1], [], []>} : vector<64x64xbf16>, vector<64x128xbf16>, vector<64x128xf32> -> vector<64x128xf32>
    %79 = tpu.concatenate %55, %78 in 1 : vector<64x128xf32>, vector<64x128xf32> -> vector<64x256xf32>
    %80 = arith.truncf %79 : vector<64x256xf32> to vector<64x256xbf16>
    %c0_27 = arith.constant 0 : index
    %c0_28 = arith.constant 0 : index
    %81 = vector.load %arg7[%c0_27, %c0_28] : memref<256x256xbf16, #tpu.memory_space<vmem>>, vector<256x256xbf16>
    %cst_29 = arith.constant dense<0.000000e+00> : vector<64x256xf32>
    %82 = tpu.matmul %80, %81, %cst_29 {dimension_numbers = #tpu.dot_dimension_numbers<[1], [0], [0], [1], [0, 0, 1, 1], [], []>} : vector<64x256xbf16>, vector<256x256xbf16>, vector<64x256xf32> -> vector<64x256xf32>
    %c0_30 = arith.constant 0 : index
    %c0_31 = arith.constant 0 : index
    %83 = vector.load %arg8[%c0_30, %c0_31] : memref<1x256xf32, #tpu.memory_space<vmem>>, vector<1x256xf32>
    %84 = vector.broadcast %83 : vector<1x256xf32> to vector<64x256xf32>
    %85 = arith.addf %82, %84 : vector<64x256xf32>
    %86 = arith.addf %85, %24 : vector<64x256xf32>
    %c0_32 = arith.constant 0 : index
    %c0_33 = arith.constant 0 : index
    %87 = vector.load %arg9[%c0_32, %c0_33] : memref<1x256xf32, #tpu.memory_space<vmem>>, vector<1x256xf32>
    %c0_34 = arith.constant 0 : index
    %c0_35 = arith.constant 0 : index
    %88 = vector.load %arg10[%c0_34, %c0_35] : memref<1x256xf32, #tpu.memory_space<vmem>>, vector<1x256xf32>
    %cst_36 = arith.constant dense<0.000000e+00> : vector<64xf32>
    %89 = vector.multi_reduction <add>, %86, %cst_36 [1] : vector<64x256xf32> to vector<64xf32>
    %90 = vector.shape_cast %89 : vector<64xf32> to vector<64x1xf32>
    %cst_37 = arith.constant 2.560000e+02 : f32
    %91 = vector.broadcast %cst_37 : f32 to vector<64x1xf32>
    %92 = arith.divf %90, %91 : vector<64x1xf32>
    %93 = vector.broadcast %92 : vector<64x1xf32> to vector<64x256xf32>
    %94 = arith.subf %86, %93 : vector<64x256xf32>
    %95 = arith.mulf %94, %94 : vector<64x256xf32>
    %cst_38 = arith.constant dense<0.000000e+00> : vector<64xf32>
    %96 = vector.multi_reduction <add>, %95, %cst_38 [1] : vector<64x256xf32> to vector<64xf32>
    %97 = vector.shape_cast %96 : vector<64xf32> to vector<64x1xf32>
    %cst_39 = arith.constant 2.560000e+02 : f32
    %98 = vector.broadcast %cst_39 : f32 to vector<64x1xf32>
    %99 = arith.divf %97, %98 : vector<64x1xf32>
    %cst_40 = arith.constant 9.99999996E-13 : f32
    %100 = vector.broadcast %cst_40 : f32 to vector<64x1xf32>
    %101 = arith.addf %99, %100 : vector<64x1xf32>
    %102 = math.rsqrt %101 : vector<64x1xf32>
    %103 = vector.broadcast %92 : vector<64x1xf32> to vector<64x256xf32>
    %104 = arith.subf %86, %103 : vector<64x256xf32>
    %105 = vector.broadcast %102 : vector<64x1xf32> to vector<64x256xf32>
    %106 = arith.mulf %104, %105 : vector<64x256xf32>
    %107 = vector.broadcast %87 : vector<1x256xf32> to vector<64x256xf32>
    %108 = arith.mulf %106, %107 : vector<64x256xf32>
    %109 = vector.broadcast %88 : vector<1x256xf32> to vector<64x256xf32>
    %110 = arith.addf %108, %109 : vector<64x256xf32>
    %111 = arith.truncf %110 : vector<64x256xf32> to vector<64x256xbf16>
    %c0_41 = arith.constant 0 : index
    %c0_42 = arith.constant 0 : index
    %112 = vector.load %arg11[%c0_41, %c0_42] : memref<64x256xbf16, #tpu.memory_space<vmem>>, vector<64x256xbf16>
    tpu.vector_store %arg11[%c0_41, %c0_42], %111 {strides = array<i32>} : memref<64x256xbf16, #tpu.memory_space<vmem>>, vector<64x256xbf16>,
    return
  }
  func.func @transform_0(%arg0: i32) -> (i32, i32) {
    %c0_i32 = arith.constant 0 : i32
    %c0_i32_0 = arith.constant 0 : i32
    return %arg0, %c0_i32 : i32, i32
  }
  func.func @transform_1(%arg0: i32) -> (i32, i32) {
    %c0_i32 = arith.constant 0 : i32
    %c0_i32_0 = arith.constant 0 : i32
    %c0_i32_1 = arith.constant 0 : i32
    return %c0_i32, %c0_i32_0 : i32, i32
  }
  func.func @transform_2(%arg0: i32) -> (i32, i32) {
    %c0_i32 = arith.constant 0 : i32
    %c0_i32_0 = arith.constant 0 : i32
    %c0_i32_1 = arith.constant 0 : i32
    return %c0_i32, %c0_i32_0 : i32, i32
  }
  func.func @transform_3(%arg0: i32) -> (i32, i32) {
    %c0_i32 = arith.constant 0 : i32
    %c0_i32_0 = arith.constant 0 : i32
    %c0_i32_1 = arith.constant 0 : i32
    return %c0_i32, %c0_i32_0 : i32, i32
  }
  func.func @transform_4(%arg0: i32) -> (i32, i32) {
    %c0_i32 = arith.constant 0 : i32
    %c0_i32_0 = arith.constant 0 : i32
    %c0_i32_1 = arith.constant 0 : i32
    return %c0_i32, %c0_i32_0 : i32, i32
  }
  func.func @transform_5(%arg0: i32) -> (i32, i32, i32) {
    %c0_i32 = arith.constant 0 : i32
    %c0_i32_0 = arith.constant 0 : i32
    %c0_i32_1 = arith.constant 0 : i32
    return %arg0, %c0_i32, %c0_i32_0 : i32, i32, i32
  }
  func.func @transform_6(%arg0: i32) -> (i32, i32) {
    %c0_i32 = arith.constant 0 : i32
    %c0_i32_0 = arith.constant 0 : i32
    %c0_i32_1 = arith.constant 0 : i32
    return %c0_i32, %c0_i32_0 : i32, i32
  }
  func.func @transform_7(%arg0: i32) -> (i32, i32) {
    %c0_i32 = arith.constant 0 : i32
    %c0_i32_0 = arith.constant 0 : i32
    %c0_i32_1 = arith.constant 0 : i32
    return %c0_i32, %c0_i32_0 : i32, i32
  }
  func.func @transform_8(%arg0: i32) -> (i32, i32) {
    %c0_i32 = arith.constant 0 : i32
    %c0_i32_0 = arith.constant 0 : i32
    %c0_i32_1 = arith.constant 0 : i32
    return %c0_i32, %c0_i32_0 : i32, i32
  }
  func.func @transform_9(%arg0: i32) -> (i32, i32) {
    %c0_i32 = arith.constant 0 : i32
    %c0_i32_0 = arith.constant 0 : i32
    %c0_i32_1 = arith.constant 0 : i32
    return %c0_i32, %c0_i32_0 : i32, i32
  }
  func.func @transform_10(%arg0: i32) -> (i32, i32) {
    %c0_i32 = arith.constant 0 : i32
    %c0_i32_0 = arith.constant 0 : i32
    return %arg0, %c0_i32 : i32, i32
  }
}

module attributes {stable_mosaic.version = 11 : i64} {
  func.func @_ffn_head_kernel(%arg0: i32, %arg1: memref<128x256xbf16, #tpu.memory_space<vmem>>, %arg2: memref<256x512xbf16, #tpu.memory_space<vmem>>, %arg3: memref<1x512xf32, #tpu.memory_space<vmem>>, %arg4: memref<512x256xbf16, #tpu.memory_space<vmem>>, %arg5: memref<1x256xf32, #tpu.memory_space<vmem>>, %arg6: memref<1x256xf32, #tpu.memory_space<vmem>>, %arg7: memref<1x256xf32, #tpu.memory_space<vmem>>, %arg8: memref<256x256xbf16, #tpu.memory_space<vmem>>, %arg9: memref<1x256xf32, #tpu.memory_space<vmem>>, %arg10: memref<1x256xf32, #tpu.memory_space<vmem>>, %arg11: memref<1x256xf32, #tpu.memory_space<vmem>>, %arg12: memref<128x256xbf16, #tpu.memory_space<vmem>>) attributes {dimension_semantics = [#tpu.dimension_semantics<parallel>], iteration_bounds = array<i64: 1>, scalar_prefetch = 0 : i64, scratch_operands = 0 : i64, tpu.core_type = #tpu.core_type<tc>, window_params = [{transform_indices = @transform_0, window_bounds = array<i64: 128, 256>}, {pipeline_mode = #tpu.pipeline_mode<synchronous>, transform_indices = @transform_1, window_bounds = array<i64: 256, 512>}, {pipeline_mode = #tpu.pipeline_mode<synchronous>, transform_indices = @transform_2, window_bounds = array<i64: 1, 512>}, {pipeline_mode = #tpu.pipeline_mode<synchronous>, transform_indices = @transform_3, window_bounds = array<i64: 512, 256>}, {pipeline_mode = #tpu.pipeline_mode<synchronous>, transform_indices = @transform_4, window_bounds = array<i64: 1, 256>}, {pipeline_mode = #tpu.pipeline_mode<synchronous>, transform_indices = @transform_5, window_bounds = array<i64: 1, 256>}, {pipeline_mode = #tpu.pipeline_mode<synchronous>, transform_indices = @transform_6, window_bounds = array<i64: 1, 256>}, {pipeline_mode = #tpu.pipeline_mode<synchronous>, transform_indices = @transform_7, window_bounds = array<i64: 256, 256>}, {pipeline_mode = #tpu.pipeline_mode<synchronous>, transform_indices = @transform_8, window_bounds = array<i64: 1, 256>}, {pipeline_mode = #tpu.pipeline_mode<synchronous>, transform_indices = @transform_9, window_bounds = array<i64: 1, 256>}, {pipeline_mode = #tpu.pipeline_mode<synchronous>, transform_indices = @transform_10, window_bounds = array<i64: 1, 256>}, {transform_indices = @transform_11, window_bounds = array<i64: 128, 256>}]} {
    %c0 = arith.constant 0 : index
    %c0_0 = arith.constant 0 : index
    %0 = vector.load %arg1[%c0, %c0_0] : memref<128x256xbf16, #tpu.memory_space<vmem>>, vector<128x256xbf16>
    %1 = arith.extf %0 : vector<128x256xbf16> to vector<128x256xf32>
    %c0_1 = arith.constant 0 : index
    %c0_2 = arith.constant 0 : index
    %2 = vector.load %arg2[%c0_1, %c0_2] : memref<256x512xbf16, #tpu.memory_space<vmem>>, vector<256x512xbf16>
    %cst = arith.constant dense<0.000000e+00> : vector<128x512xf32>
    %3 = tpu.matmul %0, %2, %cst {dimension_numbers = #tpu.dot_dimension_numbers<[1], [0], [0], [1], [0, 0, 1, 1], [], []>} : vector<128x256xbf16>, vector<256x512xbf16>, vector<128x512xf32> -> vector<128x512xf32>
    %c0_3 = arith.constant 0 : index
    %c0_4 = arith.constant 0 : index
    %4 = vector.load %arg3[%c0_3, %c0_4] : memref<1x512xf32, #tpu.memory_space<vmem>>, vector<1x512xf32>
    %5 = vector.broadcast %4 : vector<1x512xf32> to vector<128x512xf32>
    %6 = arith.addf %3, %5 : vector<128x512xf32>
    %cst_5 = arith.constant 5.000000e-01 : f32
    %7 = vector.broadcast %cst_5 : f32 to vector<128x512xf32>
    %8 = arith.mulf %7, %6 : vector<128x512xf32>
    %cst_6 = arith.constant 4.471500e-02 : f32
    %9 = vector.broadcast %cst_6 : f32 to vector<128x512xf32>
    %10 = arith.mulf %9, %6 : vector<128x512xf32>
    %11 = arith.mulf %10, %6 : vector<128x512xf32>
    %12 = arith.mulf %11, %6 : vector<128x512xf32>
    %13 = arith.addf %6, %12 : vector<128x512xf32>
    %cst_7 = arith.constant 0.797884583 : f32
    %14 = vector.broadcast %cst_7 : f32 to vector<128x512xf32>
    %15 = arith.mulf %14, %13 : vector<128x512xf32>
    %16 = math.tanh %15 : vector<128x512xf32>
    %cst_8 = arith.constant 1.000000e+00 : f32
    %17 = vector.broadcast %cst_8 : f32 to vector<128x512xf32>
    %18 = arith.addf %17, %16 : vector<128x512xf32>
    %19 = arith.mulf %8, %18 : vector<128x512xf32>
    %20 = arith.truncf %19 : vector<128x512xf32> to vector<128x512xbf16>
    %c0_9 = arith.constant 0 : index
    %c0_10 = arith.constant 0 : index
    %21 = vector.load %arg4[%c0_9, %c0_10] : memref<512x256xbf16, #tpu.memory_space<vmem>>, vector<512x256xbf16>
    %cst_11 = arith.constant dense<0.000000e+00> : vector<128x256xf32>
    %22 = tpu.matmul %20, %21, %cst_11 {dimension_numbers = #tpu.dot_dimension_numbers<[1], [0], [0], [1], [0, 0, 1, 1], [], []>} : vector<128x512xbf16>, vector<512x256xbf16>, vector<128x256xf32> -> vector<128x256xf32>
    %c0_12 = arith.constant 0 : index
    %c0_13 = arith.constant 0 : index
    %23 = vector.load %arg5[%c0_12, %c0_13] : memref<1x256xf32, #tpu.memory_space<vmem>>, vector<1x256xf32>
    %24 = vector.broadcast %23 : vector<1x256xf32> to vector<128x256xf32>
    %25 = arith.addf %22, %24 : vector<128x256xf32>
    %26 = arith.addf %25, %1 : vector<128x256xf32>
    %c0_14 = arith.constant 0 : index
    %c0_15 = arith.constant 0 : index
    %27 = vector.load %arg6[%c0_14, %c0_15] : memref<1x256xf32, #tpu.memory_space<vmem>>, vector<1x256xf32>
    %c0_16 = arith.constant 0 : index
    %c0_17 = arith.constant 0 : index
    %28 = vector.load %arg7[%c0_16, %c0_17] : memref<1x256xf32, #tpu.memory_space<vmem>>, vector<1x256xf32>
    %cst_18 = arith.constant dense<0.000000e+00> : vector<128xf32>
    %29 = vector.multi_reduction <add>, %26, %cst_18 [1] : vector<128x256xf32> to vector<128xf32>
    %30 = vector.shape_cast %29 : vector<128xf32> to vector<128x1xf32>
    %cst_19 = arith.constant 2.560000e+02 : f32
    %31 = vector.broadcast %cst_19 : f32 to vector<128x1xf32>
    %32 = arith.divf %30, %31 : vector<128x1xf32>
    %33 = vector.broadcast %32 : vector<128x1xf32> to vector<128x256xf32>
    %34 = arith.subf %26, %33 : vector<128x256xf32>
    %35 = arith.mulf %34, %34 : vector<128x256xf32>
    %cst_20 = arith.constant dense<0.000000e+00> : vector<128xf32>
    %36 = vector.multi_reduction <add>, %35, %cst_20 [1] : vector<128x256xf32> to vector<128xf32>
    %37 = vector.shape_cast %36 : vector<128xf32> to vector<128x1xf32>
    %cst_21 = arith.constant 2.560000e+02 : f32
    %38 = vector.broadcast %cst_21 : f32 to vector<128x1xf32>
    %39 = arith.divf %37, %38 : vector<128x1xf32>
    %cst_22 = arith.constant 9.99999996E-13 : f32
    %40 = vector.broadcast %cst_22 : f32 to vector<128x1xf32>
    %41 = arith.addf %39, %40 : vector<128x1xf32>
    %42 = math.rsqrt %41 : vector<128x1xf32>
    %43 = vector.broadcast %32 : vector<128x1xf32> to vector<128x256xf32>
    %44 = arith.subf %26, %43 : vector<128x256xf32>
    %45 = vector.broadcast %42 : vector<128x1xf32> to vector<128x256xf32>
    %46 = arith.mulf %44, %45 : vector<128x256xf32>
    %47 = vector.broadcast %27 : vector<1x256xf32> to vector<128x256xf32>
    %48 = arith.mulf %46, %47 : vector<128x256xf32>
    %49 = vector.broadcast %28 : vector<1x256xf32> to vector<128x256xf32>
    %50 = arith.addf %48, %49 : vector<128x256xf32>
    %51 = arith.truncf %50 : vector<128x256xf32> to vector<128x256xbf16>
    %c0_23 = arith.constant 0 : index
    %c0_24 = arith.constant 0 : index
    %52 = vector.load %arg8[%c0_23, %c0_24] : memref<256x256xbf16, #tpu.memory_space<vmem>>, vector<256x256xbf16>
    %cst_25 = arith.constant dense<0.000000e+00> : vector<128x256xf32>
    %53 = tpu.matmul %51, %52, %cst_25 {dimension_numbers = #tpu.dot_dimension_numbers<[1], [0], [0], [1], [0, 0, 1, 1], [], []>} : vector<128x256xbf16>, vector<256x256xbf16>, vector<128x256xf32> -> vector<128x256xf32>
    %c0_26 = arith.constant 0 : index
    %c0_27 = arith.constant 0 : index
    %54 = vector.load %arg9[%c0_26, %c0_27] : memref<1x256xf32, #tpu.memory_space<vmem>>, vector<1x256xf32>
    %55 = vector.broadcast %54 : vector<1x256xf32> to vector<128x256xf32>
    %56 = arith.addf %53, %55 : vector<128x256xf32>
    %cst_28 = arith.constant 5.000000e-01 : f32
    %57 = vector.broadcast %cst_28 : f32 to vector<128x256xf32>
    %58 = arith.mulf %57, %56 : vector<128x256xf32>
    %cst_29 = arith.constant 4.471500e-02 : f32
    %59 = vector.broadcast %cst_29 : f32 to vector<128x256xf32>
    %60 = arith.mulf %59, %56 : vector<128x256xf32>
    %61 = arith.mulf %60, %56 : vector<128x256xf32>
    %62 = arith.mulf %61, %56 : vector<128x256xf32>
    %63 = arith.addf %56, %62 : vector<128x256xf32>
    %cst_30 = arith.constant 0.797884583 : f32
    %64 = vector.broadcast %cst_30 : f32 to vector<128x256xf32>
    %65 = arith.mulf %64, %63 : vector<128x256xf32>
    %66 = math.tanh %65 : vector<128x256xf32>
    %cst_31 = arith.constant 1.000000e+00 : f32
    %67 = vector.broadcast %cst_31 : f32 to vector<128x256xf32>
    %68 = arith.addf %67, %66 : vector<128x256xf32>
    %69 = arith.mulf %58, %68 : vector<128x256xf32>
    %c0_32 = arith.constant 0 : index
    %c0_33 = arith.constant 0 : index
    %70 = vector.load %arg10[%c0_32, %c0_33] : memref<1x256xf32, #tpu.memory_space<vmem>>, vector<1x256xf32>
    %c0_34 = arith.constant 0 : index
    %c0_35 = arith.constant 0 : index
    %71 = vector.load %arg11[%c0_34, %c0_35] : memref<1x256xf32, #tpu.memory_space<vmem>>, vector<1x256xf32>
    %cst_36 = arith.constant dense<0.000000e+00> : vector<128xf32>
    %72 = vector.multi_reduction <add>, %69, %cst_36 [1] : vector<128x256xf32> to vector<128xf32>
    %73 = vector.shape_cast %72 : vector<128xf32> to vector<128x1xf32>
    %cst_37 = arith.constant 2.560000e+02 : f32
    %74 = vector.broadcast %cst_37 : f32 to vector<128x1xf32>
    %75 = arith.divf %73, %74 : vector<128x1xf32>
    %76 = vector.broadcast %75 : vector<128x1xf32> to vector<128x256xf32>
    %77 = arith.subf %69, %76 : vector<128x256xf32>
    %78 = arith.mulf %77, %77 : vector<128x256xf32>
    %cst_38 = arith.constant dense<0.000000e+00> : vector<128xf32>
    %79 = vector.multi_reduction <add>, %78, %cst_38 [1] : vector<128x256xf32> to vector<128xf32>
    %80 = vector.shape_cast %79 : vector<128xf32> to vector<128x1xf32>
    %cst_39 = arith.constant 2.560000e+02 : f32
    %81 = vector.broadcast %cst_39 : f32 to vector<128x1xf32>
    %82 = arith.divf %80, %81 : vector<128x1xf32>
    %cst_40 = arith.constant 9.99999996E-13 : f32
    %83 = vector.broadcast %cst_40 : f32 to vector<128x1xf32>
    %84 = arith.addf %82, %83 : vector<128x1xf32>
    %85 = math.rsqrt %84 : vector<128x1xf32>
    %86 = vector.broadcast %75 : vector<128x1xf32> to vector<128x256xf32>
    %87 = arith.subf %69, %86 : vector<128x256xf32>
    %88 = vector.broadcast %85 : vector<128x1xf32> to vector<128x256xf32>
    %89 = arith.mulf %87, %88 : vector<128x256xf32>
    %90 = vector.broadcast %70 : vector<1x256xf32> to vector<128x256xf32>
    %91 = arith.mulf %89, %90 : vector<128x256xf32>
    %92 = vector.broadcast %71 : vector<1x256xf32> to vector<128x256xf32>
    %93 = arith.addf %91, %92 : vector<128x256xf32>
    %94 = arith.truncf %93 : vector<128x256xf32> to vector<128x256xbf16>
    %c0_41 = arith.constant 0 : index
    %c0_42 = arith.constant 0 : index
    %95 = vector.load %arg12[%c0_41, %c0_42] : memref<128x256xbf16, #tpu.memory_space<vmem>>, vector<128x256xbf16>
    tpu.vector_store %arg12[%c0_41, %c0_42], %94 {strides = array<i32>} : memref<128x256xbf16, #tpu.memory_space<vmem>>, vector<128x256xbf16>,
    return
  }
  func.func @transform_0(%arg0: i32) -> (i32, i32) {
    %c0_i32 = arith.constant 0 : i32
    %c0_i32_0 = arith.constant 0 : i32
    return %arg0, %c0_i32 : i32, i32
  }
  func.func @transform_1(%arg0: i32) -> (i32, i32) {
    %c0_i32 = arith.constant 0 : i32
    %c0_i32_0 = arith.constant 0 : i32
    %c0_i32_1 = arith.constant 0 : i32
    return %c0_i32, %c0_i32_0 : i32, i32
  }
  func.func @transform_2(%arg0: i32) -> (i32, i32) {
    %c0_i32 = arith.constant 0 : i32
    %c0_i32_0 = arith.constant 0 : i32
    %c0_i32_1 = arith.constant 0 : i32
    return %c0_i32, %c0_i32_0 : i32, i32
  }
  func.func @transform_3(%arg0: i32) -> (i32, i32) {
    %c0_i32 = arith.constant 0 : i32
    %c0_i32_0 = arith.constant 0 : i32
    %c0_i32_1 = arith.constant 0 : i32
    return %c0_i32, %c0_i32_0 : i32, i32
  }
  func.func @transform_4(%arg0: i32) -> (i32, i32) {
    %c0_i32 = arith.constant 0 : i32
    %c0_i32_0 = arith.constant 0 : i32
    %c0_i32_1 = arith.constant 0 : i32
    return %c0_i32, %c0_i32_0 : i32, i32
  }
  func.func @transform_5(%arg0: i32) -> (i32, i32) {
    %c0_i32 = arith.constant 0 : i32
    %c0_i32_0 = arith.constant 0 : i32
    %c0_i32_1 = arith.constant 0 : i32
    return %c0_i32, %c0_i32_0 : i32, i32
  }
  func.func @transform_6(%arg0: i32) -> (i32, i32) {
    %c0_i32 = arith.constant 0 : i32
    %c0_i32_0 = arith.constant 0 : i32
    %c0_i32_1 = arith.constant 0 : i32
    return %c0_i32, %c0_i32_0 : i32, i32
  }
  func.func @transform_7(%arg0: i32) -> (i32, i32) {
    %c0_i32 = arith.constant 0 : i32
    %c0_i32_0 = arith.constant 0 : i32
    %c0_i32_1 = arith.constant 0 : i32
    return %c0_i32, %c0_i32_0 : i32, i32
  }
  func.func @transform_8(%arg0: i32) -> (i32, i32) {
    %c0_i32 = arith.constant 0 : i32
    %c0_i32_0 = arith.constant 0 : i32
    %c0_i32_1 = arith.constant 0 : i32
    return %c0_i32, %c0_i32_0 : i32, i32
  }
  func.func @transform_9(%arg0: i32) -> (i32, i32) {
    %c0_i32 = arith.constant 0 : i32
    %c0_i32_0 = arith.constant 0 : i32
    %c0_i32_1 = arith.constant 0 : i32
    return %c0_i32, %c0_i32_0 : i32, i32
  }
  func.func @transform_10(%arg0: i32) -> (i32, i32) {
    %c0_i32 = arith.constant 0 : i32
    %c0_i32_0 = arith.constant 0 : i32
    %c0_i32_1 = arith.constant 0 : i32
    return %c0_i32, %c0_i32_0 : i32, i32
  }
  func.func @transform_11(%arg0: i32) -> (i32, i32) {
    %c0_i32 = arith.constant 0 : i32
    %c0_i32_0 = arith.constant 0 : i32
    return %arg0, %c0_i32 : i32, i32
  }
}

module attributes {stable_mosaic.version = 11 : i64} {
  func.func @_matmul_kernel(%arg0: i32, %arg1: i32, %arg2: i32, %arg3: memref<128x256xbf16, #tpu.memory_space<vmem>>, %arg4: memref<256x256xbf16, #tpu.memory_space<vmem>>, %arg5: memref<1x256xf32, #tpu.memory_space<vmem>>, %arg6: memref<128x256xf32, #tpu.memory_space<vmem>>, %arg7: memref<128x256xf32, #tpu.memory_space<vmem>>) attributes {dimension_semantics = [#tpu.dimension_semantics<parallel>, #tpu.dimension_semantics<parallel>, #tpu.dimension_semantics<arbitrary>], iteration_bounds = array<i64: 1, 2, 1>, scalar_prefetch = 0 : i64, scratch_operands = 1 : i64, tpu.core_type = #tpu.core_type<tc>, window_params = [{transform_indices = @transform_0, window_bounds = array<i64: 128, 256>}, {transform_indices = @transform_1, window_bounds = array<i64: 256, 256>}, {transform_indices = @transform_2, window_bounds = array<i64: 1, 256>}, {transform_indices = @transform_3, window_bounds = array<i64: 128, 256>}]} {
    %c0_i32 = arith.constant 0 : i32
    %0 = arith.cmpi eq, %arg2, %c0_i32 : i32
    %1 = arith.extui %0 : i1 to i32
    %c0_i32_0 = arith.constant 0 : i32
    %2 = arith.cmpi ne, %1, %c0_i32_0 : i32
    scf.if %2 {
      %cst_10 = arith.constant 0.000000e+00 : f32
      %12 = vector.broadcast %cst_10 : f32 to vector<128x256xf32>
      %c0_11 = arith.constant 0 : index
      %c0_12 = arith.constant 0 : index
      %13 = vector.load %arg7[%c0_11, %c0_12] : memref<128x256xf32, #tpu.memory_space<vmem>>, vector<128x256xf32>
      tpu.vector_store %arg7[%c0_11, %c0_12], %12 {strides = array<i32>} : memref<128x256xf32, #tpu.memory_space<vmem>>, vector<128x256xf32>,
    } else {
    }
    %c0 = arith.constant 0 : index
    %c0_1 = arith.constant 0 : index
    %3 = vector.load %arg7[%c0, %c0_1] : memref<128x256xf32, #tpu.memory_space<vmem>>, vector<128x256xf32>
    %c0_2 = arith.constant 0 : index
    %c0_3 = arith.constant 0 : index
    %4 = vector.load %arg3[%c0_2, %c0_3] : memref<128x256xbf16, #tpu.memory_space<vmem>>, vector<128x256xbf16>
    %c0_4 = arith.constant 0 : index
    %c0_5 = arith.constant 0 : index
    %5 = vector.load %arg4[%c0_4, %c0_5] : memref<256x256xbf16, #tpu.memory_space<vmem>>, vector<256x256xbf16>
    %cst = arith.constant dense<0.000000e+00> : vector<128x256xf32>
    %6 = tpu.matmul %4, %5, %cst {dimension_numbers = #tpu.dot_dimension_numbers<[1], [0], [0], [1], [0, 0, 1, 1], [], []>} : vector<128x256xbf16>, vector<256x256xbf16>, vector<128x256xf32> -> vector<128x256xf32>
    %7 = arith.addf %3, %6 : vector<128x256xf32>
    %c0_6 = arith.constant 0 : index
    %c0_7 = arith.constant 0 : index
    %8 = vector.load %arg7[%c0_6, %c0_7] : memref<128x256xf32, #tpu.memory_space<vmem>>, vector<128x256xf32>
    tpu.vector_store %arg7[%c0_6, %c0_7], %7 {strides = array<i32>} : memref<128x256xf32, #tpu.memory_space<vmem>>, vector<128x256xf32>,
    %c0_i32_8 = arith.constant 0 : i32
    %9 = arith.cmpi eq, %arg2, %c0_i32_8 : i32
    %10 = arith.extui %9 : i1 to i32
    %c0_i32_9 = arith.constant 0 : i32
    %11 = arith.cmpi ne, %10, %c0_i32_9 : i32
    scf.if %11 {
      %c0_10 = arith.constant 0 : index
      %c0_11 = arith.constant 0 : index
      %12 = vector.load %arg7[%c0_10, %c0_11] : memref<128x256xf32, #tpu.memory_space<vmem>>, vector<128x256xf32>
      %c0_12 = arith.constant 0 : index
      %c0_13 = arith.constant 0 : index
      %13 = vector.load %arg5[%c0_12, %c0_13] : memref<1x256xf32, #tpu.memory_space<vmem>>, vector<1x256xf32>
      %14 = vector.broadcast %13 : vector<1x256xf32> to vector<128x256xf32>
      %15 = arith.addf %12, %14 : vector<128x256xf32>
      %c0_14 = arith.constant 0 : index
      %c0_15 = arith.constant 0 : index
      %16 = vector.load %arg6[%c0_14, %c0_15] : memref<128x256xf32, #tpu.memory_space<vmem>>, vector<128x256xf32>
      tpu.vector_store %arg6[%c0_14, %c0_15], %15 {strides = array<i32>} : memref<128x256xf32, #tpu.memory_space<vmem>>, vector<128x256xf32>,
    } else {
    }
    return
  }
  func.func @transform_0(%arg0: i32, %arg1: i32, %arg2: i32) -> (i32, i32) {
    %c0_i32 = arith.constant 0 : i32
    return %arg0, %arg2 : i32, i32
  }
  func.func @transform_1(%arg0: i32, %arg1: i32, %arg2: i32) -> (i32, i32) {
    %c0_i32 = arith.constant 0 : i32
    return %arg2, %arg1 : i32, i32
  }
  func.func @transform_2(%arg0: i32, %arg1: i32, %arg2: i32) -> (i32, i32) {
    %c0_i32 = arith.constant 0 : i32
    %c0_i32_0 = arith.constant 0 : i32
    return %c0_i32, %arg1 : i32, i32
  }
  func.func @transform_3(%arg0: i32, %arg1: i32, %arg2: i32) -> (i32, i32) {
    %c0_i32 = arith.constant 0 : i32
    return %arg0, %arg1 : i32, i32
  }
}

</mosaic_0001>

<bundles_post_ra>
// kernel: generator_forward.5
= control target key start
LH: loop header
LB: loop body
LE: loop exit
PB: predicated region body
PF: predicated region fallthrough
CT: control target
= control target key end

     0   :  { %8 = vsyncpa [#allocation5], 0  ;;  %s1880_s0 = inlined_call_operand.vmem [shape: bf16[128,256], index: 0, kind: input, shape index: {}]   ;;  %s1881_s1 = inlined_call_operand.vmem [shape: bf16[256,512], index: 1, kind: input, shape index: {}]   ;;  %s1882_s2 = inlined_call_operand.vmem [shape: f32[1,512], index: 2, kind: input, shape index: {}]   ;;  %s1883_s3 = inlined_call_operand.hbm [shape: f32[128,512], index: 3, kind: output, shape index: {}]  }
   0x1   :  { %10 = vsyncpa [#allocation5 + $0x1], 0  ;;  %s1527_s12 = smov 0   ;;  %s1529_s13 = smov 0  }
   0x2   :  { %s1531_s14 = smov 0   ;;  %s1533_s15 = smov 0  }
   0x3   :  { %s1535_s16 = smov 0   ;;  %s1537_s17 = smov 0  }
   0x4 LB: > { %s1194_s18 = sadd.s32 4294967295, %s1501_s17   ;;  %s1195_s19 = sadd.s32 4294967294, %s1501_s17   ;;  %s1501_s17 = sphi %s1537_s17, %s16_s17   ;;  %s1497_s16 = sphi %s1535_s16, %s1890_s16   ;;  %s1493_s15 = sphi %s1533_s15, %s1889_s15   ;;  %s1489_s14 = sphi %s1531_s14, %s1888_s14   ;;  %s1485_s13 = sphi %s1529_s13, %s1887_s13   ;;  %s1481_s12 = sphi %s1527_s12, %s1886_s12  }
   0x5   : > { %s31_s20 = sadd.s32 1, %s1497_s16  ;;  %s72_s21 = sadd.s32 1, %s1489_s14 }
   0x6   : > { %p33_p0 = scmp.ge.s32.totalorder %s31_s20, 2  ;;  %p79_p1 = scmp.ne.s32.totalorder %s1489_s14, %s1485_s13 }
   0x7   : > { %p80_p2 = scmp.eq.s32.totalorder %s1501_s17, 0  ;;  %p137_p3 = scmp.eq.s32.totalorder %s1194_s18, 1 }
   0x8   : > { %s1892_s20 = smov (%p33_p0, %s31_s20), 0  ;;  %p142_p6 = scmp.ne.s32.totalorder %s1485_s13, %s1481_s12 }
   0x9   : > { %p81_p4 = por %p80_p2, %p79_p1  ;;  %p1566_p5 = por %p137_p3, %p79_p1 }
   0xa   : > { %s68_s23 = ssub.s32 %s1497_s16, %s1892_s20  ;;  %p143_p8 = scmp.eq.s32.totalorder %s1195_s19, 1 }
   0xb   : > { %p70_p7 = scmp.eq.s32.totalorder %s68_s23, 0  ;;  %p1198_p10 = scmp.ge.s32.totalorder %s1501_s17, 2 }
   0xc   : > { %p1577_p9 = por %p143_p8, %p142_p6 }
   0xd   : > { %s1575_s24 = scalar_select %p70_p7, %s1489_s14, %s72_s21  }
   0xe   : > { %174 = sbr.rel (%p1198_p10) target bundleno = 41 (0x29), region = 20 }
  0x15   : > { %177 = sbr.rel (!%p81_p4) target bundleno = 41 (0x29), region = 24  ;;  %s179_s26 = sand.u32 (%p81_p4), 1, %s1489_s14  }
  0x16   : > { %s1259_s27 = sshll.u32 (%p81_p4), %s1497_s16, 3  ;;  %s1199_s28 = sshll.u32 (%p81_p4), %s179_s26, 8 }
  0x17   : > { %s1589_s4 = scalar_lea.vmem (%p81_p4), %s1881_s1, %s1259_s27  ;;  %s1594_s5 = scalar_lea.vmem (%p81_p4), [#allocation3], %s1199_s28 }
  0x18   : > { %v277_v0 = vld [vmem:[%s1589_s4] sm:$0xff] (%p81_p4)  ;;  %v279_v1 = vld [vmem:[%s1589_s4 + $0x10] sm:$0xff] (%p81_p4) }
  0x19   : > { %v281_v2 = vld [vmem:[%s1589_s4 + $0x20] sm:$0xff] (%p81_p4)  ;;  %278 = vst [vmem:[%s1594_s5] sm:$0xff] (%p81_p4), %v277_v0  ;;  %280 = vst [vmem:[%s1594_s5 + $0x8] sm:$0xff] (%p81_p4), %v279_v1  ;;  %v283_v3 = vld [vmem:[%s1589_s4 + $0x30] sm:$0xff] (%p81_p4) }
  0x1a   : > { %282 = vst [vmem:[%s1594_s5 + $0x10] sm:$0xff] (%p81_p4), %v281_v2  ;;  %v285_v4 = vld [vmem:[%s1589_s4 + $0x40] sm:$0xff] (%p81_p4)  ;;  %v287_v5 = vld [vmem:[%s1589_s4 + $0x50] sm:$0xff] (%p81_p4)  ;;  %284 = vst [vmem:[%s1594_s5 + $0x18] sm:$0xff] (%p81_p4), %v283_v3 }
  0x1b   : > { %286 = vst [vmem:[%s1594_s5 + $0x20] sm:$0xff] (%p81_p4), %v285_v4  ;;  %288 = vst [vmem:[%s1594_s5 + $0x28] sm:$0xff] (%p81_p4), %v287_v5  ;;  %v289_v6 = vld [vmem:[%s1589_s4 + $0x60] sm:$0xff] (%p81_p4)  ;;  %v291_v7 = vld [vmem:[%s1589_s4 + $0x70] sm:$0xff] (%p81_p4) }
  0x1c   : > { %v293_v8 = vld [vmem:[%s1589_s4 + $0x80] sm:$0xff]  ;;  %290 = vst [vmem:[%s1594_s5 + $0x30] sm:$0xff] %v289_v6  ;;  %292 = vst [vmem:[%s1594_s5 + $0x38] sm:$0xff] %v291_v7  ;;  %v295_v9 = vld [vmem:[%s1589_s4 + $0x90] sm:$0xff] }
  0x1d   : > { %294 = vst [vmem:[%s1594_s5 + $0x40] sm:$0xff] %v293_v8  ;;  %v297_v10 = vld [vmem:[%s1589_s4 + $0xa0] sm:$0xff]  ;;  %v299_v11 = vld [vmem:[%s1589_s4 + $0xb0] sm:$0xff]  ;;  %296 = vst [vmem:[%s1594_s5 + $0x48] sm:$0xff] %v295_v9 }
  0x1e   : > { %298 = vst [vmem:[%s1594_s5 + $0x50] sm:$0xff] %v297_v10  ;;  %300 = vst [vmem:[%s1594_s5 + $0x58] sm:$0xff] %v299_v11  ;;  %v301_v12 = vld [vmem:[%s1589_s4 + $0xc0] sm:$0xff]  ;;  %v303_v13 = vld [vmem:[%s1589_s4 + $0xd0] sm:$0xff] }
  0x1f   : > { %v305_v14 = vld [vmem:[%s1589_s4 + $0xe0] sm:$0xff]  ;;  %302 = vst [vmem:[%s1594_s5 + $0x60] sm:$0xff] %v301_v12  ;;  %304 = vst [vmem:[%s1594_s5 + $0x68] sm:$0xff] %v303_v13  ;;  %v307_v15 = vld [vmem:[%s1589_s4 + $0xf0] sm:$0xff] }
  0x20   : > { %306 = vst [vmem:[%s1594_s5 + $0x70] sm:$0xff] %v305_v14  ;;  %v309_v16 = vld [vmem:[%s1589_s4 + $0x100] sm:$0xff]  ;;  %v311_v17 = vld [vmem:[%s1589_s4 + $0x110] sm:$0xff]  ;;  %308 = vst [vmem:[%s1594_s5 + $0x78] sm:$0xff] %v307_v15 }
  0x21   : > { %310 = vst [vmem:[%s1594_s5 + $0x80] sm:$0xff] %v309_v16  ;;  %312 = vst [vmem:[%s1594_s5 + $0x88] sm:$0xff] %v311_v17  ;;  %v313_v18 = vld [vmem:[%s1589_s4 + $0x120] sm:$0xff]  ;;  %v315_v19 = vld [vmem:[%s1589_s4 + $0x130] sm:$0xff] }
  0x22   : > { %v317_v20 = vld [vmem:[%s1589_s4 + $0x140] sm:$0xff]  ;;  %314 = vst [vmem:[%s1594_s5 + $0x90] sm:$0xff] %v313_v18  ;;  %316 = vst [vmem:[%s1594_s5 + $0x98] sm:$0xff] %v315_v19  ;;  %v319_v21 = vld [vmem:[%s1589_s4 + $0x150] sm:$0xff] }
  0x23   : > { %318 = vst [vmem:[%s1594_s5 + $0xa0] sm:$0xff] %v317_v20  ;;  %v321_v22 = vld [vmem:[%s1589_s4 + $0x160] sm:$0xff]  ;;  %v323_v23 = vld [vmem:[%s1589_s4 + $0x170] sm:$0xff]  ;;  %320 = vst [vmem:[%s1594_s5 + $0xa8] sm:$0xff] %v319_v21 }
  0x24   : > { %322 = vst [vmem:[%s1594_s5 + $0xb0] sm:$0xff] %v321_v22  ;;  %324 = vst [vmem:[%s1594_s5 + $0xb8] sm:$0xff] %v323_v23  ;;  %v325_v24 = vld [vmem:[%s1589_s4 + $0x180] sm:$0xff]  ;;  %v327_v25 = vld [vmem:[%s1589_s4 + $0x190] sm:$0xff] }
  0x25   : > { %v329_v26 = vld [vmem:[%s1589_s4 + $0x1a0] sm:$0xff]  ;;  %326 = vst [vmem:[%s1594_s5 + $0xc0] sm:$0xff] %v325_v24  ;;  %328 = vst [vmem:[%s1594_s5 + $0xc8] sm:$0xff] %v327_v25  ;;  %v331_v27 = vld [vmem:[%s1589_s4 + $0x1b0] sm:$0xff] }
  0x26   : > { %330 = vst [vmem:[%s1594_s5 + $0xd0] sm:$0xff] %v329_v26  ;;  %v333_v28 = vld [vmem:[%s1589_s4 + $0x1c0] sm:$0xff]  ;;  %v335_v29 = vld [vmem:[%s1589_s4 + $0x1d0] sm:$0xff]  ;;  %332 = vst [vmem:[%s1594_s5 + $0xd8] sm:$0xff] %v331_v27 }
  0x27   : > { %334 = vst [vmem:[%s1594_s5 + $0xe0] sm:$0xff] %v333_v28  ;;  %336 = vst [vmem:[%s1594_s5 + $0xe8] sm:$0xff] %v335_v29  ;;  %v337_v30 = vld [vmem:[%s1589_s4 + $0x1e0] sm:$0xff]  ;;  %v339_v31 = vld [vmem:[%s1589_s4 + $0x1f0] sm:$0xff] }
  0x28   : > { %338 = vst [vmem:[%s1594_s5 + $0xf0] sm:$0xff] %v337_v30  ;;  %340 = vst [vmem:[%s1594_s5 + $0xf8] sm:$0xff] %v339_v31 }
  0x29 PF: > { %p1202_p11 = scmp.ge.s32.totalorder %s1501_s17, 1  ;;  %p353_p12 = scmp.lt.s32.totalorder %s1501_s17, 3 }
  0x2b   : > { %p354_p13 = pnand %p1202_p11, %p353_p12 }
  0x2c   : > { %s360_s6 = sand.u32 (!%p354_p13), 1, %s1485_s13   ;;  %v1401_v32 = vld [vmem:[%s1880_s0 + $0x4] ss:$8 sps:$4 sm:$0xff] (!%p354_p13)   ;;  %v1399_v2 = vld [vmem:[%s1880_s0] ss:$8 sps:$4 sm:$0xff] (!%p354_p13)   ;;  %s1205_s11 = sshll.u32 (!%p354_p13), %s1493_s15, 1  ;;  %v988_v16 = vlaneseq (!%p354_p13) }
  0x2d   : > { %357 = sbr.rel (%p354_p13) target bundleno = 369 (0x171), region = 66  ;;  %s1662_s7 = sshll.u32 (!%p354_p13), %s360_s6, 8  ;;  %v1404_v33 = vld [vmem:[%s1880_s0 + $0x44] ss:$8 sps:$4 sm:$0xff] (!%p354_p13)   ;;  %806 = vmatprep.mubr.bf16.mxu0 (!%p354_p13), %v1401_v32  ;;  %v1402_v3 = vld [vmem:[%s1880_s0 + $0x40] ss:$8 sps:$4 sm:$0xff] (!%p354_p13)  }
  0x2e   : > { %s1671_s18 = scalar_lea.vmem (!%p354_p13), [#allocation3], %s1662_s7  ;;  %846 = vmatprep.mubr.bf16.mxu1 (!%p354_p13), %v1404_v33  ;;  %v1405_v4 = vld [vmem:[%s1880_s0 + $0x14] ss:$8 sps:$4 sm:$0xff] (!%p354_p13)   ;;  %v1409_v6 = vld [vmem:[%s1880_s0 + $0x10] ss:$8 sps:$4 sm:$0xff] (!%p354_p13)   ;;  %p412_p0 = scmp.lt.s32.totalorder (!%p354_p13), %s1205_s11, 3 }
  0x2f   : > { %v1351_v34 = vld [vmem:[%s1671_s18 + $0x4] ss:$8 sps:$4 sm:$0xff] (!%p354_p13)   ;;  %v1353_v35 = vld [vmem:[%s1671_s18] ss:$8 sps:$4 sm:$0xff] (!%p354_p13)   ;;  %v1354_v36 = vld [vmem:[%s1671_s18 + $0x14] ss:$8 sps:$4 sm:$0xff] (!%p354_p13)  }
  0x30   : > { %774 = vmatprep.subr.bf16.mxu0 (!%p354_p13), %v1351_v34  ;;  %1261 = vmatprep.subr.bf16.mxu1 (!%p354_p13), %v1351_v34  ;;  %v1356_v37 = vld [vmem:[%s1671_s18 + $0x10] ss:$8 sps:$4 sm:$0xff] (!%p354_p13)   ;;  %v1357_v38 = vld [vmem:[%s1671_s18 + $0x24] ss:$8 sps:$4 sm:$0xff] (!%p354_p13)   ;;  %v1359_v39 = vld [vmem:[%s1671_s18 + $0x20] ss:$8 sps:$4 sm:$0xff] (!%p354_p13)  }
  0x31   : > { %775 = vmatpush1.bf16.msra.mxu0 (!%p354_p13), %v1353_v35  ;;  %1277 = vmatpush1.bf16.msra.mxu1 (!%p354_p13), %v1353_v35  ;;  %v1360_v40 = vld [vmem:[%s1671_s18 + $0x34] ss:$8 sps:$4 sm:$0xff] (!%p354_p13)   ;;  %v1362_v41 = vld [vmem:[%s1671_s18 + $0x30] ss:$8 sps:$4 sm:$0xff] (!%p354_p13)   ;;  %v1363_v42 = vld [vmem:[%s1671_s18 + $0x44] ss:$8 sps:$4 sm:$0xff] (!%p354_p13)  }
  0x32   : > { %776 = vmatprep.subr.bf16.mxu0 (!%p354_p13), %v1354_v36  ;;  %1262 = vmatprep.subr.bf16.mxu1 (!%p354_p13), %v1354_v36  ;;  %v1365_v43 = vld [vmem:[%s1671_s18 + $0x40] ss:$8 sps:$4 sm:$0xff] (!%p354_p13)   ;;  %v1366_v44 = vld [vmem:[%s1671_s18 + $0x54] ss:$8 sps:$4 sm:$0xff] (!%p354_p13)   ;;  %v1368_v45 = vld [vmem:[%s1671_s18 + $0x50] ss:$8 sps:$4 sm:$0xff] (!%p354_p13)  }
  0x33   : > { %v1369_v46 = vld [vmem:[%s1671_s18 + $0x64] ss:$8 sps:$4 sm:$0xff] (!%p354_p13)   ;;  %v1371_v47 = vld [vmem:[%s1671_s18 + $0x60] ss:$8 sps:$4 sm:$0xff] (!%p354_p13)   ;;  %v1372_v48 = vld [vmem:[%s1671_s18 + $0x74] ss:$8 sps:$4 sm:$0xff] (!%p354_p13)  }
  0x34   : > { %v1374_v49 = vld [vmem:[%s1671_s18 + $0x70] ss:$8 sps:$4 sm:$0xff]   ;;  %v1375_v50 = vld [vmem:[%s1671_s18 + $0x84] ss:$8 sps:$4 sm:$0xff]   ;;  %v1377_v51 = vld [vmem:[%s1671_s18 + $0x80] ss:$8 sps:$4 sm:$0xff]  }
  0x35   : > { %777 = vmatpush1.bf16.msra.mxu0 %v1356_v37  ;;  %1278 = vmatpush1.bf16.msra.mxu1 %v1356_v37  ;;  %v1378_v52 = vld [vmem:[%s1671_s18 + $0x94] ss:$8 sps:$4 sm:$0xff]   ;;  %v1380_v53 = vld [vmem:[%s1671_s18 + $0x90] ss:$8 sps:$4 sm:$0xff]   ;;  %v1381_v54 = vld [vmem:[%s1671_s18 + $0xa4] ss:$8 sps:$4 sm:$0xff]  }
  0x36   : > { %778 = vmatprep.subr.bf16.mxu0 %v1357_v38  ;;  %1263 = vmatprep.subr.bf16.mxu1 %v1357_v38  ;;  %v1383_v55 = vld [vmem:[%s1671_s18 + $0xa0] ss:$8 sps:$4 sm:$0xff]   ;;  %v1384_v56 = vld [vmem:[%s1671_s18 + $0xb4] ss:$8 sps:$4 sm:$0xff]   ;;  %v1386_v57 = vld [vmem:[%s1671_s18 + $0xb0] ss:$8 sps:$4 sm:$0xff]  }
  0x37   : > { %v1387_v58 = vld [vmem:[%s1671_s18 + $0xc4] ss:$8 sps:$4 sm:$0xff]   ;;  %v1389_v59 = vld [vmem:[%s1671_s18 + $0xc0] ss:$8 sps:$4 sm:$0xff]   ;;  %v1390_v60 = vld [vmem:[%s1671_s18 + $0xd4] ss:$8 sps:$4 sm:$0xff]  }
  0x38   : > { %v1392_v61 = vld [vmem:[%s1671_s18 + $0xd0] ss:$8 sps:$4 sm:$0xff]   ;;  %v1393_v62 = vld [vmem:[%s1671_s18 + $0xe4] ss:$8 sps:$4 sm:$0xff]   ;;  %v1395_v63 = vld [vmem:[%s1671_s18 + $0xe0] ss:$8 sps:$4 sm:$0xff]  }
  0x39   : > { %779 = vmatpush1.bf16.msra.mxu0 %v1359_v39  ;;  %1279 = vmatpush1.bf16.msra.mxu1 %v1359_v39  ;;  %v1396_v0 = vld [vmem:[%s1671_s18 + $0xf4] ss:$8 sps:$4 sm:$0xff]   ;;  %v1398_v1 = vld [vmem:[%s1671_s18 + $0xf0] ss:$8 sps:$4 sm:$0xff]   ;;  %v1411_v8 = vld [vmem:[%s1880_s0 + $0x24] ss:$8 sps:$4 sm:$0xff]  }
  0x3a   : > { %780 = vmatprep.subr.bf16.mxu0 %v1360_v40  ;;  %1264 = vmatprep.subr.bf16.mxu1 %v1360_v40  ;;  %v1407_v5 = vld [vmem:[%s1880_s0 + $0x54] ss:$8 sps:$4 sm:$0xff]   ;;  %v1410_v7 = vld [vmem:[%s1880_s0 + $0x50] ss:$8 sps:$4 sm:$0xff]   ;;  %v1413_v9 = vld [vmem:[%s1880_s0 + $0x64] ss:$8 sps:$4 sm:$0xff]  }
  0x3b   : > { %v1415_v10 = vld [vmem:[%s1880_s0 + $0x20] ss:$8 sps:$4 sm:$0xff]   ;;  %v1417_v12 = vld [vmem:[%s1880_s0 + $0x34] ss:$8 sps:$4 sm:$0xff]   ;;  %v1421_v14 = vld [vmem:[%s1880_s0 + $0x30] ss:$8 sps:$4 sm:$0xff]  }
  0x3c   : > { %v1416_v11 = vld [vmem:[%s1880_s0 + $0x60] ss:$8 sps:$4 sm:$0xff]   ;;  %v1419_v13 = vld [vmem:[%s1880_s0 + $0x74] ss:$8 sps:$4 sm:$0xff]   ;;  %v1422_v15 = vld [vmem:[%s1880_s0 + $0x70] ss:$8 sps:$4 sm:$0xff]  }
  0x3d   : > { %781 = vmatpush1.bf16.msra.mxu0 %v1362_v41  ;;  %1280 = vmatpush1.bf16.msra.mxu1 %v1362_v41  ;;  %s1894_s11 = smov (!%p412_p0, %s1205_s11), 3  ;;  %v989_v17 = vshrl.u32 %v988_v16, 7  ;;  %s1760_s23 = scalar_lea.vmem [#allocation4], %s1662_s7 }
  0x3e   : > { %782 = vmatprep.subr.bf16.mxu0 %v1363_v42  ;;  %1265 = vmatprep.subr.bf16.mxu1 %v1363_v42  ;;  %s414_s21 = scalar_lea.vmem %s1882_s2, %s1894_s11  ;;  %s1260_s7 = sshll.u32 %s1493_s15, 8 }
  0x3f   : > { %v990_v18 = vsub.s32 0, %v989_v17  ;;  %v986_v19 = vld [vmem:[%s414_s21] sm:$0x3]  ;;  %v994_v20 = vsub.s32 1, %v989_v17  ;;  %s1079_s26 = sshll.u32 %s1760_s23, 4  ;;  %s1815_s28 = scalar_lea.hbm %s1883_s3, %s1260_s7  ;;  %s1821_s26 = int_to_ptr.vmem [resolvable:$true] %s1079_s26 }
  0x40   : > { %s1833_s29 = scalar_lea.sflag [#allocation5], %s360_s6  ;;  %s1423_s30 = scalar_lea.vmem %s1821_s26, 4096 }
  0x41   : > { %783 = vmatpush1.bf16.msra.mxu0 %v1365_v43  ;;  %1281 = vmatpush1.bf16.msra.mxu1 %v1365_v43  ;;  %v1751_v21 = vrot.slane %v986_v19, %v990_v18  ;;  %v1753_v22 = vrot.slane %v986_v19, %v994_v20  ;;  %p1424_p1 = scmp.ne.s32.totalorder %s1821_s26, %s1423_s30  ;;  %s1503_s4 = smov [#allocation4]  }
  0x42   : > { %784 = vmatprep.subr.bf16.mxu0 %v1366_v44  ;;  %1266 = vmatprep.subr.bf16.mxu1 %v1366_v44  ;;  %s1427_s5 = sshll.u32 %s1503_s4, 4  ;;  %s1428_s5 = int_to_ptr.vmem [resolvable:$false] %s1427_s5 }
  0x43   : > { %p1425_p2 = pnand %p1424_p1, %p1566_p5  ;;  %s1429_s8 = scalar_lea.vmem %s1428_s5, 8192 }
  0x44   : > { %p1430_p4 = scmp.lt.s32.totalorder %s1821_s26, %s1428_s5  ;;  %p1431_p6 = scmp.lt.s32.totalorder %s1429_s8, %s1423_s30 }
  0x45   : > { %785 = vmatpush1.bf16.msra.mxu0 %v1368_v45  ;;  %1282 = vmatpush1.bf16.msra.mxu1 %v1368_v45  ;;  %p1426_p3 = pneg %p1425_p2 }
  0x46   : > { %786 = vmatprep.subr.bf16.mxu0 %v1369_v46  ;;  %1267 = vmatprep.subr.bf16.mxu1 %v1369_v46  ;;  %p1432_p7 = por %p1431_p6, %p1430_p4 }
  0x48   : > { %p1433_p8 = pnand %p1432_p7, %p1426_p3 }
  0x49   : > { %787 = vmatpush1.bf16.msra.mxu0 %v1371_v47  ;;  %1283 = vmatpush1.bf16.msra.mxu1 %v1371_v47 }
  0x4a   : > { %788 = vmatprep.subr.bf16.mxu0 %v1372_v48  ;;  %1268 = vmatprep.subr.bf16.mxu1 %v1372_v48 }
  0x4d   : > { %789 = vmatpush1.bf16.msra.mxu0 %v1374_v49  ;;  %1284 = vmatpush1.bf16.msra.mxu1 %v1374_v49 }
  0x4e   : > { %790 = vmatprep.subr.bf16.mxu0 %v1375_v50  ;;  %1269 = vmatprep.subr.bf16.mxu1 %v1375_v50 }
  0x51   : > { %791 = vmatpush1.bf16.msra.mxu0 %v1377_v51  ;;  %1285 = vmatpush1.bf16.msra.mxu1 %v1377_v51 }
  0x52   : > { %792 = vmatprep.subr.bf16.mxu0 %v1378_v52  ;;  %1270 = vmatprep.subr.bf16.mxu1 %v1378_v52 }
  0x55   : > { %793 = vmatpush1.bf16.msra.mxu0 %v1380_v53  ;;  %1286 = vmatpush1.bf16.msra.mxu1 %v1380_v53 }
  0x56   : > { %794 = vmatprep.subr.bf16.mxu0 %v1381_v54  ;;  %1271 = vmatprep.subr.bf16.mxu1 %v1381_v54 }
  0x59   : > { %795 = vmatpush1.bf16.msra.mxu0 %v1383_v55  ;;  %1287 = vmatpush1.bf16.msra.mxu1 %v1383_v55 }
  0x5a   : > { %796 = vmatprep.subr.bf16.mxu0 %v1384_v56  ;;  %1272 = vmatprep.subr.bf16.mxu1 %v1384_v56 }
  0x5d   : > { %797 = vmatpush1.bf16.msra.mxu0 %v1386_v57  ;;  %1288 = vmatpush1.bf16.msra.mxu1 %v1386_v57 }
  0x5e   : > { %798 = vmatprep.subr.bf16.mxu0 %v1387_v58  ;;  %1273 = vmatprep.subr.bf16.mxu1 %v1387_v58 }
  0x61   : > { %799 = vmatpush1.bf16.msra.mxu0 %v1389_v59  ;;  %1289 = vmatpush1.bf16.msra.mxu1 %v1389_v59 }
  0x62   : > { %800 = vmatprep.subr.bf16.mxu0 %v1390_v60  ;;  %1274 = vmatprep.subr.bf16.mxu1 %v1390_v60 }
  0x65   : > { %801 = vmatpush1.bf16.msra.mxu0 %v1392_v61  ;;  %1290 = vmatpush1.bf16.msra.mxu1 %v1392_v61 }
  0x66   : > { %802 = vmatprep.subr.bf16.mxu0 %v1393_v62  ;;  %1275 = vmatprep.subr.bf16.mxu1 %v1393_v62 }
  0x69   : > { %803 = vmatpush1.bf16.msra.mxu0 %v1395_v63  ;;  %1291 = vmatpush1.bf16.msra.mxu1 %v1395_v63 }
  0x6a   : > { %804 = vmatprep.subr.bf16.mxu0 %v1396_v0  ;;  %1276 = vmatprep.subr.bf16.mxu1 %v1396_v0 }
  0x6d   : > { %805 = vmatpush1.bf16.msra.mxu0 %v1398_v1  ;;  %1292 = vmatpush1.bf16.msra.mxu1 %v1398_v1 }
  0x70   : > { %807 = vmatmul.mubr.bf16.vlgmr.msra.gmra.mrb[0].mxu0 %v1399_v2  ;;  %847 = vmatmul.mubr.bf16.vlgmr.msra.gmra.mrb[0].mxu1 %v1402_v3 }
  0x71   : > { %816 = vmatprep.mubr.bf16.mxu0 %v1405_v4  ;;  %856 = vmatprep.mubr.bf16.mxu1 %v1407_v5 }
  0x78   : > { %817 = vmatmul.mubr.bf16.gmra.mrb[4].mxu0 %v1409_v6  ;;  %857 = vmatmul.mubr.bf16.gmra.mrb[4].mxu1 %v1410_v7 }
  0x79   : > { %826 = vmatprep.mubr.bf16.mxu0 %v1411_v8  ;;  %866 = vmatprep.mubr.bf16.mxu1 %v1413_v9 }
  0x80   : > { %827 = vmatmul.mubr.bf16.gmra.mrb[8].mxu0 %v1415_v10  ;;  %867 = vmatmul.mubr.bf16.gmra.mrb[8].mxu1 %v1416_v11 }
  0x81   : > { %836 = vmatprep.mubr.bf16.mxu0 %v1417_v12  ;;  %876 = vmatprep.mubr.bf16.mxu1 %v1419_v13 }
  0x88   : > { %837 = vmatmul.mubr.bf16.gmra.mrb[12].mxu0 %v1421_v14  ;;  %877 = vmatmul.mubr.bf16.gmra.mrb[12].mxu1 %v1422_v15 }
 0x143   : > { %v808_v23 = vpop.f32.mrb[0].mxu0  ;;  %v848_v24 = vpop.f32.mrb[0].mxu1 }
 0x144   : > { %v998_v25 = vadd.f32 %v1751_v21, %v808_v23  ;;  %v1014_v26 = vadd.f32 %v1751_v21, %v848_v24  ;;  %v810_v27 = vpop.f32.mrb[1].mxu0  ;;  %v850_v28 = vpop.f32.mrb[1].mxu1 }
 0x145   : > { %v999_v29 = vadd.f32 %v1753_v22, %v810_v27  ;;  %v1015_v30 = vadd.f32 %v1753_v22, %v850_v28  ;;  %v812_v31 = vpop.f32.mrb[2].mxu0  ;;  %v852_v32 = vpop.f32.mrb[2].mxu1 }
 0x146   : > { %1030 = vst [vmem:[%s1760_s23] sm:$0xff] %v998_v25  ;;  %1046 = vst [vmem:[%s1760_s23 + $0x80] sm:$0xff] %v1014_v26  ;;  %v1000_v33 = vadd.f32 %v1751_v21, %v812_v31  ;;  %v1016_v34 = vadd.f32 %v1751_v21, %v852_v32  ;;  %v814_v35 = vpop.f32.mrb[3].mxu0  ;;  %v854_v36 = vpop.f32.mrb[3].mxu1 }
 0x147   : > { %1031 = vst [vmem:[%s1760_s23 + $0x8] sm:$0xff] %v999_v29  ;;  %1047 = vst [vmem:[%s1760_s23 + $0x88] sm:$0xff] %v1015_v30  ;;  %v1001_v37 = vadd.f32 %v1753_v22, %v814_v35  ;;  %v1017_v38 = vadd.f32 %v1753_v22, %v854_v36 }
 0x148   : > { %1032 = vst [vmem:[%s1760_s23 + $0x10] sm:$0xff] %v1000_v33  ;;  %1048 = vst [vmem:[%s1760_s23 + $0x90] sm:$0xff] %v1016_v34 }
 0x149   : > { %1033 = vst [vmem:[%s1760_s23 + $0x18] sm:$0xff] %v1001_v37  ;;  %1049 = vst [vmem:[%s1760_s23 + $0x98] sm:$0xff] %v1017_v38 }
 0x14b   : > { %v818_v39 = vpop.f32.mrb[4].mxu0  ;;  %v858_v40 = vpop.f32.mrb[4].mxu1 }
 0x14c   : > { %v1002_v41 = vadd.f32 %v1751_v21, %v818_v39  ;;  %v1018_v42 = vadd.f32 %v1751_v21, %v858_v40  ;;  %v820_v43 = vpop.f32.mrb[5].mxu0  ;;  %v860_v44 = vpop.f32.mrb[5].mxu1 }
 0x14d   : > { %v1003_v45 = vadd.f32 %v1753_v22, %v820_v43  ;;  %v1019_v46 = vadd.f32 %v1753_v22, %v860_v44  ;;  %v822_v47 = vpop.f32.mrb[6].mxu0  ;;  %v862_v48 = vpop.f32.mrb[6].mxu1 }
 0x14e   : > { %1034 = vst [vmem:[%s1760_s23 + $0x20] sm:$0xff] %v1002_v41  ;;  %1050 = vst [vmem:[%s1760_s23 + $0xa0] sm:$0xff] %v1018_v42  ;;  %v1004_v49 = vadd.f32 %v1751_v21, %v822_v47  ;;  %v1020_v50 = vadd.f32 %v1751_v21, %v862_v48  ;;  %v824_v51 = vpop.f32.mrb[7].mxu0  ;;  %v864_v52 = vpop.f32.mrb[7].mxu1 }
 0x14f   : > { %1035 = vst [vmem:[%s1760_s23 + $0x28] sm:$0xff] %v1003_v45  ;;  %1051 = vst [vmem:[%s1760_s23 + $0xa8] sm:$0xff] %v1019_v46  ;;  %v1005_v53 = vadd.f32 %v1753_v22, %v824_v51  ;;  %v1021_v54 = vadd.f32 %v1753_v22, %v864_v52 }
 0x150   : > { %1036 = vst [vmem:[%s1760_s23 + $0x30] sm:$0xff] %v1004_v49  ;;  %1052 = vst [vmem:[%s1760_s23 + $0xb0] sm:$0xff] %v1020_v50 }
 0x151   : > { %1037 = vst [vmem:[%s1760_s23 + $0x38] sm:$0xff] %v1005_v53  ;;  %1053 = vst [vmem:[%s1760_s23 + $0xb8] sm:$0xff] %v1021_v54 }
 0x153   : > { %v828_v55 = vpop.f32.mrb[8].mxu0  ;;  %v868_v56 = vpop.f32.mrb[8].mxu1 }
 0x154   : > { %v1006_v57 = vadd.f32 %v1751_v21, %v828_v55  ;;  %v1022_v58 = vadd.f32 %v1751_v21, %v868_v56  ;;  %v830_v59 = vpop.f32.mrb[9].mxu0  ;;  %v870_v60 = vpop.f32.mrb[9].mxu1 }
 0x155   : > { %v1007_v61 = vadd.f32 %v1753_v22, %v830_v59  ;;  %v1023_v62 = vadd.f32 %v1753_v22, %v870_v60  ;;  %v832_v63 = vpop.f32.mrb[10].mxu0  ;;  %v872_v0 = vpop.f32.mrb[10].mxu1 }
 0x156   : > { %1038 = vst [vmem:[%s1760_s23 + $0x40] sm:$0xff] %v1006_v57  ;;  %1054 = vst [vmem:[%s1760_s23 + $0xc0] sm:$0xff] %v1022_v58  ;;  %v1008_v1 = vadd.f32 %v1751_v21, %v832_v63  ;;  %v1024_v2 = vadd.f32 %v1751_v21, %v872_v0  ;;  %v834_v3 = vpop.f32.mrb[11].mxu0  ;;  %v874_v4 = vpop.f32.mrb[11].mxu1 }
 0x157   : > { %1039 = vst [vmem:[%s1760_s23 + $0x48] sm:$0xff] %v1007_v61  ;;  %1055 = vst [vmem:[%s1760_s23 + $0xc8] sm:$0xff] %v1023_v62  ;;  %v1009_v5 = vadd.f32 %v1753_v22, %v834_v3  ;;  %v1025_v6 = vadd.f32 %v1753_v22, %v874_v4 }
 0x158   : > { %1040 = vst [vmem:[%s1760_s23 + $0x50] sm:$0xff] %v1008_v1  ;;  %1056 = vst [vmem:[%s1760_s23 + $0xd0] sm:$0xff] %v1024_v2 }
 0x159   : > { %1041 = vst [vmem:[%s1760_s23 + $0x58] sm:$0xff] %v1009_v5  ;;  %1057 = vst [vmem:[%s1760_s23 + $0xd8] sm:$0xff] %v1025_v6 }
 0x15b   : > { %v838_v7 = vpop.f32.mrb[12].mxu0  ;;  %v878_v8 = vpop.f32.mrb[12].mxu1 }
 0x15c   : > { %v1010_v9 = vadd.f32 %v1751_v21, %v838_v7  ;;  %v1026_v10 = vadd.f32 %v1751_v21, %v878_v8  ;;  %v840_v11 = vpop.f32.mrb[13].mxu0  ;;  %v880_v12 = vpop.f32.mrb[13].mxu1 }
 0x15d   : > { %v1011_v13 = vadd.f32 %v1753_v22, %v840_v11  ;;  %v1027_v14 = vadd.f32 %v1753_v22, %v880_v12  ;;  %v842_v15 = vpop.f32.mrb[14].mxu0  ;;  %v882_v16 = vpop.f32.mrb[14].mxu1 }
 0x15e   : > { %1042 = vst [vmem:[%s1760_s23 + $0x60] sm:$0xff] %v1010_v9  ;;  %1058 = vst [vmem:[%s1760_s23 + $0xe0] sm:$0xff] %v1026_v10  ;;  %v1012_v17 = vadd.f32 %v1751_v21, %v842_v15  ;;  %v1028_v18 = vadd.f32 %v1751_v21, %v882_v16  ;;  %v844_v19 = vpop.f32.mrb[15].mxu0  ;;  %v884_v20 = vpop.f32.mrb[15].mxu1 }
 0x15f   : > { %1043 = vst [vmem:[%s1760_s23 + $0x68] sm:$0xff] %v1011_v13  ;;  %1059 = vst [vmem:[%s1760_s23 + $0xe8] sm:$0xff] %v1027_v14  ;;  %v1013_v23 = vadd.f32 %v1753_v22, %v844_v19  ;;  %v1029_v24 = vadd.f32 %v1753_v22, %v884_v20 }
 0x160   : > { %1044 = vst [vmem:[%s1760_s23 + $0x70] sm:$0xff] %v1012_v17  ;;  %1060 = vst [vmem:[%s1760_s23 + $0xf0] sm:$0xff] %v1028_v18 }
 0x161   : > { %1045 = vst [vmem:[%s1760_s23 + $0x78] sm:$0xff] %v1013_v23  ;;  %1061 = vst [vmem:[%s1760_s23 + $0xf8] sm:$0xff] %v1029_v24 }
 0x162   : > { %1436 = shalt.err (!%p1433_p8)
}
 0x163   : > { %s1437_s6 = scalar_lea.hbm %s1815_s28, 4096  ;;  %s1441_s11 = scalar_lea.hbm %s1883_s3, 8192 }
 0x164   : > { %p1438_p11 = scmp.ne.s32.totalorder %s1815_s28, %s1437_s6  ;;  %p1442_p0 = scmp.lt.u32.totalorder %s1815_s28, %s1883_s3 }
 0x165   : > { %p1443_p1 = scmp.lt.u32.totalorder %s1441_s11, %s1437_s6  ;;  %p1445_p3 = scmp.lt.u32.totalorder %s1437_s6, %s1815_s28 }
 0x166   : > { %p1439_p12 = pnand %p1438_p11, %p1566_p5 }
 0x167   : > { %p1444_p2 = por %p1443_p1, %p1442_p0 }
 0x168   : > { %p1440_p13 = pneg %p1439_p12 }
 0x169   : > { %p1446_p4 = por %p1445_p3, %p1444_p2 }
 0x16b   : > { %p1447_p6 = pnand %p1446_p4, %p1440_p13 }
 0x16d   : > { %1450 = shalt.err (!%p1447_p6)
}
 0x16e   : > { %s1504_s21 = smov 256   ;;  %s1505_s23 = smov 512  }
 0x16f   : > { %s1506_s7 = smov 16  }
 0x170   : > { %1293 = dma.vmem_to_hbm [thread:$0]  (%p1566_p5), %s1821_s26, 4096, %s1815_s28, %s1833_s29, %s1504_s21, %s1505_s23, %s1506_s7  }
 0x171 PF: > { %s1094_s15 = sand.u32 1, %s1481_s12   ;;  %p1296_p7 = pnand %p1198_p10, %p1577_p9 }
 0x172   : > { %s1095_s27 = scalar_lea.sflag [#allocation5], %s1094_s15 }
 0x173   : > { %1476 = dma.done.wait (!%p1296_p7), %s1095_s27, 4096  }
 0x174   : > { %1478 = vsyncadd (!%p1296_p7), %s1095_s27, 4294963200  ;;  %s16_s17 = sadd.s32 1, %s1501_s17   ;;  %s1886_s12 = smov %s1485_s13 }
 0x175   : > { %p13_p8 = scmp.ge.s32.totalorder %s16_s17, 4   ;;  %s1887_s13 = smov %s1489_s14 }
 0x176   : > { %s1888_s14 = smov %s1575_s24  ;;  %s1889_s15 = smov %s1497_s16 }
 0x177   : > { %s1890_s16 = smov %s1892_s20  ;;  %15 = sbr.rel (!%p13_p8) target bundleno = 4 (0x4), region = 124 }
 0x17e   :  { %1100 = vsyncpa [#allocation5], 1 }
 0x17f   :  { %1102 = vsyncpa [#allocation5 + $0x1], 1 }

// kernel: generator_forward.3
= control target key start
LH: loop header
LB: loop body
LE: loop exit
PB: predicated region body
PF: predicated region fallthrough
CT: control target
= control target key end

     0   :  { %s3182_s13 = smov 0   ;;  %s4280_s0 = inlined_call_operand.vmem [shape: f32[128,256], index: 0, kind: input, shape index: {}]   ;;  %s4281_s1 = inlined_call_operand.vmem [shape: f32[1,256], index: 1, kind: input, shape index: {}]   ;;  %s4282_s2 = inlined_call_operand.vmem [shape: f32[1,256], index: 2, kind: input, shape index: {}]   ;;  %s4283_s3 = inlined_call_operand.vmem [shape: bf16[256,768], index: 3, kind: input, shape index: {}]   ;;  %s4284_s4 = inlined_call_operand.vmem [shape: f32[1,768], index: 4, kind: input, shape index: {}]   ;;  %s4285_s5 = inlined_call_operand.vmem [shape: f32[2,1,64], index: 5, kind: input, shape index: {}]   ;;  %s4286_s6 = inlined_call_operand.vmem [shape: bf16[256,256], index: 6, kind: input, shape index: {}]   ;;  %s4287_s7 = inlined_call_operand.vmem [shape: f32[1,256], index: 7, kind: input, shape index: {}]   ;;  %s4288_s8 = inlined_call_operand.vmem [shape: f32[1,256], index: 8, kind: input, shape index: {}]   ;;  %s4289_s9 = inlined_call_operand.vmem [shape: f32[1,256], index: 9, kind: input, shape index: {}]   ;;  %s4290_s10 = inlined_call_operand.vmem [shape: bf16[128,256], index: 10, kind: output, shape index: {}]  }
   0x1 LB: > { %s3188_s14 = sadd.s32 4294967295, %s3125_s13   ;;  %p2563_p0 = scmp.ge.s32.totalorder %s3125_s13, 1  ;;  %s3125_s13 = sphi %s3182_s13, %s20_s13  }
   0x2   : > { %p322_p1 = scmp.lt.s32.totalorder %s3125_s13, 3 }
   0x4   : > { %p323_p2 = pnand %p2563_p0, %p322_p1 }
   0x5   : > { %s2564_s15 = sshll.u32 (!%p323_p2), %s3188_s14, 3  ;;  %v2831_v24 = vld [vmem:[%s4283_s3 + $0x4] ss:$24 sps:$4 sm:$0xff] (!%p323_p2)   ;;  %v2833_v25 = vld [vmem:[%s4283_s3] ss:$24 sps:$4 sm:$0xff] (!%p323_p2)   ;;  %p372_p4 = scmp.lt.s32.totalorder (!%p323_p2), %s3188_s14, 1 }
   0x6   : > { %326 = sbr.rel (%p323_p2) target bundleno = 1914 (0x77a), region = 60  ;;  %p366_p3 = scmp.lt.s32.totalorder (!%p323_p2), %s2564_s15, 15  ;;  %v2834_v26 = vld [vmem:[%s4283_s3 + $0xc] ss:$24 sps:$4 sm:$0xff] (!%p323_p2)   ;;  %v2836_v27 = vld [vmem:[%s4283_s3 + $0x8] ss:$24 sps:$4 sm:$0xff] (!%p323_p2)   ;;  %1200 = vmatprep.subr.bf16.mxu0 (!%p323_p2), %v2831_v24 }
   0x7   : > { %v2837_v28 = vld [vmem:[%s4283_s3 + $0x34] ss:$24 sps:$4 sm:$0xff] (!%p323_p2)   ;;  %1273 = vmatprep.subr.bf16.mxu1 (!%p323_p2), %v2834_v26  ;;  %1201 = vmatpush1.bf16.msra.mxu0 (!%p323_p2), %v2833_v25  ;;  %v2839_v30 = vld [vmem:[%s4283_s3 + $0x30] ss:$24 sps:$4 sm:$0xff] (!%p323_p2)   ;;  %v2843_v32 = vld [vmem:[%s4283_s3 + $0x64] ss:$24 sps:$4 sm:$0xff] (!%p323_p2)  }
   0x8   : > { %v2840_v29 = vld [vmem:[%s4283_s3 + $0x3c] ss:$24 sps:$4 sm:$0xff] (!%p323_p2)   ;;  %1274 = vmatpush1.bf16.msra.mxu1 (!%p323_p2), %v2836_v27  ;;  %v2842_v31 = vld [vmem:[%s4283_s3 + $0x38] ss:$24 sps:$4 sm:$0xff] (!%p323_p2)   ;;  %1202 = vmatprep.subr.bf16.mxu0 (!%p323_p2), %v2837_v28  ;;  %v2846_v33 = vld [vmem:[%s4283_s3 + $0x6c] ss:$24 sps:$4 sm:$0xff] (!%p323_p2)  }
   0x9   : > { %1275 = vmatprep.subr.bf16.mxu1 (!%p323_p2), %v2840_v29  ;;  %v2845_v34 = vld [vmem:[%s4283_s3 + $0x60] ss:$24 sps:$4 sm:$0xff] (!%p323_p2)   ;;  %v2849_v36 = vld [vmem:[%s4283_s3 + $0x94] ss:$24 sps:$4 sm:$0xff] (!%p323_p2)   ;;  %v2851_v38 = vld [vmem:[%s4283_s3 + $0x90] ss:$24 sps:$4 sm:$0xff] (!%p323_p2)  }
   0xa   : > { %v2848_v35 = vld [vmem:[%s4283_s3 + $0x68] ss:$24 sps:$4 sm:$0xff] (!%p323_p2)   ;;  %v2852_v37 = vld [vmem:[%s4283_s3 + $0x9c] ss:$24 sps:$4 sm:$0xff] (!%p323_p2)   ;;  %v2854_v39 = vld [vmem:[%s4283_s3 + $0x98] ss:$24 sps:$4 sm:$0xff] (!%p323_p2)  }
   0xb   : > { %1203 = vmatpush1.bf16.msra.mxu0 (!%p323_p2), %v2839_v30  ;;  %v2855_v40 = vld [vmem:[%s4283_s3 + $0xc4] ss:$24 sps:$4 sm:$0xff] (!%p323_p2)   ;;  %v2857_v42 = vld [vmem:[%s4283_s3 + $0xc0] ss:$24 sps:$4 sm:$0xff] (!%p323_p2)   ;;  %v2861_v44 = vld [vmem:[%s4283_s3 + $0xf4] ss:$24 sps:$4 sm:$0xff] (!%p323_p2)  }
   0xc   : > { %1276 = vmatpush1.bf16.msra.mxu1 (!%p323_p2), %v2842_v31  ;;  %1204 = vmatprep.subr.bf16.mxu0 (!%p323_p2), %v2843_v32  ;;  %v2858_v41 = vld [vmem:[%s4283_s3 + $0xcc] ss:$24 sps:$4 sm:$0xff] (!%p323_p2)   ;;  %v2860_v43 = vld [vmem:[%s4283_s3 + $0xc8] ss:$24 sps:$4 sm:$0xff] (!%p323_p2)   ;;  %v2864_v45 = vld [vmem:[%s4283_s3 + $0xfc] ss:$24 sps:$4 sm:$0xff] (!%p323_p2)  }
   0xd   : > { %s4292_s15 = smov (!%p366_p3, %s2564_s15), 15  ;;  %1277 = vmatprep.subr.bf16.mxu1 %v2846_v33  ;;  %v2863_v46 = vld [vmem:[%s4283_s3 + $0xf0] ss:$24 sps:$4 sm:$0xff]   ;;  %v2867_v48 = vld [vmem:[%s4283_s3 + $0x124] ss:$24 sps:$4 sm:$0xff]   ;;  %s4294_s14 = smov (!%p372_p4, %s3188_s14), 1 }
   0xe   : > { %s2717_s16 = sshll.u32 %s4292_s15, 4  ;;  %v2866_v47 = vld [vmem:[%s4283_s3 + $0xf8] ss:$24 sps:$4 sm:$0xff]   ;;  %v2870_v49 = vld [vmem:[%s4283_s3 + $0x12c] ss:$24 sps:$4 sm:$0xff]   ;;  %vm1519_vm0 = vcmask 523264  }
   0xf   : > { %s370_s19 = scalar_lea.vmem %s4280_s0, %s2717_s16  ;;  %1205 = vmatpush1.bf16.msra.mxu0 %v2845_v34  ;;  %v2869_v50 = vld [vmem:[%s4283_s3 + $0x120] ss:$24 sps:$4 sm:$0xff]   ;;  %v2873_v52 = vld [vmem:[%s4283_s3 + $0x154] ss:$24 sps:$4 sm:$0xff]   ;;  %v2875_v54 = vld [vmem:[%s4283_s3 + $0x150] ss:$24 sps:$4 sm:$0xff]   ;;  %s374_s16 = scalar_lea.vmem %s4285_s5, %s4294_s14 }
  0x10   : > { %v3199_v0 = vld [vmem:[%s370_s19] sm:$0xff]  ;;  %v3201_v1 = vld [vmem:[%s370_s19 + $0x8] sm:$0xff]  ;;  %v3209_v5 = vld [vmem:[%s370_s19 + $0x10] sm:$0xff]  ;;  %1278 = vmatpush1.bf16.msra.mxu1 %v2848_v35  ;;  %1206 = vmatprep.subr.bf16.mxu0 %v2849_v36  ;;  %s2718_s12 = sshll.u32 %s4292_s15, 3 }
  0x11   : > { %v3203_v2 = vld [vmem:[%s370_s19 + $0x20] sm:$0xff]  ;;  %v401_v3 = vadd.f32 %v3201_v1, %v3199_v0  ;;  %v3207_v4 = vld [vmem:[%s370_s19 + $0x28] sm:$0xff]  ;;  %v3211_v6 = vld [vmem:[%s370_s19 + $0x18] sm:$0xff]  ;;  %1279 = vmatprep.subr.bf16.mxu1 %v2852_v37  ;;  %s4229_s14 = scalar_lea.vmem %s4290_s10, %s2718_s12 }
  0x12   : > { %v407_v7 = vadd.f32 %v3207_v4, %v3203_v2  ;;  %v3215_v8 = vld [vmem:[%s370_s19 + $0x30] sm:$0xff]  ;;  %v3217_v9 = vld [vmem:[%s370_s19 + $0x38] sm:$0xff]  ;;  %v404_v10 = vadd.f32 %v3211_v6, %v3209_v5  ;;  %v3223_v12 = vld [vmem:[%s370_s19 + $0x40] sm:$0xff] }
  0x13   : > { %402 = vadd.xlane.f32.xlu0 %v401_v3  ;;  %v410_v11 = vadd.f32 %v3217_v9, %v3215_v8  ;;  %v3225_v13 = vld [vmem:[%s370_s19 + $0x48] sm:$0xff]  ;;  %v3227_v14 = vld [vmem:[%s370_s19 + $0x50] sm:$0xff]  ;;  %v3229_v15 = vld [vmem:[%s370_s19 + $0x58] sm:$0xff]  ;;  %1207 = vmatpush1.bf16.msra.mxu0 %v2851_v38 }
  0x14   : > { %408 = vadd.xlane.f32.xlu1 %v407_v7  ;;  %v3231_v16 = vld [vmem:[%s370_s19 + $0x60] sm:$0xff]  ;;  %v3233_v17 = vld [vmem:[%s370_s19 + $0x68] sm:$0xff]  ;;  %v413_v18 = vadd.f32 %v3225_v13, %v3223_v12  ;;  %v3237_v19 = vld [vmem:[%s370_s19 + $0x70] sm:$0xff]  ;;  %v416_v21 = vadd.f32 %v3229_v15, %v3227_v14  ;;  %1280 = vmatpush1.bf16.msra.mxu1 %v2854_v39 }
  0x15   : > { %v3239_v20 = vld [vmem:[%s370_s19 + $0x78] sm:$0xff]  ;;  %v419_v22 = vadd.f32 %v3233_v17, %v3231_v16  ;;  %1208 = vmatprep.subr.bf16.mxu0 %v2855_v40  ;;  %1281 = vmatprep.subr.bf16.mxu1 %v2858_v41  ;;  %v2872_v51 = vld [vmem:[%s4283_s3 + $0x128] ss:$24 sps:$4 sm:$0xff]   ;;  %v2882_v57 = vld [vmem:[%s4283_s3 + $0x18c] ss:$24 sps:$4 sm:$0xff]  }
  0x16   : > { %v422_v23 = vadd.f32 %v3239_v20, %v3237_v19  ;;  %v2876_v53 = vld [vmem:[%s4283_s3 + $0x15c] ss:$24 sps:$4 sm:$0xff]   ;;  %v2878_v55 = vld [vmem:[%s4283_s3 + $0x158] ss:$24 sps:$4 sm:$0xff]   ;;  %v2884_v59 = vld [vmem:[%s4283_s3 + $0x188] ss:$24 sps:$4 sm:$0xff]  }
  0x17   : > { %405 = vadd.xlane.f32.xlu0 %v404_v10  ;;  %1209 = vmatpush1.bf16.msra.mxu0 %v2857_v42  ;;  %v2879_v56 = vld [vmem:[%s4283_s3 + $0x184] ss:$24 sps:$4 sm:$0xff]   ;;  %v2881_v58 = vld [vmem:[%s4283_s3 + $0x180] ss:$24 sps:$4 sm:$0xff]   ;;  %v2885_v60 = vld [vmem:[%s4283_s3 + $0x1b4] ss:$24 sps:$4 sm:$0xff]  }
  0x18   : > { %411 = vadd.xlane.f32.xlu1 %v410_v11  ;;  %1282 = vmatpush1.bf16.msra.mxu1 %v2860_v43 }
  0x19   : > { %1210 = vmatprep.subr.bf16.mxu0 %v2861_v44  ;;  %1283 = vmatprep.subr.bf16.mxu1 %v2864_v45 }
  0x1b   : > { %414 = vadd.xlane.f32.xlu0 %v413_v18  ;;  %1211 = vmatpush1.bf16.msra.mxu0 %v2863_v46 }
  0x1c   : > { %417 = vadd.xlane.f32.xlu1 %v416_v21  ;;  %1284 = vmatpush1.bf16.msra.mxu1 %v2866_v47 }
  0x1d   : > { %1212 = vmatprep.subr.bf16.mxu0 %v2867_v48  ;;  %1285 = vmatprep.subr.bf16.mxu1 %v2870_v49 }
  0x1f   : > { %420 = vadd.xlane.f32.xlu0 %v419_v22  ;;  %1213 = vmatpush1.bf16.msra.mxu0 %v2869_v50 }
  0x20   : > { %423 = vadd.xlane.f32.xlu1 %v422_v23  ;;  %1286 = vmatpush1.bf16.msra.mxu1 %v2872_v51 }
  0x21   : > { %1214 = vmatprep.subr.bf16.mxu0 %v2873_v52  ;;  %1287 = vmatprep.subr.bf16.mxu1 %v2876_v53  ;;  %v2887_v53 = vld [vmem:[%s4283_s3 + $0x1b0] ss:$24 sps:$4 sm:$0xff]  }
  0x23   : > { %1215 = vmatpush1.bf16.msra.mxu0 %v2875_v54  ;;  %v2888_v54 = vld [vmem:[%s4283_s3 + $0x1bc] ss:$24 sps:$4 sm:$0xff]  }
  0x24   : > { %1288 = vmatpush1.bf16.msra.mxu1 %v2878_v55  ;;  %1216 = vmatprep.subr.bf16.mxu0 %v2879_v56  ;;  %v2890_v55 = vld [vmem:[%s4283_s3 + $0x1b8] ss:$24 sps:$4 sm:$0xff]   ;;  %v2891_v56 = vld [vmem:[%s4283_s3 + $0x1e4] ss:$24 sps:$4 sm:$0xff]  }
  0x25   : > { %1289 = vmatprep.subr.bf16.mxu1 %v2882_v57  ;;  %v2893_v57 = vld [vmem:[%s4283_s3 + $0x1e0] ss:$24 sps:$4 sm:$0xff]  }
  0x27   : > { %1217 = vmatpush1.bf16.msra.mxu0 %v2881_v58  ;;  %v2894_v58 = vld [vmem:[%s4283_s3 + $0x1ec] ss:$24 sps:$4 sm:$0xff]  }
  0x28   : > { %1290 = vmatpush1.bf16.msra.mxu1 %v2884_v59  ;;  %1218 = vmatprep.subr.bf16.mxu0 %v2885_v60  ;;  %v2896_v59 = vld [vmem:[%s4283_s3 + $0x1e8] ss:$24 sps:$4 sm:$0xff]   ;;  %v2897_v60 = vld [vmem:[%s4283_s3 + $0x214] ss:$24 sps:$4 sm:$0xff]  }
  0x29   : > { %1291 = vmatprep.subr.bf16.mxu1 %v2888_v54  ;;  %v399_v54 = vld [vmem:[%s4281_s1] sm:$0x3] }
  0x2b   : > { %1219 = vmatpush1.bf16.msra.mxu0 %v2887_v53 }
  0x2c   : > { %1292 = vmatpush1.bf16.msra.mxu1 %v2890_v55  ;;  %1220 = vmatprep.subr.bf16.mxu0 %v2891_v56 }
  0x2d   : > { %1293 = vmatprep.subr.bf16.mxu1 %v2894_v58 }
  0x2f   : > { %1221 = vmatpush1.bf16.msra.mxu0 %v2893_v57 }
  0x30   : > { %1294 = vmatpush1.bf16.msra.mxu1 %v2896_v59  ;;  %1222 = vmatprep.subr.bf16.mxu0 %v2897_v60  ;;  %v400_v59 = vld [vmem:[%s4282_s2] sm:$0x3] }
  0xa0   : > { %v403_v61 = vpop.xlane.xlu0 %402 }
  0xa1   : > { %v426_v62 = vmul.f32 0.00390625, %v403_v61  ;;  %v409_v63 = vpop.xlane.xlu1 %408  ;;  %v2899_v61 = vld [vmem:[%s4283_s3 + $0x210] ss:$24 sps:$4 sm:$0xff]  }
  0xa2   : > { %v428_v3 = vmul.f32 0.00390625, %v409_v63  ;;  %v2902_v63 = vld [vmem:[%s4283_s3 + $0x218] ss:$24 sps:$4 sm:$0xff]   ;;  %1223 = vmatpush1.bf16.msra.mxu0 %v2899_v61 }
  0xa3   : > { %v3359_v7 = vsub.f32 %v3199_v0, %v426_v62  ;;  %v3362_v10 = vsub.f32 %v3201_v1, %v426_v62  ;;  %v2900_v62 = vld [vmem:[%s4283_s3 + $0x21c] ss:$24 sps:$4 sm:$0xff]  }
  0xa4   : > { %v3365_v11 = vsub.f32 %v3203_v2, %v428_v3  ;;  %v3368_v18 = vsub.f32 %v3207_v4, %v428_v3  ;;  %v406_v21 = vpop.xlane.xlu0 %405  ;;  %1295 = vmatprep.subr.bf16.mxu1 %v2900_v62  ;;  %v2903_v3 = vld [vmem:[%s4283_s3 + $0x244] ss:$24 sps:$4 sm:$0xff]  }
  0xa5   : > { %v427_v22 = vmul.f32 0.00390625, %v406_v21  ;;  %v412_v23 = vpop.xlane.xlu1 %411  ;;  %v450_v24 = vmul.f32 %v3359_v7, %v3359_v7  ;;  %v451_v25 = vmul.f32 %v3362_v10, %v3362_v10  ;;  %1296 = vmatpush1.bf16.msra.mxu1 %v2902_v63  ;;  %v2905_v21 = vld [vmem:[%s4283_s3 + $0x240] ss:$24 sps:$4 sm:$0xff]   ;;  %1224 = vmatprep.subr.bf16.mxu0 %v2903_v3 }
  0xa6   : > { %v429_v0 = vmul.f32 0.00390625, %v412_v23  ;;  %v454_v1 = vmul.f32 %v3365_v11, %v3365_v11  ;;  %v455_v2 = vmul.f32 %v3368_v18, %v3368_v18  ;;  %v2908_v23 = vld [vmem:[%s4283_s3 + $0x248] ss:$24 sps:$4 sm:$0xff]   ;;  %1225 = vmatpush1.bf16.msra.mxu0 %v2905_v21 }
  0xa7   : > { %v3379_v26 = vsub.f32 %v3209_v5, %v427_v22  ;;  %v3382_v4 = vsub.f32 %v3211_v6, %v427_v22  ;;  %v466_v27 = vadd.f32 %v451_v25, %v450_v24  ;;  %v2906_v22 = vld [vmem:[%s4283_s3 + $0x24c] ss:$24 sps:$4 sm:$0xff]   ;;  %v2911_v25 = vld [vmem:[%s4283_s3 + $0x270] ss:$24 sps:$4 sm:$0xff]  }
  0xa8   : > { %v3385_v28 = vsub.f32 %v3215_v8, %v429_v0  ;;  %v3388_v29 = vsub.f32 %v3217_v9, %v429_v0  ;;  %v415_v30 = vpop.xlane.xlu0 %414  ;;  %v472_v33 = vadd.f32 %v455_v2, %v454_v1  ;;  %1297 = vmatprep.subr.bf16.mxu1 %v2906_v22  ;;  %v2909_v24 = vld [vmem:[%s4283_s3 + $0x274] ss:$24 sps:$4 sm:$0xff]   ;;  %v2914_v1 = vld [vmem:[%s4283_s3 + $0x278] ss:$24 sps:$4 sm:$0xff]   ;;  %v2915_v2 = vld [vmem:[%s4283_s3 + $0x2a4] ss:$24 sps:$4 sm:$0xff]  }
  0xa9   : > { %v430_v31 = vmul.f32 0.00390625, %v415_v30  ;;  %467 = vadd.xlane.f32.xlu0 %v466_v27  ;;  %v418_v32 = vpop.xlane.xlu1 %417  ;;  %v452_v34 = vmul.f32 %v3379_v26, %v3379_v26  ;;  %v453_v5 = vmul.f32 %v3382_v4, %v3382_v4  ;;  %1298 = vmatpush1.bf16.msra.mxu1 %v2908_v23  ;;  %v2912_v0 = vld [vmem:[%s4283_s3 + $0x27c] ss:$24 sps:$4 sm:$0xff]   ;;  %v2917_v27 = vld [vmem:[%s4283_s3 + $0x2a0] ss:$24 sps:$4 sm:$0xff]  }
  0xaa   : > { %v431_v6 = vmul.f32 0.00390625, %v418_v32  ;;  %v456_v35 = vmul.f32 %v3385_v28, %v3385_v28  ;;  %v457_v8 = vmul.f32 %v3388_v29, %v3388_v29  ;;  %1226 = vmatprep.subr.bf16.mxu0 %v2909_v24  ;;  %1299 = vmatprep.subr.bf16.mxu1 %v2912_v0  ;;  %v2918_v30 = vld [vmem:[%s4283_s3 + $0x2ac] ss:$24 sps:$4 sm:$0xff]  }
  0xab   : > { %v3399_v9 = vsub.f32 %v3223_v12, %v430_v31  ;;  %v3402_v36 = vsub.f32 %v3225_v13, %v430_v31  ;;  %v469_v37 = vadd.f32 %v453_v5, %v452_v34  ;;  %1227 = vmatpush1.bf16.msra.mxu0 %v2911_v25  ;;  %v2920_v31 = vld [vmem:[%s4283_s3 + $0x2a8] ss:$24 sps:$4 sm:$0xff]   ;;  %v2921_v32 = vld [vmem:[%s4283_s3 + $0x2d4] ss:$24 sps:$4 sm:$0xff]   ;;  %v2926_v5 = vld [vmem:[%s4283_s3 + $0x2d8] ss:$24 sps:$4 sm:$0xff]  }
  0xac   : > { %v3405_v38 = vsub.f32 %v3227_v14, %v431_v6  ;;  %v3408_v39 = vsub.f32 %v3229_v15, %v431_v6  ;;  %v421_v40 = vpop.xlane.xlu0 %420  ;;  %v475_v43 = vadd.f32 %v457_v8, %v456_v35  ;;  %1228 = vmatprep.subr.bf16.mxu0 %v2915_v2  ;;  %v2924_v34 = vld [vmem:[%s4283_s3 + $0x2dc] ss:$24 sps:$4 sm:$0xff]  }
  0xad   : > { %v432_v41 = vmul.f32 0.00390625, %v421_v40  ;;  %473 = vadd.xlane.f32.xlu0 %v472_v33  ;;  %470 = vadd.xlane.f32.xlu1 %v469_v37  ;;  %v424_v42 = vpop.xlane.xlu1 %423  ;;  %v458_v12 = vmul.f32 %v3399_v9, %v3399_v9  ;;  %v459_v13 = vmul.f32 %v3402_v36, %v3402_v36  ;;  %v2923_v33 = vld [vmem:[%s4283_s3 + $0x2d0] ss:$24 sps:$4 sm:$0xff]   ;;  %v2929_v6 = vld [vmem:[%s4283_s3 + $0x14] ss:$24 sps:$4 sm:$0xff]   ;;  %v531_v40 = vlaneseq }
  0xae   : > { %v433_v44 = vmul.f32 0.00390625, %v424_v42  ;;  %v460_v14 = vmul.f32 %v3405_v38, %v3405_v38  ;;  %v461_v15 = vmul.f32 %v3408_v39, %v3408_v39  ;;  %1300 = vmatpush1.bf16.msra.mxu1 %v2914_v1 }
  0xaf   : > { %v3419_v45 = vsub.f32 %v3231_v16, %v432_v41  ;;  %v3422_v46 = vsub.f32 %v3233_v17, %v432_v41  ;;  %v478_v47 = vadd.f32 %v459_v13, %v458_v12  ;;  %1229 = vmatpush1.bf16.msra.mxu0 %v2917_v27  ;;  %1301 = vmatprep.subr.bf16.mxu1 %v2918_v30 }
  0xb0   : > { %v3425_v48 = vsub.f32 %v3237_v19, %v433_v44  ;;  %v3428_v49 = vsub.f32 %v3239_v20, %v433_v44  ;;  %v481_v50 = vadd.f32 %v461_v15, %v460_v14  ;;  %1230 = vmatprep.subr.bf16.mxu0 %v2921_v32  ;;  %v3522_v14 = vshrl.u32 %v531_v40, 7 }
  0xb1   : > { %476 = vadd.xlane.f32.xlu1 %v475_v43  ;;  %479 = vadd.xlane.f32.xlu0 %v478_v47  ;;  %v462_v51 = vmul.f32 %v3419_v45, %v3419_v45  ;;  %v463_v16 = vmul.f32 %v3422_v46, %v3422_v46 }
  0xb2   : > { %v464_v17 = vmul.f32 %v3425_v48, %v3425_v48  ;;  %v465_v52 = vmul.f32 %v3428_v49, %v3428_v49  ;;  %1302 = vmatpush1.bf16.msra.mxu1 %v2920_v31 }
  0xb3   : > { %v484_v19 = vadd.f32 %v463_v16, %v462_v51  ;;  %1303 = vmatprep.subr.bf16.mxu1 %v2924_v34  ;;  %1231 = vmatpush1.bf16.msra.mxu0 %v2923_v33 }
  0xb4   : > { %v487_v20 = vadd.f32 %v465_v52, %v464_v17  ;;  %1346 = vmatprep.subr.bf16.mxu0 %v2929_v6  ;;  %v3525_v52 = vsub.s32 1, %v3522_v14 }
  0xb5   : > { %482 = vadd.xlane.f32.xlu1 %v481_v50  ;;  %485 = vadd.xlane.f32.xlu0 %v484_v19  ;;  %v3528_v19 = vsub.s32 0, %v3522_v14 }
  0xb6   : > { %1304 = vmatpush1.bf16.msra.mxu1 %v2926_v5  ;;  %v3537_v60 = vrot.slane %v399_v54, %v3525_v52  ;;  %v3545_v23 = vrot.slane %v400_v59, %v3525_v52 }
  0xb7   : > { %v3540_v61 = vrot.slane %v399_v54, %v3528_v19  ;;  %v3550_v2 = vrot.slane %v400_v59, %v3528_v19  ;;  %v2933_v59 = vld [vmem:[%s4283_s3 + $0x70] ss:$24 sps:$4 sm:$0xff]  }
  0xb9   : > { %488 = vadd.xlane.f32.xlu1 %v487_v20 }
 0x136   : > { %v468_v35 = vpop.xlane.xlu0 %467 }
 0x137   : > { %v490_v8 = vmul.f32 0.00390625, %v468_v35 }
 0x139   : > { %v498_v37 = vadd.f32 1e-12, %v490_v8 }
 0x13a   : > { %v471_v41 = vpop.xlane.xlu1 %470  ;;  %v474_v42 = vpop.xlane.xlu0 %473 }
 0x13b   : > { %3023 = vrsqrt.f32 %v498_v37  ;;  %v491_v43 = vmul.f32 0.00390625, %v471_v41  ;;  %v492_v12 = vmul.f32 0.00390625, %v474_v42  ;;  %v2927_v41 = vld [vmem:[%s4283_s3 + $0x10] ss:$24 sps:$4 sm:$0xff]  }
 0x13d   : > { %v499_v13 = vadd.f32 1e-12, %v491_v43  ;;  %v500_v44 = vadd.f32 1e-12, %v492_v12 }
 0x13e   : > { %v477_v15 = vpop.xlane.xlu1 %476  ;;  %v480_v47 = vpop.xlane.xlu0 %479 }
 0x13f   : > { %3025 = vrsqrt.f32 %v499_v13  ;;  %v493_v50 = vmul.f32 0.00390625, %v477_v15  ;;  %v494_v51 = vmul.f32 0.00390625, %v480_v47 }
 0x140   : > { %3027 = vrsqrt.f32 %v500_v44 }
 0x141   : > { %v501_v16 = vadd.f32 1e-12, %v493_v50  ;;  %v502_v17 = vadd.f32 1e-12, %v494_v51  ;;  %v2930_v51 = vld [vmem:[%s4283_s3 + $0x40] ss:$24 sps:$4 sm:$0xff]  }
 0x142   : > { %v483_v20 = vpop.xlane.xlu1 %482  ;;  %v486_v53 = vpop.xlane.xlu0 %485 }
 0x143   : > { %3029 = vrsqrt.f32 %v501_v16  ;;  %v495_v55 = vmul.f32 0.00390625, %v483_v20  ;;  %v496_v56 = vmul.f32 0.00390625, %v486_v53  ;;  %v2935_v20 = vld [vmem:[%s4283_s3 + $0x74] ss:$24 sps:$4 sm:$0xff]  }
 0x144   : > { %3031 = vrsqrt.f32 %v502_v17 }
 0x145   : > { %v3024_v57 = vpop.eup %3023  ;;  %v503_v58 = vadd.f32 1e-12, %v495_v55  ;;  %v504_v62 = vadd.f32 1e-12, %v496_v56 }
 0x146   : > { %v489_v63 = vpop.xlane.xlu1 %488  ;;  %v515_v3 = vmul.f32 %v3024_v57, %v3362_v10  ;;  %v514_v21 = vmul.f32 %v3024_v57, %v3359_v7 }
 0x147   : > { %3033 = vrsqrt.f32 %v503_v58  ;;  %v497_v22 = vmul.f32 0.00390625, %v489_v63 }
 0x148   : > { %v542_v0 = vmul.f32 %v3537_v60, %v515_v3  ;;  %v541_v1 = vmul.f32 %v3540_v61, %v514_v21  ;;  %3035 = vrsqrt.f32 %v504_v62 }
 0x149   : > { %v3026_v24 = vpop.eup %3025  ;;  %v505_v25 = vadd.f32 1e-12, %v497_v22  ;;  %v2936_v22 = vld [vmem:[%s4283_s3 + $0xa0] ss:$24 sps:$4 sm:$0xff]  }
 0x14a   : > { %v3028_v27 = vpop.eup %3027  ;;  %v517_v10 = vmul.f32 %v3026_v24, %v3382_v4  ;;  %v516_v7 = vmul.f32 %v3026_v24, %v3379_v26  ;;  %v3558_v34 = vadd.f32 %v3545_v23, %v542_v0  ;;  %v3561_v5 = vadd.f32 %v3550_v2, %v541_v1 }
 0x14b   : > { %3037 = vrsqrt.f32 %v505_v25  ;;  %v519_v30 = vmul.f32 %v3028_v27, %v3368_v18  ;;  %v518_v37 = vmul.f32 %v3028_v27, %v3365_v11  ;;  %v2932_v11 = vld [vmem:[%s4283_s3 + $0x44] ss:$24 sps:$4 sm:$0xff]   ;;  %v2941_v25 = vld [vmem:[%s4283_s3 + $0xd4] ss:$24 sps:$4 sm:$0xff]  }
 0x14c   : > { %v544_v31 = vmul.f32 %v3537_v60, %v517_v10  ;;  %v543_v32 = vmul.f32 %v3540_v61, %v516_v7  ;;  %v2939_v7 = vld [vmem:[%s4283_s3 + $0xd0] ss:$24 sps:$4 sm:$0xff]  }
 0x14d   : > { %v3030_v33 = vpop.eup %3029  ;;  %v546_v6 = vmul.f32 %v3537_v60, %v519_v30 }
 0x14e   : > { %v3032_v35 = vpop.eup %3031  ;;  %v3565_v4 = vadd.f32 %v3545_v23, %v544_v31  ;;  %v3568_v26 = vadd.f32 %v3550_v2, %v543_v32  ;;  %v521_v18 = vmul.f32 %v3030_v33, %v3388_v29  ;;  %v520_v8 = vmul.f32 %v3030_v33, %v3385_v28  ;;  %v2944_v31 = vld [vmem:[%s4283_s3 + $0x104] ss:$24 sps:$4 sm:$0xff]  }
 0x14f   : > { %v523_v29 = vmul.f32 %v3032_v35, %v3402_v36  ;;  %v3593_v13 = vadd.f32 %v3545_v23, %v546_v6  ;;  %v545_v36 = vmul.f32 %v3540_v61, %v518_v37  ;;  %v522_v58 = vmul.f32 %v3032_v35, %v3399_v9  ;;  %v2947_v6 = vld [vmem:[%s4283_s3 + $0x134] ss:$24 sps:$4 sm:$0xff]   ;;  %v2950_v37 = vld [vmem:[%s4283_s3 + $0x164] ss:$24 sps:$4 sm:$0xff]  }
 0x150   : > { %v3575_v40 = vpack.c.bf16 %v3565_v4, %v3558_v34  ;;  %v3582_v42 = vpack.c.bf16 %v3568_v26, %v3561_v5  ;;  %v548_v43 = vmul.f32 %v3537_v60, %v521_v18  ;;  %v547_v28 = vmul.f32 %v3540_v61, %v520_v8 }
 0x151   : > { %v3034_v12 = vpop.eup %3033  ;;  %v550_v16 = vmul.f32 %v3537_v60, %v523_v29  ;;  %v3625_v57 = vadd.f32 %v3550_v2, %v545_v36  ;;  %v2956_v29 = vld [vmem:[%s4283_s3 + $0x1c4] ss:$24 sps:$4 sm:$0xff]   ;;  %v2965_v36 = vld [vmem:[%s4283_s3 + $0x254] ss:$24 sps:$4 sm:$0xff]  }
 0x152   : > { %1232 = vmatprep.mubr.bf16.mxu0 %v3575_v40  ;;  %1305 = vmatprep.mubr.bf16.mxu1 %v3575_v40  ;;  %v3596_v44 = vadd.f32 %v3545_v23, %v548_v43  ;;  %v525_v15 = vmul.f32 %v3034_v12, %v3408_v39  ;;  %v3036_v47 = vpop.eup %3035  ;;  %v3615_v53 = vadd.f32 %v3550_v2, %v547_v28  ;;  %v2951_v43 = vld [vmem:[%s4283_s3 + $0x190] ss:$24 sps:$4 sm:$0xff]   ;;  %v2962_v28 = vld [vmem:[%s4283_s3 + $0x224] ss:$24 sps:$4 sm:$0xff]  }
 0x153   : > { %1233 = vmatmul.mubr.bf16.vlgmr.msra.gmra.mrb[0].mxu0 %v3582_v42  ;;  %1306 = vmatmul.mubr.bf16.vlgmr.msra.gmra.mrb[0].mxu1 %v3582_v42  ;;  %v524_v54 = vmul.f32 %v3034_v12, %v3405_v38  ;;  %v3632_v38 = vadd.f32 %v3545_v23, %v550_v16  ;;  %v527_v62 = vmul.f32 %v3036_v47, %v3422_v46  ;;  %v2959_v12 = vld [vmem:[%s4283_s3 + $0x1f4] ss:$24 sps:$4 sm:$0xff]   ;;  %v2966_v16 = vld [vmem:[%s4283_s3 + $0x280] ss:$24 sps:$4 sm:$0xff]  }
 0x154   : > { %1347 = vmatpush1.bf16.msra.mxu0 %v2927_v41  ;;  %v3604_v50 = vpack.c.bf16 %v3596_v44, %v3593_v13  ;;  %v552_v39 = vmul.f32 %v3537_v60, %v525_v15  ;;  %v3637_v63 = vpack.c.bf16 %v3615_v53, %v3625_v57  ;;  %v549_v46 = vmul.f32 %v3540_v61, %v522_v58  ;;  %v2953_v41 = vld [vmem:[%s4283_s3 + $0x194] ss:$24 sps:$4 sm:$0xff]   ;;  %v2960_v15 = vld [vmem:[%s4283_s3 + $0x220] ss:$24 sps:$4 sm:$0xff]  }
 0x155   : > { %v3038_v17 = vpop.eup %3037  ;;  %1348 = vmatprep.subr.bf16.mxu0 %v2932_v11  ;;  %v551_v9 = vmul.f32 %v3540_v61, %v524_v54  ;;  %v554_v24 = vmul.f32 %v3537_v60, %v527_v62  ;;  %v2957_v11 = vld [vmem:[%s4283_s3 + $0x1f0] ss:$24 sps:$4 sm:$0xff]   ;;  %v2972_v54 = vld [vmem:[%s4283_s3 + $0x2e0] ss:$24 sps:$4 sm:$0xff]  }
 0x156   : > { %1242 = vmatprep.mubr.bf16.mxu0 %v3604_v50  ;;  %1315 = vmatprep.mubr.bf16.mxu1 %v3604_v50  ;;  %v3621_v55 = vadd.f32 %v3545_v23, %v552_v39  ;;  %v529_v56 = vmul.f32 %v3038_v17, %v3428_v49  ;;  %v2938_v49 = vld [vmem:[%s4283_s3 + $0xa4] ss:$24 sps:$4 sm:$0xff]   ;;  %v528_v1 = vmul.f32 %v3038_v17, %v3425_v48  ;;  %v2971_v39 = vld [vmem:[%s4283_s3 + $0x2b4] ss:$24 sps:$4 sm:$0xff]   ;;  %v2969_v17 = vld [vmem:[%s4283_s3 + $0x2b0] ss:$24 sps:$4 sm:$0xff]  }
 0x157   : > { %v3661_v0 = vadd.f32 %v3550_v2, %v551_v9  ;;  %v3668_v10 = vadd.f32 %v3550_v2, %v549_v46  ;;  %v3675_v30 = vadd.f32 %v3545_v23, %v554_v24  ;;  %v3766_v58 = vld [vmem:[%s4284_s4] sm:$0x3f] }
 0x158   : > { %1349 = vmatpush1.bf16.msra.mxu0 %v2930_v51  ;;  %v3645_v3 = vpack.c.bf16 %v3621_v55, %v3632_v38  ;;  %v556_v21 = vmul.f32 %v3537_v60, %v529_v56  ;;  %v526_v60 = vmul.f32 %v3036_v47, %v3419_v45  ;;  %v555_v32 = vmul.f32 %v3540_v61, %v528_v1  ;;  %v2963_v47 = vld [vmem:[%s4283_s3 + $0x250] ss:$24 sps:$4 sm:$0xff]   ;;  %v2968_v51 = vld [vmem:[%s4283_s3 + $0x284] ss:$24 sps:$4 sm:$0xff]  }
 0x159   : > { %1350 = vmatprep.subr.bf16.mxu0 %v2935_v20  ;;  %v588_v48 = vpack.c.bf16 %v3661_v0, %v3668_v10  ;;  %v2974_v20 = vld [vmem:[%s4283_s3 + $0x2e4] ss:$24 sps:$4 sm:$0xff]   ;;  %v700_v56 = vsub.s32 2, %v3522_v14 }
 0x15a   : > { %v3665_v27 = vadd.f32 %v3545_v23, %v556_v21  ;;  %v553_v33 = vmul.f32 %v3540_v61, %v526_v60  ;;  %v2942_v23 = vld [vmem:[%s4283_s3 + $0x100] ss:$24 sps:$4 sm:$0xff]   ;;  %v3693_v35 = vadd.f32 %v3550_v2, %v555_v32  ;;  %v2945_v61 = vld [vmem:[%s4283_s3 + $0x130] ss:$24 sps:$4 sm:$0xff]  }
 0x15b   : > { %1243 = vmatmul.mubr.bf16.gmra.mrb[4].mxu0 %v3637_v63  ;;  %1316 = vmatmul.mubr.bf16.gmra.mrb[4].mxu1 %v3637_v63 }
 0x15c   : > { %1351 = vmatpush1.bf16.msra.mxu0 %v2933_v59  ;;  %1252 = vmatprep.mubr.bf16.mxu0 %v3645_v3  ;;  %v591_v45 = vpack.c.bf16 %v3665_v27, %v3675_v30  ;;  %v3696_v18 = vadd.f32 %v3550_v2, %v553_v33  ;;  %v2948_v2 = vld [vmem:[%s4283_s3 + $0x160] ss:$24 sps:$4 sm:$0xff]   ;;  %v704_v59 = vsub.s32 3, %v3522_v14 }
 0x15d   : > { %1325 = vmatprep.mubr.bf16.mxu1 %v3645_v3  ;;  %1352 = vmatprep.subr.bf16.mxu0 %v2938_v49  ;;  %v3778_v49 = vrot.slane %v3766_v58, %v3525_v52 }
 0x15e   : > { %v590_v8 = vpack.c.bf16 %v3693_v35, %v3696_v18  ;;  %v3781_v9 = vrot.slane %v3766_v58, %v704_v59 }
 0x160   : > { %1353 = vmatpush1.bf16.msra.mxu0 %v2936_v22 }
 0x161   : > { %1354 = vmatprep.subr.bf16.mxu0 %v2941_v25 }
 0x163   : > { %1253 = vmatmul.mubr.bf16.gmra.mrb[8].mxu0 %v588_v48  ;;  %1326 = vmatmul.mubr.bf16.gmra.mrb[8].mxu1 %v588_v48 }
 0x164   : > { %1355 = vmatpush1.bf16.msra.mxu0 %v2939_v7  ;;  %1262 = vmatprep.mubr.bf16.mxu0 %v591_v45 }
 0x165   : > { %1335 = vmatprep.mubr.bf16.mxu1 %v591_v45  ;;  %1356 = vmatprep.subr.bf16.mxu0 %v2944_v31 }
 0x168   : > { %1357 = vmatpush1.bf16.msra.mxu0 %v2942_v23 }
 0x169   : > { %1358 = vmatprep.subr.bf16.mxu0 %v2947_v6 }
 0x16b   : > { %1263 = vmatmul.mubr.bf16.gmra.mrb[12].mxu0 %v590_v8  ;;  %1336 = vmatmul.mubr.bf16.gmra.mrb[12].mxu1 %v590_v8 }
 0x16c   : > { %1359 = vmatpush1.bf16.msra.mxu0 %v2945_v61  ;;  %1378 = vmatprep.mubr.bf16.mxu0 %v3575_v40  ;;  %v2954_v40 = vld [vmem:[%s4283_s3 + $0x1c0] ss:$24 sps:$4 sm:$0xff]  }
 0x16d   : > { %1360 = vmatprep.subr.bf16.mxu0 %v2950_v37 }
 0x170   : > { %1361 = vmatpush1.bf16.msra.mxu0 %v2948_v2 }
 0x171   : > { %1362 = vmatprep.subr.bf16.mxu0 %v2953_v41 }
 0x174   : > { %1363 = vmatpush1.bf16.msra.mxu0 %v2951_v43 }
 0x175   : > { %1364 = vmatprep.subr.bf16.mxu0 %v2956_v29 }
 0x178   : > { %1365 = vmatpush1.bf16.msra.mxu0 %v2954_v40 }
 0x179   : > { %1366 = vmatprep.subr.bf16.mxu0 %v2959_v12 }
 0x17c   : > { %1367 = vmatpush1.bf16.msra.mxu0 %v2957_v11 }
 0x17d   : > { %1368 = vmatprep.subr.bf16.mxu0 %v2962_v28 }
 0x180   : > { %1369 = vmatpush1.bf16.msra.mxu0 %v2960_v15 }
 0x181   : > { %1370 = vmatprep.subr.bf16.mxu0 %v2965_v36 }
 0x184   : > { %1371 = vmatpush1.bf16.msra.mxu0 %v2963_v47 }
 0x185   : > { %1372 = vmatprep.subr.bf16.mxu0 %v2968_v51 }
 0x188   : > { %1373 = vmatpush1.bf16.msra.mxu0 %v2966_v16 }
 0x189   : > { %1374 = vmatprep.subr.bf16.mxu0 %v2971_v39 }
 0x18c   : > { %1375 = vmatpush1.bf16.msra.mxu0 %v2969_v17 }
 0x18d   : > { %1376 = vmatprep.subr.bf16.mxu0 %v2974_v20 }
 0x190   : > { %1377 = vmatpush1.bf16.msra.mxu0 %v2972_v54 }
 0x193   : > { %1379 = vmatmul.mubr.bf16.vlgmr.msra.gmra.mrb[16].mxu0 %v3582_v42  ;;  %v3771_v42 = vrot.slane %v3766_v58, %v3528_v19 }
 0x194   : > { %1388 = vmatprep.mubr.bf16.mxu0 %v3604_v50  ;;  %v3774_v50 = vrot.slane %v3766_v58, %v700_v56 }
 0x19b   : > { %1389 = vmatmul.mubr.bf16.gmra.mrb[20].mxu0 %v3637_v63 }
 0x19c   : > { %1398 = vmatprep.mubr.bf16.mxu0 %v3645_v3 }
 0x1a3   : > { %1399 = vmatmul.mubr.bf16.gmra.mrb[24].mxu0 %v588_v48 }
 0x1a4   : > { %1408 = vmatprep.mubr.bf16.mxu0 %v591_v45 }
 0x1ab   : > { %1409 = vmatmul.mubr.bf16.gmra.mrb[28].mxu0 %v590_v8 }
 0x226   : > { %v1234_v62 = vpop.f32.mrb[0].mxu0  ;;  %v1307_v63 = vpop.f32.mrb[0].mxu1 }
 0x227   : > { %v1236_v3 = vpop.f32.mrb[1].mxu0  ;;  %v1309_v21 = vpop.f32.mrb[1].mxu1  ;;  %v1235_v24 = vadd.f32 %v1234_v62, %v3771_v42  ;;  %v1308_v25 = vadd.f32 %v1307_v63, %v3774_v50 }
 0x228   : > { %v1238_v46 = vpop.f32.mrb[2].mxu0  ;;  %v1311_v22 = vpop.f32.mrb[2].mxu1  ;;  %v1237_v31 = vadd.f32 %v1236_v3, %v3778_v49  ;;  %v1310_v32 = vadd.f32 %v1309_v21, %v3781_v9 }
 0x229   : > { %v1239_v1 = vadd.f32 %v1238_v46, %v3771_v42  ;;  %v1312_v60 = vadd.f32 %v1311_v22, %v3774_v50  ;;  %v1240_v7 = vpop.f32.mrb[3].mxu0  ;;  %v1313_v48 = vpop.f32.mrb[3].mxu1 }
 0x22a   : > { %v1241_v45 = vadd.f32 %v1240_v7, %v3778_v49  ;;  %v1314_v33 = vadd.f32 %v1313_v48, %v3781_v9 }
 0x22b   : > { %v1420_v23 = vpack.c.bf16 %v1239_v1, %v1235_v24  ;;  %v1424_v6 = vpack.c.bf16 %v1312_v60, %v1308_v25 }
 0x22c   : > { %v1689_v61 = vpack.c.bf16 %v1241_v45, %v1237_v31  ;;  %v1693_v8 = vpack.c.bf16 %v1314_v33, %v1310_v32 }
 0x22d   : > { %2759 = vmatprep.subr.bf16.mxu1 %v1424_v6  ;;  %2767 = vmatprep.mubr.bf16.mxu1 %v1420_v23 }
 0x22e   : > { %v1244_v37 = vpop.f32.mrb[4].mxu0  ;;  %v1317_v2 = vpop.f32.mrb[4].mxu1  ;;  %2760 = vmatpush3.bf16.xpose.msra.mxu1 %v1424_v6  ;;  %2791 = vmatprep.subr.bf16.mxu0 %v1693_v8 }
 0x22f   : > { %2799 = vmatprep.mubr.bf16.mxu0 %v1689_v61  ;;  %v1246_v41 = vpop.f32.mrb[5].mxu0  ;;  %v1319_v43 = vpop.f32.mrb[5].mxu1  ;;  %2792 = vmatpush3.bf16.xpose.msra.mxu0 %v1693_v8  ;;  %v3792_v12 = vadd.f32 %v1244_v37, %v3771_v42  ;;  %v1318_v11 = vadd.f32 %v1317_v2, %v3774_v50 }
 0x230   : > { %v1248_v29 = vpop.f32.mrb[6].mxu0  ;;  %v1321_v40 = vpop.f32.mrb[6].mxu1  ;;  %v1247_v51 = vadd.f32 %v1246_v41, %v3778_v49  ;;  %v1320_v16 = vadd.f32 %v1319_v43, %v3781_v9 }
 0x231   : > { %v3796_v28 = vadd.f32 %v1248_v29, %v3771_v42  ;;  %v1322_v15 = vadd.f32 %v1321_v40, %v3774_v50  ;;  %v1250_v36 = vpop.f32.mrb[7].mxu0  ;;  %v1323_v47 = vpop.f32.mrb[7].mxu1 }
 0x232   : > { %v1251_v39 = vadd.f32 %v1250_v36, %v3778_v49  ;;  %v1324_v17 = vadd.f32 %v1323_v47, %v3781_v9 }
 0x233   : > { %v1421_v20 = vpack.c.bf16 %v3796_v28, %v3792_v12  ;;  %v1425_v54 = vpack.c.bf16 %v1322_v15, %v1318_v11 }
 0x234   : > { %v1690_v56 = vpack.c.bf16 %v1251_v39, %v1247_v51  ;;  %v1694_v59 = vpack.c.bf16 %v1324_v17, %v1320_v16 }
 0x235   : > { %2761 = vmatprep.subr.bf16.mxu1 %v1425_v54 }
 0x236   : > { %v1254_v62 = vpop.f32.mrb[8].mxu0  ;;  %v1327_v63 = vpop.f32.mrb[8].mxu1  ;;  %2762 = vmatpush3.bf16.xpose.msra.mxu1 %v1425_v54  ;;  %2793 = vmatprep.subr.bf16.mxu0 %v1694_v59 }
 0x237   : > { %v1256_v3 = vpop.f32.mrb[9].mxu0  ;;  %v1329_v21 = vpop.f32.mrb[9].mxu1  ;;  %2794 = vmatpush3.bf16.xpose.msra.mxu0 %v1694_v59  ;;  %v1255_v24 = vadd.f32 %v1254_v62, %v3771_v42  ;;  %v1328_v25 = vadd.f32 %v1327_v63, %v3774_v50 }
 0x238   : > { %v1258_v46 = vpop.f32.mrb[10].mxu0  ;;  %v1331_v22 = vpop.f32.mrb[10].mxu1  ;;  %v1257_v31 = vadd.f32 %v1256_v3, %v3778_v49  ;;  %v1330_v32 = vadd.f32 %v1329_v21, %v3781_v9 }
 0x239   : > { %v1259_v1 = vadd.f32 %v1258_v46, %v3771_v42  ;;  %v1332_v60 = vadd.f32 %v1331_v22, %v3774_v50  ;;  %v1260_v7 = vpop.f32.mrb[11].mxu0  ;;  %v1333_v48 = vpop.f32.mrb[11].mxu1 }
 0x23a   : > { %v1261_v45 = vadd.f32 %v1260_v7, %v3778_v49  ;;  %v1334_v33 = vadd.f32 %v1333_v48, %v3781_v9 }
 0x23b   : > { %v1422_v23 = vpack.c.bf16 %v1259_v1, %v1255_v24  ;;  %v1426_v6 = vpack.c.bf16 %v1332_v60, %v1328_v25 }
 0x23c   : > { %v1691_v61 = vpack.c.bf16 %v1261_v45, %v1257_v31  ;;  %v1695_v8 = vpack.c.bf16 %v1334_v33, %v1330_v32 }
 0x23d   : > { %2763 = vmatprep.subr.bf16.mxu1 %v1426_v6 }
 0x23e   : > { %v1264_v37 = vpop.f32.mrb[12].mxu0  ;;  %v1337_v2 = vpop.f32.mrb[12].mxu1  ;;  %2764 = vmatpush3.bf16.xpose.msra.mxu1 %v1426_v6  ;;  %2795 = vmatprep.subr.bf16.mxu0 %v1695_v8 }
 0x23f   : > { %v1266_v41 = vpop.f32.mrb[13].mxu0  ;;  %v1339_v43 = vpop.f32.mrb[13].mxu1  ;;  %2796 = vmatpush3.bf16.xpose.msra.mxu0 %v1695_v8  ;;  %v1265_v12 = vadd.f32 %v1264_v37, %v3771_v42  ;;  %v1338_v11 = vadd.f32 %v1337_v2, %v3774_v50 }
 0x240   : > { %v1268_v29 = vpop.f32.mrb[14].mxu0  ;;  %v1341_v40 = vpop.f32.mrb[14].mxu1  ;;  %v1267_v51 = vadd.f32 %v1266_v41, %v3778_v49  ;;  %v1340_v16 = vadd.f32 %v1339_v43, %v3781_v9 }
 0x241   : > { %v1269_v28 = vadd.f32 %v1268_v29, %v3771_v42  ;;  %v1342_v15 = vadd.f32 %v1341_v40, %v3774_v50  ;;  %v1270_v36 = vpop.f32.mrb[15].mxu0  ;;  %v1343_v47 = vpop.f32.mrb[15].mxu1  ;;  %v708_v42 = vsub.s32 4, %v3522_v14  ;;  %v712_v50 = vsub.s32 5, %v3522_v14 }
 0x242   : > { %v1271_v39 = vadd.f32 %v1270_v36, %v3778_v49  ;;  %v1344_v17 = vadd.f32 %v1343_v47, %v3781_v9 }
 0x243   : > { %v1423_v54 = vpack.c.bf16 %v1269_v28, %v1265_v12  ;;  %v1427_v59 = vpack.c.bf16 %v1342_v15, %v1338_v11  ;;  %v709_v49 = vrot.slane %v3766_v58, %v708_v42  ;;  %v713_v3 = vrot.slane %v3766_v58, %v712_v50  ;;  %v3830_v50 = vld [vmem:[%s374_s16] ss:$0 sm:$0xff] }
 0x244   : > { %v1692_v62 = vpack.c.bf16 %v1271_v39, %v1267_v51  ;;  %v1696_v63 = vpack.c.bf16 %v1344_v17, %v1340_v16 }
 0x245   : > { %2765 = vmatprep.subr.bf16.mxu1 %v1427_v59 }
 0x246   : > { %2766 = vmatpush3.bf16.xpose.msra.mxu1 %v1427_v59  ;;  %2797 = vmatprep.subr.bf16.mxu0 %v1696_v63 }
 0x247   : > { %2798 = vmatpush3.bf16.xpose.msra.mxu0 %v1696_v63 }
 0x24d   : > { %2768 = vmatmul.mubr.bf16.vlgmr.msra.gmra.mrb[16].mxu1 %v1421_v20 }
 0x24e   : > { %2771 = vmatprep.mubr.bf16.mxu1 %v1422_v23  ;;  %2800 = vmatmul.mubr.bf16.vlgmr.msra.gmra.mrb[32].mxu0 %v1690_v56 }
 0x24f   : > { %2803 = vmatprep.mubr.bf16.mxu0 %v1691_v61 }
 0x255   : > { %2772 = vmatmul.mubr.bf16.gmra.mrb[20].mxu1 %v1423_v54 }
 0x256   : > { %2804 = vmatmul.mubr.bf16.gmra.mrb[36].mxu0 %v1692_v62 }
 0x266   : > { %v1380_v9 = vpop.f32.mrb[16].mxu0 }
 0x267   : > { %v1382_v21 = vpop.f32.mrb[17].mxu0  ;;  %v1381_v22 = vadd.f32 %v1380_v9, %v709_v49 }
 0x268   : > { %v1384_v46 = vpop.f32.mrb[18].mxu0  ;;  %v1383_v20 = vadd.f32 %v1382_v21, %v713_v3 }
 0x269   : > { %v1385_v24 = vadd.f32 %v1384_v46, %v709_v49  ;;  %v1386_v25 = vpop.f32.mrb[19].mxu0 }
 0x26a   : > { %v1387_v1 = vadd.f32 %v1386_v25, %v713_v3 }
 0x26b   : > { %v1428_v56 = vpack.c.bf16 %v1385_v24, %v1381_v22 }
 0x26c   : > { %v1697_v60 = vpack.c.bf16 %v1387_v1, %v1383_v20 }
 0x26d   : > { %2775 = vmatprep.subr.bf16.mxu1 %v1428_v56 }
 0x26e   : > { %v1390_v7 = vpop.f32.mrb[20].mxu0  ;;  %2776 = vmatpush3.bf16.msra.mxu1 %v1428_v56  ;;  %2807 = vmatprep.subr.bf16.mxu0 %v1697_v60 }
 0x26f   : > { %v1392_v48 = vpop.f32.mrb[21].mxu0  ;;  %2808 = vmatpush3.bf16.msra.mxu0 %v1697_v60  ;;  %v1391_v31 = vadd.f32 %v1390_v7, %v709_v49 }
 0x270   : > { %v1394_v14 = vpop.f32.mrb[22].mxu0  ;;  %v1393_v58 = vadd.f32 %v1392_v48, %v713_v3 }
 0x271   : > { %v1395_v32 = vadd.f32 %v1394_v14, %v709_v49  ;;  %v1396_v45 = vpop.f32.mrb[23].mxu0 }
 0x272   : > { %v1397_v33 = vadd.f32 %v1396_v45, %v713_v3 }
 0x273   : > { %v1429_v23 = vpack.c.bf16 %v1395_v32, %v1391_v31 }
 0x274   : > { %v1698_v6 = vpack.c.bf16 %v1397_v33, %v1393_v58 }
 0x275   : > { %2777 = vmatprep.subr.bf16.mxu1 %v1429_v23 }
 0x276   : > { %v1400_v61 = vpop.f32.mrb[24].mxu0  ;;  %2778 = vmatpush3.bf16.msra.mxu1 %v1429_v23  ;;  %2809 = vmatprep.subr.bf16.mxu0 %v1698_v6 }
 0x277   : > { %v1402_v8 = vpop.f32.mrb[25].mxu0  ;;  %2810 = vmatpush3.bf16.msra.mxu0 %v1698_v6  ;;  %v1401_v2 = vadd.f32 %v1400_v61, %v709_v49 }
 0x278   : > { %v1404_v37 = vpop.f32.mrb[26].mxu0  ;;  %v1403_v29 = vadd.f32 %v1402_v8, %v713_v3 }
 0x279   : > { %v1405_v41 = vadd.f32 %v1404_v37, %v709_v49  ;;  %v1406_v43 = vpop.f32.mrb[27].mxu0 }
 0x27a   : > { %v1407_v40 = vadd.f32 %v1406_v43, %v713_v3 }
 0x27b   : > { %v1430_v12 = vpack.c.bf16 %v1405_v41, %v1401_v2 }
 0x27c   : > { %v1699_v11 = vpack.c.bf16 %v1407_v40, %v1403_v29 }
 0x27d   : > { %2779 = vmatprep.subr.bf16.mxu1 %v1430_v12 }
 0x27e   : > { %v1410_v28 = vpop.f32.mrb[28].mxu0  ;;  %2780 = vmatpush3.bf16.msra.mxu1 %v1430_v12  ;;  %2811 = vmatprep.subr.bf16.mxu0 %v1699_v11 }
 0x27f   : > { %v1412_v15 = vpop.f32.mrb[29].mxu0  ;;  %2812 = vmatpush3.bf16.msra.mxu0 %v1699_v11  ;;  %v1411_v47 = vadd.f32 %v1410_v28, %v709_v49 }
 0x280   : > { %v1414_v36 = vpop.f32.mrb[30].mxu0  ;;  %v1413_v39 = vadd.f32 %v1412_v15, %v713_v3 }
 0x281   : > { %v1415_v51 = vadd.f32 %v1414_v36, %v709_v49  ;;  %v1416_v16 = vpop.f32.mrb[31].mxu0 }
 0x282   : > { %v1417_v17 = vadd.f32 %v1416_v16, %v713_v3 }
 0x283   : > { %v1431_v54 = vpack.c.bf16 %v1415_v51, %v1411_v47 }
 0x284   : > { %v1700_v59 = vpack.c.bf16 %v1417_v17, %v1413_v39 }
 0x285   : > { %2781 = vmatprep.subr.bf16.mxu1 %v1431_v54 }
 0x286   : > { %2782 = vmatpush3.bf16.msra.mxu1 %v1431_v54  ;;  %2813 = vmatprep.subr.bf16.mxu0 %v1700_v59 }
 0x287   : > { %2814 = vmatpush3.bf16.msra.mxu0 %v1700_v59 }
 0x320   : > { %v2769_v62 = vpop.f32.mrb[16].mxu1 }
 0x321   : > { %v1466_v63 = vpop.f32.mrb[17].mxu1  ;;  %v2801_v42 = vpop.f32.mrb[32].mxu0  ;;  %v1499_v23 = vmul.f32 0.088388346, %v2769_v62 }
 0x322   : > { %v1497_v49 = vmul.f32 0.088388346, %v1466_v63  ;;  %v1768_v9 = vmul.f32 0.088388346, %v2801_v42  ;;  %v2770_v3 = vpop.f32.mrb[18].mxu1  ;;  %v1735_v21 = vpop.f32.mrb[33].mxu0 }
 0x323   : > { %v1469_v46 = vpop.f32.mrb[19].mxu1  ;;  %v2802_v22 = vpop.f32.mrb[34].mxu0  ;;  %v1766_v56 = vmul.f32 0.088388346, %v1735_v21  ;;  %v1500_v43 = vmul.f32 0.088388346, %v2770_v3  ;;  %v3861_v15 = vadd.f32 %v3830_v50, %v1499_v23 }
 0x324   : > { %v1498_v24 = vmul.f32 0.088388346, %v1469_v46  ;;  %v1769_v25 = vmul.f32 0.088388346, %v2802_v22  ;;  %v1738_v20 = vpop.f32.mrb[35].mxu0  ;;  %v3833_v1 = vadd.f32 %v3830_v50, %v1497_v49  ;;  %v3841_v48 = vadd.f32 %v3830_v50, %v1768_v9 }
 0x325   : > { %v1767_v14 = vmul.f32 0.088388346, %v1738_v20  ;;  %v3851_v37 = vadd.f32 %v3830_v50, %v1766_v56  ;;  %v3866_v51 = vadd.f32 %v3830_v50, %v1500_v43  ;;  %v1526_v39 = vsel %vm1519_vm0, %v3861_v15, -inf }
 0x326   : > { %v1520_v60 = vsel %vm1519_vm0, %v3833_v1, -inf  ;;  %v3838_v7 = vadd.f32 %v3830_v50, %v1498_v24  ;;  %v3846_v45 = vadd.f32 %v3830_v50, %v1769_v25  ;;  %v1788_v8 = vsel %vm1519_vm0, %v3841_v48, -inf }
 0x327   : > { %1521 = vmax.xlane.f32.xlu0 %v1520_v60  ;;  %v3856_v12 = vadd.f32 %v3830_v50, %v1767_v14  ;;  %v1782_v28 = vsel %vm1519_vm0, %v3851_v37, -inf  ;;  %v1529_v59 = vsel %vm1519_vm0, %v3866_v51, -inf }
 0x328   : > { %v2773_v31 = vpop.f32.mrb[20].mxu1  ;;  %v1523_v32 = vsel %vm1519_vm0, %v3838_v7, -inf  ;;  %v1791_v40 = vsel %vm1519_vm0, %v3846_v45, -inf }
 0x329   : > { %1524 = vmax.xlane.f32.xlu1 %v1523_v32  ;;  %v1482_v58 = vpop.f32.mrb[21].mxu1  ;;  %v2805_v33 = vpop.f32.mrb[36].mxu0  ;;  %v1785_v47 = vsel %vm1519_vm0, %v3856_v12, -inf  ;;  %v1503_v46 = vmul.f32 0.088388346, %v2773_v31 }
 0x32a   : > { %v2774_v6 = vpop.f32.mrb[22].mxu1  ;;  %v1751_v61 = vpop.f32.mrb[37].mxu0  ;;  %v1501_v11 = vmul.f32 0.088388346, %v1482_v58  ;;  %v1772_v16 = vmul.f32 0.088388346, %v2805_v33 }
 0x32b   : > { %1789 = vmax.xlane.f32.xlu0 %v1788_v8  ;;  %v1485_v2 = vpop.f32.mrb[23].mxu1  ;;  %v2806_v41 = vpop.f32.mrb[38].mxu0  ;;  %v1770_v63 = vmul.f32 0.088388346, %v1751_v61  ;;  %v1504_v25 = vmul.f32 0.088388346, %v2774_v6  ;;  %v3901_v14 = vadd.f32 %v3830_v50, %v1503_v46 }
 0x32c   : > { %v1754_v29 = vpop.f32.mrb[39].mxu0  ;;  %v1502_v36 = vmul.f32 0.088388346, %v1485_v2  ;;  %v3871_v17 = vadd.f32 %v3830_v50, %v1501_v11  ;;  %v1773_v54 = vmul.f32 0.088388346, %v2806_v41  ;;  %v3881_v49 = vadd.f32 %v3830_v50, %v1772_v16 }
 0x32d   : > { %1792 = vmax.xlane.f32.xlu1 %v1791_v40  ;;  %v1771_v9 = vmul.f32 0.088388346, %v1754_v29  ;;  %v3891_v24 = vadd.f32 %v3830_v50, %v1770_v63  ;;  %v3906_v32 = vadd.f32 %v3830_v50, %v1504_v25  ;;  %v1538_v58 = vsel %vm1519_vm0, %v3901_v14, -inf }
 0x32e   : > { %v3876_v62 = vadd.f32 %v3830_v50, %v1502_v36  ;;  %v1532_v42 = vsel %vm1519_vm0, %v3871_v17, -inf  ;;  %v3886_v21 = vadd.f32 %v3830_v50, %v1773_v54  ;;  %v1800_v22 = vsel %vm1519_vm0, %v3881_v49, -inf }
 0x32f   : > { %1783 = vmax.xlane.f32.xlu0 %v1782_v28  ;;  %v3896_v56 = vadd.f32 %v3830_v50, %v1771_v9  ;;  %v1794_v60 = vsel %vm1519_vm0, %v3891_v24, -inf  ;;  %v1541_v33 = vsel %vm1519_vm0, %v3906_v32, -inf }
 0x330   : > { %v1535_v3 = vsel %vm1519_vm0, %v3876_v62, -inf  ;;  %v1803_v20 = vsel %vm1519_vm0, %v3886_v21, -inf }
 0x331   : > { %1786 = vmax.xlane.f32.xlu1 %v1785_v47  ;;  %v1797_v31 = vsel %vm1519_vm0, %v3896_v56, -inf }
 0x333   : > { %1527 = vmax.xlane.f32.xlu0 %v1526_v39 }
 0x335   : > { %1530 = vmax.xlane.f32.xlu1 %v1529_v59 }
 0x337   : > { %1533 = vmax.xlane.f32.xlu0 %v1532_v42 }
 0x339   : > { %1536 = vmax.xlane.f32.xlu1 %v1535_v3 }
 0x33b   : > { %1801 = vmax.xlane.f32.xlu0 %v1800_v22 }
 0x33d   : > { %1804 = vmax.xlane.f32.xlu1 %v1803_v20 }
 0x33f   : > { %1795 = vmax.xlane.f32.xlu0 %v1794_v60 }
 0x341   : > { %1798 = vmax.xlane.f32.xlu1 %v1797_v31 }
 0x343   : > { %1539 = vmax.xlane.f32.xlu0 %v1538_v58 }
 0x345   : > { %1542 = vmax.xlane.f32.xlu1 %v1541_v33 }
 0x3b4   : > { %v1522_v23 = vpop.xlane.xlu0 %1521 }
 0x3b5   : > { %v1544_v6 = vsub.f32 %v3833_v1, %v1522_v23 }
 0x3b6   : > { %v1525_v61 = vpop.xlane.xlu1 %1524 }
 0x3b7   : > { %v1552_v8 = vmul.f32 1.442695, %v1544_v6  ;;  %v1545_v2 = vsub.f32 %v3838_v7, %v1525_v61 }
 0x3b8   : > { %v1790_v41 = vpop.xlane.xlu0 %1789 }
 0x3b9   : > { %3039 = vpow2.f32 %v1552_v8  ;;  %v1554_v50 = vmul.f32 1.442695, %v1545_v2  ;;  %v1808_v43 = vsub.f32 %v3841_v48, %v1790_v41 }
 0x3ba   : > { %v1793_v29 = vpop.xlane.xlu1 %1792 }
 0x3bb   : > { %3041 = vpow2.f32 %v1554_v50  ;;  %v1818_v40 = vmul.f32 1.442695, %v1808_v43  ;;  %v1809_v11 = vsub.f32 %v3846_v45, %v1793_v29 }
 0x3bc   : > { %v1784_v28 = vpop.xlane.xlu0 %1783 }
 0x3bd   : > { %3043 = vpow2.f32 %v1818_v40  ;;  %v1820_v36 = vmul.f32 1.442695, %v1809_v11  ;;  %v1806_v47 = vsub.f32 %v3851_v37, %v1784_v28 }
 0x3be   : > { %v1787_v1 = vpop.xlane.xlu1 %1786 }
 0x3bf   : > { %3045 = vpow2.f32 %v1820_v36  ;;  %v1814_v16 = vmul.f32 1.442695, %v1806_v47  ;;  %v1807_v7 = vsub.f32 %v3856_v12, %v1787_v1 }
 0x3c0   : > { %v1528_v39 = vpop.xlane.xlu0 %1527 }
 0x3c1   : > { %3047 = vpow2.f32 %v1814_v16  ;;  %v1816_v54 = vmul.f32 1.442695, %v1807_v7  ;;  %v1546_v48 = vsub.f32 %v3861_v15, %v1528_v39 }
 0x3c2   : > { %v1531_v59 = vpop.xlane.xlu1 %1530 }
 0x3c3   : > { %v3919_v63 = vpop.eup %3039  ;;  %3049 = vpow2.f32 %v1816_v54  ;;  %v1556_v45 = vmul.f32 1.442695, %v1546_v48  ;;  %v1547_v42 = vsub.f32 %v3866_v51, %v1531_v59 }
 0x3c4   : > { %v1534_v9 = vpop.xlane.xlu0 %1533  ;;  %v1568_v37 = vsel %vm1519_vm0, %v3919_v63, 0.0 }
 0x3c5   : > { %v3924_v3 = vpop.eup %3041  ;;  %3051 = vpow2.f32 %v1556_v45  ;;  %v1558_v12 = vmul.f32 1.442695, %v1547_v42  ;;  %v1548_v46 = vsub.f32 %v3871_v17, %v1534_v9  ;;  %1569 = vadd.xlane.f32.xlu0 %v1568_v37 }
 0x3c6   : > { %v1537_v22 = vpop.xlane.xlu1 %1536  ;;  %v1571_v15 = vsel %vm1519_vm0, %v3924_v3, 0.0 }
 0x3c7   : > { %v3929_v25 = vpop.eup %3043  ;;  %3053 = vpow2.f32 %v1558_v12  ;;  %v1560_v20 = vmul.f32 1.442695, %v1548_v46  ;;  %v1549_v51 = vsub.f32 %v3876_v62, %v1537_v22  ;;  %1572 = vadd.xlane.f32.xlu1 %v1571_v15 }
 0x3c8   : > { %v1802_v60 = vpop.xlane.xlu0 %1801  ;;  %v1836_v31 = vsel %vm1519_vm0, %v3929_v25, 0.0 }
 0x3c9   : > { %v3934_v58 = vpop.eup %3045  ;;  %3055 = vpow2.f32 %v1560_v20  ;;  %v1562_v17 = vmul.f32 1.442695, %v1549_v51  ;;  %v1812_v33 = vsub.f32 %v3881_v49, %v1802_v60  ;;  %1837 = vadd.xlane.f32.xlu0 %v1836_v31 }
 0x3ca   : > { %v1805_v23 = vpop.xlane.xlu1 %1804  ;;  %v1839_v6 = vsel %vm1519_vm0, %v3934_v58, 0.0 }
 0x3cb   : > { %v3939_v61 = vpop.eup %3047  ;;  %3057 = vpow2.f32 %v1562_v17  ;;  %v1826_v62 = vmul.f32 1.442695, %v1812_v33  ;;  %v1813_v8 = vsub.f32 %v3886_v21, %v1805_v23  ;;  %1840 = vadd.xlane.f32.xlu1 %v1839_v6  ;;  %v2977_v33 = vld [vmem:[%s4286_s6 + $0x4] ss:$8 sps:$4 sm:$0xff]  }
 0x3cc   : > { %v1796_v2 = vpop.xlane.xlu0 %1795  ;;  %v1830_v41 = vsel %vm1519_vm0, %v3939_v61, 0.0  ;;  %2163 = vmatprep.subr.bf16.mxu1 %v2977_v33 }
 0x3cd   : > { %v3944_v50 = vpop.eup %3049  ;;  %3059 = vpow2.f32 %v1826_v62  ;;  %v1828_v49 = vmul.f32 1.442695, %v1813_v8  ;;  %v1810_v43 = vsub.f32 %v3891_v24, %v1796_v2  ;;  %1831 = vadd.xlane.f32.xlu0 %v1830_v41 }
 0x3ce   : > { %v1799_v29 = vpop.xlane.xlu1 %1798  ;;  %v1833_v40 = vsel %vm1519_vm0, %v3944_v50, 0.0 }
 0x3cf   : > { %v3949_v11 = vpop.eup %3051  ;;  %3061 = vpow2.f32 %v1828_v49  ;;  %v1822_v21 = vmul.f32 1.442695, %v1810_v43  ;;  %v1811_v28 = vsub.f32 %v3896_v56, %v1799_v29  ;;  %1834 = vadd.xlane.f32.xlu1 %v1833_v40 }
 0x3d0   : > { %v1540_v36 = vpop.xlane.xlu0 %1539  ;;  %v1574_v47 = vsel %vm1519_vm0, %v3949_v11, 0.0 }
 0x3d1   : > { %v3954_v1 = vpop.eup %3053  ;;  %3063 = vpow2.f32 %v1822_v21  ;;  %v1824_v24 = vmul.f32 1.442695, %v1811_v28  ;;  %v1550_v16 = vsub.f32 %v3901_v14, %v1540_v36  ;;  %1575 = vadd.xlane.f32.xlu0 %v1574_v47 }
 0x3d2   : > { %v1543_v7 = vpop.xlane.xlu1 %1542  ;;  %v1577_v39 = vsel %vm1519_vm0, %v3954_v1, 0.0 }
 0x3d3   : > { %v3959_v54 = vpop.eup %3055  ;;  %3065 = vpow2.f32 %v1824_v24  ;;  %v1564_v56 = vmul.f32 1.442695, %v1550_v16  ;;  %v1551_v48 = vsub.f32 %v3906_v32, %v1543_v7  ;;  %1578 = vadd.xlane.f32.xlu1 %v1577_v39 }
 0x3d4   : > { %v1580_v59 = vsel %vm1519_vm0, %v3959_v54, 0.0 }
 0x3d5   : > { %v3964_v45 = vpop.eup %3057  ;;  %3067 = vpow2.f32 %v1564_v56  ;;  %v1566_v42 = vmul.f32 1.442695, %v1551_v48  ;;  %1581 = vadd.xlane.f32.xlu0 %v1580_v59 }
 0x3d6   : > { %v1583_v14 = vsel %vm1519_vm0, %v3964_v45, 0.0 }
 0x3d7   : > { %v3968_v9 = vpop.eup %3059  ;;  %3069 = vpow2.f32 %v1566_v42  ;;  %1584 = vadd.xlane.f32.xlu1 %v1583_v14 }
 0x3d8   : > { %v1848_v37 = vsel %vm1519_vm0, %v3968_v9, 0.0 }
 0x3d9   : > { %v3972_v32 = vpop.eup %3061  ;;  %1849 = vadd.xlane.f32.xlu0 %v1848_v37 }
 0x3da   : > { %v1851_v12 = vsel %vm1519_vm0, %v3972_v32, 0.0 }
 0x3db   : > { %v3976_v46 = vpop.eup %3063  ;;  %1852 = vadd.xlane.f32.xlu1 %v1851_v12 }
 0x3dc   : > { %v1842_v22 = vsel %vm1519_vm0, %v3976_v46, 0.0 }
 0x3dd   : > { %v3980_v15 = vpop.eup %3065  ;;  %1843 = vadd.xlane.f32.xlu0 %v1842_v22 }
 0x3de   : > { %v1845_v20 = vsel %vm1519_vm0, %v3980_v15, 0.0 }
 0x3df   : > { %v3984_v51 = vpop.eup %3067  ;;  %1846 = vadd.xlane.f32.xlu1 %v1845_v20 }
 0x3e0   : > { %v1586_v60 = vsel %vm1519_vm0, %v3984_v51, 0.0 }
 0x3e1   : > { %v3988_v31 = vpop.eup %3069  ;;  %1587 = vadd.xlane.f32.xlu0 %v1586_v60 }
 0x3e2   : > { %v1589_v17 = vsel %vm1519_vm0, %v3988_v31, 0.0 }
 0x3e3   : > { %1590 = vadd.xlane.f32.xlu1 %v1589_v17 }
 0x452   : > { %v1570_v23 = vpop.xlane.xlu0 %1569 }
 0x453   : > { %3071 = vrcp.f32 %v1570_v23 }
 0x454   : > { %v1573_v6 = vpop.xlane.xlu1 %1572 }
 0x455   : > { %3073 = vrcp.f32 %v1573_v6 }
 0x456   : > { %v1838_v62 = vpop.xlane.xlu0 %1837 }
 0x458   : > { %v1841_v8 = vpop.xlane.xlu1 %1840 }
 0x459   : > { %3075 = vrcp.f32 %v1841_v8 }
 0x45a   : > { %v1832_v2 = vpop.xlane.xlu0 %1831 }
 0x45b   : > { %3077 = vrcp.f32 %v1832_v2  ;;  %v2978_v2 = vld [vmem:[%s4286_s6 + $0x10] ss:$8 sps:$4 sm:$0xff]  }
 0x45c   : > { %3079 = vrcp.f32 %v1838_v62  ;;  %v1835_v41 = vpop.xlane.xlu1 %1834 }
 0x45d   : > { %v3072_v49 = vpop.eup %3071  ;;  %3081 = vrcp.f32 %v1835_v41 }
 0x45e   : > { %v1576_v43 = vpop.xlane.xlu0 %1575  ;;  %v1600_v21 = vmul.f32 %v3072_v49, %v3919_v63  ;;  %v2983_v49 = vld [vmem:[%s4286_s6 + $0x24] ss:$8 sps:$4 sm:$0xff]  }
 0x45f   : > { %v3074_v29 = vpop.eup %3073  ;;  %3083 = vrcp.f32 %v1576_v43 }
 0x460   : > { %v1579_v40 = vpop.xlane.xlu1 %1578  ;;  %v1601_v28 = vmul.f32 %v3074_v29, %v3924_v3 }
 0x461   : > { %3085 = vrcp.f32 %v1579_v40  ;;  %v2986_v40 = vld [vmem:[%s4286_s6 + $0x34] ss:$8 sps:$4 sm:$0xff]  }
 0x462   : > { %v1582_v36 = vpop.xlane.xlu0 %1581  ;;  %v1608_v47 = vpack.c.bf16 %v1601_v28, %v1600_v21 }
 0x463   : > { %3087 = vrcp.f32 %v1582_v36  ;;  %v3076_v24 = vpop.eup %3075 }
 0x464   : > { %2783 = vmatprep.mubr.msk.bf16.mxu1 %vm1519_vm0, %v1608_v47  ;;  %v1585_v16 = vpop.xlane.xlu1 %1584  ;;  %v1865_v59 = vmul.f32 %v3076_v24, %v3934_v58 }
 0x465   : > { %v3078_v7 = vpop.eup %3077  ;;  %3089 = vrcp.f32 %v1585_v16 }
 0x466   : > { %v3080_v39 = vpop.eup %3079  ;;  %v1850_v56 = vpop.xlane.xlu0 %1849  ;;  %v1862_v63 = vmul.f32 %v3078_v7, %v3939_v61  ;;  %v2984_v7 = vld [vmem:[%s4286_s6 + $0x30] ss:$8 sps:$4 sm:$0xff]  }
 0x467   : > { %v3082_v48 = vpop.eup %3081  ;;  %v1864_v37 = vmul.f32 %v3080_v39, %v3929_v25  ;;  %v2975_v25 = vld [vmem:[%s4286_s6] ss:$8 sps:$4 sm:$0xff]  }
 0x468   : > { %v1853_v42 = vpop.xlane.xlu1 %1852  ;;  %v1863_v3 = vmul.f32 %v3082_v48, %v3944_v50 }
 0x469   : > { %v3084_v14 = vpop.eup %3083  ;;  %3091 = vrcp.f32 %v1853_v42  ;;  %v1871_v60 = vpack.c.bf16 %v1865_v59, %v1864_v37  ;;  %v2992_v42 = vld [vmem:[%s4286_s6 + $0x54] ss:$8 sps:$4 sm:$0xff]   ;;  %v3001_v37 = vld [vmem:[%s4286_s6 + $0x84] ss:$8 sps:$4 sm:$0xff]  }
 0x46a   : > { %v1844_v12 = vpop.xlane.xlu0 %1843  ;;  %v1870_v22 = vpack.c.bf16 %v1863_v3, %v1862_v63  ;;  %v1602_v17 = vmul.f32 %v3084_v14, %v3949_v11  ;;  %v2980_v11 = vld [vmem:[%s4286_s6 + $0x14] ss:$8 sps:$4 sm:$0xff]   ;;  %v2993_v63 = vld [vmem:[%s4286_s6 + $0x60] ss:$8 sps:$4 sm:$0xff]   ;;  %v2996_v14 = vld [vmem:[%s4286_s6 + $0x70] ss:$8 sps:$4 sm:$0xff]  }
 0x46b   : > { %v3086_v20 = vpop.eup %3085  ;;  %3093 = vrcp.f32 %v1844_v12  ;;  %v2998_v3 = vld [vmem:[%s4286_s6 + $0x74] ss:$8 sps:$4 sm:$0xff]   ;;  %v2999_v12 = vld [vmem:[%s4286_s6 + $0x80] ss:$8 sps:$4 sm:$0xff]  }
 0x46c   : > { %v1603_v33 = vmul.f32 %v3086_v20, %v3954_v1  ;;  %3095 = vrcp.f32 %v1850_v56  ;;  %2815 = vmatprep.mubr.msk.bf16.mxu0 %vm1519_vm0, %v1870_v22  ;;  %v1847_v58 = vpop.xlane.xlu1 %1846  ;;  %v2989_v56 = vld [vmem:[%s4286_s6 + $0x44] ss:$8 sps:$4 sm:$0xff]   ;;  %v3004_v22 = vld [vmem:[%s4286_s6 + $0x94] ss:$8 sps:$4 sm:$0xff]   ;;  %v3002_v20 = vld [vmem:[%s4286_s6 + $0x90] ss:$8 sps:$4 sm:$0xff]  }
 0x46d   : > { %v3088_v61 = vpop.eup %3087  ;;  %3097 = vrcp.f32 %v1847_v58  ;;  %2816 = vmatmul.mubr.msk.bf16.vlgmr.msra.gmra.mrb[40].mxu0 %vm1519_vm0, %v1871_v60  ;;  %v3007_v60 = vld [vmem:[%s4286_s6 + $0xa4] ss:$8 sps:$4 sm:$0xff]   ;;  %v3008_v58 = vld [vmem:[%s4286_s6 + $0xb0] ss:$8 sps:$4 sm:$0xff]  }
 0x46e   : > { %v1609_v50 = vpack.c.bf16 %v1603_v33, %v1602_v17  ;;  %v1588_v23 = vpop.xlane.xlu0 %1587  ;;  %v1604_v62 = vmul.f32 %v3088_v61, %v3959_v54  ;;  %v2981_v54 = vld [vmem:[%s4286_s6 + $0x20] ss:$8 sps:$4 sm:$0xff]   ;;  %v3010_v33 = vld [vmem:[%s4286_s6 + $0xb4] ss:$8 sps:$4 sm:$0xff]   ;;  %v3013_v61 = vld [vmem:[%s4286_s6 + $0xc4] ss:$8 sps:$4 sm:$0xff]  }
 0x46f   : > { %v3090_v6 = vpop.eup %3089  ;;  %3099 = vrcp.f32 %v1588_v23  ;;  %v3005_v17 = vld [vmem:[%s4286_s6 + $0xa0] ss:$8 sps:$4 sm:$0xff]   ;;  %v3014_v23 = vld [vmem:[%s4286_s6 + $0xd0] ss:$8 sps:$4 sm:$0xff]  }
 0x470   : > { %2784 = vmatmul.mubr.msk.bf16.vlgmr.msra.gmra.mrb[24].mxu1 %vm1519_vm0, %v1609_v50  ;;  %v1591_v1 = vpop.xlane.xlu1 %1590  ;;  %v1605_v8 = vmul.f32 %v3090_v6, %v3964_v45  ;;  %v3016_v50 = vld [vmem:[%s4286_s6 + $0xd4] ss:$8 sps:$4 sm:$0xff]   ;;  %v3019_v6 = vld [vmem:[%s4286_s6 + $0xe4] ss:$8 sps:$4 sm:$0xff]  }
 0x471   : > { %3101 = vrcp.f32 %v1591_v1  ;;  %2164 = vmatpush1.bf16.msra.mxu1 %v2975_v25  ;;  %v3011_v25 = vld [vmem:[%s4286_s6 + $0xc0] ss:$8 sps:$4 sm:$0xff]   ;;  %v3020_v1 = vld [vmem:[%s4286_s6 + $0xf0] ss:$8 sps:$4 sm:$0xff]  }
 0x472   : > { %v1610_v41 = vpack.c.bf16 %v1605_v8, %v1604_v62  ;;  %2165 = vmatprep.subr.bf16.mxu1 %v2980_v11  ;;  %v3017_v11 = vld [vmem:[%s4286_s6 + $0xe0] ss:$8 sps:$4 sm:$0xff]   ;;  %v3022_v62 = vld [vmem:[%s4286_s6 + $0xf4] ss:$8 sps:$4 sm:$0xff]  }
 0x473   : > { %v3092_v43 = vpop.eup %3091 }
 0x474   : > { %2787 = vmatprep.mubr.msk.bf16.mxu1 %vm1519_vm0, %v1610_v41  ;;  %v1869_v28 = vmul.f32 %v3092_v43, %v3972_v32 }
 0x475   : > { %v3094_v29 = vpop.eup %3093  ;;  %2166 = vmatpush1.bf16.msra.mxu1 %v2978_v2 }
 0x476   : > { %v3096_v45 = vpop.eup %3095  ;;  %2167 = vmatprep.subr.bf16.mxu1 %v2983_v49  ;;  %v1866_v36 = vmul.f32 %v3094_v29, %v3976_v46 }
 0x477   : > { %v3098_v21 = vpop.eup %3097  ;;  %v1868_v16 = vmul.f32 %v3096_v45, %v3968_v9  ;;  %v2987_v9 = vld [vmem:[%s4286_s6 + $0x40] ss:$8 sps:$4 sm:$0xff]  }
 0x478   : > { %v1867_v47 = vmul.f32 %v3098_v21, %v3980_v15 }
 0x479   : > { %v3100_v24 = vpop.eup %3099  ;;  %2168 = vmatpush1.bf16.msra.mxu1 %v2981_v54  ;;  %v1873_v32 = vpack.c.bf16 %v1869_v28, %v1868_v16 }
 0x47a   : > { %v1872_v39 = vpack.c.bf16 %v1867_v47, %v1866_v36  ;;  %2169 = vmatprep.subr.bf16.mxu1 %v2986_v40  ;;  %v1606_v46 = vmul.f32 %v3100_v24, %v3984_v51  ;;  %v2990_v51 = vld [vmem:[%s4286_s6 + $0x50] ss:$8 sps:$4 sm:$0xff]  }
 0x47b   : > { %v3102_v48 = vpop.eup %3101 }
 0x47c   : > { %2819 = vmatprep.mubr.msk.bf16.mxu0 %vm1519_vm0, %v1872_v39  ;;  %v1607_v15 = vmul.f32 %v3102_v48, %v3988_v31  ;;  %v2995_v31 = vld [vmem:[%s4286_s6 + $0x64] ss:$8 sps:$4 sm:$0xff]  }
 0x47d   : > { %2820 = vmatmul.mubr.msk.bf16.gmra.mrb[44].mxu0 %vm1519_vm0, %v1873_v32  ;;  %2170 = vmatpush1.bf16.msra.mxu1 %v2984_v7 }
 0x47e   : > { %v1611_v59 = vpack.c.bf16 %v1607_v15, %v1606_v46  ;;  %2171 = vmatprep.subr.bf16.mxu1 %v2989_v56 }
 0x480   : > { %2788 = vmatmul.mubr.msk.bf16.gmra.mrb[28].mxu1 %vm1519_vm0, %v1611_v59 }
 0x481   : > { %2172 = vmatpush1.bf16.msra.mxu1 %v2987_v9 }
 0x482   : > { %2173 = vmatprep.subr.bf16.mxu1 %v2992_v42  ;;  %v1991_v42 = vld [vmem:[%s4287_s7] sm:$0x3] }
 0x485   : > { %2174 = vmatpush1.bf16.msra.mxu1 %v2990_v51  ;;  %v1996_v51 = vrot.slane %v1991_v42, %v3528_v19 }
 0x486   : > { %2175 = vmatprep.subr.bf16.mxu1 %v2995_v31  ;;  %v2000_v31 = vrot.slane %v1991_v42, %v3525_v52 }
 0x489   : > { %2176 = vmatpush1.bf16.msra.mxu1 %v2993_v63 }
 0x48a   : > { %2177 = vmatprep.subr.bf16.mxu1 %v2998_v3 }
 0x48d   : > { %2178 = vmatpush1.bf16.msra.mxu1 %v2996_v14 }
 0x48e   : > { %2179 = vmatprep.subr.bf16.mxu1 %v3001_v37 }
 0x491   : > { %2180 = vmatpush1.bf16.msra.mxu1 %v2999_v12 }
 0x492   : > { %2181 = vmatprep.subr.bf16.mxu1 %v3004_v22 }
 0x495   : > { %2182 = vmatpush1.bf16.msra.mxu1 %v3002_v20 }
 0x496   : > { %2183 = vmatprep.subr.bf16.mxu1 %v3007_v60 }
 0x499   : > { %2184 = vmatpush1.bf16.msra.mxu1 %v3005_v17 }
 0x49a   : > { %2185 = vmatprep.subr.bf16.mxu1 %v3010_v33 }
 0x49d   : > { %2186 = vmatpush1.bf16.msra.mxu1 %v3008_v58 }
 0x49e   : > { %2187 = vmatprep.subr.bf16.mxu1 %v3013_v61 }
 0x4a1   : > { %2188 = vmatpush1.bf16.msra.mxu1 %v3011_v25 }
 0x4a2   : > { %2189 = vmatprep.subr.bf16.mxu1 %v3016_v50 }
 0x4a5   : > { %2190 = vmatpush1.bf16.msra.mxu1 %v3014_v23 }
 0x4a6   : > { %2191 = vmatprep.subr.bf16.mxu1 %v3019_v6 }
 0x4a9   : > { %2192 = vmatpush1.bf16.msra.mxu1 %v3017_v11 }
 0x4aa   : > { %2193 = vmatprep.subr.bf16.mxu1 %v3022_v62 }
 0x4ad   : > { %2194 = vmatpush1.bf16.msra.mxu1 %v3020_v1 }
 0x540   : > { %v2817_v8 = vpop.f32.mrb[40].mxu0 }
 0x541   : > { %v1920_v2 = vpop.f32.mrb[41].mxu0 }
 0x542   : > { %v2818_v41 = vpop.f32.mrb[42].mxu0 }
 0x543   : > { %v1954_v49 = vpack.c.bf16 %v2818_v41, %v2817_v8  ;;  %v2785_v43 = vpop.f32.mrb[24].mxu1  ;;  %v1923_v29 = vpop.f32.mrb[43].mxu0 }
 0x544   : > { %v1952_v54 = vpack.c.bf16 %v1923_v29, %v1920_v2  ;;  %v1658_v45 = vpop.f32.mrb[25].mxu1 }
 0x545   : > { %v2786_v40 = vpop.f32.mrb[26].mxu1 }
 0x546   : > { %v1953_v21 = vpack.c.bf16 %v2786_v40, %v2785_v43  ;;  %v1661_v28 = vpop.f32.mrb[27].mxu1  ;;  %2195 = vmatprep.mubr.bf16.mxu1 %v1952_v54 }
 0x547   : > { %v1951_v36 = vpack.c.bf16 %v1661_v28, %v1658_v45 }
 0x549   : > { %2196 = vmatmul.mubr.bf16.vlgmr.msra.gmra.mrb[32].mxu1 %v1951_v36 }
 0x54a   : > { %2205 = vmatprep.mubr.bf16.mxu1 %v1954_v49 }
 0x550   : > { %v2821_v47 = vpop.f32.mrb[44].mxu0 }
 0x551   : > { %v1936_v24 = vpop.f32.mrb[45].mxu0  ;;  %2206 = vmatmul.mubr.bf16.gmra.mrb[36].mxu1 %v1953_v21 }
 0x552   : > { %v2822_v16 = vpop.f32.mrb[46].mxu0 }
 0x553   : > { %v1958_v7 = vpack.c.bf16 %v2822_v16, %v2821_v47  ;;  %v2789_v39 = vpop.f32.mrb[28].mxu1  ;;  %v1939_v56 = vpop.f32.mrb[47].mxu0 }
 0x554   : > { %v1956_v48 = vpack.c.bf16 %v1939_v56, %v1936_v24  ;;  %v1674_v32 = vpop.f32.mrb[29].mxu1 }
 0x555   : > { %v2790_v46 = vpop.f32.mrb[30].mxu1 }
 0x556   : > { %v1957_v15 = vpack.c.bf16 %v2790_v46, %v2789_v39  ;;  %v1677_v9 = vpop.f32.mrb[31].mxu1  ;;  %2215 = vmatprep.mubr.bf16.mxu1 %v1956_v48 }
 0x557   : > { %v1955_v59 = vpack.c.bf16 %v1677_v9, %v1674_v32 }
 0x559   : > { %2216 = vmatmul.mubr.bf16.gmra.mrb[40].mxu1 %v1955_v59 }
 0x55a   : > { %2225 = vmatprep.mubr.bf16.mxu1 %v1958_v7 }
 0x561   : > { %2226 = vmatmul.mubr.bf16.gmra.mrb[44].mxu1 %v1957_v15 }
 0x61c   : > { %v2197_v63 = vpop.f32.mrb[32].mxu1 }
 0x61d   : > { %v2198_v3 = vadd.f32 %v2197_v63, %v1996_v51  ;;  %v2199_v14 = vpop.f32.mrb[33].mxu1 }
 0x61e   : > { %v2200_v37 = vadd.f32 %v2199_v14, %v2000_v31  ;;  %v2201_v12 = vpop.f32.mrb[34].mxu1 }
 0x61f   : > { %v2236_v22 = vadd.f32 %v2198_v3, %v3561_v5  ;;  %v2202_v20 = vadd.f32 %v2201_v12, %v1996_v51  ;;  %v2203_v60 = vpop.f32.mrb[35].mxu1 }
 0x620   : > { %v2237_v17 = vadd.f32 %v2200_v37, %v3558_v34  ;;  %v2204_v33 = vadd.f32 %v2203_v60, %v2000_v31 }
 0x621   : > { %v2238_v58 = vadd.f32 %v2202_v20, %v3568_v26 }
 0x622   : > { %v2239_v61 = vadd.f32 %v2204_v33, %v3565_v4  ;;  %v2254_v25 = vadd.f32 %v2237_v17, %v2236_v22 }
 0x624   : > { %v2207_v50 = vpop.f32.mrb[36].mxu1  ;;  %2255 = vadd.xlane.f32.xlu0 %v2254_v25  ;;  %v2257_v23 = vadd.f32 %v2239_v61, %v2238_v58 }
 0x625   : > { %v2208_v11 = vadd.f32 %v2207_v50, %v1996_v51  ;;  %v2209_v6 = vpop.f32.mrb[37].mxu1 }
 0x626   : > { %v2210_v1 = vadd.f32 %v2209_v6, %v2000_v31  ;;  %v2211_v62 = vpop.f32.mrb[38].mxu1  ;;  %2258 = vadd.xlane.f32.xlu1 %v2257_v23 }
 0x627   : > { %v2240_v5 = vadd.f32 %v2208_v11, %v3625_v57  ;;  %v2212_v8 = vadd.f32 %v2211_v62, %v1996_v51  ;;  %v2213_v2 = vpop.f32.mrb[39].mxu1 }
 0x628   : > { %v2241_v34 = vadd.f32 %v2210_v1, %v3593_v13  ;;  %v2214_v41 = vadd.f32 %v2213_v2, %v2000_v31 }
 0x629   : > { %v2242_v26 = vadd.f32 %v2212_v8, %v3615_v53 }
 0x62a   : > { %v2243_v4 = vadd.f32 %v2214_v41, %v3596_v44  ;;  %v2260_v49 = vadd.f32 %v2241_v34, %v2240_v5 }
 0x62c   : > { %2261 = vadd.xlane.f32.xlu0 %v2260_v49  ;;  %v2217_v43 = vpop.f32.mrb[40].mxu1  ;;  %v2263_v29 = vadd.f32 %v2243_v4, %v2242_v26 }
 0x62d   : > { %v2218_v54 = vadd.f32 %v2217_v43, %v1996_v51  ;;  %v2219_v45 = vpop.f32.mrb[41].mxu1 }
 0x62e   : > { %v2220_v40 = vadd.f32 %v2219_v45, %v2000_v31  ;;  %2264 = vadd.xlane.f32.xlu1 %v2263_v29  ;;  %v2221_v21 = vpop.f32.mrb[42].mxu1 }
 0x62f   : > { %v2244_v57 = vadd.f32 %v2218_v54, %v3668_v10  ;;  %v2222_v28 = vadd.f32 %v2221_v21, %v1996_v51  ;;  %v2223_v36 = vpop.f32.mrb[43].mxu1 }
 0x630   : > { %v2245_v13 = vadd.f32 %v2220_v40, %v3632_v38  ;;  %v2224_v47 = vadd.f32 %v2223_v36, %v2000_v31 }
 0x631   : > { %v2246_v53 = vadd.f32 %v2222_v28, %v3661_v0 }
 0x632   : > { %v2247_v44 = vadd.f32 %v2224_v47, %v3621_v55  ;;  %v2266_v24 = vadd.f32 %v2245_v13, %v2244_v57 }
 0x634   : > { %v2227_v16 = vpop.f32.mrb[44].mxu1  ;;  %2267 = vadd.xlane.f32.xlu0 %v2266_v24  ;;  %v2269_v7 = vadd.f32 %v2247_v44, %v2246_v53 }
 0x635   : > { %v2228_v39 = vadd.f32 %v2227_v16, %v1996_v51  ;;  %v2229_v56 = vpop.f32.mrb[45].mxu1 }
 0x636   : > { %v2230_v48 = vadd.f32 %v2229_v56, %v2000_v31  ;;  %v2231_v32 = vpop.f32.mrb[46].mxu1  ;;  %2270 = vadd.xlane.f32.xlu1 %v2269_v7 }
 0x637   : > { %v2248_v10 = vadd.f32 %v2228_v39, %v3696_v18  ;;  %v2232_v46 = vadd.f32 %v2231_v32, %v1996_v51  ;;  %v2233_v15 = vpop.f32.mrb[47].mxu1 }
 0x638   : > { %v2249_v38 = vadd.f32 %v2230_v48, %v3675_v30  ;;  %v2234_v9 = vadd.f32 %v2233_v15, %v2000_v31 }
 0x639   : > { %v2250_v0 = vadd.f32 %v2232_v46, %v3693_v35 }
 0x63a   : > { %v2251_v55 = vadd.f32 %v2234_v9, %v3665_v27  ;;  %v2272_v59 = vadd.f32 %v2249_v38, %v2248_v10 }
 0x63c   : > { %2273 = vadd.xlane.f32.xlu0 %v2272_v59  ;;  %v2275_v42 = vadd.f32 %v2251_v55, %v2250_v0 }
 0x63e   : > { %2276 = vadd.xlane.f32.xlu1 %v2275_v42 }
 0x6b1   : > { %v2256_v63 = vpop.xlane.xlu0 %2255 }
 0x6b2   : > { %v2278_v3 = vmul.f32 0.00390625, %v2256_v63 }
 0x6b3   : > { %v2259_v14 = vpop.xlane.xlu1 %2258 }
 0x6b4   : > { %v4133_v37 = vsub.f32 %v2236_v22, %v2278_v3  ;;  %v4135_v12 = vsub.f32 %v2237_v17, %v2278_v3  ;;  %v2279_v18 = vmul.f32 0.00390625, %v2259_v14 }
 0x6b6   : > { %v4137_v51 = vsub.f32 %v2238_v58, %v2279_v18  ;;  %v4139_v30 = vsub.f32 %v2239_v61, %v2279_v18  ;;  %v2302_v35 = vmul.f32 %v4133_v37, %v4133_v37  ;;  %v2303_v27 = vmul.f32 %v4135_v12, %v4135_v12  ;;  %v2252_v18 = vld [vmem:[%s4288_s8] sm:$0x3] }
 0x6b8   : > { %v2318_v31 = vadd.f32 %v2303_v27, %v2302_v35  ;;  %v2304_v20 = vmul.f32 %v4137_v51, %v4137_v51  ;;  %v2305_v22 = vmul.f32 %v4139_v30, %v4139_v30 }
 0x6b9   : > { %v2262_v60 = vpop.xlane.xlu0 %2261 }
 0x6ba   : > { %v2280_v17 = vmul.f32 0.00390625, %v2262_v60  ;;  %2319 = vadd.xlane.f32.xlu0 %v2318_v31  ;;  %v2321_v33 = vadd.f32 %v2305_v22, %v2304_v20  ;;  %v2253_v31 = vld [vmem:[%s4289_s9] sm:$0x3]  ;;  %v4204_v22 = vrot.slane %v2252_v18, %v3528_v19  ;;  %v4207_v60 = vrot.slane %v2252_v18, %v3525_v52 }
 0x6bb   : > { %v2265_v58 = vpop.xlane.xlu1 %2264 }
 0x6bc   : > { %v4149_v61 = vsub.f32 %v2240_v5, %v2280_v17  ;;  %v4151_v25 = vsub.f32 %v2241_v34, %v2280_v17  ;;  %v2281_v50 = vmul.f32 0.00390625, %v2265_v58  ;;  %2322 = vadd.xlane.f32.xlu1 %v2321_v33  ;;  %v4210_v33 = vrot.slane %v2253_v31, %v3528_v19 }
 0x6bd   : > { %v4213_v58 = vrot.slane %v2253_v31, %v3525_v52 }
 0x6be   : > { %v4153_v23 = vsub.f32 %v2242_v26, %v2281_v50  ;;  %v4155_v11 = vsub.f32 %v2243_v4, %v2281_v50  ;;  %v2306_v6 = vmul.f32 %v4149_v61, %v4149_v61  ;;  %v2307_v1 = vmul.f32 %v4151_v25, %v4151_v25 }
 0x6c0   : > { %v2324_v62 = vadd.f32 %v2307_v1, %v2306_v6  ;;  %v2308_v8 = vmul.f32 %v4153_v23, %v4153_v23  ;;  %v2309_v5 = vmul.f32 %v4155_v11, %v4155_v11 }
 0x6c1   : > { %v2268_v2 = vpop.xlane.xlu0 %2267 }
 0x6c2   : > { %v2282_v34 = vmul.f32 0.00390625, %v2268_v2  ;;  %2325 = vadd.xlane.f32.xlu0 %v2324_v62  ;;  %v2327_v41 = vadd.f32 %v2309_v5, %v2308_v8 }
 0x6c3   : > { %v2271_v26 = vpop.xlane.xlu1 %2270 }
 0x6c4   : > { %v4165_v4 = vsub.f32 %v2244_v57, %v2282_v34  ;;  %v4167_v49 = vsub.f32 %v2245_v13, %v2282_v34  ;;  %v2283_v43 = vmul.f32 0.00390625, %v2271_v26  ;;  %2328 = vadd.xlane.f32.xlu1 %v2327_v41 }
 0x6c6   : > { %v4169_v29 = vsub.f32 %v2246_v53, %v2283_v43  ;;  %v4171_v54 = vsub.f32 %v2247_v44, %v2283_v43  ;;  %v2310_v45 = vmul.f32 %v4165_v4, %v4165_v4  ;;  %v2311_v40 = vmul.f32 %v4167_v49, %v4167_v49 }
 0x6c8   : > { %v2330_v21 = vadd.f32 %v2311_v40, %v2310_v45  ;;  %v2312_v28 = vmul.f32 %v4169_v29, %v4169_v29  ;;  %v2313_v57 = vmul.f32 %v4171_v54, %v4171_v54 }
 0x6c9   : > { %v2274_v36 = vpop.xlane.xlu0 %2273 }
 0x6ca   : > { %v2284_v13 = vmul.f32 0.00390625, %v2274_v36  ;;  %2331 = vadd.xlane.f32.xlu0 %v2330_v21  ;;  %v2333_v47 = vadd.f32 %v2313_v57, %v2312_v28 }
 0x6cb   : > { %v2277_v53 = vpop.xlane.xlu1 %2276 }
 0x6cc   : > { %v4181_v44 = vsub.f32 %v2248_v10, %v2284_v13  ;;  %v4183_v24 = vsub.f32 %v2249_v38, %v2284_v13  ;;  %v2285_v16 = vmul.f32 0.00390625, %v2277_v53  ;;  %2334 = vadd.xlane.f32.xlu1 %v2333_v47 }
 0x6ce   : > { %v4185_v7 = vsub.f32 %v2250_v0, %v2285_v16  ;;  %v4187_v39 = vsub.f32 %v2251_v55, %v2285_v16  ;;  %v2314_v56 = vmul.f32 %v4181_v44, %v4181_v44  ;;  %v2315_v48 = vmul.f32 %v4183_v24, %v4183_v24 }
 0x6d0   : > { %v2336_v32 = vadd.f32 %v2315_v48, %v2314_v56  ;;  %v2316_v46 = vmul.f32 %v4185_v7, %v4185_v7  ;;  %v2317_v10 = vmul.f32 %v4187_v39, %v4187_v39 }
 0x6d2   : > { %2337 = vadd.xlane.f32.xlu0 %v2336_v32  ;;  %v2339_v15 = vadd.f32 %v2317_v10, %v2316_v46 }
 0x6d4   : > { %2340 = vadd.xlane.f32.xlu1 %v2339_v15 }
 0x747   : > { %v2320_v38 = vpop.xlane.xlu0 %2319 }
 0x748   : > { %v2342_v9 = vmul.f32 0.00390625, %v2320_v38 }
 0x749   : > { %v2323_v0 = vpop.xlane.xlu1 %2322 }
 0x74a   : > { %v2350_v55 = vadd.f32 1e-12, %v2342_v9  ;;  %v2343_v59 = vmul.f32 0.00390625, %v2323_v0 }
 0x74c   : > { %3103 = vrsqrt.f32 %v2350_v55  ;;  %v2351_v42 = vadd.f32 1e-12, %v2343_v59 }
 0x74e   : > { %3105 = vrsqrt.f32 %v2351_v42 }
 0x74f   : > { %v2326_v63 = vpop.xlane.xlu0 %2325 }
 0x750   : > { %v2344_v3 = vmul.f32 0.00390625, %v2326_v63 }
 0x751   : > { %v2329_v14 = vpop.xlane.xlu1 %2328 }
 0x752   : > { %v2352_v35 = vadd.f32 1e-12, %v2344_v3  ;;  %v2345_v27 = vmul.f32 0.00390625, %v2329_v14 }
 0x754   : > { %3107 = vrsqrt.f32 %v2352_v35  ;;  %v2353_v20 = vadd.f32 1e-12, %v2345_v27 }
 0x756   : > { %v3104_v17 = vpop.eup %3103  ;;  %3109 = vrsqrt.f32 %v2353_v20 }
 0x757   : > { %v2366_v50 = vmul.f32 %v3104_v17, %v4133_v37  ;;  %v2367_v6 = vmul.f32 %v3104_v17, %v4135_v12  ;;  %v2332_v1 = vpop.xlane.xlu0 %2331 }
 0x758   : > { %v3106_v62 = vpop.eup %3105  ;;  %v2346_v8 = vmul.f32 0.00390625, %v2332_v1 }
 0x759   : > { %v2393_v5 = vmul.f32 %v4204_v22, %v2366_v50  ;;  %v2394_v2 = vmul.f32 %v4207_v60, %v2367_v6  ;;  %v2368_v34 = vmul.f32 %v3106_v62, %v4137_v51  ;;  %v2369_v19 = vmul.f32 %v3106_v62, %v4139_v30  ;;  %v2335_v41 = vpop.xlane.xlu1 %2334 }
 0x75a   : > { %v2354_v26 = vadd.f32 1e-12, %v2346_v8  ;;  %v2347_v52 = vmul.f32 0.00390625, %v2335_v41 }
 0x75b   : > { %v2420_v43 = vadd.f32 %v4210_v33, %v2393_v5  ;;  %v2421_v37 = vadd.f32 %v4213_v58, %v2394_v2  ;;  %v2395_v12 = vmul.f32 %v4204_v22, %v2368_v34  ;;  %v2396_v45 = vmul.f32 %v4207_v60, %v2369_v19 }
 0x75c   : > { %3111 = vrsqrt.f32 %v2354_v26  ;;  %v2355_v51 = vadd.f32 1e-12, %v2347_v52 }
 0x75d   : > { %v2719_v30 = vpack.c.bf16 %v2421_v37, %v2420_v43  ;;  %v2422_v40 = vadd.f32 %v4210_v33, %v2395_v12  ;;  %v2423_v21 = vadd.f32 %v4213_v58, %v2396_v45 }
 0x75e   : > { %v3108_v28 = vpop.eup %3107  ;;  %3113 = vrsqrt.f32 %v2355_v51 }
 0x75f   : > { %2484 = vst [vmem:[%s4229_s14] sm:$0xff] %v2719_v30  ;;  %v2720_v57 = vpack.c.bf16 %v2423_v21, %v2422_v40  ;;  %v2370_v36 = vmul.f32 %v3108_v28, %v4149_v61  ;;  %v2371_v13 = vmul.f32 %v3108_v28, %v4151_v25  ;;  %v2338_v47 = vpop.xlane.xlu0 %2337 }
 0x760   : > { %v3110_v53 = vpop.eup %3109  ;;  %v2348_v16 = vmul.f32 0.00390625, %v2338_v47 }
 0x761   : > { %2485 = vst [vmem:[%s4229_s14 + $0x8] sm:$0xff] %v2720_v57  ;;  %v2397_v56 = vmul.f32 %v4204_v22, %v2370_v36  ;;  %v2398_v48 = vmul.f32 %v4207_v60, %v2371_v13  ;;  %v2372_v32 = vmul.f32 %v3110_v53, %v4153_v23  ;;  %v2373_v46 = vmul.f32 %v3110_v53, %v4155_v11  ;;  %v2341_v10 = vpop.xlane.xlu1 %2340 }
 0x762   : > { %v2356_v15 = vadd.f32 1e-12, %v2348_v16  ;;  %v2349_v38 = vmul.f32 0.00390625, %v2341_v10 }
 0x763   : > { %v2424_v61 = vadd.f32 %v4210_v33, %v2397_v56  ;;  %v2425_v25 = vadd.f32 %v4213_v58, %v2398_v48  ;;  %v2399_v9 = vmul.f32 %v4204_v22, %v2372_v32  ;;  %v2400_v0 = vmul.f32 %v4207_v60, %v2373_v46 }
 0x764   : > { %3115 = vrsqrt.f32 %v2356_v15  ;;  %v2357_v55 = vadd.f32 1e-12, %v2349_v38 }
 0x765   : > { %v2721_v59 = vpack.c.bf16 %v2425_v25, %v2424_v61  ;;  %v2426_v23 = vadd.f32 %v4210_v33, %v2399_v9  ;;  %v2427_v42 = vadd.f32 %v4213_v58, %v2400_v0 }
 0x766   : > { %v3112_v11 = vpop.eup %3111  ;;  %3117 = vrsqrt.f32 %v2357_v55 }
 0x767   : > { %2486 = vst [vmem:[%s4229_s14 + $0x10] sm:$0xff] %v2721_v59  ;;  %v2722_v63 = vpack.c.bf16 %v2427_v42, %v2426_v23  ;;  %v2374_v3 = vmul.f32 %v3112_v11, %v4165_v4  ;;  %v2375_v14 = vmul.f32 %v3112_v11, %v4167_v49 }
 0x768   : > { %v3114_v18 = vpop.eup %3113 }
 0x769   : > { %2487 = vst [vmem:[%s4229_s14 + $0x18] sm:$0xff] %v2722_v63  ;;  %v2401_v35 = vmul.f32 %v4204_v22, %v2374_v3  ;;  %v2402_v27 = vmul.f32 %v4207_v60, %v2375_v14  ;;  %v2376_v31 = vmul.f32 %v3114_v18, %v4169_v29  ;;  %v2377_v20 = vmul.f32 %v3114_v18, %v4171_v54 }
 0x76b   : > { %v2428_v17 = vadd.f32 %v4210_v33, %v2401_v35  ;;  %v2429_v50 = vadd.f32 %v4213_v58, %v2402_v27  ;;  %v2403_v4 = vmul.f32 %v4204_v22, %v2376_v31  ;;  %v2404_v6 = vmul.f32 %v4207_v60, %v2377_v20 }
 0x76d   : > { %v2723_v49 = vpack.c.bf16 %v2429_v50, %v2428_v17  ;;  %v2430_v1 = vadd.f32 %v4210_v33, %v2403_v4  ;;  %v2431_v62 = vadd.f32 %v4213_v58, %v2404_v6 }
 0x76e   : > { %v3116_v8 = vpop.eup %3115 }
 0x76f   : > { %2488 = vst [vmem:[%s4229_s14 + $0x20] sm:$0xff] %v2723_v49  ;;  %v2724_v5 = vpack.c.bf16 %v2431_v62, %v2430_v1  ;;  %v2378_v29 = vmul.f32 %v3116_v8, %v4181_v44  ;;  %v2379_v54 = vmul.f32 %v3116_v8, %v4183_v24 }
 0x770   : > { %v3118_v2 = vpop.eup %3117 }
 0x771   : > { %2489 = vst [vmem:[%s4229_s14 + $0x28] sm:$0xff] %v2724_v5  ;;  %v2405_v34 = vmul.f32 %v4204_v22, %v2378_v29  ;;  %v2406_v19 = vmul.f32 %v4207_v60, %v2379_v54  ;;  %v2380_v41 = vmul.f32 %v3118_v2, %v4185_v7  ;;  %v2381_v26 = vmul.f32 %v3118_v2, %v4187_v39 }
 0x773   : > { %v2432_v52 = vadd.f32 %v4210_v33, %v2405_v34  ;;  %v2433_v43 = vadd.f32 %v4213_v58, %v2406_v19  ;;  %v2407_v37 = vmul.f32 %v4204_v22, %v2380_v41  ;;  %v2408_v44 = vmul.f32 %v4207_v60, %v2381_v26 }
 0x775   : > { %v2725_v24 = vpack.c.bf16 %v2433_v43, %v2432_v52  ;;  %v2434_v12 = vadd.f32 %v4210_v33, %v2407_v37  ;;  %v2435_v45 = vadd.f32 %v4213_v58, %v2408_v44 }
 0x777   : > { %2490 = vst [vmem:[%s4229_s14 + $0x30] sm:$0xff] %v2725_v24  ;;  %v2726_v51 = vpack.c.bf16 %v2435_v45, %v2434_v12 }
 0x779   : > { %2491 = vst [vmem:[%s4229_s14 + $0x38] sm:$0xff] %v2726_v51 }
 0x77a PF: > { %s20_s13 = sadd.s32 1, %s3125_s13  }
 0x77b   : > { %p17_p5 = scmp.ge.s32.totalorder %s20_s13, 4  }
 0x77d   :  { %19 = sbr.rel (!%p17_p5) target bundleno = 1 (0x1), region = 93 }

// kernel: generator_forward.4
= control target key start
LH: loop header
LB: loop body
LE: loop exit
PB: predicated region body
PF: predicated region fallthrough
CT: control target
= control target key end

     0   :  { %s6861_s1 = inlined_call_operand.vmem [shape: bf16[256,512], index: 1, kind: input, shape index: {}]   ;;  %s6862_s0 = inlined_call_operand.vmem [shape: bf16[128,256], index: 0, kind: input, shape index: {}]   ;;  %s6863_s3 = inlined_call_operand.vmem [shape: bf16[512,256], index: 3, kind: input, shape index: {}]   ;;  %s6864_s2 = inlined_call_operand.vmem [shape: f32[1,512], index: 2, kind: input, shape index: {}]   ;;  %s6865_s4 = inlined_call_operand.vmem [shape: f32[1,256], index: 4, kind: input, shape index: {}]   ;;  %s6866_s7 = inlined_call_operand.vmem [shape: bf16[256,256], index: 7, kind: input, shape index: {}]   ;;  %s6867_s5 = inlined_call_operand.vmem [shape: f32[1,256], index: 5, kind: input, shape index: {}]   ;;  %s6868_s6 = inlined_call_operand.vmem [shape: f32[1,256], index: 6, kind: input, shape index: {}]   ;;  %s6869_s8 = inlined_call_operand.vmem [shape: f32[1,256], index: 8, kind: input, shape index: {}]   ;;  %s6870_s9 = inlined_call_operand.vmem [shape: f32[1,256], index: 9, kind: input, shape index: {}]   ;;  %s6871_s10 = inlined_call_operand.vmem [shape: f32[1,256], index: 10, kind: input, shape index: {}]   ;;  %s6872_s11 = inlined_call_operand.vmem [shape: bf16[128,256], index: 11, kind: output, shape index: {}]  }
   0x1   :  { %v3758_v0 = vld [vmem:[%s6861_s1 + $0x4] ss:$16 sps:$4 sm:$0xff]   ;;  %v3760_v1 = vld [vmem:[%s6861_s1] ss:$16 sps:$4 sm:$0xff]   ;;  %v3790_v10 = vld [vmem:[%s6861_s1 + $0xc] ss:$16 sps:$4 sm:$0xff]  }
   0x2   :  { %572 = vmatprep.subr.bf16.mxu0 %v3758_v0  ;;  %v3761_v2 = vld [vmem:[%s6861_s1 + $0x24] ss:$16 sps:$4 sm:$0xff]   ;;  %v3763_v3 = vld [vmem:[%s6861_s1 + $0x20] ss:$16 sps:$4 sm:$0xff]   ;;  %v3793_v11 = vld [vmem:[%s6861_s1 + $0x8] ss:$16 sps:$4 sm:$0xff]   ;;  %685 = vmatprep.subr.bf16.mxu1 %v3790_v10 }
   0x3   :  { %573 = vmatpush1.bf16.msra.mxu0 %v3760_v1  ;;  %v3764_v4 = vld [vmem:[%s6861_s1 + $0x44] ss:$16 sps:$4 sm:$0xff]   ;;  %v3766_v5 = vld [vmem:[%s6861_s1 + $0x40] ss:$16 sps:$4 sm:$0xff]   ;;  %v3796_v13 = vld [vmem:[%s6861_s1 + $0x2c] ss:$16 sps:$4 sm:$0xff]   ;;  %686 = vmatpush1.bf16.msra.mxu1 %v3793_v11 }
   0x4   :  { %574 = vmatprep.subr.bf16.mxu0 %v3761_v2  ;;  %v3767_v6 = vld [vmem:[%s6861_s1 + $0x64] ss:$16 sps:$4 sm:$0xff]   ;;  %v3769_v7 = vld [vmem:[%s6861_s1 + $0x60] ss:$16 sps:$4 sm:$0xff]   ;;  %v3799_v14 = vld [vmem:[%s6861_s1 + $0x28] ss:$16 sps:$4 sm:$0xff]   ;;  %687 = vmatprep.subr.bf16.mxu1 %v3796_v13 }
   0x5   :  { %v3770_v8 = vld [vmem:[%s6861_s1 + $0x84] ss:$16 sps:$4 sm:$0xff]   ;;  %v3772_v9 = vld [vmem:[%s6861_s1 + $0x80] ss:$16 sps:$4 sm:$0xff]   ;;  %v3802_v17 = vld [vmem:[%s6861_s1 + $0x4c] ss:$16 sps:$4 sm:$0xff]  }
   0x6   :  { %v3773_v12 = vld [vmem:[%s6861_s1 + $0xa4] ss:$16 sps:$4 sm:$0xff]   ;;  %v3775_v15 = vld [vmem:[%s6861_s1 + $0xa0] ss:$16 sps:$4 sm:$0xff]   ;;  %v3805_v18 = vld [vmem:[%s6861_s1 + $0x48] ss:$16 sps:$4 sm:$0xff]  }
   0x7   :  { %575 = vmatpush1.bf16.msra.mxu0 %v3763_v3  ;;  %v3776_v16 = vld [vmem:[%s6861_s1 + $0xc4] ss:$16 sps:$4 sm:$0xff]   ;;  %688 = vmatpush1.bf16.msra.mxu1 %v3799_v14  ;;  %v3778_v19 = vld [vmem:[%s6861_s1 + $0xc0] ss:$16 sps:$4 sm:$0xff]   ;;  %v3808_v20 = vld [vmem:[%s6861_s1 + $0x6c] ss:$16 sps:$4 sm:$0xff]  }
   0x8   :  { %576 = vmatprep.subr.bf16.mxu0 %v3764_v4  ;;  %689 = vmatprep.subr.bf16.mxu1 %v3802_v17  ;;  %v3779_v21 = vld [vmem:[%s6861_s1 + $0xe4] ss:$16 sps:$4 sm:$0xff]   ;;  %v3781_v22 = vld [vmem:[%s6861_s1 + $0xe0] ss:$16 sps:$4 sm:$0xff]   ;;  %v3811_v23 = vld [vmem:[%s6861_s1 + $0x68] ss:$16 sps:$4 sm:$0xff]  }
   0x9   :  { %v3814_v24 = vld [vmem:[%s6861_s1 + $0x8c] ss:$16 sps:$4 sm:$0xff]   ;;  %v3782_v25 = vld [vmem:[%s6861_s1 + $0x104] ss:$16 sps:$4 sm:$0xff]   ;;  %v3784_v26 = vld [vmem:[%s6861_s1 + $0x100] ss:$16 sps:$4 sm:$0xff]  }
   0xa   :  { %v4430_v27 = vld [vmem:[%s6862_s0] sm:$0xff]  ;;  %v4435_v28 = vld [vmem:[%s6862_s0 + $0x8] sm:$0xff]  ;;  %v40_v58 = vld [vmem:[%s6862_s0 + $0x10] sm:$0xff] }
   0xb   :  { %577 = vmatpush1.bf16.msra.mxu0 %v3766_v5  ;;  %690 = vmatpush1.bf16.msra.mxu1 %v3805_v18  ;;  %v3817_v29 = vld [vmem:[%s6861_s1 + $0x88] ss:$16 sps:$4 sm:$0xff]   ;;  %v3487_v30 = vcombine.high %v4430_v27, %v4435_v28  ;;  %v3820_v31 = vld [vmem:[%s6861_s1 + $0xac] ss:$16 sps:$4 sm:$0xff]   ;;  %v3785_v32 = vld [vmem:[%s6861_s1 + $0x124] ss:$16 sps:$4 sm:$0xff]   ;;  %v3486_v1 = vcombine.low %v4430_v27, %v4435_v28 }
   0xc   :  { %578 = vmatprep.subr.bf16.mxu0 %v3767_v6  ;;  %691 = vmatprep.subr.bf16.mxu1 %v3808_v20  ;;  %v3823_v33 = vld [vmem:[%s6861_s1 + $0xa8] ss:$16 sps:$4 sm:$0xff]   ;;  %v3787_v34 = vld [vmem:[%s6861_s1 + $0x120] ss:$16 sps:$4 sm:$0xff]   ;;  %v3826_v35 = vld [vmem:[%s6861_s1 + $0xcc] ss:$16 sps:$4 sm:$0xff]  }
   0xd   :  { %604 = vmatprep.mubr.bf16.mxu0 %v3487_v30  ;;  %717 = vmatprep.mubr.bf16.mxu1 %v3487_v30  ;;  %v3788_v36 = vld [vmem:[%s6861_s1 + $0x144] ss:$16 sps:$4 sm:$0xff]   ;;  %v3828_v37 = vld [vmem:[%s6861_s1 + $0xc8] ss:$16 sps:$4 sm:$0xff]   ;;  %v3792_v38 = vld [vmem:[%s6861_s1 + $0x140] ss:$16 sps:$4 sm:$0xff]  }
   0xe   :  { %v3829_v39 = vld [vmem:[%s6861_s1 + $0xec] ss:$16 sps:$4 sm:$0xff]   ;;  %v3794_v40 = vld [vmem:[%s6861_s1 + $0x164] ss:$16 sps:$4 sm:$0xff]   ;;  %v3798_v41 = vld [vmem:[%s6861_s1 + $0x160] ss:$16 sps:$4 sm:$0xff]  }
   0xf   :  { %579 = vmatpush1.bf16.msra.mxu0 %v3769_v7  ;;  %692 = vmatpush1.bf16.msra.mxu1 %v3811_v23  ;;  %v3831_v42 = vld [vmem:[%s6861_s1 + $0xe8] ss:$16 sps:$4 sm:$0xff]   ;;  %v3834_v43 = vld [vmem:[%s6861_s1 + $0x10c] ss:$16 sps:$4 sm:$0xff]   ;;  %v3800_v44 = vld [vmem:[%s6861_s1 + $0x184] ss:$16 sps:$4 sm:$0xff]  }
  0x10   :  { %580 = vmatprep.subr.bf16.mxu0 %v3770_v8  ;;  %693 = vmatprep.subr.bf16.mxu1 %v3814_v24  ;;  %v3836_v45 = vld [vmem:[%s6861_s1 + $0x108] ss:$16 sps:$4 sm:$0xff]   ;;  %v3804_v46 = vld [vmem:[%s6861_s1 + $0x180] ss:$16 sps:$4 sm:$0xff]   ;;  %v3837_v47 = vld [vmem:[%s6861_s1 + $0x12c] ss:$16 sps:$4 sm:$0xff]  }
  0x11   :  { %v3806_v48 = vld [vmem:[%s6861_s1 + $0x1a4] ss:$16 sps:$4 sm:$0xff]   ;;  %v3839_v49 = vld [vmem:[%s6861_s1 + $0x128] ss:$16 sps:$4 sm:$0xff]   ;;  %v3810_v50 = vld [vmem:[%s6861_s1 + $0x1a0] ss:$16 sps:$4 sm:$0xff]  }
  0x12   :  { %v3842_v51 = vld [vmem:[%s6861_s1 + $0x14c] ss:$16 sps:$4 sm:$0xff]   ;;  %v3812_v52 = vld [vmem:[%s6861_s1 + $0x1c4] ss:$16 sps:$4 sm:$0xff]   ;;  %v3844_v53 = vld [vmem:[%s6861_s1 + $0x148] ss:$16 sps:$4 sm:$0xff]  }
  0x13   :  { %581 = vmatpush1.bf16.msra.mxu0 %v3772_v9  ;;  %694 = vmatpush1.bf16.msra.mxu1 %v3817_v29  ;;  %v3816_v54 = vld [vmem:[%s6861_s1 + $0x1c0] ss:$16 sps:$4 sm:$0xff]   ;;  %v3845_v55 = vld [vmem:[%s6861_s1 + $0x16c] ss:$16 sps:$4 sm:$0xff]   ;;  %v3818_v56 = vld [vmem:[%s6861_s1 + $0x1e4] ss:$16 sps:$4 sm:$0xff]  }
  0x14   :  { %582 = vmatprep.subr.bf16.mxu0 %v3773_v12  ;;  %695 = vmatprep.subr.bf16.mxu1 %v3820_v31  ;;  %v3822_v57 = vld [vmem:[%s6861_s1 + $0x1e0] ss:$16 sps:$4 sm:$0xff]   ;;  %v41_v59 = vld [vmem:[%s6862_s0 + $0x18] sm:$0xff]  ;;  %v3872_v62 = vld [vmem:[%s6863_s3 + $0x4] ss:$8 sps:$4 sm:$0xff]  }
  0x15   :  { %v3847_v60 = vld [vmem:[%s6861_s1 + $0x168] ss:$16 sps:$4 sm:$0xff]   ;;  %v3850_v61 = vld [vmem:[%s6861_s1 + $0x18c] ss:$16 sps:$4 sm:$0xff]   ;;  %v3489_v3 = vcombine.high %v40_v58, %v41_v59  ;;  %v42_v7 = vld [vmem:[%s6862_s0 + $0x20] sm:$0xff]  ;;  %v3488_v13 = vcombine.low %v40_v58, %v41_v59 }
  0x16   :  { %v3852_v63 = vld [vmem:[%s6861_s1 + $0x188] ss:$16 sps:$4 sm:$0xff]   ;;  %v3853_v0 = vld [vmem:[%s6861_s1 + $0x1ac] ss:$16 sps:$4 sm:$0xff]   ;;  %v44_v18 = vld [vmem:[%s6862_s0 + $0x30] sm:$0xff] }
  0x17   :  { %583 = vmatpush1.bf16.msra.mxu0 %v3775_v15  ;;  %696 = vmatpush1.bf16.msra.mxu1 %v3823_v33  ;;  %v3870_v2 = vld [vmem:[%s6863_s3] ss:$8 sps:$4 sm:$0xff]   ;;  %v3875_v4 = vld [vmem:[%s6863_s3 + $0x14] ss:$8 sps:$4 sm:$0xff]   ;;  %v3873_v9 = vld [vmem:[%s6863_s3 + $0x10] ss:$8 sps:$4 sm:$0xff]  }
  0x18   :  { %584 = vmatprep.subr.bf16.mxu0 %v3776_v16  ;;  %697 = vmatprep.subr.bf16.mxu1 %v3826_v35  ;;  %v3855_v5 = vld [vmem:[%s6861_s1 + $0x1a8] ss:$16 sps:$4 sm:$0xff]   ;;  %v3858_v6 = vld [vmem:[%s6861_s1 + $0x1cc] ss:$16 sps:$4 sm:$0xff]  }
  0x19   :  { %v43_v8 = vld [vmem:[%s6862_s0 + $0x28] sm:$0xff]  ;;  %v3881_v16 = vld [vmem:[%s6863_s3 + $0x34] ss:$8 sps:$4 sm:$0xff]   ;;  %v3879_v20 = vld [vmem:[%s6863_s3 + $0x30] ss:$8 sps:$4 sm:$0xff]  }
  0x1a   :  { %v3878_v10 = vld [vmem:[%s6863_s3 + $0x24] ss:$8 sps:$4 sm:$0xff]   ;;  %v3860_v11 = vld [vmem:[%s6861_s1 + $0x1c8] ss:$16 sps:$4 sm:$0xff]   ;;  %v3491_v15 = vcombine.high %v42_v7, %v43_v8  ;;  %v3893_v33 = vld [vmem:[%s6863_s3 + $0x74] ss:$8 sps:$4 sm:$0xff]  }
  0x1b   :  { %585 = vmatpush1.bf16.msra.mxu0 %v3778_v19  ;;  %698 = vmatpush1.bf16.msra.mxu1 %v3828_v37  ;;  %v3861_v12 = vld [vmem:[%s6861_s1 + $0x1ec] ss:$16 sps:$4 sm:$0xff]   ;;  %v3876_v14 = vld [vmem:[%s6863_s3 + $0x20] ss:$8 sps:$4 sm:$0xff]   ;;  %v3885_v28 = vld [vmem:[%s6863_s3 + $0x50] ss:$8 sps:$4 sm:$0xff]  }
  0x1c   :  { %586 = vmatprep.subr.bf16.mxu0 %v3779_v21  ;;  %699 = vmatprep.subr.bf16.mxu1 %v3829_v39  ;;  %v3863_v17 = vld [vmem:[%s6861_s1 + $0x1e8] ss:$16 sps:$4 sm:$0xff]   ;;  %v3884_v21 = vld [vmem:[%s6863_s3 + $0x44] ss:$8 sps:$4 sm:$0xff]   ;;  %v3911_v58 = vld [vmem:[%s6863_s3 + $0xd4] ss:$8 sps:$4 sm:$0xff]  }
  0x1d   :  { %v45_v19 = vld [vmem:[%s6862_s0 + $0x38] sm:$0xff]  ;;  %v3882_v24 = vld [vmem:[%s6863_s3 + $0x40] ss:$8 sps:$4 sm:$0xff]   ;;  %v3890_v29 = vld [vmem:[%s6863_s3 + $0x64] ss:$8 sps:$4 sm:$0xff]  }
  0x1e   :  { %v3493_v23 = vcombine.high %v44_v18, %v45_v19  ;;  %v47_v27 = vld [vmem:[%s6862_s0 + $0x48] sm:$0xff]  ;;  %v3492_v30 = vcombine.low %v44_v18, %v45_v19  ;;  %v49_v35 = vld [vmem:[%s6862_s0 + $0x58] sm:$0xff]  ;;  %v50_v39 = vld [vmem:[%s6862_s0 + $0x60] sm:$0xff] }
  0x1f   :  { %587 = vmatpush1.bf16.msra.mxu0 %v3781_v22  ;;  %700 = vmatpush1.bf16.msra.mxu1 %v3831_v42  ;;  %v3490_v22 = vcombine.low %v42_v7, %v43_v8  ;;  %v3909_v59 = vld [vmem:[%s6863_s3 + $0xd0] ss:$8 sps:$4 sm:$0xff]  }
  0x20   :  { %588 = vmatprep.subr.bf16.mxu0 %v3782_v25  ;;  %701 = vmatprep.subr.bf16.mxu1 %v3834_v43  ;;  %v3887_v25 = vld [vmem:[%s6863_s3 + $0x54] ss:$8 sps:$4 sm:$0xff]  }
  0x21   :  { %v52_v43 = vld [vmem:[%s6862_s0 + $0x70] sm:$0xff] }
  0x23   :  { %589 = vmatpush1.bf16.msra.mxu0 %v3784_v26  ;;  %702 = vmatpush1.bf16.msra.mxu1 %v3836_v45  ;;  %v46_v26 = vld [vmem:[%s6862_s0 + $0x40] sm:$0xff] }
  0x24   :  { %590 = vmatprep.subr.bf16.mxu0 %v3785_v32  ;;  %703 = vmatprep.subr.bf16.mxu1 %v3837_v47  ;;  %v3495_v31 = vcombine.high %v46_v26, %v47_v27  ;;  %v3888_v32 = vld [vmem:[%s6863_s3 + $0x60] ss:$8 sps:$4 sm:$0xff]   ;;  %v3494_v37 = vcombine.low %v46_v26, %v47_v27 }
  0x27   :  { %591 = vmatpush1.bf16.msra.mxu0 %v3787_v34  ;;  %704 = vmatpush1.bf16.msra.mxu1 %v3839_v49  ;;  %v48_v34 = vld [vmem:[%s6862_s0 + $0x50] sm:$0xff]  ;;  %v3894_v49 = vld [vmem:[%s6863_s3 + $0x80] ss:$8 sps:$4 sm:$0xff]  }
  0x28   :  { %592 = vmatprep.subr.bf16.mxu0 %v3788_v36  ;;  %705 = vmatprep.subr.bf16.mxu1 %v3842_v51  ;;  %v3891_v36 = vld [vmem:[%s6863_s3 + $0x70] ss:$8 sps:$4 sm:$0xff]  }
  0x29   :  { %v3897_v51 = vld [vmem:[%s6863_s3 + $0x90] ss:$8 sps:$4 sm:$0xff]  }
  0x2b   :  { %593 = vmatpush1.bf16.msra.mxu0 %v3792_v38  ;;  %706 = vmatpush1.bf16.msra.mxu1 %v3844_v53  ;;  %v3497_v38 = vcombine.high %v48_v34, %v49_v35  ;;  %v3900_v53 = vld [vmem:[%s6863_s3 + $0xa0] ss:$8 sps:$4 sm:$0xff]  }
  0x2c   :  { %594 = vmatprep.subr.bf16.mxu0 %v3794_v40  ;;  %707 = vmatprep.subr.bf16.mxu1 %v3845_v55  ;;  %v51_v40 = vld [vmem:[%s6862_s0 + $0x68] sm:$0xff]  ;;  %v3903_v55 = vld [vmem:[%s6863_s3 + $0xb0] ss:$8 sps:$4 sm:$0xff]  }
  0x2d   :  { %v3499_v42 = vcombine.high %v50_v39, %v51_v40  ;;  %v3498_v45 = vcombine.low %v50_v39, %v51_v40 }
  0x2f   :  { %595 = vmatpush1.bf16.msra.mxu0 %v3798_v41  ;;  %708 = vmatpush1.bf16.msra.mxu1 %v3847_v60  ;;  %v3496_v41 = vcombine.low %v48_v34, %v49_v35  ;;  %v3914_v60 = vld [vmem:[%s6863_s3 + $0xe4] ss:$8 sps:$4 sm:$0xff]  }
  0x30   :  { %596 = vmatprep.subr.bf16.mxu0 %v3800_v44  ;;  %709 = vmatprep.subr.bf16.mxu1 %v3850_v61  ;;  %v53_v44 = vld [vmem:[%s6862_s0 + $0x78] sm:$0xff]  ;;  %v3912_v61 = vld [vmem:[%s6863_s3 + $0xe0] ss:$8 sps:$4 sm:$0xff]  }
  0x31   :  { %v3500_v47 = vcombine.low %v52_v43, %v53_v44 }
  0x33   :  { %597 = vmatpush1.bf16.msra.mxu0 %v3804_v46  ;;  %710 = vmatpush1.bf16.msra.mxu1 %v3852_v63  ;;  %v3501_v46 = vcombine.high %v52_v43, %v53_v44  ;;  %v3915_v63 = vld [vmem:[%s6863_s3 + $0xf0] ss:$8 sps:$4 sm:$0xff]  }
  0x34   :  { %598 = vmatprep.subr.bf16.mxu0 %v3806_v48  ;;  %711 = vmatprep.subr.bf16.mxu1 %v3853_v0  ;;  %v3896_v48 = vld [vmem:[%s6863_s3 + $0x84] ss:$8 sps:$4 sm:$0xff]  }
  0x35   :  { %v3920_v0 = vld [vmem:[%s6863_s3 + $0x104] ss:$8 sps:$4 sm:$0xff]  }
  0x37   :  { %599 = vmatpush1.bf16.msra.mxu0 %v3810_v50  ;;  %712 = vmatpush1.bf16.msra.mxu1 %v3855_v5  ;;  %v3899_v50 = vld [vmem:[%s6863_s3 + $0x94] ss:$8 sps:$4 sm:$0xff]  }
  0x38   :  { %600 = vmatprep.subr.bf16.mxu0 %v3812_v52  ;;  %713 = vmatprep.subr.bf16.mxu1 %v3858_v6  ;;  %v3902_v52 = vld [vmem:[%s6863_s3 + $0xa4] ss:$8 sps:$4 sm:$0xff]  }
  0x3b   :  { %601 = vmatpush1.bf16.msra.mxu0 %v3816_v54  ;;  %714 = vmatpush1.bf16.msra.mxu1 %v3860_v11  ;;  %v3905_v54 = vld [vmem:[%s6863_s3 + $0xb4] ss:$8 sps:$4 sm:$0xff]  }
  0x3c   :  { %602 = vmatprep.subr.bf16.mxu0 %v3818_v56  ;;  %715 = vmatprep.subr.bf16.mxu1 %v3861_v12  ;;  %v3908_v56 = vld [vmem:[%s6863_s3 + $0xc4] ss:$8 sps:$4 sm:$0xff]  }
  0x3f   :  { %603 = vmatpush1.bf16.msra.mxu0 %v3822_v57  ;;  %716 = vmatpush1.bf16.msra.mxu1 %v3863_v17  ;;  %v3906_v57 = vld [vmem:[%s6863_s3 + $0xc0] ss:$8 sps:$4 sm:$0xff]  }
  0x40   :  { %1802 = vmatprep.subr.bf16.mxu0 %v3872_v62  ;;  %v3917_v62 = vld [vmem:[%s6863_s3 + $0xf4] ss:$8 sps:$4 sm:$0xff]  }
  0x42   :  { %605 = vmatmul.mubr.bf16.vlgmr.msra.gmra.mrb[0].mxu0 %v3486_v1  ;;  %718 = vmatmul.mubr.bf16.vlgmr.msra.gmra.mrb[0].mxu1 %v3486_v1  ;;  %v152_v1 = vlaneseq }
  0x43   :  { %614 = vmatprep.mubr.bf16.mxu0 %v3489_v3  ;;  %1803 = vmatpush1.bf16.msra.mxu0 %v3870_v2 }
  0x44   :  { %1804 = vmatprep.subr.bf16.mxu0 %v3875_v4  ;;  %727 = vmatprep.mubr.bf16.mxu1 %v3489_v3  ;;  %v153_v2 = vshrl.u32 %v152_v1, 7  ;;  %v150_v4 = vld [vmem:[%s6864_s2] sm:$0xf] }
  0x46   :  { %v4693_v3 = vsub.s32 0, %v153_v2  ;;  %v4698_v5 = vsub.s32 1, %v153_v2 }
  0x47   :  { %1805 = vmatpush1.bf16.msra.mxu0 %v3873_v9 }
  0x48   :  { %1806 = vmatprep.subr.bf16.mxu0 %v3878_v10  ;;  %6899 = vst [vmem:[#allocation2_spill] sm:$0xff] %v4693_v3  ;;  %6900 = vst [vmem:[#allocation3_spill] sm:$0xff] %v4698_v5  ;;  %v4701_v6 = vrot.slane %v150_v4, %v4693_v3  ;;  %v4704_v7 = vrot.slane %v150_v4, %v4698_v5 }
  0x4a   :  { %615 = vmatmul.mubr.bf16.gmra.mrb[4].mxu0 %v3488_v13  ;;  %728 = vmatmul.mubr.bf16.gmra.mrb[4].mxu1 %v3488_v13 }
  0x4b   :  { %624 = vmatprep.mubr.bf16.mxu0 %v3491_v15  ;;  %1807 = vmatpush1.bf16.msra.mxu0 %v3876_v14 }
  0x4c   :  { %1808 = vmatprep.subr.bf16.mxu0 %v3881_v16  ;;  %737 = vmatprep.mubr.bf16.mxu1 %v3491_v15 }
  0x4f   :  { %1809 = vmatpush1.bf16.msra.mxu0 %v3879_v20 }
  0x50   :  { %1810 = vmatprep.subr.bf16.mxu0 %v3884_v21 }
  0x52   :  { %625 = vmatmul.mubr.bf16.gmra.mrb[8].mxu0 %v3490_v22  ;;  %738 = vmatmul.mubr.bf16.gmra.mrb[8].mxu1 %v3490_v22  ;;  %v162_v22 = vsub.s32 2, %v153_v2 }
  0x53   :  { %634 = vmatprep.mubr.bf16.mxu0 %v3493_v23  ;;  %1811 = vmatpush1.bf16.msra.mxu0 %v3882_v24 }
  0x54   :  { %1812 = vmatprep.subr.bf16.mxu0 %v3887_v25  ;;  %747 = vmatprep.mubr.bf16.mxu1 %v3493_v23  ;;  %v166_v25 = vsub.s32 3, %v153_v2 }
  0x57   :  { %1813 = vmatpush1.bf16.msra.mxu0 %v3885_v28 }
  0x58   :  { %1814 = vmatprep.subr.bf16.mxu0 %v3890_v29 }
  0x5a   :  { %635 = vmatmul.mubr.bf16.gmra.mrb[12].mxu0 %v3492_v30  ;;  %748 = vmatmul.mubr.bf16.gmra.mrb[12].mxu1 %v3492_v30 }
  0x5b   :  { %644 = vmatprep.mubr.bf16.mxu0 %v3495_v31  ;;  %1815 = vmatpush1.bf16.msra.mxu0 %v3888_v32 }
  0x5c   :  { %1816 = vmatprep.subr.bf16.mxu0 %v3893_v33  ;;  %757 = vmatprep.mubr.bf16.mxu1 %v3495_v31 }
  0x5f   :  { %1817 = vmatpush1.bf16.msra.mxu0 %v3891_v36 }
  0x60   :  { %1818 = vmatprep.subr.bf16.mxu0 %v3896_v48 }
  0x62   :  { %645 = vmatmul.mubr.bf16.gmra.mrb[16].mxu0 %v3494_v37  ;;  %758 = vmatmul.mubr.bf16.gmra.mrb[16].mxu1 %v3494_v37  ;;  %v4719_v37 = vrot.slane %v150_v4, %v162_v22 }
  0x63   :  { %654 = vmatprep.mubr.bf16.mxu0 %v3497_v38  ;;  %767 = vmatprep.mubr.bf16.mxu1 %v3497_v38 }
  0x64   :  { %1819 = vmatpush1.bf16.msra.mxu0 %v3894_v49 }
  0x65   :  { %1820 = vmatprep.subr.bf16.mxu0 %v3899_v50 }
  0x68   :  { %1821 = vmatpush1.bf16.msra.mxu0 %v3897_v51 }
  0x69   :  { %1822 = vmatprep.subr.bf16.mxu0 %v3902_v52 }
  0x6a   :  { %655 = vmatmul.mubr.bf16.gmra.mrb[20].mxu0 %v3496_v41  ;;  %768 = vmatmul.mubr.bf16.gmra.mrb[20].mxu1 %v3496_v41 }
  0x6b   :  { %664 = vmatprep.mubr.bf16.mxu0 %v3499_v42  ;;  %777 = vmatprep.mubr.bf16.mxu1 %v3499_v42  ;;  %v4724_v42 = vrot.slane %v150_v4, %v166_v25 }
  0x6c   :  { %1823 = vmatpush1.bf16.msra.mxu0 %v3900_v53 }
  0x6d   :  { %1824 = vmatprep.subr.bf16.mxu0 %v3905_v54 }
  0x70   :  { %1825 = vmatpush1.bf16.msra.mxu0 %v3903_v55 }
  0x71   :  { %1826 = vmatprep.subr.bf16.mxu0 %v3908_v56 }
  0x72   :  { %665 = vmatmul.mubr.bf16.gmra.mrb[24].mxu0 %v3498_v45  ;;  %778 = vmatmul.mubr.bf16.gmra.mrb[24].mxu1 %v3498_v45 }
  0x73   :  { %674 = vmatprep.mubr.bf16.mxu0 %v3501_v46  ;;  %787 = vmatprep.mubr.bf16.mxu1 %v3501_v46 }
  0x74   :  { %1827 = vmatpush1.bf16.msra.mxu0 %v3906_v57 }
  0x75   :  { %1828 = vmatprep.subr.bf16.mxu0 %v3911_v58 }
  0x78   :  { %1829 = vmatpush1.bf16.msra.mxu0 %v3909_v59 }
  0x79   :  { %1830 = vmatprep.subr.bf16.mxu0 %v3914_v60 }
  0x7a   :  { %675 = vmatmul.mubr.bf16.gmra.mrb[28].mxu0 %v3500_v47  ;;  %788 = vmatmul.mubr.bf16.gmra.mrb[28].mxu1 %v3500_v47 }
  0x7c   :  { %1831 = vmatpush1.bf16.msra.mxu0 %v3912_v61 }
  0x7d   :  { %1832 = vmatprep.subr.bf16.mxu0 %v3917_v62 }
  0x80   :  { %1833 = vmatpush1.bf16.msra.mxu0 %v3915_v63 }
  0x81   :  { %1915 = vmatprep.subr.bf16.mxu0 %v3920_v0 }
 0x115   :  { %v606_v8 = vpop.f32.mrb[0].mxu0  ;;  %v719_v55 = vpop.f32.mrb[0].mxu1 }
 0x116   :  { %v607_v9 = vadd.f32 %v606_v8, %v4701_v6  ;;  %v608_v10 = vpop.f32.mrb[1].mxu0  ;;  %v4735_v59 = vadd.f32 %v719_v55, %v4719_v37  ;;  %v721_v60 = vpop.f32.mrb[1].mxu1 }
 0x117   :  { %v609_v11 = vadd.f32 %v608_v10, %v4704_v7  ;;  %v610_v12 = vpop.f32.mrb[2].mxu0  ;;  %v4744_v1 = vadd.f32 %v721_v60, %v4724_v42  ;;  %v4746_v2 = vpop.f32.mrb[2].mxu1 }
 0x118   :  { %v862_v13 = vmul.f32 0.044715, %v607_v9  ;;  %v611_v14 = vadd.f32 %v610_v12, %v4701_v6  ;;  %v612_v15 = vpop.f32.mrb[3].mxu0  ;;  %v4730_v53 = vmul.f32 0.5, %v607_v9  ;;  %v4753_v12 = vpop.f32.mrb[3].mxu1 }
 0x119   :  { %v863_v16 = vmul.f32 0.044715, %v609_v11  ;;  %v4710_v17 = vadd.f32 %v612_v15, %v4704_v7  ;;  %v4732_v54 = vmul.f32 0.5, %v609_v11  ;;  %6901 = vst [vmem:[#allocation4_spill] sm:$0xff] %v4744_v1 }
 0x11a   :  { %v926_v18 = vmul.f32 %v862_v13, %v607_v9  ;;  %v866_v19 = vmul.f32 0.044715, %v611_v14  ;;  %v4737_v61 = vmul.f32 0.5, %v611_v14 }
 0x11b   :  { %v927_v20 = vmul.f32 %v863_v16, %v609_v11  ;;  %v867_v21 = vmul.f32 0.044715, %v4710_v17  ;;  %v865_v16 = vmul.f32 0.044715, %v4744_v1  ;;  %v803_v25 = vmul.f32 0.5, %v4710_v17 }
 0x11c   :  { %v990_v23 = vmul.f32 %v926_v18, %v607_v9  ;;  %v930_v24 = vmul.f32 %v866_v19, %v611_v14 }
 0x11d   :  { %v991_v26 = vmul.f32 %v927_v20, %v609_v11  ;;  %v931_v27 = vmul.f32 %v867_v21, %v4710_v17  ;;  %v616_v28 = vpop.f32.mrb[4].mxu0 }
 0x11e   :  { %v1054_v29 = vadd.f32 %v990_v23, %v607_v9  ;;  %v994_v30 = vmul.f32 %v930_v24, %v611_v14  ;;  %v4715_v31 = vadd.f32 %v616_v28, %v4701_v6  ;;  %v618_v32 = vpop.f32.mrb[5].mxu0 }
 0x11f   :  { %v995_v33 = vmul.f32 %v931_v27, %v4710_v17  ;;  %v619_v34 = vadd.f32 %v618_v32, %v4704_v7  ;;  %v620_v35 = vpop.f32.mrb[6].mxu0  ;;  %v1055_v36 = vadd.f32 %v991_v26, %v609_v11  ;;  %v864_v11 = vmul.f32 0.044715, %v4735_v59 }
 0x120   :  { %v1118_v38 = vmul.f32 0.7978846, %v1054_v29  ;;  %v1058_v39 = vadd.f32 %v994_v30, %v611_v14  ;;  %v4722_v40 = vadd.f32 %v620_v35, %v4701_v6  ;;  %v622_v41 = vpop.f32.mrb[7].mxu0  ;;  %v870_v48 = vmul.f32 0.044715, %v4715_v31 }
 0x121   :  { %v871_v43 = vmul.f32 0.044715, %v619_v34  ;;  %v623_v44 = vadd.f32 %v622_v41, %v4704_v7  ;;  %v1059_v45 = vadd.f32 %v995_v33, %v4710_v17  ;;  %v1119_v46 = vmul.f32 0.7978846, %v1055_v36 }
 0x122   :  { %4014 = vtanh.f32 %v1118_v38  ;;  %v1122_v47 = vmul.f32 0.7978846, %v1058_v39  ;;  %v874_v49 = vmul.f32 0.044715, %v4722_v40  ;;  %v934_v62 = vmul.f32 %v870_v48, %v4715_v31  ;;  %v4780_v38 = vpop.f32.mrb[4].mxu1 }
 0x123   :  { %v935_v50 = vmul.f32 %v871_v43, %v619_v34  ;;  %v875_v51 = vmul.f32 0.044715, %v623_v44  ;;  %v1123_v52 = vmul.f32 0.7978846, %v1059_v45  ;;  %4016 = vtanh.f32 %v1119_v46  ;;  %v4785_v46 = vpop.f32.mrb[5].mxu1 }
 0x124   :  { %4018 = vtanh.f32 %v1122_v47  ;;  %v938_v4 = vmul.f32 %v874_v49, %v4722_v40  ;;  %v928_v21 = vmul.f32 %v864_v11, %v4735_v59  ;;  %v4766_v23 = vmul.f32 %v934_v62, %v4715_v31 }
 0x125   :  { %v999_v56 = vmul.f32 %v935_v50, %v619_v34  ;;  %v939_v57 = vmul.f32 %v875_v51, %v623_v44  ;;  %v626_v58 = vpop.f32.mrb[8].mxu0  ;;  %4020 = vtanh.f32 %v1123_v52  ;;  %v4772_v29 = vmul.f32 0.5, %v619_v34  ;;  %v4791_v51 = vpop.f32.mrb[6].mxu1 }
 0x126   :  { %v4741_v63 = vadd.f32 %v626_v58, %v4701_v6  ;;  %v628_v0 = vpop.f32.mrb[9].mxu0  ;;  %v992_v28 = vmul.f32 %v928_v21, %v4735_v59  ;;  %v4775_v33 = vmul.f32 %v938_v4, %v4722_v40  ;;  %v4778_v36 = vmul.f32 0.5, %v623_v44  ;;  %v4798_v62 = vpop.f32.mrb[7].mxu1 }
 0x127   :  { %v1003_v8 = vmul.f32 %v939_v57, %v623_v44  ;;  %v4750_v9 = vadd.f32 %v628_v0, %v4704_v7  ;;  %v630_v10 = vpop.f32.mrb[10].mxu0  ;;  %v1063_v18 = vadd.f32 %v999_v56, %v619_v34  ;;  %v929_v45 = vmul.f32 %v865_v16, %v4744_v1 }
 0x128   :  { %v878_v13 = vmul.f32 0.044715, %v4741_v63  ;;  %v4757_v14 = vadd.f32 %v630_v10, %v4701_v6  ;;  %v632_v15 = vpop.f32.mrb[11].mxu0  ;;  %v1056_v34 = vadd.f32 %v992_v28, %v4735_v59  ;;  %v810_v5 = vmul.f32 0.5, %v4722_v40 }
 0x129   :  { %v879_v19 = vmul.f32 0.044715, %v4750_v9  ;;  %v4762_v20 = vadd.f32 %v632_v15, %v4704_v7  ;;  %v1067_v22 = vadd.f32 %v1003_v8, %v623_v44  ;;  %v1127_v26 = vmul.f32 0.7978846, %v1063_v18 }
 0x12a   :  { %v882_v24 = vmul.f32 0.044715, %v4757_v14  ;;  %v942_v35 = vmul.f32 %v878_v13, %v4741_v63  ;;  %v1120_v18 = vmul.f32 0.7978846, %v1056_v34 }
 0x12b   :  { %v883_v27 = vmul.f32 0.044715, %v4762_v20  ;;  %v1131_v30 = vmul.f32 0.7978846, %v1067_v22  ;;  %4022 = vtanh.f32 %v1127_v26  ;;  %v943_v39 = vmul.f32 %v879_v19, %v4750_v9 }
 0x12c   :  { %v4015_v32 = vpop.eup %4014  ;;  %v946_v48 = vmul.f32 %v882_v24, %v4757_v14  ;;  %v724_v22 = vadd.f32 %v4746_v2, %v4719_v37  ;;  %v4815_v24 = vmul.f32 %v942_v35, %v4741_v63  ;;  %v4818_v26 = vmul.f32 0.5, %v4735_v59  ;;  %v3918_v2 = vld [vmem:[%s6863_s3 + $0x100] ss:$8 sps:$4 sm:$0xff]   ;;  %v3923_v59 = vld [vmem:[%s6863_s3 + $0x114] ss:$8 sps:$4 sm:$0xff]  }
 0x12d   :  { %v4017_v17 = vpop.eup %4016  ;;  %v636_v41 = vpop.f32.mrb[12].mxu0  ;;  %v1246_v43 = vadd.f32 1.0, %v4015_v32  ;;  %4024 = vtanh.f32 %v1131_v30  ;;  %v947_v55 = vmul.f32 %v883_v27, %v4762_v20  ;;  %v4821_v27 = vmul.f32 %v929_v45, %v4744_v1 }
 0x12e   :  { %v4019_v47 = vpop.eup %4018  ;;  %v4789_v44 = vadd.f32 %v636_v41, %v4701_v6  ;;  %v638_v49 = vpop.f32.mrb[13].mxu0  ;;  %v1247_v50 = vadd.f32 1.0, %v4017_v17  ;;  %6902 = vst [vmem:[#allocation5_spill] sm:$0xff] %v4818_v26  ;;  %v4827_v28 = vmul.f32 %v946_v48, %v4757_v14  ;;  %4026 = vtanh.f32 %v1120_v18  ;;  %v3926_v18 = vld [vmem:[%s6863_s3 + $0x124] ss:$8 sps:$4 sm:$0xff]  }
 0x12f   :  { %v4021_v52 = vpop.eup %4020  ;;  %v4795_v56 = vadd.f32 %v638_v49, %v4704_v7  ;;  %v640_v57 = vpop.f32.mrb[14].mxu0  ;;  %v1250_v58 = vadd.f32 1.0, %v4019_v47  ;;  %v1310_v60 = vmul.f32 %v1246_v43, %v4730_v53  ;;  %6903 = vst [vmem:[#allocation6_spill] sm:$0xff] %v4821_v27  ;;  %v4839_v35 = vmul.f32 %v947_v55, %v4762_v20 }
 0x130   :  { %v886_v0 = vmul.f32 0.044715, %v4789_v44  ;;  %v4802_v4 = vadd.f32 %v640_v57, %v4701_v6  ;;  %v642_v8 = vpop.f32.mrb[15].mxu0  ;;  %v1251_v10 = vadd.f32 1.0, %v4021_v52  ;;  %v1311_v11 = vmul.f32 %v1247_v50, %v4732_v54  ;;  %v4836_v32 = vpop.f32.mrb[8].mxu1 }
 0x131   :  { %v887_v13 = vmul.f32 0.044715, %v4795_v56  ;;  %v4807_v15 = vadd.f32 %v642_v8, %v4704_v7  ;;  %v1314_v16 = vmul.f32 %v1250_v58, %v4737_v61  ;;  %v4824_v61 = vmul.f32 %v943_v39, %v4750_v9  ;;  %v4842_v43 = vpop.f32.mrb[9].mxu1  ;;  %v3921_v58 = vld [vmem:[%s6863_s3 + $0x110] ss:$8 sps:$4 sm:$0xff]  }
 0x132   :  { %v950_v53 = vmul.f32 %v886_v0, %v4789_v44  ;;  %v890_v19 = vmul.f32 0.044715, %v4802_v4  ;;  %v1315_v21 = vmul.f32 %v1251_v10, %v803_v25  ;;  %v868_v41 = vmul.f32 0.044715, %v724_v22  ;;  %v4853_v52 = vpop.f32.mrb[10].mxu1 }
 0x133   :  { %v1374_v54 = vpack.c.bf16 %v1314_v16, %v1310_v60  ;;  %v951_v25 = vmul.f32 %v887_v13, %v4795_v56  ;;  %v891_v17 = vmul.f32 0.044715, %v4807_v15  ;;  %v1062_v50 = vadd.f32 %v4766_v23, %v4715_v31  ;;  %v4863_v10 = vpop.f32.mrb[11].mxu1 }
 0x134   :  { %v1375_v30 = vpack.c.bf16 %v1315_v21, %v1311_v11  ;;  %v4845_v45 = vmul.f32 %v950_v53, %v4789_v44  ;;  %v954_v47 = vmul.f32 %v890_v19, %v4802_v4  ;;  %v4861_v0 = vmul.f32 0.5, %v724_v22 }
 0x135   :  { %v646_v39 = vpop.f32.mrb[16].mxu0  ;;  %v4023_v34 = vpop.eup %4022  ;;  %v932_v8 = vmul.f32 %v868_v41, %v724_v22  ;;  %v4866_v23 = vmul.f32 %v951_v25, %v4795_v56  ;;  %v1066_v53 = vadd.f32 %v4775_v33, %v4722_v40  ;;  %v1126_v19 = vmul.f32 0.7978846, %v1062_v50 }
 0x136   :  { %v4849_v48 = vadd.f32 %v646_v39, %v4701_v6  ;;  %v648_v49 = vpop.f32.mrb[17].mxu0  ;;  %1834 = vmatprep.mubr.bf16.mxu0 %v1375_v30  ;;  %v1255_v60 = vadd.f32 1.0, %v4023_v34  ;;  %6904 = vst [vmem:[#allocation7_spill] sm:$0xff] %v4861_v0 }
 0x137   :  { %v4856_v55 = vadd.f32 %v648_v49, %v4704_v7  ;;  %v650_v57 = vpop.f32.mrb[18].mxu0  ;;  %1835 = vmatmul.mubr.bf16.vlgmr.msra.gmra.mrb[32].mxu0 %v1374_v54  ;;  %v4025_v11 = vpop.eup %4024  ;;  %v996_v41 = vmul.f32 %v932_v8, %v724_v22  ;;  %v1130_v34 = vmul.f32 0.7978846, %v1066_v53  ;;  %4028 = vtanh.f32 %v1126_v19 }
 0x138   :  { %v4869_v13 = vadd.f32 %v650_v57, %v4701_v6  ;;  %1916 = vmatpush1.bf16.msra.mxu0 %v3918_v2  ;;  %v652_v16 = vpop.f32.mrb[19].mxu0  ;;  %v894_v21 = vmul.f32 0.044715, %v4849_v48  ;;  %v1259_v30 = vadd.f32 1.0, %v4025_v11  ;;  %v955_v2 = vmul.f32 %v891_v17, %v4807_v15  ;;  %v4895_v8 = vpop.f32.mrb[12].mxu1 }
 0x139   :  { %v895_v54 = vmul.f32 0.044715, %v4856_v55  ;;  %v4879_v25 = vadd.f32 %v652_v16, %v4704_v7  ;;  %1917 = vmatprep.subr.bf16.mxu0 %v3923_v59  ;;  %v1319_v33 = vmul.f32 %v1255_v60, %v4772_v29  ;;  %v4887_v57 = vmul.f32 %v954_v47, %v4802_v4  ;;  %v3924_v59 = vld [vmem:[%s6863_s3 + $0x120] ss:$8 sps:$4 sm:$0xff]  }
 0x13a   :  { %v898_v39 = vmul.f32 0.044715, %v4869_v13  ;;  %v1323_v50 = vmul.f32 %v1259_v30, %v4778_v36  ;;  %v1060_v17 = vadd.f32 %v996_v41, %v724_v22  ;;  %v4893_v11 = vmul.f32 0.5, %v4715_v31  ;;  %v3929_v22 = vld [vmem:[%s6863_s3 + $0x134] ss:$8 sps:$4 sm:$0xff]   ;;  %v4906_v31 = vpop.f32.mrb[13].mxu1  ;;  %v4922_v30 = vpop.eup %4026 }
 0x13b   :  { %v899_v49 = vmul.f32 0.044715, %v4879_v25  ;;  %4030 = vtanh.f32 %v1130_v34  ;;  %v958_v29 = vmul.f32 %v894_v21, %v4849_v48  ;;  %v959_v36 = vmul.f32 %v895_v54, %v4856_v55  ;;  %6906 = vst [vmem:[#allocation9_spill] sm:$0xff] %v4906_v31  ;;  %v4920_v54 = vpop.f32.mrb[14].mxu1  ;;  %6910 = vst [vmem:[#allocation13_spill] sm:$0xff] %v4922_v30 }
 0x13c   :  { %1918 = vmatpush1.bf16.msra.mxu0 %v3921_v58  ;;  %v1379_v16 = vpack.c.bf16 %v1323_v50, %v1319_v33  ;;  %v4901_v47 = vadd.f32 %v4753_v12, %v4724_v42  ;;  %v962_v58 = vmul.f32 %v898_v39, %v4869_v13  ;;  %v4918_v12 = vadd.f32 %v4780_v38, %v4719_v37  ;;  %v4932_v50 = vpop.f32.mrb[15].mxu1 }
 0x13d   :  { %v656_v60 = vpop.f32.mrb[20].mxu0  ;;  %1919 = vmatprep.subr.bf16.mxu0 %v3926_v18  ;;  %v963_v53 = vmul.f32 %v899_v49, %v4879_v25  ;;  %v3927_v18 = vld [vmem:[%s6863_s3 + $0x130] ss:$8 sps:$4 sm:$0xff]   ;;  %6909 = vst [vmem:[#allocation12_spill] sm:$0xff] %v4920_v54  ;;  %v1124_v34 = vmul.f32 0.7978846, %v1060_v17  ;;  %v4930_v33 = vadd.f32 %v4785_v46, %v4724_v42  ;;  %v4950_v40 = vmul.f32 %v955_v2, %v4807_v15 }
 0x13e   :  { %6905 = vst [vmem:[#allocation8_spill] sm:$0xff] %v4901_v47  ;;  %v4911_v19 = vadd.f32 %v656_v60, %v4701_v6  ;;  %v658_v21 = vpop.f32.mrb[21].mxu0  ;;  %6908 = vst [vmem:[#allocation11_spill] sm:$0xff] %v4918_v12  ;;  %1844 = vmatprep.mubr.bf16.mxu0 %v1379_v16  ;;  %v869_v49 = vmul.f32 0.044715, %v4901_v47  ;;  %v4958_v30 = vmul.f32 %v959_v36, %v4856_v55 }
 0x13f   :  { %v4925_v39 = vadd.f32 %v658_v21, %v4704_v7  ;;  %v660_v41 = vpop.f32.mrb[22].mxu0  ;;  %6911 = vst [vmem:[#allocation14_spill] sm:$0xff] %v4930_v33  ;;  %6912 = vst [vmem:[#allocation15_spill] sm:$0xff] %v4932_v50  ;;  %v872_v16 = vmul.f32 0.044715, %v4918_v12  ;;  %4032 = vtanh.f32 %v1124_v34 }
 0x140   :  { %6907 = vst [vmem:[#allocation10_spill] sm:$0xff] %v4911_v19  ;;  %v902_v38 = vmul.f32 0.044715, %v4911_v19  ;;  %v4936_v60 = vadd.f32 %v660_v41, %v4701_v6  ;;  %1920 = vmatpush1.bf16.msra.mxu0 %v3924_v59  ;;  %v662_v21 = vpop.f32.mrb[23].mxu0  ;;  %v933_v46 = vmul.f32 %v869_v49, %v4901_v47  ;;  %v873_v0 = vmul.f32 0.044715, %v4930_v33 }
 0x141   :  { %v903_v17 = vmul.f32 0.044715, %v4925_v39  ;;  %v4942_v3 = vadd.f32 %v662_v21, %v4704_v7  ;;  %1921 = vmatprep.subr.bf16.mxu0 %v3929_v22  ;;  %v3932_v41 = vld [vmem:[%s6863_s3 + $0x144] ss:$8 sps:$4 sm:$0xff]   ;;  %v4953_v59 = vmul.f32 %v958_v29, %v4849_v48  ;;  %v4961_v22 = vmul.f32 %v962_v58, %v4869_v13  ;;  %v3930_v36 = vld [vmem:[%s6863_s3 + $0x140] ss:$8 sps:$4 sm:$0xff]   ;;  %v4029_v1 = vpop.eup %4028 }
 0x142   :  { %v966_v26 = vmul.f32 %v902_v38, %v4911_v19  ;;  %v906_v21 = vmul.f32 0.044715, %v4936_v60  ;;  %v4964_v49 = vmul.f32 %v963_v53, %v4879_v25  ;;  %v936_v27 = vmul.f32 %v872_v16, %v4918_v12  ;;  %v4975_v58 = vpop.f32.mrb[16].mxu1  ;;  %v3935_v50 = vld [vmem:[%s6863_s3 + $0x154] ss:$8 sps:$4 sm:$0xff]  }
 0x143   :  { %6913 = vst [vmem:[#allocation16_spill] sm:$0xff] %v4961_v22  ;;  %v967_v2 = vmul.f32 %v903_v17, %v4925_v39  ;;  %v907_v29 = vmul.f32 0.044715, %v4942_v3  ;;  %v4970_v38 = vmul.f32 0.5, %v4750_v9  ;;  %6914 = vst [vmem:[#allocation17_spill] sm:$0xff] %v4975_v58  ;;  %v4981_v16 = vmul.f32 %v933_v46, %v4901_v47  ;;  %v4989_v54 = vpop.f32.mrb[17].mxu1 }
 0x144   :  { %1922 = vmatpush1.bf16.msra.mxu0 %v3927_v18  ;;  %v4978_v53 = vmul.f32 %v966_v26, %v4911_v19  ;;  %v937_v17 = vmul.f32 %v873_v0, %v4930_v33  ;;  %v1071_v18 = vadd.f32 %v4824_v61, %v4750_v9  ;;  %6917 = vst [vmem:[#allocation20_spill] sm:$0xff] %v4989_v54  ;;  %v3933_v9 = vld [vmem:[%s6863_s3 + $0x150] ss:$8 sps:$4 sm:$0xff]   ;;  %v5000_v61 = vpop.f32.mrb[18].mxu1 }
 0x145   :  { %6916 = vst [vmem:[#allocation19_spill] sm:$0xff] %v4981_v16  ;;  %v666_v34 = vpop.f32.mrb[24].mxu0  ;;  %1923 = vmatprep.subr.bf16.mxu0 %v3932_v41  ;;  %v4031_v58 = vpop.eup %4030  ;;  %v970_v26 = vmul.f32 %v906_v21, %v4936_v60  ;;  %v1075_v0 = vadd.f32 %v4839_v35, %v4762_v20  ;;  %6919 = vst [vmem:[#allocation22_spill] sm:$0xff] %v5000_v61  ;;  %v5003_v47 = vmul.f32 %v936_v27, %v4918_v12 }
 0x146   :  { %6915 = vst [vmem:[#allocation18_spill] sm:$0xff] %v4978_v53  ;;  %v1254_v53 = vadd.f32 1.0, %v4029_v1  ;;  %v4993_v46 = vadd.f32 %v666_v34, %v4701_v6  ;;  %v668_v16 = vpop.f32.mrb[25].mxu0  ;;  %v1258_v41 = vadd.f32 1.0, %v4031_v58  ;;  %v1135_v1 = vmul.f32 0.7978846, %v1071_v18 }
 0x147   :  { %6920 = vst [vmem:[#allocation23_spill] sm:$0xff] %v5003_v47  ;;  %v5006_v21 = vadd.f32 %v668_v16, %v4704_v7  ;;  %v670_v34 = vpop.f32.mrb[26].mxu0  ;;  %v5008_v54 = vpop.f32.mrb[19].mxu1  ;;  %v1139_v31 = vmul.f32 0.7978846, %v1075_v0  ;;  %v5018_v16 = vadd.f32 %v4791_v51, %v4719_v37  ;;  %v5021_v18 = vmul.f32 %v967_v2, %v4925_v39 }
 0x148   :  { %6918 = vst [vmem:[#allocation21_spill] sm:$0xff] %v4993_v46  ;;  %v1318_v19 = vmul.f32 %v1254_v53, %v4893_v11  ;;  %v910_v35 = vmul.f32 0.044715, %v4993_v46  ;;  %v5013_v22 = vadd.f32 %v670_v34, %v4701_v6  ;;  %1924 = vmatpush1.bf16.msra.mxu0 %v3930_v36  ;;  %v672_v58 = vpop.f32.mrb[27].mxu0  ;;  %v1322_v61 = vmul.f32 %v1258_v41, %v810_v5  ;;  %v3938_v5 = vld [vmem:[%s6863_s3 + $0x164] ss:$8 sps:$4 sm:$0xff]  }
 0x149   :  { %6921 = vst [vmem:[#allocation24_spill] sm:$0xff] %v5006_v21  ;;  %v911_v27 = vmul.f32 0.044715, %v5006_v21  ;;  %4034 = vtanh.f32 %v1135_v1  ;;  %6922 = vst [vmem:[#allocation25_spill] sm:$0xff] %v5018_v16  ;;  %1925 = vmatprep.subr.bf16.mxu0 %v3935_v50  ;;  %v971_v11 = vmul.f32 %v907_v29, %v4942_v3  ;;  %v5025_v53 = vmul.f32 0.5, %v4762_v20  ;;  %v5064_v34 = vpop.eup %4032 }
 0x14a   :  { %4036 = vtanh.f32 %v1139_v31  ;;  %v1378_v36 = vpack.c.bf16 %v1322_v61, %v1318_v19  ;;  %v974_v0 = vmul.f32 %v910_v35, %v4993_v46  ;;  %v5032_v51 = vmul.f32 %v937_v17, %v4930_v33  ;;  %v3936_v19 = vld [vmem:[%s6863_s3 + $0x160] ss:$8 sps:$4 sm:$0xff]   ;;  %v3941_v17 = vld [vmem:[%s6863_s3 + $0x174] ss:$8 sps:$4 sm:$0xff]   ;;  %v5049_v61 = vpop.f32.mrb[20].mxu1  ;;  %6926 = vst [vmem:[#allocation29_spill] sm:$0xff] %v5064_v34 }
 0x14b   :  { %v914_v50 = vmul.f32 0.044715, %v5013_v22  ;;  %v975_v2 = vmul.f32 %v911_v27, %v5006_v21  ;;  %v5037_v29 = vmul.f32 0.5, %v4741_v63  ;;  %v1070_v20 = vadd.f32 %v4815_v24, %v4741_v63  ;;  %6924 = vst [vmem:[#allocation27_spill] sm:$0xff] %v5049_v61  ;;  %v3939_v34 = vld [vmem:[%s6863_s3 + $0x170] ss:$8 sps:$4 sm:$0xff]  }
 0x14c   :  { %6923 = vst [vmem:[#allocation26_spill] sm:$0xff] %v5032_v51  ;;  %v1074_v31 = vadd.f32 %v4827_v28, %v4757_v14  ;;  %1926 = vmatpush1.bf16.msra.mxu0 %v3933_v9  ;;  %v876_v41 = vmul.f32 0.044715, %v5018_v16  ;;  %v5053_v1 = vmul.f32 0.5, %v4757_v14  ;;  %v5056_v63 = vadd.f32 %v672_v58, %v4704_v7  ;;  %v5062_v9 = vpop.f32.mrb[21].mxu1 }
 0x14d   :  { %1845 = vmatmul.mubr.bf16.gmra.mrb[36].mxu0 %v1378_v36  ;;  %v5060_v24 = vadd.f32 %v4798_v62, %v4724_v42  ;;  %v676_v28 = vpop.f32.mrb[28].mxu0  ;;  %6925 = vst [vmem:[#allocation28_spill] sm:$0xff] %v5062_v9  ;;  %v5067_v35 = vmul.f32 %v970_v26, %v4936_v60  ;;  %v1134_v27 = vmul.f32 0.7978846, %v1070_v20  ;;  %1927 = vmatprep.subr.bf16.mxu0 %v3938_v5  ;;  %v5072_v58 = vpop.f32.mrb[22].mxu1 }
 0x14e   :  { %v1138_v36 = vmul.f32 0.7978846, %v1074_v31  ;;  %v5070_v14 = vadd.f32 %v676_v28, %v4701_v6  ;;  %v678_v47 = vpop.f32.mrb[29].mxu0  ;;  %6927 = vst [vmem:[#allocation30_spill] sm:$0xff] %v5072_v58  ;;  %v5075_v62 = vmul.f32 %v971_v11, %v4942_v3  ;;  %v915_v12 = vmul.f32 0.044715, %v5056_v63 }
 0x14f   :  { %v877_v51 = vmul.f32 0.044715, %v5060_v24  ;;  %v5080_v33 = vadd.f32 %v678_v47, %v4704_v7  ;;  %v680_v26 = vpop.f32.mrb[30].mxu0  ;;  %v5082_v20 = vpop.f32.mrb[23].mxu1  ;;  %v5085_v31 = vmul.f32 %v974_v0, %v4993_v46  ;;  %v5088_v5 = vmul.f32 %v975_v2, %v5006_v21  ;;  %v3944_v2 = vld [vmem:[%s6863_s3 + $0x184] ss:$8 sps:$4 sm:$0xff]  }
 0x150   :  { %6928 = vst [vmem:[#allocation31_spill] sm:$0xff] %v5082_v20  ;;  %v978_v28 = vmul.f32 %v914_v50, %v5013_v22  ;;  %4038 = vtanh.f32 %v1134_v27  ;;  %1928 = vmatpush1.bf16.msra.mxu0 %v3936_v19  ;;  %v682_v11 = vpop.f32.mrb[31].mxu0  ;;  %v940_v47 = vmul.f32 %v876_v41, %v5018_v16  ;;  %v979_v20 = vmul.f32 %v915_v12, %v5056_v63  ;;  %v3942_v12 = vld [vmem:[%s6863_s3 + $0x180] ss:$8 sps:$4 sm:$0xff]  }
 0x151   :  { %6929 = vst [vmem:[#allocation32_spill] sm:$0xff] %v5085_v31  ;;  %6930 = vst [vmem:[#allocation33_spill] sm:$0xff] %v5088_v5  ;;  %4040 = vtanh.f32 %v1138_v36  ;;  %v918_v0 = vmul.f32 0.044715, %v5070_v14  ;;  %1929 = vmatprep.subr.bf16.mxu0 %v3941_v17  ;;  %v941_v50 = vmul.f32 %v877_v51, %v5060_v24  ;;  %v1079_v19 = vadd.f32 %v4866_v23, %v4795_v56 }
 0x152   :  { %v1083_v27 = vadd.f32 %v4950_v40, %v4807_v15  ;;  %v5106_v41 = vadd.f32 %v680_v26, %v4701_v6  ;;  %v919_v36 = vmul.f32 0.044715, %v5080_v33  ;;  %v5113_v58 = vmul.f32 0.5, %v4795_v56  ;;  %v3947_v6 = vld [vmem:[%s6863_s3 + $0x194] ss:$8 sps:$4 sm:$0xff]   ;;  %v5128_v56 = vpop.f32.mrb[24].mxu1 }
 0x153   :  { %v4035_v17 = vpop.eup %4034  ;;  %v5116_v51 = vmul.f32 0.5, %v4807_v15  ;;  %v5120_v23 = vadd.f32 %v4836_v32, %v4719_v37  ;;  %v5126_v9 = vmul.f32 %v978_v28, %v5013_v22  ;;  %v1143_v31 = vmul.f32 0.7978846, %v1079_v19  ;;  %v5135_v21 = vpop.f32.mrb[25].mxu1 }
 0x154   :  { %v4037_v40 = vpop.eup %4036  ;;  %v1263_v26 = vadd.f32 1.0, %v4035_v17  ;;  %v1147_v46 = vmul.f32 0.7978846, %v1083_v27  ;;  %1930 = vmatpush1.bf16.msra.mxu0 %v3939_v34  ;;  %v5131_v61 = vmul.f32 %v940_v47, %v5018_v16  ;;  %v922_v32 = vmul.f32 0.044715, %v5106_v41  ;;  %v5144_v19 = vpop.f32.mrb[26].mxu1 }
 0x155   :  { %6931 = vst [vmem:[#allocation34_spill] sm:$0xff] %v5120_v23  ;;  %v1267_v15 = vadd.f32 1.0, %v4037_v40  ;;  %v880_v5 = vmul.f32 0.044715, %v5120_v23  ;;  %1931 = vmatprep.subr.bf16.mxu0 %v3944_v2  ;;  %v5138_v17 = vmul.f32 %v979_v20, %v5056_v63  ;;  %v5141_v28 = vmul.f32 %v941_v50, %v5060_v24  ;;  %v5149_v2 = vpop.f32.mrb[27].mxu1 }
 0x156   :  { %6932 = vst [vmem:[#allocation35_spill] sm:$0xff] %v5131_v61  ;;  %v982_v34 = vmul.f32 %v918_v0, %v5070_v14  ;;  %4042 = vtanh.f32 %v1143_v31  ;;  %v1327_v47 = vmul.f32 %v1263_v26, %v4970_v38  ;;  %v983_v40 = vmul.f32 %v919_v36, %v5080_v33  ;;  %v3945_v38 = vld [vmem:[%s6863_s3 + $0x190] ss:$8 sps:$4 sm:$0xff]  }
 0x157   :  { %v1331_v27 = vmul.f32 %v1267_v15, %v5025_v53  ;;  %4044 = vtanh.f32 %v1147_v46  ;;  %v1078_v20 = vadd.f32 %v4845_v45, %v4789_v44  ;;  %v1082_v50 = vadd.f32 %v4887_v57, %v4802_v4 }
 0x158   :  { %v5156_v0 = vadd.f32 %v682_v11, %v4704_v7  ;;  %v5160_v31 = vadd.f32 %v4842_v43, %v4724_v42  ;;  %1932 = vmatpush1.bf16.msra.mxu0 %v3942_v12  ;;  %v986_v53 = vmul.f32 %v922_v32, %v5106_v41  ;;  %v944_v45 = vmul.f32 %v880_v5, %v5120_v23  ;;  %v3950_v7 = vld [vmem:[%s6863_s3 + $0x1a4] ss:$8 sps:$4 sm:$0xff]  }
 0x159   :  { %v1383_v46 = vpack.c.bf16 %v1331_v27, %v1327_v47  ;;  %v5169_v57 = vadd.f32 %v4853_v52, %v4719_v37  ;;  %1933 = vmatprep.subr.bf16.mxu0 %v3947_v6  ;;  %v1142_v11 = vmul.f32 0.7978846, %v1078_v20  ;;  %v1146_v12 = vmul.f32 0.7978846, %v1082_v50  ;;  %v3948_v47 = vld [vmem:[%s6863_s3 + $0x1a0] ss:$8 sps:$4 sm:$0xff]  }
 0x15a   :  { %v4039_v43 = vpop.eup %4038  ;;  %v923_v36 = vmul.f32 0.044715, %v5156_v0  ;;  %v5177_v26 = vadd.f32 %v4863_v10, %v4724_v42  ;;  %v5180_v52 = vmul.f32 %v982_v34, %v5070_v14  ;;  %v5183_v6 = vmul.f32 %v983_v40, %v5080_v33  ;;  %v3953_v34 = vld [vmem:[%s6863_s3 + $0x1b4] ss:$8 sps:$4 sm:$0xff]   ;;  %v5194_v50 = vpop.f32.mrb[28].mxu1 }
 0x15b   :  { %v4041_v15 = vpop.eup %4040  ;;  %1854 = vmatprep.mubr.bf16.mxu0 %v1383_v46  ;;  %v1262_v5 = vadd.f32 1.0, %v4039_v43  ;;  %v881_v32 = vmul.f32 0.044715, %v5160_v31  ;;  %4046 = vtanh.f32 %v1142_v11  ;;  %v884_v20 = vmul.f32 0.044715, %v5169_v57  ;;  %v5203_v11 = vpop.f32.mrb[29].mxu1 }
 0x15c   :  { %v1266_v27 = vadd.f32 1.0, %v4041_v15  ;;  %v987_v10 = vmul.f32 %v923_v36, %v5156_v0  ;;  %1934 = vmatpush1.bf16.msra.mxu0 %v3945_v38  ;;  %v5197_v40 = vmul.f32 0.5, %v4789_v44  ;;  %v5200_v46 = vmul.f32 0.5, %v4802_v4  ;;  %v5213_v44 = vpop.f32.mrb[30].mxu1 }
 0x15d   :  { %4048 = vtanh.f32 %v1146_v12  ;;  %v885_v43 = vmul.f32 0.044715, %v5177_v26  ;;  %1935 = vmatprep.subr.bf16.mxu0 %v3950_v7  ;;  %v1326_v38 = vmul.f32 %v1262_v5, %v5037_v29  ;;  %v5208_v15 = vmul.f32 %v986_v53, %v5106_v41 }
 0x15e   :  { %v1330_v36 = vmul.f32 %v1266_v27, %v5053_v1  ;;  %v5211_v61 = vmul.f32 %v944_v45, %v5120_v23  ;;  %v945_v4 = vmul.f32 %v881_v32, %v5160_v31  ;;  %v5217_v12 = vmul.f32 0.5, %v4856_v55  ;;  %v5223_v1 = vpop.f32.mrb[31].mxu1  ;;  %v6936_v23 = vld [vmem:[#allocation16_spill] sm:$0xff] }
 0x15f   :  { %v1087_v7 = vadd.f32 %v4958_v30, %v4856_v55  ;;  %v1091_v29 = vadd.f32 %v4964_v49, %v4879_v25  ;;  %6934 = vst [vmem:[#allocation37_spill] sm:$0xff] %v5223_v1  ;;  %v5226_v45 = vmul.f32 %v987_v10, %v5156_v0  ;;  %v948_v27 = vmul.f32 %v884_v20, %v5169_v57  ;;  %v3951_v55 = vld [vmem:[%s6863_s3 + $0x1b0] ss:$8 sps:$4 sm:$0xff]   ;;  %v3956_v30 = vld [vmem:[%s6863_s3 + $0x1c4] ss:$8 sps:$4 sm:$0xff]  }
 0x160   :  { %6933 = vst [vmem:[#allocation36_spill] sm:$0xff] %v5211_v61  ;;  %v4043_v53 = vpop.eup %4042  ;;  %v1382_v5 = vpack.c.bf16 %v1330_v36, %v1326_v38  ;;  %v5231_v32 = vadd.f32 %v4895_v8, %v4719_v37  ;;  %1936 = vmatpush1.bf16.msra.mxu0 %v3948_v47  ;;  %v949_v10 = vmul.f32 %v885_v43, %v5177_v26  ;;  %v5246_v1 = vmul.f32 0.5, %v4879_v25  ;;  %v3954_v25 = vld [vmem:[%s6863_s3 + $0x1c0] ss:$8 sps:$4 sm:$0xff]  }
 0x161   :  { %v4045_v49 = vpop.eup %4044  ;;  %v1271_v38 = vadd.f32 1.0, %v4043_v53  ;;  %v1151_v36 = vmul.f32 0.7978846, %v1087_v7  ;;  %v1155_v61 = vmul.f32 0.7978846, %v1091_v29  ;;  %1937 = vmatprep.subr.bf16.mxu0 %v3953_v34  ;;  %v1086_v47 = vadd.f32 %v4953_v59, %v4849_v48  ;;  %v6937_v53 = vld [vmem:[#allocation9_spill] sm:$0xff] }
 0x162   :  { %6935 = vst [vmem:[#allocation38_spill] sm:$0xff] %v5231_v32  ;;  %1855 = vmatmul.mubr.bf16.gmra.mrb[40].mxu0 %v1382_v5  ;;  %v1275_v20 = vadd.f32 1.0, %v4045_v49  ;;  %v888_v8 = vmul.f32 0.044715, %v5231_v32  ;;  %v1090_v16 = vadd.f32 %v6936_v23, %v4869_v13  ;;  %v5250_v43 = vadd.f32 %v6937_v53, %v4724_v42  ;;  %v6938_v34 = vld [vmem:[#allocation12_spill] sm:$0xff]  ;;  %v6939_v53 = vld [vmem:[#allocation15_spill] sm:$0xff] }
 0x163   :  { %4050 = vtanh.f32 %v1151_v36  ;;  %v5254_v7 = vadd.f32 %v6938_v34, %v4719_v37  ;;  %v1335_v29 = vmul.f32 %v1271_v38, %v5113_v58  ;;  %v1150_v59 = vmul.f32 0.7978846, %v1086_v47 }
 0x164   :  { %v1339_v5 = vmul.f32 %v1275_v20, %v5116_v51  ;;  %4052 = vtanh.f32 %v1155_v61  ;;  %1938 = vmatpush1.bf16.msra.mxu0 %v3951_v55  ;;  %v5262_v23 = vmul.f32 %v945_v4, %v5160_v31  ;;  %v952_v49 = vmul.f32 %v888_v8, %v5231_v32  ;;  %v3959_v61 = vld [vmem:[%s6863_s3 + $0x1d4] ss:$8 sps:$4 sm:$0xff]  }
 0x165   :  { %v1154_v36 = vmul.f32 0.7978846, %v1090_v16  ;;  %v5267_v34 = vadd.f32 %v6939_v53, %v4724_v42  ;;  %1939 = vmatprep.subr.bf16.mxu0 %v3956_v30  ;;  %v4047_v58 = vpop.eup %4046  ;;  %v5273_v55 = vmul.f32 %v948_v27, %v5169_v57  ;;  %v5276_v4 = vmul.f32 %v949_v10, %v5177_v26  ;;  %v3957_v10 = vld [vmem:[%s6863_s3 + $0x1d0] ss:$8 sps:$4 sm:$0xff]  }
 0x166   :  { %v1387_v51 = vpack.c.bf16 %v1339_v5, %v1335_v29  ;;  %4054 = vtanh.f32 %v1150_v59  ;;  %v1270_v16 = vadd.f32 1.0, %v4047_v58  ;;  %v889_v20 = vmul.f32 0.044715, %v5250_v43 }
 0x167   :  { %6940 = vst [vmem:[#allocation16_spill] sm:$0xff] %v5273_v55  ;;  %v4049_v38 = vpop.eup %4048  ;;  %4056 = vtanh.f32 %v1154_v36  ;;  %v892_v30 = vmul.f32 0.044715, %v5254_v7  ;;  %v5281_v47 = vmul.f32 0.5, %v4849_v48  ;;  %v893_v29 = vmul.f32 0.044715, %v5267_v34 }
 0x168   :  { %1864 = vmatprep.mubr.bf16.mxu0 %v1387_v51  ;;  %v1274_v8 = vadd.f32 1.0, %v4049_v38  ;;  %v1095_v27 = vadd.f32 %v5021_v18, %v4925_v39  ;;  %1940 = vmatpush1.bf16.msra.mxu0 %v3954_v25  ;;  %v5290_v5 = vmul.f32 %v952_v49, %v5231_v32  ;;  %v834_v59 = vmul.f32 0.5, %v4869_v13  ;;  %v3962_v18 = vld [vmem:[%s6863_s3 + $0x1e4] ss:$8 sps:$4 sm:$0xff]   ;;  %v6942_v49 = vld [vmem:[#allocation17_spill] sm:$0xff] }
 0x169   :  { %v5294_v36 = vmul.f32 0.5, %v4925_v39  ;;  %v1099_v48 = vadd.f32 %v5075_v62, %v4942_v3  ;;  %1941 = vmatprep.subr.bf16.mxu0 %v3959_v61  ;;  %v1334_v25 = vmul.f32 %v1270_v16, %v5197_v40  ;;  %v5305_v51 = vadd.f32 %v6942_v49, %v4719_v37  ;;  %v6944_v62 = vld [vmem:[#allocation10_spill] sm:$0xff] }
 0x16a   :  { %6941 = vst [vmem:[#allocation9_spill] sm:$0xff] %v5290_v5  ;;  %v1338_v53 = vmul.f32 %v1274_v8, %v5200_v46  ;;  %v1159_v58 = vmul.f32 0.7978846, %v1095_v27  ;;  %v953_v13 = vmul.f32 %v889_v20, %v5250_v43  ;;  %v956_v39 = vmul.f32 %v892_v30, %v5254_v7  ;;  %v6945_v61 = vld [vmem:[#allocation18_spill] sm:$0xff]  ;;  %v6946_v8 = vld [vmem:[#allocation20_spill] sm:$0xff] }
 0x16b   :  { %6943 = vst [vmem:[#allocation12_spill] sm:$0xff] %v5305_v51  ;;  %v1163_v38 = vmul.f32 0.7978846, %v1099_v48  ;;  %v1094_v5 = vadd.f32 %v6945_v61, %v6944_v62  ;;  %v957_v55 = vmul.f32 %v893_v29, %v5267_v34  ;;  %v896_v40 = vmul.f32 0.044715, %v5305_v51 }
 0x16c   :  { %v1386_v32 = vpack.c.bf16 %v1338_v53, %v1334_v25  ;;  %4058 = vtanh.f32 %v1159_v58  ;;  %1942 = vmatpush1.bf16.msra.mxu0 %v3957_v10  ;;  %v3960_v46 = vld [vmem:[%s6863_s3 + $0x1e0] ss:$8 sps:$4 sm:$0xff]   ;;  %v1098_v20 = vadd.f32 %v5067_v35, %v4936_v60  ;;  %v5320_v27 = vadd.f32 %v6946_v8, %v4724_v42  ;;  %v3965_v29 = vld [vmem:[%s6863_s3 + $0x1f4] ss:$8 sps:$4 sm:$0xff]  }
 0x16d   :  { %v4051_v16 = vpop.eup %4050  ;;  %4060 = vtanh.f32 %v1163_v38  ;;  %v1158_v30 = vmul.f32 0.7978846, %v1094_v5  ;;  %1943 = vmatprep.subr.bf16.mxu0 %v3962_v18  ;;  %v960_v25 = vmul.f32 %v896_v40, %v5305_v51  ;;  %v6947_v53 = vld [vmem:[#allocation22_spill] sm:$0xff]  ;;  %v5332_v35 = vadd.f32 %v5008_v54, %v4724_v42  ;;  %v3963_v54 = vld [vmem:[%s6863_s3 + $0x1f0] ss:$8 sps:$4 sm:$0xff]  }
 0x16e   :  { %v4053_v10 = vpop.eup %4052  ;;  %1865 = vmatmul.mubr.bf16.gmra.mrb[44].mxu0 %v1386_v32  ;;  %v1279_v48 = vadd.f32 1.0, %v4051_v16  ;;  %v5328_v58 = vadd.f32 %v6947_v53, %v4719_v37  ;;  %v1162_v49 = vmul.f32 0.7978846, %v1098_v20  ;;  %v897_v18 = vmul.f32 0.044715, %v5320_v27 }
 0x16f   :  { %v1283_v5 = vadd.f32 1.0, %v4053_v10  ;;  %4062 = vtanh.f32 %v1158_v30  ;;  %v5337_v32 = vmul.f32 %v953_v13, %v5250_v43  ;;  %v843_v40 = vmul.f32 0.5, %v4942_v3 }
 0x170   :  { %v4055_v38 = vpop.eup %4054  ;;  %v1343_v61 = vmul.f32 %v1279_v48, %v5217_v12  ;;  %v900_v16 = vmul.f32 0.044715, %v5328_v58  ;;  %1944 = vmatpush1.bf16.msra.mxu0 %v3960_v46  ;;  %4064 = vtanh.f32 %v1162_v49  ;;  %v901_v10 = vmul.f32 0.044715, %v5332_v35 }
 0x171   :  { %6948 = vst [vmem:[#allocation15_spill] sm:$0xff] %v5337_v32  ;;  %v4057_v8 = vpop.eup %4056  ;;  %v1347_v20 = vmul.f32 %v1283_v5, %v5246_v1  ;;  %v1278_v30 = vadd.f32 1.0, %v4055_v38  ;;  %1945 = vmatprep.subr.bf16.mxu0 %v3965_v29  ;;  %v5347_v13 = vmul.f32 %v956_v39, %v5254_v7  ;;  %v838_v3 = vmul.f32 0.5, %v6944_v62  ;;  %v6950_v39 = vld [vmem:[#allocation24_spill] sm:$0xff]  ;;  %v6951_v38 = vld [vmem:[#allocation33_spill] sm:$0xff] }
 0x172   :  { %v1282_v12 = vadd.f32 1.0, %v4057_v8  ;;  %v842_v46 = vmul.f32 0.5, %v4936_v60  ;;  %v5352_v53 = vmul.f32 %v957_v55, %v5267_v34  ;;  %v5355_v32 = vmul.f32 %v960_v25, %v5305_v51  ;;  %v6952_v25 = vld [vmem:[#allocation27_spill] sm:$0xff] }
 0x173   :  { %v1391_v48 = vpack.c.bf16 %v1347_v20, %v1343_v61  ;;  %v961_v1 = vmul.f32 %v897_v18, %v5320_v27  ;;  %v1342_v5 = vmul.f32 %v1278_v30, %v5281_v47  ;;  %v964_v49 = vmul.f32 %v900_v16, %v5328_v58  ;;  %v6953_v16 = vld [vmem:[#allocation21_spill] sm:$0xff]  ;;  %v6954_v20 = vld [vmem:[#allocation32_spill] sm:$0xff] }
 0x174   :  { %6949 = vst [vmem:[#allocation17_spill] sm:$0xff] %v5355_v32  ;;  %v1346_v29 = vmul.f32 %v1282_v12, %v834_v59  ;;  %v1103_v8 = vadd.f32 %v6951_v38, %v6950_v39  ;;  %1946 = vmatpush1.bf16.msra.mxu0 %v3963_v54  ;;  %v965_v60 = vmul.f32 %v901_v10, %v5332_v35  ;;  %v5364_v55 = vmul.f32 0.5, %v6950_v39 }
 0x175   :  { %1874 = vmatprep.mubr.bf16.mxu0 %v1391_v48  ;;  %v1107_v62 = vadd.f32 %v5138_v17, %v5056_v63  ;;  %v5370_v18 = vadd.f32 %v6952_v25, %v4719_v37  ;;  %v1102_v30 = vadd.f32 %v6954_v20, %v6953_v16  ;;  %v1106_v54 = vadd.f32 %v5126_v9, %v5013_v22  ;;  %v6955_v17 = vld [vmem:[#allocation28_spill] sm:$0xff] }
 0x176   :  { %v4059_v47 = vpop.eup %4058  ;;  %v1390_v59 = vpack.c.bf16 %v1346_v29, %v1342_v5  ;;  %v1167_v61 = vmul.f32 0.7978846, %v1103_v8  ;;  %v5379_v38 = vadd.f32 %v6955_v17, %v4724_v42  ;;  %v5383_v32 = vmul.f32 %v961_v1, %v5320_v27  ;;  %v6956_v17 = vld [vmem:[#allocation30_spill] sm:$0xff] }
 0x177   :  { %v4061_v10 = vpop.eup %4060  ;;  %v1287_v12 = vadd.f32 1.0, %v4059_v47  ;;  %v1171_v48 = vmul.f32 0.7978846, %v1107_v62  ;;  %v904_v39 = vmul.f32 0.044715, %v5370_v18  ;;  %v5388_v51 = vadd.f32 %v6956_v17, %v4719_v37 }
 0x178   :  { %1875 = vmatmul.mubr.bf16.gmra.mrb[48].mxu0 %v1390_v59  ;;  %v1291_v25 = vadd.f32 1.0, %v4061_v10  ;;  %4066 = vtanh.f32 %v1167_v61  ;;  %v1166_v5 = vmul.f32 0.7978846, %v1102_v30  ;;  %v1170_v29 = vmul.f32 0.7978846, %v1106_v54 }
 0x179   :  { %v4063_v8 = vpop.eup %4062  ;;  %v1351_v20 = vmul.f32 %v1287_v12, %v5294_v36  ;;  %4068 = vtanh.f32 %v1171_v48  ;;  %v905_v9 = vmul.f32 0.044715, %v5379_v38  ;;  %v968_v61 = vmul.f32 %v904_v39, %v5370_v18  ;;  %v6957_v36 = vld [vmem:[#allocation31_spill] sm:$0xff] }
 0x17a   :  { %v1355_v62 = vmul.f32 %v1291_v25, %v843_v40  ;;  %v1286_v47 = vadd.f32 1.0, %v4063_v8  ;;  %4070 = vtanh.f32 %v1166_v5  ;;  %v4065_v59 = vpop.eup %4064  ;;  %v5394_v1 = vadd.f32 %v6957_v36, %v4724_v42 }
 0x17b   :  { %4072 = vtanh.f32 %v1170_v29  ;;  %v969_v30 = vmul.f32 %v905_v9, %v5379_v38  ;;  %v1290_v10 = vadd.f32 1.0, %v4065_v59  ;;  %v5397_v40 = vmul.f32 %v964_v49, %v5328_v58 }
 0x17c   :  { %v1395_v54 = vpack.c.bf16 %v1355_v62, %v1351_v20  ;;  %v851_v12 = vmul.f32 0.5, %v5056_v63  ;;  %v1350_v48 = vmul.f32 %v1286_v47, %v838_v3  ;;  %v5401_v25 = vmul.f32 %v965_v60, %v5332_v35 }
 0x17d   :  { %v846_v39 = vmul.f32 0.5, %v6953_v16  ;;  %v908_v5 = vmul.f32 0.044715, %v5388_v51  ;;  %v1354_v29 = vmul.f32 %v1290_v10, %v842_v46  ;;  %v909_v8 = vmul.f32 0.044715, %v5394_v1 }
 0x17e   :  { %1884 = vmatprep.mubr.bf16.mxu0 %v1395_v54  ;;  %v1111_v20 = vadd.f32 %v5183_v6, %v5080_v33  ;;  %v1115_v49 = vadd.f32 %v5226_v45, %v5156_v0  ;;  %v5411_v63 = vmul.f32 %v968_v61, %v5370_v18  ;;  %v850_v3 = vmul.f32 0.5, %v5013_v22 }
 0x17f   :  { %v5415_v60 = vmul.f32 %v969_v30, %v5379_v38  ;;  %v5419_v16 = vadd.f32 %v5128_v56, %v4719_v37  ;;  %v1394_v46 = vpack.c.bf16 %v1354_v29, %v1350_v48  ;;  %v5422_v9 = vmul.f32 0.5, %v5080_v33  ;;  %v6959_v29 = vld [vmem:[#allocation6_spill] sm:$0xff] }
 0x180   :  { %v1175_v6 = vmul.f32 0.7978846, %v1111_v20  ;;  %v1179_v62 = vmul.f32 0.7978846, %v1115_v49  ;;  %v972_v45 = vmul.f32 %v908_v5, %v5388_v51  ;;  %v5426_v47 = vmul.f32 0.5, %v5156_v0  ;;  %v6958_v5 = vld [vmem:[#allocation4_spill] sm:$0xff] }
 0x181   :  { %v1110_v22 = vadd.f32 %v5180_v52, %v5070_v14  ;;  %v1114_v17 = vadd.f32 %v5208_v15, %v5106_v41  ;;  %1885 = vmatmul.mubr.bf16.gmra.mrb[52].mxu0 %v1394_v46  ;;  %v973_v56 = vmul.f32 %v909_v8, %v5394_v1  ;;  %v5434_v33 = vmul.f32 0.5, %v5070_v14 }
 0x182   :  { %v4067_v59 = vpop.eup %4066  ;;  %4074 = vtanh.f32 %v1175_v6  ;;  %v5438_v61 = vadd.f32 %v5135_v21, %v4724_v42  ;;  %v912_v52 = vmul.f32 0.044715, %v5419_v16  ;;  %v5442_v10 = vmul.f32 0.5, %v5106_v41 }
 0x183   :  { %v4069_v0 = vpop.eup %4068  ;;  %v1295_v30 = vadd.f32 1.0, %v4067_v59  ;;  %4076 = vtanh.f32 %v1179_v62  ;;  %v1174_v36 = vmul.f32 0.7978846, %v1110_v22  ;;  %v1178_v48 = vmul.f32 0.7978846, %v1114_v17  ;;  %v6961_v22 = vld [vmem:[#allocation8_spill] sm:$0xff] }
 0x184   :  { %v4071_v54 = vpop.eup %4070  ;;  %v1299_v15 = vadd.f32 1.0, %v4069_v0  ;;  %v1057_v14 = vadd.f32 %v6959_v29, %v6958_v5  ;;  %v5447_v21 = vmul.f32 %v972_v45, %v5388_v51  ;;  %v913_v49 = vmul.f32 0.044715, %v5438_v61  ;;  %v6962_v17 = vld [vmem:[#allocation19_spill] sm:$0xff] }
 0x185   :  { %v4073_v8 = vpop.eup %4072  ;;  %v1294_v20 = vadd.f32 1.0, %v4071_v54  ;;  %4078 = vtanh.f32 %v1174_v36  ;;  %v1359_v46 = vmul.f32 %v1295_v30, %v5364_v55  ;;  %v976_v41 = vmul.f32 %v912_v52, %v5419_v16 }
 0x186   :  { %6960 = vst [vmem:[#allocation10_spill] sm:$0xff] %v5447_v21  ;;  %v1363_v6 = vmul.f32 %v1299_v15, %v851_v12  ;;  %v1298_v62 = vadd.f32 1.0, %v4073_v8  ;;  %4080 = vtanh.f32 %v1178_v48  ;;  %v1061_v59 = vadd.f32 %v6962_v17, %v6961_v22 }
 0x187   :  { %v1121_v0 = vmul.f32 0.7978846, %v1057_v14  ;;  %v5456_v54 = vadd.f32 %v5144_v19, %v4719_v37  ;;  %v1358_v29 = vmul.f32 %v1294_v20, %v846_v39  ;;  %v5460_v21 = vadd.f32 %v5149_v2, %v4724_v42  ;;  %v6963_v19 = vld [vmem:[#allocation13_spill] sm:$0xff] }
 0x188   :  { %v1399_v45 = vpack.c.bf16 %v1363_v6, %v1359_v46  ;;  %v1362_v36 = vmul.f32 %v1298_v62, %v850_v3  ;;  %v977_v55 = vmul.f32 %v913_v49, %v5438_v61  ;;  %v1125_v12 = vmul.f32 0.7978846, %v1061_v59  ;;  %v6964_v39 = vld [vmem:[#allocation29_spill] sm:$0xff]  ;;  %v6966_v62 = vld [vmem:[#allocation7_spill] sm:$0xff] }
 0x189   :  { %4082 = vtanh.f32 %v1121_v0  ;;  %v916_v30 = vmul.f32 0.044715, %v5456_v54  ;;  %v5466_v15 = vadd.f32 %v5194_v50, %v4719_v37  ;;  %v1248_v48 = vadd.f32 1.0, %v6963_v19  ;;  %v6965_v46 = vld [vmem:[#allocation5_spill] sm:$0xff] }
 0x18a   :  { %1894 = vmatprep.mubr.bf16.mxu0 %v1399_v45  ;;  %v1398_v52 = vpack.c.bf16 %v1362_v36, %v1358_v29  ;;  %v1252_v3 = vadd.f32 1.0, %v6964_v39  ;;  %v5471_v14 = vmul.f32 %v973_v56, %v5394_v1  ;;  %4084 = vtanh.f32 %v1125_v12 }
 0x18b   :  { %v917_v2 = vmul.f32 0.044715, %v5460_v21  ;;  %v5476_v8 = vadd.f32 %v5203_v11, %v4724_v42  ;;  %v801_v49 = vmul.f32 0.5, %v6958_v5  ;;  %v805_v50 = vmul.f32 0.5, %v6961_v22 }
 0x18c   :  { %v4075_v20 = vpop.eup %4074  ;;  %1895 = vmatmul.mubr.bf16.gmra.mrb[56].mxu0 %v1398_v52  ;;  %v5481_v6 = vmul.f32 %v1248_v48, %v6965_v46  ;;  %v5484_v17 = vmul.f32 %v1252_v3, %v6966_v62  ;;  %v5487_v0 = vmul.f32 %v976_v41, %v5419_v16  ;;  %v5490_v11 = vmul.f32 %v977_v55, %v5438_v61  ;;  %v6967_v41 = vld [vmem:[#allocation14_spill] sm:$0xff] }
 0x18d   :  { %v4077_v56 = vpop.eup %4076  ;;  %v1303_v59 = vadd.f32 1.0, %v4075_v20  ;;  %v980_v45 = vmul.f32 %v916_v30, %v5456_v54  ;;  %v920_v5 = vmul.f32 0.044715, %v5466_v15  ;;  %v921_v36 = vmul.f32 0.044715, %v5476_v8  ;;  %v6968_v55 = vld [vmem:[#allocation26_spill] sm:$0xff] }
 0x18e   :  { %v1307_v29 = vadd.f32 1.0, %v4077_v56  ;;  %v981_v19 = vmul.f32 %v917_v2, %v5460_v21  ;;  %v5500_v48 = vmul.f32 0.5, %v6967_v41  ;;  %v1065_v39 = vadd.f32 %v6968_v55, %v6967_v41 }
 0x18f   :  { %v4079_v12 = vpop.eup %4078  ;;  %v1367_v52 = vmul.f32 %v1303_v59, %v5422_v9  ;;  %v1069_v46 = vadd.f32 %v5141_v28, %v5060_v24  ;;  %v5509_v62 = vadd.f32 %v5213_v44, %v4719_v37  ;;  %v5512_v2 = vmul.f32 %v980_v45, %v5456_v54  ;;  %v6969_v59 = vld [vmem:[#allocation37_spill] sm:$0xff] }
 0x190   :  { %v4081_v30 = vpop.eup %4080  ;;  %v1371_v3 = vmul.f32 %v1307_v29, %v5426_v47  ;;  %v1302_v20 = vadd.f32 1.0, %v4079_v12  ;;  %v1129_v56 = vmul.f32 0.7978846, %v1065_v39  ;;  %v5516_v22 = vadd.f32 %v6969_v59, %v4724_v42 }
 0x191   :  { %v1306_v9 = vadd.f32 1.0, %v4081_v30  ;;  %v984_v47 = vmul.f32 %v920_v5, %v5466_v15  ;;  %v985_v29 = vmul.f32 %v921_v36, %v5476_v8  ;;  %v1133_v12 = vmul.f32 0.7978846, %v1069_v46  ;;  %v6970_v30 = vld [vmem:[#allocation11_spill] sm:$0xff] }
 0x192   :  { %v1403_v41 = vpack.c.bf16 %v1371_v3, %v1367_v52  ;;  %v1366_v55 = vmul.f32 %v1302_v20, %v5434_v33  ;;  %4086 = vtanh.f32 %v1129_v56  ;;  %v924_v44 = vmul.f32 0.044715, %v5509_v62  ;;  %v6971_v3 = vld [vmem:[#allocation23_spill] sm:$0xff]  ;;  %v6972_v20 = vld [vmem:[#allocation25_spill] sm:$0xff] }
 0x193   :  { %v4083_v28 = vpop.eup %4082  ;;  %v1370_v37 = vmul.f32 %v1306_v9, %v5442_v10  ;;  %v5524_v39 = vmul.f32 %v981_v19, %v5460_v21  ;;  %4088 = vtanh.f32 %v1133_v12  ;;  %v925_v42 = vmul.f32 0.044715, %v5516_v22  ;;  %v6973_v10 = vld [vmem:[#allocation35_spill] sm:$0xff] }
 0x194   :  { %1904 = vmatprep.mubr.bf16.mxu0 %v1403_v41  ;;  %v1249_v45 = vadd.f32 1.0, %v4083_v28  ;;  %v4085_v5 = vpop.eup %4084  ;;  %v813_v36 = vmul.f32 0.5, %v5060_v24  ;;  %v1064_v33 = vadd.f32 %v6971_v3, %v6970_v30  ;;  %v1068_v46 = vadd.f32 %v6973_v10, %v6972_v20 }
 0x195   :  { %v1402_v52 = vpack.c.bf16 %v1370_v37, %v1366_v55  ;;  %v1253_v9 = vadd.f32 1.0, %v4085_v5  ;;  %v5533_v59 = vmul.f32 %v984_v47, %v5466_v15  ;;  %v5536_v19 = vmul.f32 %v985_v29, %v5476_v8 }
 0x196   :  { %v1313_v56 = vmul.f32 %v1249_v45, %v801_v49  ;;  %v988_v41 = vmul.f32 %v924_v44, %v5509_v62  ;;  %v5540_v12 = vmul.f32 0.5, %v6970_v30  ;;  %v1128_v24 = vmul.f32 0.7978846, %v1064_v33  ;;  %v6974_v45 = vld [vmem:[#allocation34_spill] sm:$0xff]  ;;  %v6975_v44 = vld [vmem:[#allocation36_spill] sm:$0xff] }
 0x197   :  { %1905 = vmatmul.mubr.bf16.gmra.mrb[60].mxu0 %v1402_v52  ;;  %v1132_v28 = vmul.f32 0.7978846, %v1068_v46  ;;  %v1317_v55 = vmul.f32 %v1253_v9, %v805_v50  ;;  %v989_v37 = vmul.f32 %v925_v42, %v5516_v22  ;;  %v1073_v49 = vadd.f32 %v5262_v23, %v5160_v31  ;;  %v6976_v52 = vld [vmem:[#allocation16_spill] sm:$0xff]  ;;  %v6977_v46 = vld [vmem:[#allocation15_spill] sm:$0xff] }
 0x198   :  { %v1077_v47 = vadd.f32 %v5276_v4, %v5177_v26  ;;  %v5548_v29 = vmul.f32 0.5, %v6972_v20  ;;  %4090 = vtanh.f32 %v1128_v24  ;;  %v1072_v5 = vadd.f32 %v6975_v44, %v6974_v45 }
 0x199   :  { %v1076_v30 = vadd.f32 %v6976_v52, %v5169_v57  ;;  %v1377_v3 = vpack.c.bf16 %v1317_v55, %v1313_v56  ;;  %4092 = vtanh.f32 %v1132_v28  ;;  %v1137_v50 = vmul.f32 0.7978846, %v1073_v49  ;;  %v6978_v28 = vld [vmem:[#allocation38_spill] sm:$0xff] }
 0x19a   :  { %v1141_v42 = vmul.f32 0.7978846, %v1077_v47  ;;  %v5555_v33 = vmul.f32 %v988_v41, %v5509_v62  ;;  %v5558_v23 = vmul.f32 0.5, %v5160_v31  ;;  %v1136_v4 = vmul.f32 0.7978846, %v1072_v5  ;;  %v6979_v31 = vld [vmem:[#allocation9_spill] sm:$0xff] }
 0x19b   :  { %v1140_v20 = vmul.f32 0.7978846, %v1076_v30  ;;  %1947 = vmatprep.mubr.bf16.mxu0 %v1377_v3  ;;  %v5561_v10 = vmul.f32 %v989_v37, %v5516_v22  ;;  %4094 = vtanh.f32 %v1137_v50  ;;  %v1081_v9 = vadd.f32 %v6977_v46, %v5250_v43  ;;  %v6981_v46 = vld [vmem:[#allocation12_spill] sm:$0xff] }
 0x19c   :  { %v1085_v56 = vadd.f32 %v5352_v53, %v5267_v34  ;;  %v4087_v24 = vpop.eup %4086  ;;  %v821_v41 = vmul.f32 0.5, %v5177_v26  ;;  %4096 = vtanh.f32 %v1141_v42  ;;  %v1080_v55 = vadd.f32 %v6979_v31, %v6978_v28 }
 0x19d   :  { %v1084_v49 = vadd.f32 %v5347_v13, %v5254_v7  ;;  %v4089_v47 = vpop.eup %4088  ;;  %v1257_v37 = vadd.f32 1.0, %v4087_v24  ;;  %4098 = vtanh.f32 %v1136_v4  ;;  %v1145_v44 = vmul.f32 0.7978846, %v1081_v9 }
 0x19e   :  { %v1149_v5 = vmul.f32 0.7978846, %v1085_v56  ;;  %v6980_v52 = vpack.c.bf16 %v5484_v17, %v5481_v6  ;;  %v1261_v53 = vadd.f32 1.0, %v4089_v47  ;;  %4100 = vtanh.f32 %v1140_v20 }
 0x19f   :  { %v1144_v30 = vmul.f32 0.7978846, %v1080_v55  ;;  %v1148_v26 = vmul.f32 0.7978846, %v1084_v49  ;;  %v1321_v3 = vmul.f32 %v1257_v37, %v5500_v48  ;;  %v816_v50 = vmul.f32 0.5, %v6974_v45  ;;  %v6982_v48 = vld [vmem:[#allocation17_spill] sm:$0xff] }
 0x1a0   :  { %1948 = vmatmul.mubr.bf16.vlgmr.msra.gmra.mrb[32].mxu0 %v6980_v52  ;;  %v820_v42 = vmul.f32 0.5, %v5169_v57  ;;  %4102 = vtanh.f32 %v1145_v44  ;;  %v1325_v13 = vmul.f32 %v1261_v53, %v813_v36  ;;  %v1089_v4 = vadd.f32 %v5383_v32, %v5320_v27 }
 0x1a1   :  { %4104 = vtanh.f32 %v1149_v5  ;;  %v1093_v6 = vadd.f32 %v5401_v25, %v5332_v35  ;;  %v825_v17 = vmul.f32 0.5, %v5250_v43  ;;  %v829_v20 = vmul.f32 0.5, %v5267_v34 }
 0x1a2   :  { %4106 = vtanh.f32 %v1144_v30  ;;  %v1088_v9 = vadd.f32 %v6982_v48, %v6981_v46  ;;  %v4091_v45 = vpop.eup %4090  ;;  %v1381_v56 = vpack.c.bf16 %v1325_v13, %v1321_v3  ;;  %v1153_v57 = vmul.f32 0.7978846, %v1089_v4 }
 0x1a3   :  { %4108 = vtanh.f32 %v1148_v26  ;;  %v1157_v36 = vmul.f32 0.7978846, %v1093_v6  ;;  %v4093_v24 = vpop.eup %4092  ;;  %v1256_v31 = vadd.f32 1.0, %v4091_v45  ;;  %v824_v32 = vmul.f32 0.5, %v6978_v28 }
 0x1a4   :  { %v1092_v25 = vadd.f32 %v5397_v40, %v5328_v58  ;;  %v1152_v55 = vmul.f32 0.7978846, %v1088_v9  ;;  %1957 = vmatprep.mubr.bf16.mxu0 %v1381_v56  ;;  %v1260_v43 = vadd.f32 1.0, %v4093_v24  ;;  %v828_v34 = vmul.f32 0.5, %v5254_v7 }
 0x1a5   :  { %4110 = vtanh.f32 %v1153_v57  ;;  %v1097_v49 = vadd.f32 %v5415_v60, %v5379_v38  ;;  %v4095_v47 = vpop.eup %4094  ;;  %v1320_v37 = vmul.f32 %v1256_v31, %v5540_v12  ;;  %v1101_v28 = vadd.f32 %v5471_v14, %v5394_v1  ;;  %v6983_v57 = vld [vmem:[#allocation10_spill] sm:$0xff] }
 0x1a6   :  { %4112 = vtanh.f32 %v1157_v36  ;;  %v1156_v44 = vmul.f32 0.7978846, %v1092_v25  ;;  %v4097_v5 = vpop.eup %4096  ;;  %v1324_v40 = vmul.f32 %v1260_v43, %v5548_v29  ;;  %v1265_v52 = vadd.f32 1.0, %v4095_v47 }
 0x1a7   :  { %4114 = vtanh.f32 %v1152_v55  ;;  %v1161_v53 = vmul.f32 0.7978846, %v1097_v49  ;;  %v4099_v30 = vpop.eup %4098  ;;  %v1269_v7 = vadd.f32 1.0, %v4097_v5  ;;  %v833_v26 = vmul.f32 0.5, %v5320_v27 }
 0x1a8   :  { %4116 = vtanh.f32 %v1156_v44  ;;  %v1165_v60 = vmul.f32 0.7978846, %v1101_v28  ;;  %v4101_v3 = vpop.eup %4100  ;;  %v1380_v13 = vpack.c.bf16 %v1324_v40, %v1320_v37  ;;  %v1329_v12 = vmul.f32 %v1265_v52, %v5558_v23 }
 0x1a9   :  { %v1264_v4 = vadd.f32 1.0, %v4099_v30  ;;  %4118 = vtanh.f32 %v1161_v53  ;;  %v1333_v14 = vmul.f32 %v1269_v7, %v821_v41  ;;  %v1268_v48 = vadd.f32 1.0, %v4101_v3 }
 0x1aa   :  { %v4103_v6 = vpop.eup %4102  ;;  %v837_v29 = vmul.f32 0.5, %v5332_v35  ;;  %4120 = vtanh.f32 %v1165_v60  ;;  %1958 = vmatmul.mubr.bf16.gmra.mrb[36].mxu0 %v1380_v13  ;;  %v1096_v27 = vadd.f32 %v5411_v63, %v5370_v18  ;;  %v1100_v36 = vadd.f32 %v6983_v57, %v5388_v51 }
 0x1ab   :  { %v4105_v9 = vpop.eup %4104  ;;  %v1328_v45 = vmul.f32 %v1264_v4, %v816_v50  ;;  %v1273_v56 = vadd.f32 1.0, %v4103_v6  ;;  %v1385_v23 = vpack.c.bf16 %v1333_v14, %v1329_v12  ;;  %v1332_v31 = vmul.f32 %v1268_v48, %v820_v42 }
 0x1ac   :  { %v4107_v24 = vpop.eup %4106  ;;  %v1277_v25 = vadd.f32 1.0, %v4105_v9  ;;  %v832_v41 = vmul.f32 0.5, %v6981_v46  ;;  %v1160_v49 = vmul.f32 0.7978846, %v1096_v27  ;;  %v1164_v47 = vmul.f32 0.7978846, %v1100_v36 }
 0x1ad   :  { %v4109_v55 = vpop.eup %4108  ;;  %v1337_v43 = vmul.f32 %v1273_v56, %v825_v17  ;;  %v1272_v35 = vadd.f32 1.0, %v4107_v24  ;;  %1967 = vmatprep.mubr.bf16.mxu0 %v1385_v23  ;;  %v1384_v50 = vpack.c.bf16 %v1332_v31, %v1328_v45  ;;  %v836_v63 = vmul.f32 0.5, %v5328_v58 }
 0x1ae   :  { %v1341_v37 = vmul.f32 %v1277_v25, %v829_v20  ;;  %v1276_v44 = vadd.f32 1.0, %v4109_v55  ;;  %4122 = vtanh.f32 %v1160_v49  ;;  %v1105_v42 = vadd.f32 %v5490_v11, %v5438_v61 }
 0x1af   :  { %v4111_v28 = vpop.eup %4110  ;;  %v1336_v5 = vmul.f32 %v1272_v35, %v824_v32  ;;  %v1109_v46 = vadd.f32 %v5524_v39, %v5460_v21  ;;  %4124 = vtanh.f32 %v1164_v47  ;;  %v841_v20 = vmul.f32 0.5, %v5379_v38 }
 0x1b0   :  { %v4113_v40 = vpop.eup %4112  ;;  %v1389_v17 = vpack.c.bf16 %v1341_v37, %v1337_v43  ;;  %v1340_v52 = vmul.f32 %v1276_v44, %v828_v34  ;;  %v1281_v53 = vadd.f32 1.0, %v4111_v28  ;;  %v1169_v60 = vmul.f32 0.7978846, %v1105_v42 }
 0x1b1   :  { %v4115_v30 = vpop.eup %4114  ;;  %v1285_v7 = vadd.f32 1.0, %v4113_v40  ;;  %v1173_v58 = vmul.f32 0.7978846, %v1109_v46  ;;  %v845_v11 = vmul.f32 0.5, %v5394_v1  ;;  %v1104_v34 = vadd.f32 %v5487_v0, %v5419_v16 }
 0x1b2   :  { %v4117_v3 = vpop.eup %4116  ;;  %v1388_v32 = vpack.c.bf16 %v1340_v52, %v1336_v5  ;;  %v1345_v13 = vmul.f32 %v1281_v53, %v833_v26  ;;  %v1280_v12 = vadd.f32 1.0, %v4115_v30  ;;  %1968 = vmatmul.mubr.bf16.gmra.mrb[40].mxu0 %v1384_v50  ;;  %4126 = vtanh.f32 %v1169_v60 }
 0x1b3   :  { %v4119_v4 = vpop.eup %4118  ;;  %v1349_v39 = vmul.f32 %v1285_v7, %v837_v29  ;;  %v1284_v6 = vadd.f32 1.0, %v4117_v3  ;;  %1977 = vmatprep.mubr.bf16.mxu0 %v1389_v17  ;;  %4128 = vtanh.f32 %v1173_v58  ;;  %v1108_v9 = vadd.f32 %v5512_v2, %v5456_v54 }
 0x1b4   :  { %v4121_v14 = vpop.eup %4120  ;;  %v1344_v48 = vmul.f32 %v1280_v12, %v832_v41  ;;  %v1289_v38 = vadd.f32 1.0, %v4119_v4  ;;  %v1168_v1 = vmul.f32 0.7978846, %v1104_v34  ;;  %v1113_v0 = vadd.f32 %v5536_v19, %v5476_v8 }
 0x1b5   :  { %v1393_v26 = vpack.c.bf16 %v1349_v39, %v1345_v13  ;;  %v1348_v45 = vmul.f32 %v1284_v6, %v836_v63  ;;  %v1293_v56 = vadd.f32 1.0, %v4121_v14  ;;  %v1172_v57 = vmul.f32 0.7978846, %v1108_v9 }
 0x1b6   :  { %v1353_v27 = vmul.f32 %v1289_v38, %v841_v20  ;;  %4130 = vtanh.f32 %v1168_v1  ;;  %v840_v24 = vmul.f32 0.5, %v5370_v18  ;;  %v844_v23 = vmul.f32 0.5, %v5388_v51  ;;  %v4270_v1 = vld [vmem:[%s6862_s0] sm:$0xff] }
 0x1b7   :  { %v1392_v29 = vpack.c.bf16 %v1348_v45, %v1344_v48  ;;  %v1357_v36 = vmul.f32 %v1293_v56, %v845_v11  ;;  %4132 = vtanh.f32 %v1172_v57  ;;  %v1117_v2 = vadd.f32 %v5561_v10, %v5516_v22  ;;  %v6985_v45 = vld [vmem:[#allocation3_spill] sm:$0xff] }
 0x1b8   :  { %v4123_v31 = vpop.eup %4122  ;;  %v1177_v41 = vmul.f32 0.7978846, %v1113_v0  ;;  %v1112_v55 = vadd.f32 %v5533_v59, %v5466_v15  ;;  %v1116_v43 = vadd.f32 %v5555_v33, %v5509_v62  ;;  %v849_v10 = vmul.f32 0.5, %v5438_v61 }
 0x1b9   :  { %v1397_v25 = vpack.c.bf16 %v1357_v36, %v1353_v27  ;;  %v4125_v35 = vpop.eup %4124  ;;  %v1288_v49 = vadd.f32 1.0, %v4123_v31  ;;  %v1181_v19 = vmul.f32 0.7978846, %v1117_v2  ;;  %v853_v59 = vmul.f32 0.5, %v5460_v21 }
 0x1ba   :  { %1978 = vmatmul.mubr.bf16.gmra.mrb[44].mxu0 %v1388_v32  ;;  %v1292_v18 = vadd.f32 1.0, %v4125_v35  ;;  %4134 = vtanh.f32 %v1177_v41  ;;  %v1176_v51 = vmul.f32 0.7978846, %v1112_v55  ;;  %v1180_v47 = vmul.f32 0.7978846, %v1116_v43 }
 0x1bb   :  { %1987 = vmatprep.mubr.bf16.mxu0 %v1393_v26  ;;  %v1352_v50 = vmul.f32 %v1288_v49, %v840_v24  ;;  %4136 = vtanh.f32 %v1181_v19  ;;  %v848_v46 = vmul.f32 0.5, %v5419_v16  ;;  %v852_v52 = vmul.f32 0.5, %v5456_v54  ;;  %v6984_v26 = vld [vmem:[#allocation2_spill] sm:$0xff] }
 0x1bc   :  { %v4127_v37 = vpop.eup %4126  ;;  %v1356_v44 = vmul.f32 %v1292_v18, %v844_v23  ;;  %4138 = vtanh.f32 %v1176_v51  ;;  %v857_v20 = vmul.f32 0.5, %v5476_v8  ;;  %v861_v3 = vmul.f32 0.5, %v5516_v22  ;;  %v4271_v23 = vld [vmem:[%s6862_s0 + $0x8] sm:$0xff] }
 0x1bd   :  { %v4129_v63 = vpop.eup %4128  ;;  %v1297_v33 = vadd.f32 1.0, %v4127_v37  ;;  %4140 = vtanh.f32 %v1180_v47  ;;  %v856_v16 = vmul.f32 0.5, %v5466_v15  ;;  %v860_v4 = vmul.f32 0.5, %v5509_v62  ;;  %v1470_v15 = vld [vmem:[%s6865_s4] sm:$0x3] }
 0x1be   :  { %v1396_v28 = vpack.c.bf16 %v1356_v44, %v1352_v50  ;;  %v1301_v5 = vadd.f32 1.0, %v4129_v63  ;;  %v5637_v62 = vrot.slane %v1470_v15, %v6984_v26  ;;  %v5640_v56 = vrot.slane %v1470_v15, %v6985_v45  ;;  %v4272_v50 = vld [vmem:[%s6862_s0 + $0x10] sm:$0xff] }
 0x1bf   :  { %v1361_v42 = vmul.f32 %v1297_v33, %v849_v10  ;;  %v54_v27 = vunpack.c.l.bf16 %v4270_v1  ;;  %v56_v2 = vunpack.c.l.bf16 %v4271_v23  ;;  %v58_v10 = vunpack.c.l.bf16 %v4272_v50  ;;  %v4276_v15 = vld [vmem:[%s6862_s0 + $0x30] sm:$0xff] }
 0x1c0   :  { %v4131_v40 = vpop.eup %4130  ;;  %v1365_v17 = vmul.f32 %v1301_v5, %v853_v59  ;;  %v59_v44 = vunpack.c.h.bf16 %v4272_v50 }
 0x1c1   :  { %v4133_v53 = vpop.eup %4132  ;;  %v1296_v61 = vadd.f32 1.0, %v4131_v40 }
 0x1c2   :  { %1988 = vmatmul.mubr.bf16.gmra.mrb[48].mxu0 %v1392_v29  ;;  %v1401_v30 = vpack.c.bf16 %v1365_v17, %v1361_v42  ;;  %v1300_v7 = vadd.f32 1.0, %v4133_v53  ;;  %v55_v29 = vunpack.c.h.bf16 %v4270_v1  ;;  %v66_v1 = vunpack.c.l.bf16 %v4276_v15 }
 0x1c3   :  { %1997 = vmatprep.mubr.bf16.mxu0 %v1397_v25  ;;  %v1360_v21 = vmul.f32 %v1296_v61, %v848_v46  ;;  %v57_v25 = vunpack.c.h.bf16 %v4271_v23 }
 0x1c4   :  { %v4135_v60 = vpop.eup %4134  ;;  %v1364_v58 = vmul.f32 %v1300_v7, %v852_v52 }
 0x1c5   :  { %v4137_v32 = vpop.eup %4136  ;;  %v1305_v13 = vadd.f32 1.0, %v4135_v60 }
 0x1c6   :  { %v4139_v12 = vpop.eup %4138  ;;  %v1400_v11 = vpack.c.bf16 %v1364_v58, %v1360_v21  ;;  %v1309_v54 = vadd.f32 1.0, %v4137_v32 }
 0x1c7   :  { %v4141_v39 = vpop.eup %4140  ;;  %v1369_v6 = vmul.f32 %v1305_v13, %v857_v20  ;;  %v1304_v34 = vadd.f32 1.0, %v4139_v12  ;;  %v4274_v20 = vld [vmem:[%s6862_s0 + $0x20] sm:$0xff] }
 0x1c8   :  { %v1373_v14 = vmul.f32 %v1309_v54, %v861_v3  ;;  %v1308_v48 = vadd.f32 1.0, %v4141_v39  ;;  %v62_v60 = vunpack.c.l.bf16 %v4274_v20  ;;  %v63_v3 = vunpack.c.h.bf16 %v4274_v20 }
 0x1c9   :  { %v1368_v38 = vmul.f32 %v1304_v34, %v856_v16  ;;  %v4275_v16 = vld [vmem:[%s6862_s0 + $0x28] sm:$0xff] }
 0x1ca   :  { %1998 = vmatmul.mubr.bf16.gmra.mrb[52].mxu0 %v1396_v28  ;;  %v1405_v8 = vpack.c.bf16 %v1373_v14, %v1369_v6  ;;  %v1372_v9 = vmul.f32 %v1308_v48, %v860_v4  ;;  %v4273_v28 = vld [vmem:[%s6862_s0 + $0x18] sm:$0xff]  ;;  %v64_v12 = vunpack.c.l.bf16 %v4275_v16  ;;  %v65_v4 = vunpack.c.h.bf16 %v4275_v16 }
 0x1cb   :  { %2007 = vmatprep.mubr.bf16.mxu0 %v1401_v30  ;;  %v60_v5 = vunpack.c.l.bf16 %v4273_v28  ;;  %v61_v46 = vunpack.c.h.bf16 %v4273_v28 }
 0x1cc   :  { %v1404_v22 = vpack.c.bf16 %v1372_v9, %v1368_v38 }
 0x1d2   :  { %2008 = vmatmul.mubr.bf16.gmra.mrb[56].mxu0 %v1400_v11 }
 0x1d3   :  { %2017 = vmatprep.mubr.bf16.mxu0 %v1405_v8 }
 0x1da   :  { %2018 = vmatmul.mubr.bf16.gmra.mrb[60].mxu0 %v1404_v22 }
 0x273   :  { %v1949_v57 = vpop.f32.mrb[32].mxu0 }
 0x274   :  { %v3694_v36 = vadd.f32 %v1949_v57, %v5637_v62  ;;  %v1951_v0 = vpop.f32.mrb[33].mxu0  ;;  %v67_v57 = vunpack.c.h.bf16 %v4276_v15 }
 0x275   :  { %v3695_v24 = vadd.f32 %v1951_v0, %v5640_v56  ;;  %v1953_v31 = vpop.f32.mrb[34].mxu0 }
 0x276   :  { %v3696_v41 = vadd.f32 %v1953_v31, %v5637_v62  ;;  %v1955_v55 = vpop.f32.mrb[35].mxu0  ;;  %v5651_v43 = vadd.f32 %v3694_v36, %v54_v27 }
 0x277   :  { %v3697_v35 = vadd.f32 %v1955_v55, %v5640_v56  ;;  %v5654_v49 = vadd.f32 %v3695_v24, %v55_v29  ;;  %v4277_v24 = vld [vmem:[%s6862_s0 + $0x38] sm:$0xff] }
 0x278   :  { %v5656_v19 = vadd.f32 %v3696_v41, %v56_v2  ;;  %v68_v23 = vunpack.c.l.bf16 %v4277_v24 }
 0x279   :  { %v5658_v18 = vadd.f32 %v3697_v35, %v57_v25  ;;  %v2062_v51 = vadd.f32 %v5654_v49, %v5651_v43  ;;  %v69_v25 = vunpack.c.h.bf16 %v4277_v24 }
 0x27b   :  { %2063 = vadd.xlane.f32.xlu0 %v2062_v51  ;;  %v2065_v47 = vadd.f32 %v5658_v18, %v5656_v19 }
 0x27d   :  { %v1959_v37 = vpop.f32.mrb[36].mxu0 }
 0x27e   :  { %v3698_v59 = vadd.f32 %v1959_v37, %v5637_v62  ;;  %v1961_v63 = vpop.f32.mrb[37].mxu0 }
 0x27f   :  { %2066 = vadd.xlane.f32.xlu0 %v2065_v47  ;;  %v3699_v33 = vadd.f32 %v1961_v63, %v5640_v56  ;;  %v1963_v42 = vpop.f32.mrb[38].mxu0 }
 0x280   :  { %v3700_v40 = vadd.f32 %v1963_v42, %v5637_v62  ;;  %v1965_v17 = vpop.f32.mrb[39].mxu0  ;;  %v5673_v52 = vadd.f32 %v3698_v59, %v58_v10 }
 0x281   :  { %v3701_v53 = vadd.f32 %v1965_v17, %v5640_v56  ;;  %v5676_v61 = vadd.f32 %v3699_v33, %v59_v44  ;;  %v4278_v44 = vld [vmem:[%s6862_s0 + $0x40] sm:$0xff] }
 0x282   :  { %v5678_v30 = vadd.f32 %v3700_v40, %v60_v5  ;;  %v70_v59 = vunpack.c.l.bf16 %v4278_v44  ;;  %v71_v33 = vunpack.c.h.bf16 %v4278_v44 }
 0x283   :  { %v5680_v7 = vadd.f32 %v3701_v53, %v61_v46  ;;  %v2068_v21 = vadd.f32 %v5676_v61, %v5673_v52  ;;  %v4279_v46 = vld [vmem:[%s6862_s0 + $0x48] sm:$0xff] }
 0x284   :  { %v72_v40 = vunpack.c.l.bf16 %v4279_v46 }
 0x285   :  { %v1969_v58 = vpop.f32.mrb[40].mxu0  ;;  %2069 = vadd.xlane.f32.xlu1 %v2068_v21  ;;  %v2071_v39 = vadd.f32 %v5680_v7, %v5678_v30  ;;  %v73_v21 = vunpack.c.h.bf16 %v4279_v46 }
 0x286   :  { %v3702_v32 = vadd.f32 %v1969_v58, %v5637_v62  ;;  %v1971_v13 = vpop.f32.mrb[41].mxu0 }
 0x287   :  { %v3703_v11 = vadd.f32 %v1971_v13, %v5640_v56  ;;  %v1973_v54 = vpop.f32.mrb[42].mxu0 }
 0x288   :  { %v5694_v6 = vadd.f32 %v3702_v32, %v62_v60  ;;  %v3704_v34 = vadd.f32 %v1973_v54, %v5637_v62  ;;  %v1975_v14 = vpop.f32.mrb[43].mxu0 }
 0x289   :  { %v5697_v48 = vadd.f32 %v3703_v11, %v63_v3  ;;  %v3705_v38 = vadd.f32 %v1975_v14, %v5640_v56  ;;  %2072 = vadd.xlane.f32.xlu1 %v2071_v39  ;;  %v4280_v11 = vld [vmem:[%s6862_s0 + $0x50] sm:$0xff] }
 0x28a   :  { %v5700_v8 = vadd.f32 %v3704_v34, %v64_v12  ;;  %v74_v54 = vunpack.c.l.bf16 %v4280_v11  ;;  %v75_v39 = vunpack.c.h.bf16 %v4280_v11  ;;  %v4284_v11 = vld [vmem:[%s6862_s0 + $0x70] sm:$0xff] }
 0x28b   :  { %v5702_v9 = vadd.f32 %v3705_v38, %v65_v4  ;;  %v2074_v22 = vadd.f32 %v5697_v48, %v5694_v6 }
 0x28d   :  { %v1979_v27 = vpop.f32.mrb[44].mxu0  ;;  %2075 = vadd.xlane.f32.xlu0 %v2074_v22  ;;  %v2077_v29 = vadd.f32 %v5702_v9, %v5700_v8  ;;  %v4281_v22 = vld [vmem:[%s6862_s0 + $0x58] sm:$0xff] }
 0x28e   :  { %v3706_v36 = vadd.f32 %v1979_v27, %v5637_v62  ;;  %v1981_v0 = vpop.f32.mrb[45].mxu0  ;;  %v76_v15 = vunpack.c.l.bf16 %v4281_v22 }
 0x28f   :  { %v3707_v2 = vadd.f32 %v1981_v0, %v5640_v56  ;;  %v1983_v31 = vpop.f32.mrb[46].mxu0  ;;  %2078 = vadd.xlane.f32.xlu1 %v2077_v29 }
 0x290   :  { %v5716_v41 = vadd.f32 %v3706_v36, %v66_v1  ;;  %v3708_v55 = vadd.f32 %v1983_v31, %v5637_v62  ;;  %v1985_v35 = vpop.f32.mrb[47].mxu0 }
 0x291   :  { %v5719_v51 = vadd.f32 %v3707_v2, %v67_v57  ;;  %v3709_v47 = vadd.f32 %v1985_v35, %v5640_v56  ;;  %v77_v57 = vunpack.c.h.bf16 %v4281_v22  ;;  %v4285_v22 = vld [vmem:[%s6862_s0 + $0x78] sm:$0xff] }
 0x292   :  { %v5722_v50 = vadd.f32 %v3708_v55, %v68_v23  ;;  %v4282_v55 = vld [vmem:[%s6862_s0 + $0x60] sm:$0xff] }
 0x293   :  { %v5724_v10 = vadd.f32 %v3709_v47, %v69_v25  ;;  %v2080_v37 = vadd.f32 %v5719_v51, %v5716_v41  ;;  %v78_v35 = vunpack.c.l.bf16 %v4282_v55 }
 0x295   :  { %v1989_v63 = vpop.f32.mrb[48].mxu0  ;;  %2081 = vadd.xlane.f32.xlu0 %v2080_v37  ;;  %v2083_v28 = vadd.f32 %v5724_v10, %v5722_v50  ;;  %v79_v37 = vunpack.c.h.bf16 %v4282_v55 }
 0x296   :  { %v3710_v5 = vadd.f32 %v1989_v63, %v5637_v62  ;;  %v1991_v42 = vpop.f32.mrb[49].mxu0 }
 0x297   :  { %v3711_v17 = vadd.f32 %v1991_v42, %v5640_v56  ;;  %v1993_v53 = vpop.f32.mrb[50].mxu0  ;;  %2084 = vadd.xlane.f32.xlu1 %v2083_v28 }
 0x298   :  { %v5738_v20 = vadd.f32 %v3710_v5, %v70_v59  ;;  %v3712_v60 = vadd.f32 %v1993_v53, %v5637_v62  ;;  %v1995_v58 = vpop.f32.mrb[51].mxu0 }
 0x299   :  { %v5741_v3 = vadd.f32 %v3711_v17, %v71_v33  ;;  %v3713_v32 = vadd.f32 %v1995_v58, %v5640_v56  ;;  %v4283_v33 = vld [vmem:[%s6862_s0 + $0x68] sm:$0xff] }
 0x29a   :  { %v5744_v13 = vadd.f32 %v3712_v60, %v72_v40  ;;  %v80_v28 = vunpack.c.l.bf16 %v4283_v33  ;;  %v81_v46 = vunpack.c.h.bf16 %v4283_v33  ;;  %v3974_v33 = vld [vmem:[%s6866_s7 + $0x24] ss:$8 sps:$4 sm:$0xff]  }
 0x29b   :  { %v5746_v16 = vadd.f32 %v3713_v32, %v73_v21  ;;  %v2086_v12 = vadd.f32 %v5741_v3, %v5738_v20 }
 0x29d   :  { %v1999_v4 = vpop.f32.mrb[52].mxu0  ;;  %2087 = vadd.xlane.f32.xlu0 %v2086_v12  ;;  %v2089_v34 = vadd.f32 %v5746_v16, %v5744_v13 }
 0x29e   :  { %v3714_v14 = vadd.f32 %v1999_v4, %v5637_v62  ;;  %v2001_v38 = vpop.f32.mrb[53].mxu0 }
 0x29f   :  { %v3715_v1 = vadd.f32 %v2001_v38, %v5640_v56  ;;  %v2003_v27 = vpop.f32.mrb[54].mxu0  ;;  %2090 = vadd.xlane.f32.xlu1 %v2089_v34 }
 0x2a0   :  { %v5760_v29 = vadd.f32 %v3714_v14, %v74_v54  ;;  %v3716_v36 = vadd.f32 %v2003_v27, %v5637_v62  ;;  %v2005_v0 = vpop.f32.mrb[55].mxu0  ;;  %v82_v54 = vunpack.c.l.bf16 %v4284_v11 }
 0x2a1   :  { %v5763_v24 = vadd.f32 %v3715_v1, %v75_v39  ;;  %v3717_v23 = vadd.f32 %v2005_v0, %v5640_v56  ;;  %v83_v39 = vunpack.c.h.bf16 %v4284_v11  ;;  %v3984_v11 = vld [vmem:[%s6866_s7 + $0x60] ss:$8 sps:$4 sm:$0xff]  }
 0x2a2   :  { %v5766_v2 = vadd.f32 %v3716_v36, %v76_v15  ;;  %v84_v15 = vunpack.c.l.bf16 %v4285_v22 }
 0x2a3   :  { %v5768_v31 = vadd.f32 %v3717_v23, %v77_v57  ;;  %v2092_v25 = vadd.f32 %v5763_v24, %v5760_v29  ;;  %v85_v57 = vunpack.c.h.bf16 %v4285_v22 }
 0x2a5   :  { %v2009_v47 = vpop.f32.mrb[56].mxu0  ;;  %2093 = vadd.xlane.f32.xlu0 %v2092_v25  ;;  %v2095_v44 = vadd.f32 %v5768_v31, %v5766_v2 }
 0x2a6   :  { %v3718_v59 = vadd.f32 %v2009_v47, %v5637_v62  ;;  %v2011_v63 = vpop.f32.mrb[57].mxu0 }
 0x2a7   :  { %v3719_v5 = vadd.f32 %v2011_v63, %v5640_v56  ;;  %v2013_v42 = vpop.f32.mrb[58].mxu0  ;;  %2096 = vadd.xlane.f32.xlu1 %v2095_v44  ;;  %v3969_v63 = vld [vmem:[%s6866_s7 + $0x10] ss:$8 sps:$4 sm:$0xff]  }
 0x2a8   :  { %v5782_v40 = vadd.f32 %v3718_v59, %v78_v35  ;;  %v3720_v17 = vadd.f32 %v2013_v42, %v5637_v62  ;;  %v2015_v53 = vpop.f32.mrb[59].mxu0  ;;  %v3971_v59 = vld [vmem:[%s6866_s7 + $0x14] ss:$8 sps:$4 sm:$0xff]   ;;  %v3975_v42 = vld [vmem:[%s6866_s7 + $0x30] ss:$8 sps:$4 sm:$0xff]  }
 0x2a9   :  { %v5785_v21 = vadd.f32 %v3719_v5, %v79_v37  ;;  %v3721_v60 = vadd.f32 %v2015_v53, %v5640_v56  ;;  %v3977_v5 = vld [vmem:[%s6866_s7 + $0x34] ss:$8 sps:$4 sm:$0xff]  }
 0x2aa   :  { %v5788_v58 = vadd.f32 %v3720_v17, %v80_v28  ;;  %v3972_v28 = vld [vmem:[%s6866_s7 + $0x20] ss:$8 sps:$4 sm:$0xff]   ;;  %v3983_v53 = vld [vmem:[%s6866_s7 + $0x54] ss:$8 sps:$4 sm:$0xff]  }
 0x2ab   :  { %v5790_v32 = vadd.f32 %v3721_v60, %v81_v46  ;;  %v2098_v12 = vadd.f32 %v5785_v21, %v5782_v40  ;;  %v3980_v46 = vld [vmem:[%s6866_s7 + $0x44] ss:$8 sps:$4 sm:$0xff]   ;;  %v3978_v17 = vld [vmem:[%s6866_s7 + $0x40] ss:$8 sps:$4 sm:$0xff]   ;;  %v3981_v60 = vld [vmem:[%s6866_s7 + $0x50] ss:$8 sps:$4 sm:$0xff]  }
 0x2ad   :  { %v2019_v4 = vpop.f32.mrb[60].mxu0  ;;  %2099 = vadd.xlane.f32.xlu0 %v2098_v12  ;;  %v2101_v34 = vadd.f32 %v5790_v32, %v5788_v58  ;;  %v3986_v12 = vld [vmem:[%s6866_s7 + $0x64] ss:$8 sps:$4 sm:$0xff]  }
 0x2ae   :  { %v3722_v14 = vadd.f32 %v2019_v4, %v5637_v62  ;;  %v2021_v38 = vpop.f32.mrb[61].mxu0  ;;  %v3987_v4 = vld [vmem:[%s6866_s7 + $0x70] ss:$8 sps:$4 sm:$0xff]  }
 0x2af   :  { %v3723_v1 = vadd.f32 %v2021_v38, %v5640_v56  ;;  %v2023_v27 = vpop.f32.mrb[62].mxu0  ;;  %2102 = vadd.xlane.f32.xlu1 %v2101_v34  ;;  %v3990_v34 = vld [vmem:[%s6866_s7 + $0x80] ss:$8 sps:$4 sm:$0xff]   ;;  %v3993_v38 = vld [vmem:[%s6866_s7 + $0x90] ss:$8 sps:$4 sm:$0xff]  }
 0x2b0   :  { %v5804_v36 = vadd.f32 %v3722_v14, %v82_v54  ;;  %v3724_v0 = vadd.f32 %v2023_v27, %v5637_v62  ;;  %v2025_v23 = vpop.f32.mrb[63].mxu0  ;;  %v3966_v62 = vld [vmem:[%s6866_s7] ss:$8 sps:$4 sm:$0xff]   ;;  %v3989_v54 = vld [vmem:[%s6866_s7 + $0x74] ss:$8 sps:$4 sm:$0xff]  }
 0x2b1   :  { %v5807_v25 = vadd.f32 %v3723_v1, %v83_v39  ;;  %v3725_v55 = vadd.f32 %v2025_v23, %v5640_v56  ;;  %v3968_v56 = vld [vmem:[%s6866_s7 + $0x4] ss:$8 sps:$4 sm:$0xff]   ;;  %v3995_v14 = vld [vmem:[%s6866_s7 + $0x94] ss:$8 sps:$4 sm:$0xff]  }
 0x2b2   :  { %v5810_v35 = vadd.f32 %v3724_v0, %v84_v15  ;;  %2625 = vmatprep.subr.bf16.mxu1 %v3968_v56  ;;  %v3992_v39 = vld [vmem:[%s6866_s7 + $0x84] ss:$8 sps:$4 sm:$0xff]  }
 0x2b3   :  { %v5812_v47 = vadd.f32 %v3725_v55, %v85_v57  ;;  %v2104_v37 = vadd.f32 %v5807_v25, %v5804_v36  ;;  %2626 = vmatpush1.bf16.msra.mxu1 %v3966_v62 }
 0x2b4   :  { %2627 = vmatprep.subr.bf16.mxu1 %v3971_v59 }
 0x2b5   :  { %2105 = vadd.xlane.f32.xlu0 %v2104_v37  ;;  %v2107_v44 = vadd.f32 %v5812_v47, %v5810_v35 }
 0x2b7   :  { %2108 = vadd.xlane.f32.xlu1 %v2107_v44  ;;  %2628 = vmatpush1.bf16.msra.mxu1 %v3969_v63 }
 0x2b8   :  { %2629 = vmatprep.subr.bf16.mxu1 %v3974_v33 }
 0x2bb   :  { %2630 = vmatpush1.bf16.msra.mxu1 %v3972_v28 }
 0x2bc   :  { %2631 = vmatprep.subr.bf16.mxu1 %v3977_v5 }
 0x2bf   :  { %2632 = vmatpush1.bf16.msra.mxu1 %v3975_v42 }
 0x2c0   :  { %2633 = vmatprep.subr.bf16.mxu1 %v3980_v46 }
 0x2c3   :  { %2634 = vmatpush1.bf16.msra.mxu1 %v3978_v17 }
 0x2c4   :  { %2635 = vmatprep.subr.bf16.mxu1 %v3983_v53 }
 0x2c7   :  { %2636 = vmatpush1.bf16.msra.mxu1 %v3981_v60 }
 0x2c8   :  { %2637 = vmatprep.subr.bf16.mxu1 %v3986_v12 }
 0x2cb   :  { %2638 = vmatpush1.bf16.msra.mxu1 %v3984_v11 }
 0x2cc   :  { %2639 = vmatprep.subr.bf16.mxu1 %v3989_v54 }
 0x2cf   :  { %2640 = vmatpush1.bf16.msra.mxu1 %v3987_v4 }
 0x2d0   :  { %2641 = vmatprep.subr.bf16.mxu1 %v3992_v39 }
 0x2d3   :  { %2642 = vmatpush1.bf16.msra.mxu1 %v3990_v34 }
 0x2d4   :  { %2643 = vmatprep.subr.bf16.mxu1 %v3995_v14 }
 0x2d7   :  { %2644 = vmatpush1.bf16.msra.mxu1 %v3993_v38 }
 0x308   :  { %v2064_v22 = vpop.xlane.xlu0 %2063 }
 0x309   :  { %v2111_v15 = vmul.f32 0.00390625, %v2064_v22 }
 0x30b   :  { %v5879_v1 = vsub.f32 %v5651_v43, %v2111_v15  ;;  %v5882_v27 = vsub.f32 %v5654_v49, %v2111_v15 }
 0x30c   :  { %v2067_v57 = vpop.xlane.xlu0 %2066 }
 0x30d   :  { %v2112_v0 = vmul.f32 0.00390625, %v2067_v57  ;;  %v2159_v23 = vmul.f32 %v5879_v1, %v5879_v1  ;;  %v2160_v55 = vmul.f32 %v5882_v27, %v5882_v27 }
 0x30f   :  { %v5889_v37 = vsub.f32 %v5656_v19, %v2112_v0  ;;  %v5892_v44 = vsub.f32 %v5658_v18, %v2112_v0  ;;  %v2191_v62 = vadd.f32 %v2160_v55, %v2159_v23 }
 0x311   :  { %2192 = vadd.xlane.f32.xlu0 %v2191_v62  ;;  %v2161_v43 = vmul.f32 %v5889_v37, %v5889_v37  ;;  %v2162_v49 = vmul.f32 %v5892_v44, %v5892_v44 }
 0x312   :  { %v2070_v59 = vpop.xlane.xlu1 %2069 }
 0x313   :  { %v2194_v56 = vadd.f32 %v2162_v49, %v2161_v43  ;;  %v2113_v63 = vmul.f32 0.00390625, %v2070_v59 }
 0x315   :  { %2195 = vadd.xlane.f32.xlu1 %v2194_v56  ;;  %v5899_v33 = vsub.f32 %v5673_v52, %v2113_v63  ;;  %v5902_v19 = vsub.f32 %v5676_v61, %v2113_v63 }
 0x316   :  { %v2073_v18 = vpop.xlane.xlu1 %2072 }
 0x317   :  { %v2114_v28 = vmul.f32 0.00390625, %v2073_v18  ;;  %v2163_v5 = vmul.f32 %v5899_v33, %v5899_v33  ;;  %v2164_v42 = vmul.f32 %v5902_v19, %v5902_v19 }
 0x319   :  { %v5909_v46 = vsub.f32 %v5678_v30, %v2114_v28  ;;  %v5912_v17 = vsub.f32 %v5680_v7, %v2114_v28  ;;  %v2197_v53 = vadd.f32 %v2164_v42, %v2163_v5 }
 0x31a   :  { %v2076_v52 = vpop.xlane.xlu0 %2075 }
 0x31b   :  { %v2115_v60 = vmul.f32 0.00390625, %v2076_v52  ;;  %2198 = vadd.xlane.f32.xlu0 %v2197_v53  ;;  %v2165_v61 = vmul.f32 %v5909_v46, %v5909_v46  ;;  %v2166_v12 = vmul.f32 %v5912_v17, %v5912_v17  ;;  %v3996_v53 = vld [vmem:[%s6866_s7 + $0xa0] ss:$8 sps:$4 sm:$0xff]   ;;  %v3998_v52 = vld [vmem:[%s6866_s7 + $0xa4] ss:$8 sps:$4 sm:$0xff]  }
 0x31c   :  { %v2079_v11 = vpop.xlane.xlu1 %2078  ;;  %2645 = vmatprep.subr.bf16.mxu1 %v3998_v52  ;;  %v4008_v52 = vld [vmem:[%s6866_s7 + $0xe0] ss:$8 sps:$4 sm:$0xff]  }
 0x31d   :  { %v5919_v54 = vsub.f32 %v5694_v6, %v2115_v60  ;;  %v5922_v30 = vsub.f32 %v5697_v48, %v2115_v60  ;;  %v2116_v4 = vmul.f32 0.00390625, %v2079_v11  ;;  %v2200_v7 = vadd.f32 %v2166_v12, %v2165_v61  ;;  %2646 = vmatpush1.bf16.msra.mxu1 %v3996_v53 }
 0x31f   :  { %v5925_v39 = vsub.f32 %v5700_v8, %v2116_v4  ;;  %v5928_v34 = vsub.f32 %v5702_v9, %v2116_v4  ;;  %2201 = vadd.xlane.f32.xlu1 %v2200_v7  ;;  %v2167_v14 = vmul.f32 %v5919_v54, %v5919_v54  ;;  %v2168_v38 = vmul.f32 %v5922_v30, %v5922_v30  ;;  %v4001_v7 = vld [vmem:[%s6866_s7 + $0xb4] ss:$8 sps:$4 sm:$0xff]  }
 0x320   :  { %2647 = vmatprep.subr.bf16.mxu1 %v4001_v7 }
 0x321   :  { %v2203_v6 = vadd.f32 %v2168_v38, %v2167_v14  ;;  %v2169_v48 = vmul.f32 %v5925_v39, %v5925_v39  ;;  %v2170_v22 = vmul.f32 %v5928_v34, %v5928_v34 }
 0x322   :  { %v2082_v15 = vpop.xlane.xlu0 %2081 }
 0x323   :  { %v2117_v8 = vmul.f32 0.00390625, %v2082_v15  ;;  %2204 = vadd.xlane.f32.xlu0 %v2203_v6  ;;  %v2206_v57 = vadd.f32 %v2170_v22, %v2169_v48  ;;  %v4004_v6 = vld [vmem:[%s6866_s7 + $0xc4] ss:$8 sps:$4 sm:$0xff]  }
 0x324   :  { %v2085_v9 = vpop.xlane.xlu1 %2084 }
 0x325   :  { %v5939_v0 = vsub.f32 %v5716_v41, %v2117_v8  ;;  %v5942_v23 = vsub.f32 %v5719_v51, %v2117_v8  ;;  %v2118_v55 = vmul.f32 0.00390625, %v2085_v9  ;;  %2207 = vadd.xlane.f32.xlu1 %v2206_v57  ;;  %v4002_v57 = vld [vmem:[%s6866_s7 + $0xc0] ss:$8 sps:$4 sm:$0xff]   ;;  %v4007_v9 = vld [vmem:[%s6866_s7 + $0xd4] ss:$8 sps:$4 sm:$0xff]  }
 0x327   :  { %v5945_v62 = vsub.f32 %v5722_v50, %v2118_v55  ;;  %v5948_v43 = vsub.f32 %v5724_v10, %v2118_v55  ;;  %v2171_v49 = vmul.f32 %v5939_v0, %v5939_v0  ;;  %v2172_v56 = vmul.f32 %v5942_v23, %v5942_v23 }
 0x329   :  { %v2209_v59 = vadd.f32 %v2172_v56, %v2171_v49  ;;  %v2173_v41 = vmul.f32 %v5945_v62, %v5945_v62  ;;  %v2174_v51 = vmul.f32 %v5948_v43, %v5948_v43 }
 0x32a   :  { %v2088_v63 = vpop.xlane.xlu0 %2087 }
 0x32b   :  { %v2119_v18 = vmul.f32 0.00390625, %v2088_v63  ;;  %2210 = vadd.xlane.f32.xlu0 %v2209_v59  ;;  %v2212_v50 = vadd.f32 %v2174_v51, %v2173_v41  ;;  %v4010_v51 = vld [vmem:[%s6866_s7 + $0xe4] ss:$8 sps:$4 sm:$0xff]  }
 0x32c   :  { %v2091_v28 = vpop.xlane.xlu1 %2090 }
 0x32d   :  { %v5959_v10 = vsub.f32 %v5738_v20, %v2119_v18  ;;  %v5962_v5 = vsub.f32 %v5741_v3, %v2119_v18  ;;  %v2120_v42 = vmul.f32 0.00390625, %v2091_v28  ;;  %2213 = vadd.xlane.f32.xlu1 %v2212_v50 }
 0x32f   :  { %v5971_v60 = vsub.f32 %v5744_v13, %v2120_v42  ;;  %v5974_v61 = vsub.f32 %v5746_v16, %v2120_v42  ;;  %v2175_v20 = vmul.f32 %v5959_v10, %v5959_v10  ;;  %v2176_v3 = vmul.f32 %v5962_v5, %v5962_v5  ;;  %v3999_v16 = vld [vmem:[%s6866_s7 + $0xb0] ss:$8 sps:$4 sm:$0xff]  }
 0x330   :  { %2648 = vmatpush1.bf16.msra.mxu1 %v3999_v16 }
 0x331   :  { %v2215_v12 = vadd.f32 %v2176_v3, %v2175_v20  ;;  %v2177_v11 = vmul.f32 %v5971_v60, %v5971_v60  ;;  %v2178_v4 = vmul.f32 %v5974_v61, %v5974_v61  ;;  %2649 = vmatprep.subr.bf16.mxu1 %v4004_v6  ;;  %v4013_v20 = vld [vmem:[%s6866_s7 + $0xf4] ss:$8 sps:$4 sm:$0xff]  }
 0x332   :  { %v2094_v13 = vpop.xlane.xlu0 %2093 }
 0x333   :  { %v2121_v14 = vmul.f32 0.00390625, %v2094_v13  ;;  %2216 = vadd.xlane.f32.xlu0 %v2215_v12  ;;  %v2218_v38 = vadd.f32 %v2178_v4, %v2177_v11 }
 0x334   :  { %v2097_v48 = vpop.xlane.xlu1 %2096  ;;  %2650 = vmatpush1.bf16.msra.mxu1 %v4002_v57 }
 0x335   :  { %v5994_v22 = vsub.f32 %v5760_v29, %v2121_v14  ;;  %v5997_v15 = vsub.f32 %v5763_v24, %v2121_v14  ;;  %v2122_v8 = vmul.f32 0.00390625, %v2097_v48  ;;  %2219 = vadd.xlane.f32.xlu1 %v2218_v38  ;;  %2651 = vmatprep.subr.bf16.mxu1 %v4007_v9 }
 0x337   :  { %v6006_v55 = vsub.f32 %v5766_v2, %v2122_v8  ;;  %v6009_v29 = vsub.f32 %v5768_v31, %v2122_v8  ;;  %v2179_v24 = vmul.f32 %v5994_v22, %v5994_v22  ;;  %v2180_v49 = vmul.f32 %v5997_v15, %v5997_v15  ;;  %v4005_v2 = vld [vmem:[%s6866_s7 + $0xd0] ss:$8 sps:$4 sm:$0xff]  }
 0x338   :  { %2652 = vmatpush1.bf16.msra.mxu1 %v4005_v2 }
 0x339   :  { %v2221_v56 = vadd.f32 %v2180_v49, %v2179_v24  ;;  %v2181_v59 = vmul.f32 %v6006_v55, %v6006_v55  ;;  %v2182_v41 = vmul.f32 %v6009_v29, %v6009_v29  ;;  %2653 = vmatprep.subr.bf16.mxu1 %v4010_v51 }
 0x33a   :  { %v2100_v31 = vpop.xlane.xlu0 %2099 }
 0x33b   :  { %v2123_v63 = vmul.f32 0.00390625, %v2100_v31  ;;  %2222 = vadd.xlane.f32.xlu0 %v2221_v56  ;;  %v2224_v18 = vadd.f32 %v2182_v41, %v2181_v59 }
 0x33c   :  { %v2103_v50 = vpop.xlane.xlu1 %2102  ;;  %2654 = vmatpush1.bf16.msra.mxu1 %v4008_v52 }
 0x33d   :  { %v6026_v28 = vsub.f32 %v5782_v40, %v2123_v63  ;;  %v6029_v42 = vsub.f32 %v5785_v21, %v2123_v63  ;;  %v2124_v53 = vmul.f32 0.00390625, %v2103_v50  ;;  %2225 = vadd.xlane.f32.xlu1 %v2224_v18  ;;  %2655 = vmatprep.subr.bf16.mxu1 %v4013_v20  ;;  %v2060_v63 = vld [vmem:[%s6867_s5] sm:$0x3] }
 0x33e   :  { %v6078_v52 = vrot.slane %v2060_v63, %v6984_v26 }
 0x33f   :  { %v6038_v3 = vsub.f32 %v5788_v58, %v2124_v53  ;;  %v6041_v40 = vsub.f32 %v5790_v32, %v2124_v53  ;;  %v2183_v21 = vmul.f32 %v6026_v28, %v6026_v28  ;;  %v2184_v12 = vmul.f32 %v6029_v42, %v6029_v42  ;;  %v4011_v58 = vld [vmem:[%s6866_s7 + $0xf0] ss:$8 sps:$4 sm:$0xff]  }
 0x340   :  { %2656 = vmatpush1.bf16.msra.mxu1 %v4011_v58 }
 0x341   :  { %v2227_v11 = vadd.f32 %v2184_v12, %v2183_v21  ;;  %v2185_v4 = vmul.f32 %v6038_v3, %v6038_v3  ;;  %v2186_v13 = vmul.f32 %v6041_v40, %v6041_v40  ;;  %v2061_v12 = vld [vmem:[%s6868_s6] sm:$0x3] }
 0x342   :  { %v2106_v32 = vpop.xlane.xlu0 %2105 }
 0x343   :  { %v2125_v16 = vmul.f32 0.00390625, %v2106_v32  ;;  %2228 = vadd.xlane.f32.xlu0 %v2227_v11  ;;  %v2230_v7 = vadd.f32 %v2186_v13, %v2185_v4  ;;  %v6086_v4 = vrot.slane %v2060_v63, %v6985_v45 }
 0x344   :  { %v2109_v14 = vpop.xlane.xlu1 %2108 }
 0x345   :  { %v6055_v38 = vsub.f32 %v5804_v36, %v2125_v16  ;;  %v6058_v6 = vsub.f32 %v5807_v25, %v2125_v16  ;;  %v2126_v48 = vmul.f32 0.00390625, %v2109_v14  ;;  %2231 = vadd.xlane.f32.xlu1 %v2230_v7  ;;  %v6089_v16 = vrot.slane %v2061_v12, %v6984_v26 }
 0x346   :  { %v6092_v7 = vrot.slane %v2061_v12, %v6985_v45 }
 0x347   :  { %v6061_v8 = vsub.f32 %v5810_v35, %v2126_v48  ;;  %v6064_v57 = vsub.f32 %v5812_v47, %v2126_v48  ;;  %v2187_v9 = vmul.f32 %v6055_v38, %v6055_v38  ;;  %v2188_v24 = vmul.f32 %v6058_v6, %v6058_v6 }
 0x349   :  { %v2233_v36 = vadd.f32 %v2188_v24, %v2187_v9  ;;  %v2189_v25 = vmul.f32 %v6061_v8, %v6061_v8  ;;  %v2190_v49 = vmul.f32 %v6064_v57, %v6064_v57 }
 0x34b   :  { %2234 = vadd.xlane.f32.xlu0 %v2233_v36  ;;  %v2236_v56 = vadd.f32 %v2190_v49, %v2189_v25 }
 0x34d   :  { %2237 = vadd.xlane.f32.xlu1 %v2236_v56 }
 0x39e   :  { %v2193_v35 = vpop.xlane.xlu0 %2192 }
 0x39f   :  { %v2239_v59 = vmul.f32 0.00390625, %v2193_v35 }
 0x3a1   :  { %v2255_v47 = vadd.f32 1e-12, %v2239_v59 }
 0x3a2   :  { %v2196_v41 = vpop.xlane.xlu1 %2195 }
 0x3a3   :  { %4142 = vrsqrt.f32 %v2255_v47  ;;  %v2240_v2 = vmul.f32 0.00390625, %v2196_v41 }
 0x3a5   :  { %v2256_v31 = vadd.f32 1e-12, %v2240_v2 }
 0x3a7   :  { %4144 = vrsqrt.f32 %v2256_v31 }
 0x3a8   :  { %v2199_v51 = vpop.xlane.xlu0 %2198 }
 0x3a9   :  { %v2241_v18 = vmul.f32 0.00390625, %v2199_v51 }
 0x3ab   :  { %v2257_v53 = vadd.f32 1e-12, %v2241_v18 }
 0x3ac   :  { %v2202_v21 = vpop.xlane.xlu1 %2201 }
 0x3ad   :  { %v4143_v50 = vpop.eup %4142  ;;  %4146 = vrsqrt.f32 %v2257_v53  ;;  %v2242_v13 = vmul.f32 0.00390625, %v2202_v21 }
 0x3ae   :  { %v2287_v20 = vmul.f32 %v4143_v50, %v5879_v1  ;;  %v2288_v11 = vmul.f32 %v4143_v50, %v5882_v27 }
 0x3af   :  { %v2258_v32 = vadd.f32 1e-12, %v2242_v13 }
 0x3b0   :  { %v2330_v1 = vmul.f32 %v6078_v52, %v2287_v20  ;;  %v2205_v48 = vpop.xlane.xlu0 %2204  ;;  %v2331_v9 = vmul.f32 %v6086_v4, %v2288_v11 }
 0x3b1   :  { %v4145_v58 = vpop.eup %4144  ;;  %4148 = vrsqrt.f32 %v2258_v32  ;;  %v2243_v24 = vmul.f32 0.00390625, %v2205_v48 }
 0x3b2   :  { %v2289_v14 = vmul.f32 %v4145_v58, %v5889_v37  ;;  %v2290_v27 = vmul.f32 %v4145_v58, %v5892_v44  ;;  %v2208_v25 = vpop.xlane.xlu1 %2207  ;;  %v2374_v59 = vadd.f32 %v6092_v7, %v2331_v9  ;;  %v2373_v37 = vadd.f32 %v6089_v16, %v2330_v1 }
 0x3b3   :  { %v2259_v56 = vadd.f32 1e-12, %v2243_v24  ;;  %v2244_v35 = vmul.f32 0.00390625, %v2208_v25 }
 0x3b4   :  { %v2332_v36 = vmul.f32 %v6078_v52, %v2289_v14  ;;  %v2333_v49 = vmul.f32 %v6086_v4, %v2290_v27 }
 0x3b5   :  { %4150 = vrsqrt.f32 %v2259_v56  ;;  %v2260_v44 = vadd.f32 1e-12, %v2244_v35 }
 0x3b6   :  { %v2376_v47 = vadd.f32 %v6092_v7, %v2333_v49  ;;  %v2375_v41 = vadd.f32 %v6089_v16, %v2332_v36 }
 0x3b7   :  { %v4147_v51 = vpop.eup %4146  ;;  %4152 = vrsqrt.f32 %v2260_v44 }
 0x3b8   :  { %v2406_v2 = vpack.c.bf16 %v2376_v47, %v2374_v59  ;;  %v2405_v31 = vpack.c.bf16 %v2375_v41, %v2373_v37  ;;  %v2211_v63 = vpop.xlane.xlu0 %2210  ;;  %v2292_v18 = vmul.f32 %v4147_v51, %v5902_v19  ;;  %v2291_v50 = vmul.f32 %v4147_v51, %v5899_v33 }
 0x3b9   :  { %v2245_v53 = vmul.f32 0.00390625, %v2211_v63 }
 0x3ba   :  { %2657 = vmatprep.mubr.bf16.mxu1 %v2406_v2  ;;  %v2214_v20 = vpop.xlane.xlu1 %2213  ;;  %v2335_v13 = vmul.f32 %v6086_v4, %v2292_v18  ;;  %v2334_v1 = vmul.f32 %v6078_v52, %v2291_v50 }
 0x3bb   :  { %2658 = vmatmul.mubr.bf16.vlgmr.msra.gmra.mrb[32].mxu1 %v2405_v31  ;;  %v4149_v21 = vpop.eup %4148  ;;  %v2261_v12 = vadd.f32 1e-12, %v2245_v53  ;;  %v2246_v11 = vmul.f32 0.00390625, %v2214_v20 }
 0x3bc   :  { %v2294_v58 = vmul.f32 %v4149_v21, %v5912_v17  ;;  %v2293_v32 = vmul.f32 %v4149_v21, %v5909_v46  ;;  %v2378_v27 = vadd.f32 %v6092_v7, %v2335_v13  ;;  %v2377_v36 = vadd.f32 %v6089_v16, %v2334_v1 }
 0x3bd   :  { %4154 = vrsqrt.f32 %v2261_v12  ;;  %v2262_v14 = vadd.f32 1e-12, %v2246_v11 }
 0x3be   :  { %v2337_v19 = vmul.f32 %v6086_v4, %v2294_v58  ;;  %v2336_v33 = vmul.f32 %v6078_v52, %v2293_v32 }
 0x3bf   :  { %v4151_v48 = vpop.eup %4150  ;;  %4156 = vrsqrt.f32 %v2262_v14 }
 0x3c0   :  { %v2217_v9 = vpop.xlane.xlu0 %2216  ;;  %v2380_v24 = vadd.f32 %v6092_v7, %v2337_v19  ;;  %v2379_v17 = vadd.f32 %v6089_v16, %v2336_v33  ;;  %v2296_v46 = vmul.f32 %v4151_v48, %v5922_v30  ;;  %v2295_v56 = vmul.f32 %v4151_v48, %v5919_v54 }
 0x3c1   :  { %v4153_v25 = vpop.eup %4152  ;;  %v2247_v49 = vmul.f32 0.00390625, %v2217_v9 }
 0x3c2   :  { %v2220_v35 = vpop.xlane.xlu1 %2219  ;;  %v2408_v59 = vpack.c.bf16 %v2380_v24, %v2378_v27  ;;  %v2407_v47 = vpack.c.bf16 %v2379_v17, %v2377_v36  ;;  %v2298_v37 = vmul.f32 %v4153_v25, %v5928_v34  ;;  %v2339_v41 = vmul.f32 %v6086_v4, %v2296_v46 }
 0x3c3   :  { %v2263_v44 = vadd.f32 1e-12, %v2247_v49  ;;  %v2248_v2 = vmul.f32 0.00390625, %v2220_v35  ;;  %v2297_v31 = vmul.f32 %v4153_v25, %v5925_v39  ;;  %v2338_v63 = vmul.f32 %v6078_v52, %v2295_v56 }
 0x3c4   :  { %2667 = vmatprep.mubr.bf16.mxu1 %v2408_v59  ;;  %v2341_v51 = vmul.f32 %v6086_v4, %v2298_v37  ;;  %v2382_v18 = vadd.f32 %v6092_v7, %v2339_v41 }
 0x3c5   :  { %4158 = vrsqrt.f32 %v2263_v44  ;;  %v2264_v30 = vadd.f32 1e-12, %v2248_v2  ;;  %2668 = vmatmul.mubr.bf16.gmra.mrb[36].mxu1 %v2407_v47  ;;  %v2340_v54 = vmul.f32 %v6078_v52, %v2297_v31  ;;  %v2381_v13 = vadd.f32 %v6089_v16, %v2338_v63 }
 0x3c6   :  { %v2384_v34 = vadd.f32 %v6092_v7, %v2341_v51 }
 0x3c7   :  { %v4155_v50 = vpop.eup %4154  ;;  %4160 = vrsqrt.f32 %v2264_v30  ;;  %v2383_v53 = vadd.f32 %v6089_v16, %v2340_v54 }
 0x3c8   :  { %v2223_v20 = vpop.xlane.xlu0 %2222  ;;  %v2410_v39 = vpack.c.bf16 %v2384_v34, %v2382_v18  ;;  %v2300_v21 = vmul.f32 %v4155_v50, %v5942_v23  ;;  %v2299_v58 = vmul.f32 %v4155_v50, %v5939_v0 }
 0x3c9   :  { %v4157_v12 = vpop.eup %4156  ;;  %v2249_v11 = vmul.f32 0.00390625, %v2223_v20  ;;  %v2409_v27 = vpack.c.bf16 %v2383_v53, %v2381_v13 }
 0x3ca   :  { %v2226_v32 = vpop.xlane.xlu1 %2225  ;;  %2677 = vmatprep.mubr.bf16.mxu1 %v2410_v39  ;;  %v2302_v1 = vmul.f32 %v4157_v12, %v5948_v43  ;;  %v2343_v14 = vmul.f32 %v6086_v4, %v2300_v21  ;;  %v2301_v19 = vmul.f32 %v4157_v12, %v5945_v62  ;;  %v2342_v0 = vmul.f32 %v6078_v52, %v2299_v58 }
 0x3cb   :  { %v2265_v33 = vadd.f32 1e-12, %v2249_v11  ;;  %v2250_v48 = vmul.f32 0.00390625, %v2226_v32 }
 0x3cc   :  { %v2345_v9 = vmul.f32 %v6086_v4, %v2302_v1  ;;  %v2344_v23 = vmul.f32 %v6078_v52, %v2301_v19  ;;  %v2386_v36 = vadd.f32 %v6092_v7, %v2343_v14  ;;  %v2385_v59 = vadd.f32 %v6089_v16, %v2342_v0 }
 0x3cd   :  { %4162 = vrsqrt.f32 %v2265_v33  ;;  %v2266_v24 = vadd.f32 1e-12, %v2250_v48  ;;  %2678 = vmatmul.mubr.bf16.gmra.mrb[40].mxu1 %v2409_v27 }
 0x3ce   :  { %v2388_v43 = vadd.f32 %v6092_v7, %v2345_v9  ;;  %v2387_v62 = vadd.f32 %v6089_v16, %v2344_v23 }
 0x3cf   :  { %v4159_v17 = vpop.eup %4158  ;;  %4164 = vrsqrt.f32 %v2266_v24 }
 0x3d0   :  { %v2229_v46 = vpop.xlane.xlu0 %2228  ;;  %v2412_v25 = vpack.c.bf16 %v2388_v43, %v2386_v36  ;;  %v2304_v49 = vmul.f32 %v4159_v17, %v5962_v5  ;;  %v2303_v47 = vmul.f32 %v4159_v17, %v5959_v10  ;;  %v2411_v30 = vpack.c.bf16 %v2387_v62, %v2385_v59 }
 0x3d1   :  { %v4161_v56 = vpop.eup %4160  ;;  %v2251_v35 = vmul.f32 0.00390625, %v2229_v46 }
 0x3d2   :  { %v2232_v37 = vpop.xlane.xlu1 %2231  ;;  %2687 = vmatprep.mubr.bf16.mxu1 %v2412_v25  ;;  %v2306_v41 = vmul.f32 %v4161_v56, %v5974_v61  ;;  %v2347_v44 = vmul.f32 %v6086_v4, %v2304_v49  ;;  %v2305_v2 = vmul.f32 %v4161_v56, %v5971_v60  ;;  %v2346_v10 = vmul.f32 %v6078_v52, %v2303_v47 }
 0x3d3   :  { %v2267_v31 = vadd.f32 1e-12, %v2251_v35  ;;  %v2252_v51 = vmul.f32 0.00390625, %v2232_v37 }
 0x3d4   :  { %v2349_v63 = vmul.f32 %v6086_v4, %v2306_v41  ;;  %v2348_v5 = vmul.f32 %v6078_v52, %v2305_v2  ;;  %v2390_v18 = vadd.f32 %v6092_v7, %v2347_v44  ;;  %v2389_v12 = vadd.f32 %v6089_v16, %v2346_v10 }
 0x3d5   :  { %4166 = vrsqrt.f32 %v2267_v31  ;;  %v2268_v54 = vadd.f32 1e-12, %v2252_v51  ;;  %2688 = vmatmul.mubr.bf16.gmra.mrb[44].mxu1 %v2411_v30 }
 0x3d6   :  { %v2392_v61 = vadd.f32 %v6092_v7, %v2349_v63  ;;  %v2391_v60 = vadd.f32 %v6089_v16, %v2348_v5 }
 0x3d7   :  { %v4163_v34 = vpop.eup %4162  ;;  %4168 = vrsqrt.f32 %v2268_v54 }
 0x3d8   :  { %v2235_v50 = vpop.xlane.xlu0 %2234  ;;  %v2414_v53 = vpack.c.bf16 %v2392_v61, %v2390_v18  ;;  %v2308_v20 = vmul.f32 %v4163_v34, %v5997_v15  ;;  %v2307_v11 = vmul.f32 %v4163_v34, %v5994_v22  ;;  %v2413_v33 = vpack.c.bf16 %v2391_v60, %v2389_v12 }
 0x3d9   :  { %v4165_v39 = vpop.eup %4164  ;;  %v2253_v21 = vmul.f32 0.00390625, %v2235_v50 }
 0x3da   :  { %v2238_v13 = vpop.xlane.xlu1 %2237  ;;  %2697 = vmatprep.mubr.bf16.mxu1 %v2414_v53  ;;  %v2310_v58 = vmul.f32 %v4165_v39, %v6009_v29  ;;  %v2351_v32 = vmul.f32 %v6086_v4, %v2308_v20  ;;  %v2309_v1 = vmul.f32 %v4165_v39, %v6006_v55  ;;  %v2350_v22 = vmul.f32 %v6078_v52, %v2307_v11 }
 0x3db   :  { %v2269_v14 = vadd.f32 1e-12, %v2253_v21  ;;  %v2254_v19 = vmul.f32 0.00390625, %v2238_v13 }
 0x3dc   :  { %v2353_v48 = vmul.f32 %v6086_v4, %v2310_v58  ;;  %v2352_v15 = vmul.f32 %v6078_v52, %v2309_v1  ;;  %v2394_v9 = vadd.f32 %v6092_v7, %v2351_v32  ;;  %v2393_v43 = vadd.f32 %v6089_v16, %v2350_v22 }
 0x3dd   :  { %4170 = vrsqrt.f32 %v2269_v14  ;;  %v2270_v27 = vadd.f32 1e-12, %v2254_v19  ;;  %2698 = vmatmul.mubr.bf16.gmra.mrb[48].mxu1 %v2413_v33 }
 0x3de   :  { %v2396_v29 = vadd.f32 %v6092_v7, %v2353_v48  ;;  %v2395_v55 = vadd.f32 %v6089_v16, %v2352_v15 }
 0x3df   :  { %v4167_v23 = vpop.eup %4166  ;;  %4172 = vrsqrt.f32 %v2270_v27 }
 0x3e0   :  { %v2416_v24 = vpack.c.bf16 %v2396_v29, %v2394_v9  ;;  %v2312_v0 = vmul.f32 %v4167_v23, %v6029_v42  ;;  %v2311_v17 = vmul.f32 %v4167_v23, %v6026_v28  ;;  %v2415_v49 = vpack.c.bf16 %v2395_v55, %v2393_v43 }
 0x3e1   :  { %v4169_v36 = vpop.eup %4168 }
 0x3e2   :  { %2707 = vmatprep.mubr.bf16.mxu1 %v2416_v24  ;;  %v2314_v62 = vmul.f32 %v4169_v36, %v6041_v40  ;;  %v2355_v46 = vmul.f32 %v6086_v4, %v2312_v0  ;;  %v2313_v25 = vmul.f32 %v4169_v36, %v6038_v3  ;;  %v2354_v42 = vmul.f32 %v6078_v52, %v2311_v17 }
 0x3e4   :  { %v2357_v56 = vmul.f32 %v6086_v4, %v2314_v62  ;;  %v2356_v35 = vmul.f32 %v6078_v52, %v2313_v25  ;;  %v2398_v59 = vadd.f32 %v6092_v7, %v2355_v46  ;;  %v2397_v3 = vadd.f32 %v6089_v16, %v2354_v42 }
 0x3e5   :  { %2708 = vmatmul.mubr.bf16.gmra.mrb[52].mxu1 %v2415_v49 }
 0x3e6   :  { %v2400_v47 = vadd.f32 %v6092_v7, %v2357_v56  ;;  %v2399_v37 = vadd.f32 %v6089_v16, %v2356_v35 }
 0x3e7   :  { %v4171_v28 = vpop.eup %4170 }
 0x3e8   :  { %v2418_v40 = vpack.c.bf16 %v2400_v47, %v2398_v59  ;;  %v2316_v41 = vmul.f32 %v4171_v28, %v6058_v6  ;;  %v2315_v2 = vmul.f32 %v4171_v28, %v6055_v38  ;;  %v2417_v63 = vpack.c.bf16 %v2399_v37, %v2397_v3 }
 0x3e9   :  { %v4173_v44 = vpop.eup %4172 }
 0x3ea   :  { %2717 = vmatprep.mubr.bf16.mxu1 %v2418_v40  ;;  %v2318_v31 = vmul.f32 %v4173_v44, %v6064_v57  ;;  %v2359_v51 = vmul.f32 %v6086_v4, %v2316_v41  ;;  %v2317_v30 = vmul.f32 %v4173_v44, %v6061_v8  ;;  %v2358_v6 = vmul.f32 %v6078_v52, %v2315_v2  ;;  %v2453_v8 = vld [vmem:[%s6869_s8] sm:$0x3] }
 0x3ec   :  { %v2361_v5 = vmul.f32 %v6086_v4, %v2318_v31  ;;  %v2360_v54 = vmul.f32 %v6078_v52, %v2317_v30  ;;  %v2402_v10 = vadd.f32 %v6092_v7, %v2359_v51  ;;  %v2401_v57 = vadd.f32 %v6089_v16, %v2358_v6 }
 0x3ed   :  { %2718 = vmatmul.mubr.bf16.gmra.mrb[56].mxu1 %v2417_v63  ;;  %v6192_v4 = vrot.slane %v2453_v8, %v6984_v26  ;;  %v6195_v52 = vrot.slane %v2453_v8, %v6985_v45 }
 0x3ee   :  { %v2404_v18 = vadd.f32 %v6092_v7, %v2361_v5  ;;  %v2403_v38 = vadd.f32 %v6089_v16, %v2360_v54 }
 0x3f0   :  { %v2420_v61 = vpack.c.bf16 %v2404_v18, %v2402_v10  ;;  %v2419_v34 = vpack.c.bf16 %v2403_v38, %v2401_v57 }
 0x3f2   :  { %2727 = vmatprep.mubr.bf16.mxu1 %v2420_v61 }
 0x3f5   :  { %2728 = vmatmul.mubr.bf16.gmra.mrb[60].mxu1 %v2419_v34 }
 0x48e   :  { %v2659_v60 = vpop.f32.mrb[32].mxu1 }
 0x48f   :  { %v2660_v7 = vadd.f32 %v2659_v60, %v6192_v4  ;;  %v2661_v50 = vpop.f32.mrb[33].mxu1 }
 0x490   :  { %v2662_v53 = vadd.f32 %v2661_v50, %v6195_v52  ;;  %v2663_v16 = vpop.f32.mrb[34].mxu1 }
 0x491   :  { %v2770_v20 = vmul.f32 0.044715, %v2660_v7  ;;  %v6200_v39 = vadd.f32 %v2663_v16, %v6192_v4  ;;  %v2665_v21 = vpop.f32.mrb[35].mxu1  ;;  %v2738_v63 = vmul.f32 0.5, %v2660_v7 }
 0x492   :  { %v2771_v12 = vmul.f32 0.044715, %v2662_v53  ;;  %v6203_v11 = vadd.f32 %v2665_v21, %v6195_v52  ;;  %v2739_v18 = vmul.f32 0.5, %v2662_v53 }
 0x493   :  { %v2802_v13 = vmul.f32 %v2770_v20, %v2660_v7  ;;  %v2772_v58 = vmul.f32 0.044715, %v6200_v39 }
 0x494   :  { %v2803_v32 = vmul.f32 %v2771_v12, %v2662_v53  ;;  %v2773_v1 = vmul.f32 0.044715, %v6203_v11 }
 0x495   :  { %v2804_v14 = vmul.f32 %v2772_v58, %v6200_v39  ;;  %v2834_v19 = vmul.f32 %v2802_v13, %v2660_v7 }
 0x496   :  { %v2805_v33 = vmul.f32 %v2773_v1, %v6203_v11  ;;  %v2835_v48 = vmul.f32 %v2803_v32, %v2662_v53  ;;  %v2740_v32 = vmul.f32 0.5, %v6200_v39  ;;  %v2741_v1 = vmul.f32 0.5, %v6203_v11 }
 0x497   :  { %v2866_v15 = vadd.f32 %v2834_v19, %v2660_v7  ;;  %v2836_v27 = vmul.f32 %v2804_v14, %v6200_v39 }
 0x498   :  { %v2867_v22 = vadd.f32 %v2835_v48, %v2662_v53  ;;  %v2837_v9 = vmul.f32 %v2805_v33, %v6203_v11  ;;  %v2669_v55 = vpop.f32.mrb[36].mxu1 }
 0x499   :  { %v2898_v29 = vmul.f32 0.7978846, %v2866_v15  ;;  %v2868_v23 = vadd.f32 %v2836_v27, %v6200_v39  ;;  %v6214_v36 = vadd.f32 %v2669_v55, %v6192_v4  ;;  %v2671_v43 = vpop.f32.mrb[37].mxu1 }
 0x49a   :  { %v2899_v24 = vmul.f32 0.7978846, %v2867_v22  ;;  %v2869_v0 = vadd.f32 %v2837_v9, %v6203_v11  ;;  %v6217_v62 = vadd.f32 %v2671_v43, %v6195_v52  ;;  %v2673_v46 = vpop.f32.mrb[38].mxu1 }
 0x49b   :  { %4174 = vtanh.f32 %v2898_v29  ;;  %v2900_v17 = vmul.f32 0.7978846, %v2868_v23  ;;  %v2774_v49 = vmul.f32 0.044715, %v6214_v36  ;;  %v6221_v56 = vadd.f32 %v2673_v46, %v6192_v4  ;;  %v2675_v35 = vpop.f32.mrb[39].mxu1 }
 0x49c   :  { %4176 = vtanh.f32 %v2899_v24  ;;  %v2901_v25 = vmul.f32 0.7978846, %v2869_v0  ;;  %v2775_v42 = vmul.f32 0.044715, %v6217_v62  ;;  %v6225_v59 = vadd.f32 %v2675_v35, %v6195_v52 }
 0x49d   :  { %4178 = vtanh.f32 %v2900_v17  ;;  %v2806_v47 = vmul.f32 %v2774_v49, %v6214_v36  ;;  %v2776_v28 = vmul.f32 0.044715, %v6221_v56 }
 0x49e   :  { %4180 = vtanh.f32 %v2901_v25  ;;  %v2807_v37 = vmul.f32 %v2775_v42, %v6217_v62  ;;  %v2777_v40 = vmul.f32 0.044715, %v6225_v59  ;;  %v2742_v25 = vmul.f32 0.5, %v6214_v36 }
 0x49f   :  { %v2808_v41 = vmul.f32 %v2776_v28, %v6221_v56  ;;  %v2838_v44 = vmul.f32 %v2806_v47, %v6214_v36 }
 0x4a0   :  { %v2809_v3 = vmul.f32 %v2777_v40, %v6225_v59  ;;  %v2679_v2 = vpop.f32.mrb[40].mxu1  ;;  %v2839_v31 = vmul.f32 %v2807_v37, %v6217_v62 }
 0x4a1   :  { %v2680_v51 = vadd.f32 %v2679_v2, %v6192_v4  ;;  %v2681_v30 = vpop.f32.mrb[41].mxu1  ;;  %v2870_v5 = vadd.f32 %v2838_v44, %v6214_v36  ;;  %v2840_v54 = vmul.f32 %v2808_v41, %v6221_v56  ;;  %v2743_v41 = vmul.f32 0.5, %v6217_v62 }
 0x4a2   :  { %v2682_v6 = vadd.f32 %v2681_v30, %v6195_v52  ;;  %v2683_v10 = vpop.f32.mrb[42].mxu1  ;;  %v2871_v38 = vadd.f32 %v2839_v31, %v6217_v62  ;;  %v2841_v61 = vmul.f32 %v2809_v3, %v6225_v59  ;;  %v2744_v36 = vmul.f32 0.5, %v6221_v56 }
 0x4a3   :  { %v2778_v34 = vmul.f32 0.044715, %v2680_v51  ;;  %v6242_v8 = vadd.f32 %v2683_v10, %v6192_v4  ;;  %v2685_v60 = vpop.f32.mrb[43].mxu1  ;;  %v2902_v50 = vmul.f32 0.7978846, %v2870_v5  ;;  %v2872_v7 = vadd.f32 %v2840_v54, %v6221_v56 }
 0x4a4   :  { %v2779_v20 = vmul.f32 0.044715, %v2682_v6  ;;  %v6246_v21 = vadd.f32 %v2685_v60, %v6195_v52  ;;  %v2903_v53 = vmul.f32 0.7978846, %v2871_v38  ;;  %v2873_v39 = vadd.f32 %v2841_v61, %v6225_v59 }
 0x4a5   :  { %v4175_v57 = vpop.eup %4174  ;;  %4182 = vtanh.f32 %v2902_v50  ;;  %v2810_v19 = vmul.f32 %v2778_v34, %v2680_v51  ;;  %v2780_v33 = vmul.f32 0.044715, %v6242_v8  ;;  %v2904_v11 = vmul.f32 0.7978846, %v2872_v7 }
 0x4a6   :  { %v4177_v16 = vpop.eup %4176  ;;  %v2962_v12 = vadd.f32 1.0, %v4175_v57  ;;  %v2781_v27 = vmul.f32 0.044715, %v6246_v21  ;;  %4184 = vtanh.f32 %v2903_v53  ;;  %v2811_v29 = vmul.f32 %v2779_v20, %v2682_v6 }
 0x4a7   :  { %v4179_v13 = vpop.eup %4178  ;;  %v2963_v58 = vadd.f32 1.0, %v4177_v16  ;;  %v2905_v49 = vmul.f32 0.7978846, %v2873_v39  ;;  %4186 = vtanh.f32 %v2904_v11  ;;  %v2812_v35 = vmul.f32 %v2780_v33, %v6242_v8 }
 0x4a8   :  { %v4181_v14 = vpop.eup %4180  ;;  %v6251_v48 = vmul.f32 %v2962_v12, %v2738_v63  ;;  %v2964_v15 = vadd.f32 1.0, %v4179_v13  ;;  %v2689_v23 = vpop.f32.mrb[44].mxu1  ;;  %v2813_v42 = vmul.f32 %v2781_v27, %v6246_v21  ;;  %v2842_v37 = vmul.f32 %v2810_v19, %v2680_v51 }
 0x4a9   :  { %v6254_v22 = vmul.f32 %v2963_v58, %v2739_v18  ;;  %v2965_v9 = vadd.f32 1.0, %v4181_v14  ;;  %v2691_v24 = vpop.f32.mrb[45].mxu1  ;;  %v6264_v17 = vadd.f32 %v2689_v23, %v6192_v4  ;;  %4188 = vtanh.f32 %v2905_v49 }
 0x4aa   :  { %v6256_v55 = vmul.f32 %v2964_v15, %v2740_v32  ;;  %v2693_v46 = vpop.f32.mrb[46].mxu1  ;;  %v6272_v40 = vadd.f32 %v2691_v24, %v6195_v52  ;;  %v2843_v44 = vmul.f32 %v2811_v29, %v2682_v6  ;;  %v2745_v3 = vmul.f32 0.5, %v6225_v59 }
 0x4ab   :  { %v3028_v0 = vadd.f32 %v6254_v22, %v6251_v48  ;;  %v6261_v43 = vmul.f32 %v2965_v9, %v2741_v1  ;;  %v2695_v47 = vpop.f32.mrb[47].mxu1  ;;  %v6277_v2 = vmul.f32 0.5, %v2680_v51  ;;  %v2874_v31 = vadd.f32 %v2842_v37, %v2680_v51 }
 0x4ac   :  { %v2782_v30 = vmul.f32 0.044715, %v6264_v17  ;;  %v6281_v63 = vadd.f32 %v2693_v46, %v6192_v4  ;;  %v6283_v5 = vmul.f32 0.5, %v2682_v6  ;;  %v2875_v54 = vadd.f32 %v2843_v44, %v2682_v6 }
 0x4ad   :  { %3029 = vadd.xlane.f32.xlu0 %v3028_v0  ;;  %v3031_v28 = vadd.f32 %v6261_v43, %v6256_v55  ;;  %v6286_v62 = vadd.f32 %v2695_v47, %v6195_v52  ;;  %v2906_v18 = vmul.f32 0.7978846, %v2874_v31  ;;  %v2844_v56 = vmul.f32 %v2812_v35, %v6242_v8 }
 0x4ae   :  { %v2845_v59 = vmul.f32 %v2813_v42, %v6246_v21  ;;  %v2783_v38 = vmul.f32 0.044715, %v6272_v40  ;;  %v2907_v57 = vmul.f32 0.7978846, %v2875_v54  ;;  %v2784_v16 = vmul.f32 0.044715, %v6281_v63 }
 0x4af   :  { %3032 = vadd.xlane.f32.xlu1 %v3031_v28  ;;  %v4183_v10 = vpop.eup %4182  ;;  %4190 = vtanh.f32 %v2906_v18  ;;  %v2876_v6 = vadd.f32 %v2844_v56, %v6242_v8  ;;  %v2814_v13 = vmul.f32 %v2782_v30, %v6264_v17  ;;  %v2785_v58 = vmul.f32 0.044715, %v6286_v62 }
 0x4b0   :  { %v2699_v51 = vpop.f32.mrb[48].mxu1  ;;  %v2966_v61 = vadd.f32 1.0, %v4183_v10  ;;  %v4185_v34 = vpop.eup %4184  ;;  %v2877_v7 = vadd.f32 %v2845_v59, %v6246_v21  ;;  %4192 = vtanh.f32 %v2907_v57  ;;  %v6302_v1 = vmul.f32 0.5, %v6242_v8 }
 0x4b1   :  { %v6292_v60 = vadd.f32 %v2699_v51, %v6192_v4  ;;  %v2701_v50 = vpop.f32.mrb[49].mxu1  ;;  %v2967_v12 = vadd.f32 1.0, %v4185_v34  ;;  %v2908_v14 = vmul.f32 0.7978846, %v2876_v6  ;;  %v4187_v19 = vpop.eup %4186  ;;  %v2815_v33 = vmul.f32 %v2783_v38, %v6272_v40 }
 0x4b2   :  { %v2703_v20 = vpop.f32.mrb[50].mxu1  ;;  %v6297_v53 = vmul.f32 %v2966_v61, %v2742_v25  ;;  %v6306_v15 = vadd.f32 %v2701_v50, %v6195_v52  ;;  %v2909_v9 = vmul.f32 0.7978846, %v2877_v7  ;;  %v2968_v39 = vadd.f32 1.0, %v4187_v19 }
 0x4b3   :  { %v2705_v32 = vpop.f32.mrb[51].mxu1  ;;  %v6308_v27 = vmul.f32 %v2967_v12, %v2743_v41  ;;  %v2786_v29 = vmul.f32 0.044715, %v6292_v60  ;;  %v6312_v23 = vadd.f32 %v2703_v20, %v6192_v4  ;;  %4194 = vtanh.f32 %v2908_v14  ;;  %v4189_v11 = vpop.eup %4188 }
 0x4b4   :  { %v2816_v8 = vmul.f32 %v2784_v16, %v6281_v63  ;;  %v6316_v24 = vadd.f32 %v2705_v32, %v6195_v52  ;;  %4196 = vtanh.f32 %v2909_v9  ;;  %v2817_v46 = vmul.f32 %v2785_v58, %v6286_v62 }
 0x4b5   :  { %v3034_v0 = vadd.f32 %v6308_v27, %v6297_v53  ;;  %v2969_v25 = vadd.f32 1.0, %v4189_v11  ;;  %v6321_v49 = vmul.f32 %v2968_v39, %v2744_v36  ;;  %v2846_v35 = vmul.f32 %v2814_v13, %v6264_v17 }
 0x4b6   :  { %v2787_v42 = vmul.f32 0.044715, %v6306_v15  ;;  %v2749_v28 = vmul.f32 0.5, %v6246_v21  ;;  %v6327_v37 = vmul.f32 0.5, %v6264_v17  ;;  %v2847_v41 = vmul.f32 %v2815_v33, %v6272_v40 }
 0x4b7   :  { %3035 = vadd.xlane.f32.xlu0 %v3034_v0  ;;  %v2818_v44 = vmul.f32 %v2786_v29, %v6292_v60  ;;  %v2788_v31 = vmul.f32 0.044715, %v6312_v23  ;;  %v6332_v30 = vmul.f32 %v2969_v25, %v2745_v3  ;;  %v2878_v54 = vadd.f32 %v2846_v35, %v6264_v17 }
 0x4b8   :  { %v2709_v47 = vpop.f32.mrb[52].mxu1  ;;  %v2789_v10 = vmul.f32 0.044715, %v6316_v24  ;;  %v2879_v56 = vadd.f32 %v2847_v41, %v6272_v40  ;;  %v2848_v59 = vmul.f32 %v2816_v8, %v6281_v63  ;;  %v2849_v17 = vmul.f32 %v2817_v46, %v6286_v62 }
 0x4b9   :  { %v2711_v36 = vpop.f32.mrb[53].mxu1  ;;  %v6337_v18 = vadd.f32 %v2709_v47, %v6192_v4  ;;  %v4191_v38 = vpop.eup %4190  ;;  %v3037_v51 = vadd.f32 %v6332_v30, %v6321_v49  ;;  %v2910_v57 = vmul.f32 0.7978846, %v2878_v54  ;;  %v2819_v20 = vmul.f32 %v2787_v42, %v6306_v15 }
 0x4ba   :  { %v2713_v21 = vpop.f32.mrb[54].mxu1  ;;  %v4193_v34 = vpop.eup %4192  ;;  %v6348_v50 = vadd.f32 %v2711_v36, %v6195_v52  ;;  %v2970_v7 = vadd.f32 1.0, %v4191_v38  ;;  %v2911_v16 = vmul.f32 0.7978846, %v2879_v56  ;;  %v6355_v13 = vmul.f32 0.5, %v6272_v40 }
 0x4bb   :  { %v6344_v3 = vadd.f32 %v2713_v21, %v6192_v4  ;;  %v2715_v61 = vpop.f32.mrb[55].mxu1  ;;  %3038 = vadd.xlane.f32.xlu1 %v3037_v51  ;;  %v2971_v12 = vadd.f32 1.0, %v4193_v34  ;;  %4198 = vtanh.f32 %v2910_v57  ;;  %v2820_v58 = vmul.f32 %v2788_v31, %v6312_v23 }
 0x4bc   :  { %v6351_v6 = vadd.f32 %v2715_v61, %v6195_v52  ;;  %v2821_v32 = vmul.f32 %v2789_v10, %v6316_v24  ;;  %v6360_v14 = vmul.f32 %v2970_v7, %v6277_v2  ;;  %4200 = vtanh.f32 %v2911_v16 }
 0x4bd   :  { %v4195_v19 = vpop.eup %4194  ;;  %v2790_v33 = vmul.f32 0.044715, %v6337_v18  ;;  %v6364_v9 = vmul.f32 %v2971_v12, %v6283_v5  ;;  %v2880_v29 = vadd.f32 %v2848_v59, %v6281_v63  ;;  %v2881_v40 = vadd.f32 %v2849_v17, %v6286_v62 }
 0x4be   :  { %v4197_v39 = vpop.eup %4196  ;;  %v2791_v11 = vmul.f32 0.044715, %v6348_v50  ;;  %v2792_v8 = vmul.f32 0.044715, %v6344_v3  ;;  %v2972_v46 = vadd.f32 1.0, %v4195_v19  ;;  %v2850_v2 = vmul.f32 %v2818_v44, %v6292_v60 }
 0x4bf   :  { %v3040_v25 = vadd.f32 %v6364_v9, %v6360_v14  ;;  %v2973_v5 = vadd.f32 1.0, %v4197_v39  ;;  %v2912_v47 = vmul.f32 0.7978846, %v2880_v29  ;;  %v2913_v54 = vmul.f32 0.7978846, %v2881_v40 }
 0x4c0   :  { %v2719_v0 = vpop.f32.mrb[56].mxu1  ;;  %v6377_v41 = vmul.f32 %v2972_v46, %v6302_v1  ;;  %v2851_v10 = vmul.f32 %v2819_v20, %v6306_v15  ;;  %v2793_v44 = vmul.f32 0.044715, %v6351_v6  ;;  %v2752_v38 = vmul.f32 0.5, %v6281_v63 }
 0x4c1   :  { %v6374_v35 = vadd.f32 %v2719_v0, %v6192_v4  ;;  %v2721_v42 = vpop.f32.mrb[57].mxu1  ;;  %3041 = vadd.xlane.f32.xlu0 %v3040_v25  ;;  %v6384_v21 = vmul.f32 %v2973_v5, %v2749_v28  ;;  %4202 = vtanh.f32 %v2912_v47  ;;  %v2882_v51 = vadd.f32 %v2850_v2, %v6292_v60 }
 0x4c2   :  { %v6380_v31 = vadd.f32 %v2721_v42, %v6195_v52  ;;  %v2723_v36 = vpop.f32.mrb[58].mxu1  ;;  %4204 = vtanh.f32 %v2913_v54  ;;  %v2753_v57 = vmul.f32 0.5, %v6286_v62  ;;  %v6398_v28 = vmul.f32 0.5, %v6292_v60 }
 0x4c3   :  { %v6387_v56 = vadd.f32 %v2723_v36, %v6192_v4  ;;  %v2725_v59 = vpop.f32.mrb[59].mxu1  ;;  %v3043_v61 = vadd.f32 %v6384_v21, %v6377_v41  ;;  %v2883_v17 = vadd.f32 %v2851_v10, %v6306_v15  ;;  %v2822_v34 = vmul.f32 %v2790_v33, %v6337_v18 }
 0x4c4   :  { %v6390_v1 = vadd.f32 %v2725_v59, %v6195_v52  ;;  %v2823_v7 = vmul.f32 %v2791_v11, %v6348_v50  ;;  %v2824_v16 = vmul.f32 %v2792_v8, %v6344_v3  ;;  %v2914_v63 = vmul.f32 0.7978846, %v2882_v51 }
 0x4c5   :  { %v4199_v20 = vpop.eup %4198  ;;  %v2825_v12 = vmul.f32 %v2793_v44, %v6351_v6  ;;  %v2794_v19 = vmul.f32 0.044715, %v6374_v35  ;;  %3044 = vadd.xlane.f32.xlu1 %v3043_v61  ;;  %v2915_v29 = vmul.f32 0.7978846, %v2883_v17  ;;  %v2852_v62 = vmul.f32 %v2820_v58, %v6312_v23 }
 0x4c6   :  { %v4201_v60 = vpop.eup %4200  ;;  %v2795_v40 = vmul.f32 0.044715, %v6380_v31  ;;  %v2974_v39 = vadd.f32 1.0, %v4199_v20  ;;  %4206 = vtanh.f32 %v2914_v63  ;;  %v2853_v33 = vmul.f32 %v2821_v32, %v6316_v24 }
 0x4c7   :  { %v2975_v11 = vadd.f32 1.0, %v4201_v60  ;;  %4208 = vtanh.f32 %v2915_v29  ;;  %v2884_v2 = vadd.f32 %v2852_v62, %v6312_v23  ;;  %v2755_v42 = vmul.f32 0.5, %v6306_v15 }
 0x4c8   :  { %v2729_v0 = vpop.f32.mrb[60].mxu1  ;;  %v6414_v25 = vmul.f32 %v2974_v39, %v6327_v37  ;;  %v2885_v47 = vadd.f32 %v2853_v33, %v6316_v24  ;;  %v2796_v32 = vmul.f32 0.044715, %v6387_v56  ;;  %v2797_v37 = vmul.f32 0.044715, %v6390_v1 }
 0x4c9   :  { %v6410_v8 = vadd.f32 %v2729_v0, %v6192_v4  ;;  %v2731_v46 = vpop.f32.mrb[61].mxu1  ;;  %v6423_v36 = vmul.f32 %v2975_v11, %v6355_v13  ;;  %v2916_v44 = vmul.f32 0.7978846, %v2884_v2  ;;  %v2826_v17 = vmul.f32 %v2794_v19, %v6374_v35 }
 0x4ca   :  { %v6417_v58 = vadd.f32 %v2731_v46, %v6195_v52  ;;  %v2733_v5 = vpop.f32.mrb[62].mxu1  ;;  %v2917_v15 = vmul.f32 0.7978846, %v2885_v47  ;;  %v2827_v63 = vmul.f32 %v2795_v40, %v6380_v31  ;;  %v2756_v62 = vmul.f32 0.5, %v6312_v23 }
 0x4cb   :  { %v6426_v54 = vadd.f32 %v2733_v5, %v6192_v4  ;;  %v2735_v10 = vpop.f32.mrb[63].mxu1  ;;  %v2798_v59 = vmul.f32 0.044715, %v6410_v8  ;;  %v4203_v61 = vpop.eup %4202  ;;  %v3046_v13 = vadd.f32 %v6423_v36, %v6414_v25  ;;  %4210 = vtanh.f32 %v2916_v44 }
 0x4cc   :  { %v6431_v51 = vadd.f32 %v2735_v10, %v6195_v52  ;;  %v4205_v4 = vpop.eup %4204  ;;  %v2976_v20 = vadd.f32 1.0, %v4203_v61  ;;  %v2799_v29 = vmul.f32 0.044715, %v6417_v58  ;;  %4212 = vtanh.f32 %v2917_v15 }
 0x4cd   :  { %v2828_v52 = vmul.f32 %v2796_v32, %v6387_v56  ;;  %3047 = vadd.xlane.f32.xlu0 %v3046_v13  ;;  %v2977_v60 = vadd.f32 1.0, %v4205_v4  ;;  %v2854_v39 = vmul.f32 %v2822_v34, %v6337_v18  ;;  %v2855_v19 = vmul.f32 %v2823_v7, %v6348_v50 }
 0x4ce   :  { %v2829_v40 = vmul.f32 %v2797_v37, %v6390_v1  ;;  %v2830_v0 = vmul.f32 %v2798_v59, %v6410_v8  ;;  %v6444_v33 = vmul.f32 %v2976_v20, %v2752_v38  ;;  %v2757_v11 = vmul.f32 0.5, %v6316_v24 }
 0x4cf   :  { %v6447_v46 = vmul.f32 %v2977_v60, %v2753_v57  ;;  %v2886_v23 = vadd.f32 %v2854_v39, %v6337_v18  ;;  %v2887_v2 = vadd.f32 %v2855_v19, %v6348_v50  ;;  %v2856_v5 = vmul.f32 %v2824_v16, %v6344_v3 }
 0x4d0   :  { %v4207_v47 = vpop.eup %4206  ;;  %v2831_v34 = vmul.f32 %v2799_v29, %v6417_v58  ;;  %v2800_v7 = vmul.f32 0.044715, %v6426_v54  ;;  %v2857_v32 = vmul.f32 %v2825_v12, %v6351_v6  ;;  %v2858_v38 = vmul.f32 %v2826_v17, %v6374_v35 }
 0x4d1   :  { %v4209_v10 = vpop.eup %4208  ;;  %v3049_v24 = vadd.f32 %v6447_v46, %v6444_v33  ;;  %v2978_v57 = vadd.f32 1.0, %v4207_v47  ;;  %v2918_v44 = vmul.f32 0.7978846, %v2886_v23  ;;  %v2919_v37 = vmul.f32 0.7978846, %v2887_v2 }
 0x4d2   :  { %v2979_v59 = vadd.f32 1.0, %v4209_v10  ;;  %v2888_v15 = vadd.f32 %v2856_v5, %v6344_v3  ;;  %v2889_v16 = vadd.f32 %v2857_v32, %v6351_v6  ;;  %v2859_v61 = vmul.f32 %v2827_v63, %v6380_v31 }
 0x4d3   :  { %3050 = vadd.xlane.f32.xlu1 %v3049_v24  ;;  %v2801_v13 = vmul.f32 0.044715, %v6431_v51  ;;  %v6463_v12 = vmul.f32 %v2978_v57, %v6398_v28  ;;  %4214 = vtanh.f32 %v2918_v44  ;;  %v2890_v17 = vadd.f32 %v2858_v38, %v6374_v35 }
 0x4d4   :  { %v6466_v4 = vmul.f32 %v2979_v59, %v2755_v42  ;;  %4216 = vtanh.f32 %v2919_v37  ;;  %v2920_v20 = vmul.f32 0.7978846, %v2888_v15  ;;  %v2921_v29 = vmul.f32 0.7978846, %v2889_v16 }
 0x4d5   :  { %v4211_v60 = vpop.eup %4210  ;;  %v2832_v39 = vmul.f32 %v2800_v7, %v6426_v54  ;;  %v2891_v19 = vadd.f32 %v2859_v61, %v6380_v31  ;;  %v2922_v63 = vmul.f32 0.7978846, %v2890_v17  ;;  %v2860_v23 = vmul.f32 %v2828_v52, %v6387_v56 }
 0x4d6   :  { %v4213_v2 = vpop.eup %4212  ;;  %v3052_v28 = vadd.f32 %v6466_v4, %v6463_v12  ;;  %v2980_v5 = vadd.f32 1.0, %v4211_v60  ;;  %4218 = vtanh.f32 %v2920_v20  ;;  %v2861_v42 = vmul.f32 %v2829_v40, %v6390_v1 }
 0x4d7   :  { %v2981_v47 = vadd.f32 1.0, %v4213_v2  ;;  %4220 = vtanh.f32 %v2921_v29  ;;  %v2923_v32 = vmul.f32 0.7978846, %v2891_v19  ;;  %v2892_v38 = vadd.f32 %v2860_v23, %v6387_v56 }
 0x4d8   :  { %v2833_v7 = vmul.f32 %v2801_v13, %v6431_v51  ;;  %3053 = vadd.xlane.f32.xlu0 %v3052_v28  ;;  %v6476_v10 = vmul.f32 %v2980_v5, %v2756_v62  ;;  %4222 = vtanh.f32 %v2922_v63  ;;  %v2893_v52 = vadd.f32 %v2861_v42, %v6390_v1 }
 0x4d9   :  { %v6479_v24 = vmul.f32 %v2981_v47, %v2757_v11  ;;  %4224 = vtanh.f32 %v2923_v32  ;;  %v2924_v57 = vmul.f32 0.7978846, %v2892_v38  ;;  %v2862_v40 = vmul.f32 %v2830_v0, %v6410_v8 }
 0x4da   :  { %v2925_v44 = vmul.f32 0.7978846, %v2893_v52  ;;  %v2863_v37 = vmul.f32 %v2831_v34, %v6417_v58  ;;  %v2864_v15 = vmul.f32 %v2832_v39, %v6426_v54  ;;  %v2865_v11 = vmul.f32 %v2833_v7, %v6431_v51 }
 0x4db   :  { %v3055_v59 = vadd.f32 %v6479_v24, %v6476_v10  ;;  %4226 = vtanh.f32 %v2924_v57  ;;  %v2894_v62 = vadd.f32 %v2862_v40, %v6410_v8  ;;  %v2758_v13 = vmul.f32 0.5, %v6337_v18 }
 0x4dc   :  { %4228 = vtanh.f32 %v2925_v44  ;;  %v2895_v16 = vadd.f32 %v2863_v37, %v6417_v58  ;;  %v2896_v0 = vadd.f32 %v2864_v15, %v6426_v54  ;;  %v2897_v60 = vadd.f32 %v2865_v11, %v6431_v51 }
 0x4dd   :  { %v4215_v61 = vpop.eup %4214  ;;  %3056 = vadd.xlane.f32.xlu1 %v3055_v59  ;;  %v2926_v20 = vmul.f32 0.7978846, %v2894_v62  ;;  %v2759_v39 = vmul.f32 0.5, %v6348_v50  ;;  %v2760_v18 = vmul.f32 0.5, %v6344_v3  ;;  %v2761_v38 = vmul.f32 0.5, %v6351_v6 }
 0x4de   :  { %v4217_v34 = vpop.eup %4216  ;;  %v2982_v17 = vadd.f32 1.0, %v4215_v61  ;;  %v2927_v29 = vmul.f32 0.7978846, %v2895_v16  ;;  %v2928_v63 = vmul.f32 0.7978846, %v2896_v0  ;;  %v2762_v50 = vmul.f32 0.5, %v6374_v35 }
 0x4df   :  { %v2983_v19 = vadd.f32 1.0, %v4217_v34  ;;  %4230 = vtanh.f32 %v2926_v20  ;;  %v2929_v28 = vmul.f32 0.7978846, %v2897_v60  ;;  %v2763_v3 = vmul.f32 0.5, %v6380_v31 }
 0x4e0   :  { %v4219_v23 = vpop.eup %4218  ;;  %v6493_v2 = vmul.f32 %v2982_v17, %v2758_v13  ;;  %4232 = vtanh.f32 %v2927_v29  ;;  %v2764_v11 = vmul.f32 0.5, %v6387_v56  ;;  %v2765_v13 = vmul.f32 0.5, %v6390_v1 }
 0x4e1   :  { %v4221_v5 = vpop.eup %4220  ;;  %v6495_v42 = vmul.f32 %v2983_v19, %v2759_v39  ;;  %v2984_v47 = vadd.f32 1.0, %v4219_v23  ;;  %4234 = vtanh.f32 %v2928_v63  ;;  %v2766_v56 = vmul.f32 0.5, %v6410_v8 }
 0x4e2   :  { %v4223_v32 = vpop.eup %4222  ;;  %v2985_v7 = vadd.f32 1.0, %v4221_v5  ;;  %4236 = vtanh.f32 %v2929_v28  ;;  %v2767_v1 = vmul.f32 0.5, %v6417_v58  ;;  %v2768_v5 = vmul.f32 0.5, %v6426_v54 }
 0x4e3   :  { %v4225_v52 = vpop.eup %4224  ;;  %v3058_v57 = vadd.f32 %v6495_v42, %v6493_v2  ;;  %v6502_v44 = vmul.f32 %v2984_v47, %v2760_v18  ;;  %v2986_v40 = vadd.f32 1.0, %v4223_v32  ;;  %v2769_v32 = vmul.f32 0.5, %v6431_v51 }
 0x4e4   :  { %v6504_v37 = vmul.f32 %v2985_v7, %v2761_v38  ;;  %v2987_v59 = vadd.f32 1.0, %v4225_v52 }
 0x4e5   :  { %v4227_v15 = vpop.eup %4226  ;;  %3059 = vadd.xlane.f32.xlu0 %v3058_v57  ;;  %v6507_v6 = vmul.f32 %v2986_v40, %v2762_v50 }
 0x4e6   :  { %v4229_v62 = vpop.eup %4228  ;;  %v3061_v35 = vadd.f32 %v6504_v37, %v6502_v44  ;;  %v6511_v16 = vmul.f32 %v2987_v59, %v2763_v3  ;;  %v2988_v61 = vadd.f32 1.0, %v4227_v15 }
 0x4e7   :  { %v2989_v0 = vadd.f32 1.0, %v4229_v62 }
 0x4e8   :  { %3062 = vadd.xlane.f32.xlu1 %v3061_v35  ;;  %v3064_v31 = vadd.f32 %v6511_v16, %v6507_v6  ;;  %v6517_v34 = vmul.f32 %v2988_v61, %v2764_v11 }
 0x4e9   :  { %v6519_v17 = vmul.f32 %v2989_v0, %v2765_v13  ;;  %v4231_v20 = vpop.eup %4230 }
 0x4ea   :  { %3065 = vadd.xlane.f32.xlu0 %v3064_v31  ;;  %v4233_v29 = vpop.eup %4232  ;;  %v2990_v39 = vadd.f32 1.0, %v4231_v20 }
 0x4eb   :  { %v3067_v60 = vadd.f32 %v6519_v17, %v6517_v34  ;;  %v4235_v19 = vpop.eup %4234  ;;  %v2991_v63 = vadd.f32 1.0, %v4233_v29 }
 0x4ec   :  { %v4237_v23 = vpop.eup %4236  ;;  %v6525_v28 = vmul.f32 %v2990_v39, %v2766_v56  ;;  %v2992_v18 = vadd.f32 1.0, %v4235_v19 }
 0x4ed   :  { %3068 = vadd.xlane.f32.xlu1 %v3067_v60  ;;  %v6528_v47 = vmul.f32 %v2991_v63, %v2767_v1  ;;  %v2993_v38 = vadd.f32 1.0, %v4237_v23 }
 0x4ee   :  { %v6531_v7 = vmul.f32 %v2992_v18, %v2768_v5 }
 0x4ef   :  { %v3070_v8 = vadd.f32 %v6528_v47, %v6525_v28  ;;  %v6535_v50 = vmul.f32 %v2993_v38, %v2769_v32 }
 0x4f1   :  { %3071 = vadd.xlane.f32.xlu0 %v3070_v8  ;;  %v3073_v58 = vadd.f32 %v6535_v50, %v6531_v7 }
 0x4f3   :  { %3074 = vadd.xlane.f32.xlu1 %v3073_v58 }
 0x53a   :  { %v3030_v52 = vpop.xlane.xlu0 %3029 }
 0x53b   :  { %v3076_v54 = vmul.f32 0.00390625, %v3030_v52 }
 0x53c   :  { %v3033_v57 = vpop.xlane.xlu1 %3032 }
 0x53d   :  { %v6540_v40 = vsub.f32 %v6251_v48, %v3076_v54  ;;  %v6543_v51 = vsub.f32 %v6254_v22, %v3076_v54  ;;  %v3077_v3 = vmul.f32 0.00390625, %v3033_v57 }
 0x53f   :  { %v6546_v59 = vsub.f32 %v6256_v55, %v3077_v3  ;;  %v6549_v15 = vsub.f32 %v6261_v43, %v3077_v3  ;;  %v3124_v62 = vmul.f32 %v6540_v40, %v6540_v40  ;;  %v3125_v35 = vmul.f32 %v6543_v51, %v6543_v51 }
 0x541   :  { %v3156_v11 = vadd.f32 %v3125_v35, %v3124_v62  ;;  %v3126_v48 = vmul.f32 %v6546_v59, %v6546_v59  ;;  %v3127_v22 = vmul.f32 %v6549_v15, %v6549_v15 }
 0x543   :  { %3157 = vadd.xlane.f32.xlu0 %v3156_v11  ;;  %v3159_v61 = vadd.f32 %v3127_v22, %v3126_v48 }
 0x544   :  { %v3036_v55 = vpop.xlane.xlu0 %3035 }
 0x545   :  { %3160 = vadd.xlane.f32.xlu1 %v3159_v61  ;;  %v3078_v13 = vmul.f32 0.00390625, %v3036_v55 }
 0x547   :  { %v6560_v43 = vsub.f32 %v6297_v53, %v3078_v13  ;;  %v6563_v0 = vsub.f32 %v6308_v27, %v3078_v13 }
 0x548   :  { %v3039_v31 = vpop.xlane.xlu1 %3038 }
 0x549   :  { %v3128_v20 = vmul.f32 %v6560_v43, %v6560_v43  ;;  %v3129_v29 = vmul.f32 %v6563_v0, %v6563_v0  ;;  %v3079_v60 = vmul.f32 0.00390625, %v3039_v31 }
 0x54b   :  { %v3162_v56 = vadd.f32 %v3129_v29, %v3128_v20  ;;  %v6570_v39 = vsub.f32 %v6321_v49, %v3079_v60  ;;  %v6573_v19 = vsub.f32 %v6332_v30, %v3079_v60 }
 0x54d   :  { %3163 = vadd.xlane.f32.xlu0 %v3162_v56  ;;  %v3130_v53 = vmul.f32 %v6570_v39, %v6570_v39  ;;  %v3131_v27 = vmul.f32 %v6573_v19, %v6573_v19 }
 0x54e   :  { %v3042_v1 = vpop.xlane.xlu0 %3041 }
 0x54f   :  { %v3080_v63 = vmul.f32 0.00390625, %v3042_v1  ;;  %v3165_v23 = vadd.f32 %v3131_v27, %v3130_v53 }
 0x551   :  { %v6580_v5 = vsub.f32 %v6360_v14, %v3080_v63  ;;  %v6583_v18 = vsub.f32 %v6364_v9, %v3080_v63  ;;  %3166 = vadd.xlane.f32.xlu1 %v3165_v23 }
 0x552   :  { %v3045_v49 = vpop.xlane.xlu1 %3044 }
 0x553   :  { %v3081_v30 = vmul.f32 0.00390625, %v3045_v49  ;;  %v3132_v32 = vmul.f32 %v6580_v5, %v6580_v5  ;;  %v3133_v38 = vmul.f32 %v6583_v18, %v6583_v18 }
 0x555   :  { %v6590_v8 = vsub.f32 %v6377_v41, %v3081_v30  ;;  %v6593_v58 = vsub.f32 %v6384_v21, %v3081_v30  ;;  %v3168_v14 = vadd.f32 %v3133_v38, %v3132_v32 }
 0x557   :  { %3169 = vadd.xlane.f32.xlu0 %v3168_v14  ;;  %v3134_v9 = vmul.f32 %v6590_v8, %v6590_v8  ;;  %v3135_v52 = vmul.f32 %v6593_v58, %v6593_v58 }
 0x559   :  { %v3171_v54 = vadd.f32 %v3135_v52, %v3134_v9 }
 0x55a   :  { %v3048_v57 = vpop.xlane.xlu0 %3047 }
 0x55b   :  { %v3082_v3 = vmul.f32 0.00390625, %v3048_v57  ;;  %3172 = vadd.xlane.f32.xlu1 %v3171_v54 }
 0x55d   :  { %v6600_v62 = vsub.f32 %v6414_v25, %v3082_v3  ;;  %v6603_v41 = vsub.f32 %v6423_v36, %v3082_v3 }
 0x55f   :  { %v3136_v21 = vmul.f32 %v6600_v62, %v6600_v62  ;;  %v3137_v35 = vmul.f32 %v6603_v41, %v6603_v41 }
 0x560   :  { %v3051_v11 = vpop.xlane.xlu1 %3050 }
 0x561   :  { %v3083_v48 = vmul.f32 0.00390625, %v3051_v11  ;;  %v3174_v22 = vadd.f32 %v3137_v35, %v3136_v21 }
 0x563   :  { %v6610_v61 = vsub.f32 %v6444_v33, %v3083_v48  ;;  %v6613_v55 = vsub.f32 %v6447_v46, %v3083_v48  ;;  %3175 = vadd.xlane.f32.xlu0 %v3174_v22 }
 0x565   :  { %v3054_v25 = vpop.xlane.xlu0 %3053  ;;  %v3138_v36 = vmul.f32 %v6610_v61, %v6610_v61  ;;  %v3139_v13 = vmul.f32 %v6613_v55, %v6613_v55 }
 0x566   :  { %v3084_v31 = vmul.f32 0.00390625, %v3054_v25 }
 0x567   :  { %v3177_v20 = vadd.f32 %v3139_v13, %v3138_v36 }
 0x568   :  { %v6620_v29 = vsub.f32 %v6463_v12, %v3084_v31  ;;  %v6623_v60 = vsub.f32 %v6466_v4, %v3084_v31 }
 0x569   :  { %3178 = vadd.xlane.f32.xlu1 %v3177_v20 }
 0x56a   :  { %v3057_v33 = vpop.xlane.xlu1 %3056  ;;  %v3140_v46 = vmul.f32 %v6620_v29, %v6620_v29  ;;  %v3141_v56 = vmul.f32 %v6623_v60, %v6623_v60 }
 0x56b   :  { %v3085_v53 = vmul.f32 0.00390625, %v3057_v33 }
 0x56c   :  { %v3180_v27 = vadd.f32 %v3141_v56, %v3140_v46 }
 0x56d   :  { %v6630_v1 = vsub.f32 %v6476_v10, %v3085_v53  ;;  %v6633_v63 = vsub.f32 %v6479_v24, %v3085_v53 }
 0x56e   :  { %3181 = vadd.xlane.f32.xlu0 %v3180_v27 }
 0x56f   :  { %v3142_v12 = vmul.f32 %v6630_v1, %v6630_v1  ;;  %v3143_v4 = vmul.f32 %v6633_v63, %v6633_v63 }
 0x571   :  { %v3183_v23 = vadd.f32 %v3143_v4, %v3142_v12 }
 0x572   :  { %v3060_v49 = vpop.xlane.xlu0 %3059 }
 0x573   :  { %v3086_v30 = vmul.f32 0.00390625, %v3060_v49  ;;  %3184 = vadd.xlane.f32.xlu1 %v3183_v23 }
 0x575   :  { %v6640_v32 = vsub.f32 %v6493_v2, %v3086_v30  ;;  %v6643_v10 = vsub.f32 %v6495_v42, %v3086_v30  ;;  %v3063_v38 = vpop.xlane.xlu1 %3062 }
 0x576   :  { %v3087_v24 = vmul.f32 0.00390625, %v3063_v38 }
 0x577   :  { %v3066_v14 = vpop.xlane.xlu0 %3065  ;;  %v3144_v9 = vmul.f32 %v6640_v32, %v6640_v32  ;;  %v3145_v52 = vmul.f32 %v6643_v10, %v6643_v10 }
 0x578   :  { %v6650_v54 = vsub.f32 %v6502_v44, %v3087_v24  ;;  %v6653_v57 = vsub.f32 %v6504_v37, %v3087_v24  ;;  %v3088_v2 = vmul.f32 0.00390625, %v3066_v14 }
 0x579   :  { %v3186_v3 = vadd.f32 %v3145_v52, %v3144_v9  ;;  %v3026_v52 = vld [vmem:[%s6870_s9] sm:$0x3] }
 0x57a   :  { %v6656_v42 = vsub.f32 %v6507_v6, %v3088_v2  ;;  %v6659_v21 = vsub.f32 %v6511_v16, %v3088_v2  ;;  %v3069_v35 = vpop.xlane.xlu1 %3068  ;;  %v3146_v11 = vmul.f32 %v6650_v54, %v6650_v54  ;;  %v3147_v48 = vmul.f32 %v6653_v57, %v6653_v57  ;;  %v3027_v2 = vld [vmem:[%s6871_s10] sm:$0x3] }
 0x57b   :  { %3187 = vadd.xlane.f32.xlu0 %v3186_v3  ;;  %v3089_v44 = vmul.f32 0.00390625, %v3069_v35  ;;  %v6706_v35 = vrot.slane %v3026_v52, %v6984_v26 }
 0x57c   :  { %v3189_v22 = vadd.f32 %v3147_v48, %v3146_v11  ;;  %v3148_v37 = vmul.f32 %v6656_v42, %v6656_v42  ;;  %v3149_v6 = vmul.f32 %v6659_v21, %v6659_v21  ;;  %v6709_v11 = vrot.slane %v3026_v52, %v6985_v45 }
 0x57d   :  { %v6670_v25 = vsub.f32 %v6517_v34, %v3089_v44  ;;  %v6673_v16 = vsub.f32 %v6519_v17, %v3089_v44 }
 0x57e   :  { %3190 = vadd.xlane.f32.xlu1 %v3189_v22  ;;  %v3192_v36 = vadd.f32 %v3149_v6, %v3148_v37  ;;  %v3072_v13 = vpop.xlane.xlu0 %3071  ;;  %v6712_v22 = vrot.slane %v3027_v2, %v6984_v26  ;;  %v6715_v37 = vrot.slane %v3027_v2, %v6985_v45 }
 0x57f   :  { %v3150_v31 = vmul.f32 %v6670_v25, %v6670_v25  ;;  %v3151_v20 = vmul.f32 %v6673_v16, %v6673_v16  ;;  %v3090_v33 = vmul.f32 0.00390625, %v3072_v13 }
 0x580   :  { %3193 = vadd.xlane.f32.xlu0 %v3192_v36  ;;  %v3075_v46 = vpop.xlane.xlu1 %3074 }
 0x581   :  { %v3195_v56 = vadd.f32 %v3151_v20, %v3150_v31  ;;  %v6680_v53 = vsub.f32 %v6525_v28, %v3090_v33  ;;  %v6683_v34 = vsub.f32 %v6528_v47, %v3090_v33  ;;  %v3091_v17 = vmul.f32 0.00390625, %v3075_v46 }
 0x583   :  { %3196 = vadd.xlane.f32.xlu1 %v3195_v56  ;;  %v6686_v27 = vsub.f32 %v6531_v7, %v3091_v17  ;;  %v6689_v12 = vsub.f32 %v6535_v50, %v3091_v17  ;;  %v3152_v4 = vmul.f32 %v6680_v53, %v6680_v53  ;;  %v3153_v23 = vmul.f32 %v6683_v34, %v6683_v34 }
 0x585   :  { %v3198_v49 = vadd.f32 %v3153_v23, %v3152_v4  ;;  %v3154_v28 = vmul.f32 %v6686_v27, %v6686_v27  ;;  %v3155_v47 = vmul.f32 %v6689_v12, %v6689_v12 }
 0x587   :  { %3199 = vadd.xlane.f32.xlu0 %v3198_v49  ;;  %v3201_v30 = vadd.f32 %v3155_v47, %v3154_v28 }
 0x589   :  { %3202 = vadd.xlane.f32.xlu1 %v3201_v30 }
 0x5d0   :  { %v3158_v7 = vpop.xlane.xlu0 %3157 }
 0x5d1   :  { %v3204_v38 = vmul.f32 0.00390625, %v3158_v7 }
 0x5d2   :  { %v3161_v50 = vpop.xlane.xlu1 %3160 }
 0x5d3   :  { %v3220_v24 = vadd.f32 1e-12, %v3204_v38  ;;  %v3205_v14 = vmul.f32 0.00390625, %v3161_v50 }
 0x5d5   :  { %4238 = vrsqrt.f32 %v3220_v24  ;;  %v3221_v9 = vadd.f32 1e-12, %v3205_v14 }
 0x5d7   :  { %4240 = vrsqrt.f32 %v3221_v9 }
 0x5da   :  { %v3164_v3 = vpop.xlane.xlu0 %3163 }
 0x5db   :  { %v3206_v48 = vmul.f32 0.00390625, %v3164_v3 }
 0x5dd   :  { %v3222_v13 = vadd.f32 1e-12, %v3206_v48 }
 0x5de   :  { %v3167_v17 = vpop.xlane.xlu1 %3166 }
 0x5df   :  { %v4239_v44 = vpop.eup %4238  ;;  %4242 = vrsqrt.f32 %v3222_v13  ;;  %v3207_v26 = vmul.f32 0.00390625, %v3167_v17 }
 0x5e0   :  { %v3252_v6 = vmul.f32 %v4239_v44, %v6540_v40  ;;  %v3253_v36 = vmul.f32 %v4239_v44, %v6543_v51 }
 0x5e1   :  { %v4241_v31 = vpop.eup %4240  ;;  %v3223_v23 = vadd.f32 1e-12, %v3207_v26 }
 0x5e2   :  { %v3295_v20 = vmul.f32 %v6706_v35, %v3252_v6  ;;  %v3296_v33 = vmul.f32 %v6709_v11, %v3253_v36  ;;  %v3254_v46 = vmul.f32 %v4241_v31, %v6546_v59  ;;  %v3255_v56 = vmul.f32 %v4241_v31, %v6549_v15 }
 0x5e3   :  { %4244 = vrsqrt.f32 %v3223_v23 }
 0x5e4   :  { %v3338_v45 = vadd.f32 %v6712_v22, %v3295_v20  ;;  %v3339_v4 = vadd.f32 %v6715_v37, %v3296_v33  ;;  %v3297_v40 = vmul.f32 %v6706_v35, %v3254_v46  ;;  %v3298_v51 = vmul.f32 %v6709_v11, %v3255_v56  ;;  %v3170_v15 = vpop.xlane.xlu0 %3169 }
 0x5e5   :  { %v3208_v30 = vmul.f32 0.00390625, %v3170_v15 }
 0x5e6   :  { %v3678_v49 = vpack.c.bf16 %v3339_v4, %v3338_v45  ;;  %v3340_v28 = vadd.f32 %v6712_v22, %v3297_v40  ;;  %v3341_v47 = vadd.f32 %v6715_v37, %v3298_v51 }
 0x5e7   :  { %v3224_v7 = vadd.f32 1e-12, %v3208_v30 }
 0x5e8   :  { %3466 = vst [vmem:[%s6872_s11] sm:$0xff] %v3678_v49  ;;  %v3679_v59 = vpack.c.bf16 %v3341_v47, %v3340_v28  ;;  %v3173_v38 = vpop.xlane.xlu1 %3172 }
 0x5e9   :  { %v4243_v50 = vpop.eup %4242  ;;  %4246 = vrsqrt.f32 %v3224_v7  ;;  %v3209_v24 = vmul.f32 0.00390625, %v3173_v38 }
 0x5ea   :  { %3467 = vst [vmem:[%s6872_s11 + $0x8] sm:$0xff] %v3679_v59  ;;  %v3256_v14 = vmul.f32 %v4243_v50, %v6560_v43  ;;  %v3257_v9 = vmul.f32 %v4243_v50, %v6563_v0 }
 0x5eb   :  { %v3225_v52 = vadd.f32 1e-12, %v3209_v24 }
 0x5ec   :  { %v3299_v2 = vmul.f32 %v6706_v35, %v3256_v14  ;;  %v3300_v3 = vmul.f32 %v6709_v11, %v3257_v9 }
 0x5ed   :  { %v4245_v48 = vpop.eup %4244  ;;  %4248 = vrsqrt.f32 %v3225_v52 }
 0x5ee   :  { %v3342_v44 = vadd.f32 %v6712_v22, %v3299_v2  ;;  %v3343_v6 = vadd.f32 %v6715_v37, %v3300_v3  ;;  %v3258_v36 = vmul.f32 %v4245_v48, %v6570_v39  ;;  %v3259_v13 = vmul.f32 %v4245_v48, %v6573_v19 }
 0x5f0   :  { %v3680_v31 = vpack.c.bf16 %v3343_v6, %v3342_v44  ;;  %v3301_v43 = vmul.f32 %v6706_v35, %v3258_v36  ;;  %v3302_v0 = vmul.f32 %v6709_v11, %v3259_v13  ;;  %v3176_v20 = vpop.xlane.xlu0 %3175 }
 0x5f1   :  { %v3210_v33 = vmul.f32 0.00390625, %v3176_v20 }
 0x5f2   :  { %3468 = vst [vmem:[%s6872_s11 + $0x10] sm:$0xff] %v3680_v31  ;;  %v3344_v46 = vadd.f32 %v6712_v22, %v3301_v43  ;;  %v3345_v56 = vadd.f32 %v6715_v37, %v3302_v0 }
 0x5f3   :  { %v4247_v17 = vpop.eup %4246  ;;  %v3226_v26 = vadd.f32 1e-12, %v3210_v33 }
 0x5f4   :  { %v3681_v39 = vpack.c.bf16 %v3345_v56, %v3344_v46  ;;  %v3260_v19 = vmul.f32 %v4247_v17, %v6580_v5  ;;  %v3261_v45 = vmul.f32 %v4247_v17, %v6583_v18 }
 0x5f5   :  { %4250 = vrsqrt.f32 %v3226_v26 }
 0x5f6   :  { %3469 = vst [vmem:[%s6872_s11 + $0x18] sm:$0xff] %v3681_v39  ;;  %v3303_v4 = vmul.f32 %v6706_v35, %v3260_v19  ;;  %v3304_v40 = vmul.f32 %v6709_v11, %v3261_v45  ;;  %v3179_v51 = vpop.xlane.xlu1 %3178 }
 0x5f7   :  { %v4249_v23 = vpop.eup %4248  ;;  %v3211_v49 = vmul.f32 0.00390625, %v3179_v51 }
 0x5f8   :  { %v3346_v28 = vadd.f32 %v6712_v22, %v3303_v4  ;;  %v3347_v47 = vadd.f32 %v6715_v37, %v3304_v40  ;;  %v3262_v5 = vmul.f32 %v4249_v23, %v6590_v8  ;;  %v3263_v18 = vmul.f32 %v4249_v23, %v6593_v58 }
 0x5f9   :  { %v3227_v59 = vadd.f32 1e-12, %v3211_v49 }
 0x5fa   :  { %v3682_v15 = vpack.c.bf16 %v3347_v47, %v3346_v28  ;;  %v3305_v30 = vmul.f32 %v6706_v35, %v3262_v5  ;;  %v3306_v7 = vmul.f32 %v6709_v11, %v3263_v18 }
 0x5fb   :  { %4252 = vrsqrt.f32 %v3227_v59  ;;  %v3182_v38 = vpop.xlane.xlu0 %3181 }
 0x5fc   :  { %3470 = vst [vmem:[%s6872_s11 + $0x20] sm:$0xff] %v3682_v15  ;;  %v3348_v50 = vadd.f32 %v6712_v22, %v3305_v30  ;;  %v3349_v24 = vadd.f32 %v6715_v37, %v3306_v7  ;;  %v3212_v14 = vmul.f32 0.00390625, %v3182_v38 }
 0x5fe   :  { %v3683_v8 = vpack.c.bf16 %v3349_v24, %v3348_v50  ;;  %v3228_v9 = vadd.f32 1e-12, %v3212_v14 }
 0x5ff   :  { %v4251_v58 = vpop.eup %4250 }
 0x600   :  { %3471 = vst [vmem:[%s6872_s11 + $0x28] sm:$0xff] %v3683_v8  ;;  %v3264_v52 = vmul.f32 %v4251_v58, %v6600_v62  ;;  %v3265_v2 = vmul.f32 %v4251_v58, %v6603_v41  ;;  %4254 = vrsqrt.f32 %v3228_v9  ;;  %v3185_v3 = vpop.xlane.xlu1 %3184 }
 0x601   :  { %v3213_v48 = vmul.f32 0.00390625, %v3185_v3 }
 0x602   :  { %v3307_v44 = vmul.f32 %v6706_v35, %v3264_v52  ;;  %v3308_v6 = vmul.f32 %v6709_v11, %v3265_v2 }
 0x603   :  { %v3229_v36 = vadd.f32 1e-12, %v3213_v48 }
 0x604   :  { %v3350_v13 = vadd.f32 %v6712_v22, %v3307_v44  ;;  %v3351_v31 = vadd.f32 %v6715_v37, %v3308_v6 }
 0x605   :  { %v4253_v43 = vpop.eup %4252  ;;  %4256 = vrsqrt.f32 %v3229_v36 }
 0x606   :  { %v3684_v0 = vpack.c.bf16 %v3351_v31, %v3350_v13  ;;  %v3266_v20 = vmul.f32 %v4253_v43, %v6610_v61  ;;  %v3267_v62 = vmul.f32 %v4253_v43, %v6613_v55 }
 0x608   :  { %3472 = vst [vmem:[%s6872_s11 + $0x30] sm:$0xff] %v3684_v0  ;;  %v3309_v41 = vmul.f32 %v6706_v35, %v3266_v20  ;;  %v3310_v33 = vmul.f32 %v6709_v11, %v3267_v62  ;;  %v3188_v46 = vpop.xlane.xlu0 %3187 }
 0x609   :  { %v3214_v56 = vmul.f32 0.00390625, %v3188_v46 }
 0x60a   :  { %v4255_v17 = vpop.eup %4254  ;;  %v3352_v26 = vadd.f32 %v6712_v22, %v3309_v41  ;;  %v3353_v39 = vadd.f32 %v6715_v37, %v3310_v33 }
 0x60b   :  { %v3268_v19 = vmul.f32 %v4255_v17, %v6620_v29  ;;  %v3269_v61 = vmul.f32 %v4255_v17, %v6623_v60  ;;  %v3230_v55 = vadd.f32 1e-12, %v3214_v56  ;;  %v3191_v45 = vpop.xlane.xlu1 %3190 }
 0x60c   :  { %v3685_v4 = vpack.c.bf16 %v3353_v39, %v3352_v26  ;;  %v3215_v40 = vmul.f32 0.00390625, %v3191_v45 }
 0x60d   :  { %v3311_v51 = vmul.f32 %v6706_v35, %v3268_v19  ;;  %v3312_v23 = vmul.f32 %v6709_v11, %v3269_v61  ;;  %4258 = vrsqrt.f32 %v3230_v55  ;;  %v3194_v49 = vpop.xlane.xlu0 %3193 }
 0x60e   :  { %3473 = vst [vmem:[%s6872_s11 + $0x38] sm:$0xff] %v3685_v4  ;;  %v3231_v28 = vadd.f32 1e-12, %v3215_v40  ;;  %v3216_v47 = vmul.f32 0.00390625, %v3194_v49 }
 0x60f   :  { %v4257_v5 = vpop.eup %4256  ;;  %v3354_v29 = vadd.f32 %v6712_v22, %v3311_v51  ;;  %v3355_v60 = vadd.f32 %v6715_v37, %v3312_v23 }
 0x610   :  { %v3270_v18 = vmul.f32 %v4257_v5, %v6630_v1  ;;  %v3271_v59 = vmul.f32 %v4257_v5, %v6633_v63  ;;  %4260 = vrsqrt.f32 %v3231_v28  ;;  %v3232_v15 = vadd.f32 1e-12, %v3216_v47  ;;  %v3197_v30 = vpop.xlane.xlu1 %3196 }
 0x611   :  { %v3686_v7 = vpack.c.bf16 %v3355_v60, %v3354_v29  ;;  %v3217_v38 = vmul.f32 0.00390625, %v3197_v30 }
 0x612   :  { %v3313_v50 = vmul.f32 %v6706_v35, %v3270_v18  ;;  %v3314_v24 = vmul.f32 %v6709_v11, %v3271_v59  ;;  %4262 = vrsqrt.f32 %v3232_v15 }
 0x613   :  { %3474 = vst [vmem:[%s6872_s11 + $0x40] sm:$0xff] %v3686_v7  ;;  %v3233_v14 = vadd.f32 1e-12, %v3217_v38 }
 0x614   :  { %v3356_v8 = vadd.f32 %v6712_v22, %v3313_v50  ;;  %v3357_v1 = vadd.f32 %v6715_v37, %v3314_v24  ;;  %v3200_v63 = vpop.xlane.xlu0 %3199 }
 0x615   :  { %4264 = vrsqrt.f32 %v3233_v14  ;;  %v3218_v58 = vmul.f32 0.00390625, %v3200_v63 }
 0x616   :  { %v3687_v9 = vpack.c.bf16 %v3357_v1, %v3356_v8  ;;  %v3203_v2 = vpop.xlane.xlu1 %3202 }
 0x617   :  { %v4259_v52 = vpop.eup %4258  ;;  %v3234_v44 = vadd.f32 1e-12, %v3218_v58  ;;  %v3219_v6 = vmul.f32 0.00390625, %v3203_v2 }
 0x618   :  { %3475 = vst [vmem:[%s6872_s11 + $0x48] sm:$0xff] %v3687_v9  ;;  %v3272_v3 = vmul.f32 %v4259_v52, %v6640_v32  ;;  %v3273_v48 = vmul.f32 %v4259_v52, %v6643_v10 }
 0x619   :  { %4266 = vrsqrt.f32 %v3234_v44  ;;  %v3235_v43 = vadd.f32 1e-12, %v3219_v6 }
 0x61a   :  { %v4261_v36 = vpop.eup %4260  ;;  %v3315_v13 = vmul.f32 %v6706_v35, %v3272_v3  ;;  %v3316_v31 = vmul.f32 %v6709_v11, %v3273_v48 }
 0x61b   :  { %v3274_v0 = vmul.f32 %v4261_v36, %v6650_v54  ;;  %v3275_v20 = vmul.f32 %v4261_v36, %v6653_v57  ;;  %4268 = vrsqrt.f32 %v3235_v43 }
 0x61c   :  { %v4263_v62 = vpop.eup %4262  ;;  %v3358_v41 = vadd.f32 %v6712_v22, %v3315_v13  ;;  %v3359_v32 = vadd.f32 %v6715_v37, %v3316_v31 }
 0x61d   :  { %v3317_v10 = vmul.f32 %v6706_v35, %v3274_v0  ;;  %v3318_v33 = vmul.f32 %v6709_v11, %v3275_v20  ;;  %v3276_v46 = vmul.f32 %v4263_v62, %v6656_v42  ;;  %v3277_v56 = vmul.f32 %v4263_v62, %v6659_v21 }
 0x61e   :  { %v3688_v17 = vpack.c.bf16 %v3359_v32, %v3358_v41 }
 0x61f   :  { %v4265_v26 = vpop.eup %4264  ;;  %v3360_v54 = vadd.f32 %v6712_v22, %v3317_v10  ;;  %v3361_v57 = vadd.f32 %v6715_v37, %v3318_v33  ;;  %v3319_v39 = vmul.f32 %v6706_v35, %v3276_v46  ;;  %v3320_v19 = vmul.f32 %v6709_v11, %v3277_v56 }
 0x620   :  { %3476 = vst [vmem:[%s6872_s11 + $0x50] sm:$0xff] %v3688_v17  ;;  %v3278_v61 = vmul.f32 %v4265_v26, %v6670_v25  ;;  %v3279_v42 = vmul.f32 %v4265_v26, %v6673_v16 }
 0x621   :  { %v3689_v55 = vpack.c.bf16 %v3361_v57, %v3360_v54  ;;  %v3362_v21 = vadd.f32 %v6712_v22, %v3319_v39  ;;  %v3363_v45 = vadd.f32 %v6715_v37, %v3320_v19 }
 0x622   :  { %v3321_v4 = vmul.f32 %v6706_v35, %v3278_v61  ;;  %v3322_v40 = vmul.f32 %v6709_v11, %v3279_v42 }
 0x623   :  { %3477 = vst [vmem:[%s6872_s11 + $0x58] sm:$0xff] %v3689_v55  ;;  %v3690_v51 = vpack.c.bf16 %v3363_v45, %v3362_v21  ;;  %v4267_v23 = vpop.eup %4266 }
 0x624   :  { %v3364_v49 = vadd.f32 %v6712_v22, %v3321_v4  ;;  %v3365_v25 = vadd.f32 %v6715_v37, %v3322_v40  ;;  %v3280_v16 = vmul.f32 %v4267_v23, %v6680_v53  ;;  %v3281_v28 = vmul.f32 %v4267_v23, %v6683_v34 }
 0x625   :  { %3478 = vst [vmem:[%s6872_s11 + $0x60] sm:$0xff] %v3690_v51  ;;  %v4269_v47 = vpop.eup %4268 }
 0x626   :  { %v3691_v5 = vpack.c.bf16 %v3365_v25, %v3364_v49  ;;  %v3323_v29 = vmul.f32 %v6706_v35, %v3280_v16  ;;  %v3324_v60 = vmul.f32 %v6709_v11, %v3281_v28  ;;  %v3282_v18 = vmul.f32 %v4269_v47, %v6686_v27 }
 0x627   :  { %v3283_v59 = vmul.f32 %v4269_v47, %v6689_v12 }
 0x628   :  { %3479 = vst [vmem:[%s6872_s11 + $0x68] sm:$0xff] %v3691_v5  ;;  %v3366_v15 = vadd.f32 %v6712_v22, %v3323_v29  ;;  %v3367_v53 = vadd.f32 %v6715_v37, %v3324_v60  ;;  %v3325_v34 = vmul.f32 %v6706_v35, %v3282_v18 }
 0x629   :  { %v3326_v30 = vmul.f32 %v6709_v11, %v3283_v59 }
 0x62a   :  { %v3692_v7 = vpack.c.bf16 %v3367_v53, %v3366_v15  ;;  %v3368_v38 = vadd.f32 %v6712_v22, %v3325_v34 }
 0x62b   :  { %v3369_v50 = vadd.f32 %v6715_v37, %v3326_v30 }
 0x62c   :  { %3480 = vst [vmem:[%s6872_s11 + $0x70] sm:$0xff] %v3692_v7 }
 0x62d   :  { %v3693_v27 = vpack.c.bf16 %v3369_v50, %v3368_v38 }
 0x62f   :  { %3481 = vst [vmem:[%s6872_s11 + $0x78] sm:$0xff] %v3693_v27 }

</bundles_post_ra>
